<compile_context>
chip_gen: v7x
topology: tpu7x:2x2x1
jax: 0.10.0
libtpu: 0.0.40
codegen_flags: <defaults>
</compile_context>

<pallas_src>
import functools

import jax
import jax.numpy as jnp
from jax.experimental import pallas as pl
from jax.experimental.pallas import tpu as pltpu


def _round_up(x, m):
    return ((x + m - 1) // m) * m


# =============================================================================
# Fused encoder kernel (both GRU layers + qz0_net + context head)
# =============================================================================
def _encoder_kernel(*refs, context_mode, T, Bp, Hp):
    H2, H3, H4, H6 = 2 * Hp, 3 * Hp, 4 * Hp, 6 * Hp
    if context_mode == "full":
        (x_ref, wih0, bgi0, whh0, bhn0, wih1, bgi1, whh1, bhn1,
         wqz, bqz, wlin, blin, ctx_ref, qz_ref, gi_ref, y0_ref, y1_ref) = refs
    elif context_mode == "constant":
        (x_ref, wih0, bgi0, whh0, bhn0, wih1, bgi1, whh1, bhn1,
         wqz, bqz, wlin, blin, ctx_ref, qz_ref, gi_ref, y0_ref) = refs
        y1_ref = None
    else:  # 'ic_only'
        (x_ref, wih0, bgi0, whh0, bhn0, wih1, bgi1, whh1, bhn1,
         wqz, bqz, qz_ref, gi_ref, y0_ref) = refs
        wlin = blin = ctx_ref = y1_ref = None

    def run_layer(whh_ref, bhn_ref, cat_ref, seq_ref):
        """Fwd+bwd recurrence of one bidirectional GRU layer.

        State is one (Bp, 2Hp) slab [h_f | h_b]; whh_ref is the block-diagonal
        (2Hp, 6Hp) recurrent weight, so both directions share ONE MXU matmul
        per step.  Gate columns are [r_f|r_b|z_f|z_b|n_f|n_b]; the r/z sigmoid
        is a single EUP call over the contiguous 4Hp slab.  gi_ref row-slab t
        already holds x @ W_ih + b_ih (+ folded r/z b_hh) with the backward
        half stored time-reversed, so each step reads one contiguous slab.
        """
        whh = whh_ref[...]                                   # (2Hp, 6Hp) bf16
        # Only the n-gate hidden bias survives inside r*(...); broadcast hoisted.
        bhn = jnp.broadcast_to(bhn_ref[...], (Bp, H2))
        h = jnp.zeros((Bp, H2), jnp.float32)

        # Fully unrolled: T is small & static, indices are compile-time
        # constants => aligned (8,128) tile accesses, fwd/bwd work interleaves.
        # TODO(synk): switch to lax.fori_loop(..., unroll=2-4) if T grows large.
        for t in range(T):
            tb = T - 1 - t
            gi = gi_ref[t * Bp:(t + 1) * Bp, :]              # (Bp, 6Hp) f32
            gh = jnp.dot(h.astype(whh.dtype), whh,
                         preferred_element_type=jnp.float32)  # one MXU call/step
            rz = jax.nn.sigmoid(gi[:, 0:H4] + gh[:, 0:H4])   # one EUP slab (r|z)
            r, z = rz[:, 0:H2], rz[:, H2:H4]
            n = jnp.tanh(gi[:, H4:H6] + r * (gh[:, H4:H6] + bhn))
            h = n + z * (h - n)                              # == (1-z)*n + z*h
            if cat_ref is not None:
                # Layer-0 outputs stored in original AND time-reversed order so
                # layer-1's hoisted input projection is one matmul.
                cat_ref[t * Bp:(t + 1) * Bp, 0:Hp] = h[:, 0:Hp]
                cat_ref[tb * Bp:(tb + 1) * Bp, Hp:H2] = h[:, Hp:H2]
                cat_ref[tb * Bp:(tb + 1) * Bp, H2:H3] = h[:, 0:Hp]
                cat_ref[t * Bp:(t + 1) * Bp, H3:H4] = h[:, Hp:H2]
            if seq_ref is not None:
                seq_ref[t * Bp:(t + 1) * Bp, 0:Hp] = h[:, 0:Hp]
                seq_ref[tb * Bp:(tb + 1) * Bp, Hp:H2] = h[:, Hp:H2]
        return h                                             # final [h_f | h_b]

    # ---- layer 0: hoisted input projection (fwd + time-reversed bwd) --------
    gi_ref[...] = jnp.dot(x_ref[...], wih0[...],
                          preferred_element_type=jnp.float32) + bgi0[...]
    fin0 = run_layer(whh0, bhn0, y0_ref, None)

    # ---- layer 1: input projection from layer-0 outputs (stay in VMEM) ------
    wih1_v = wih1[...]
    gi_ref[...] = jnp.dot(y0_ref[...].astype(wih1_v.dtype), wih1_v,
                          preferred_element_type=jnp.float32) + bgi1[...]
    fin1 = run_layer(whh1, bhn1, None, y1_ref)

    # ---- qz0_net on final states [hf0 | hb0 | hf1 | hb1] ---------------------
    wqz_v = wqz[...]
    fin = jnp.concatenate([fin0, fin1], axis=-1).astype(wqz_v.dtype)  # (Bp, 4Hp)
    qz_ref[...] = jnp.dot(fin, wqz_v,
                          preferred_element_type=jnp.float32) + bqz[...]

    # ---- context head (fused: seq_out never leaves VMEM) --------------------
    if context_mode == "full":
        wlin_v = wlin[...]
        ctx_ref[...] = jnp.dot(y1_ref[...].astype(wlin_v.dtype), wlin_v,
                               preferred_element_type=jnp.float32) + blin[...]
    elif context_mode == "constant":
        wlin_v = wlin[...]
        ctx_ref[...] = jnp.dot(fin.astype(wlin_v.dtype), wlin_v,
                               preferred_element_type=jnp.float32) + blin[...]


# =============================================================================
# Parameter packing (done once, outside jit)
# =============================================================================
def pack_encoder_params(params, hidden_size, context_mode="full",
                        matmul_dtype=jnp.bfloat16):
    H = hidden_size
    Hp = _round_up(H, 128)
    f32 = jnp.float32

    def pack_whh(p):
        # Block-diagonal (2Hp, 6Hp): h_f rows -> fwd gate cols, h_b rows -> bwd.
        W = jnp.zeros((2 * Hp, 6 * Hp), f32)
        for g in range(3):                                   # r, z, n
            W = W.at[0:H, 2 * g * Hp:2 * g * Hp + H].set(
                p["whh_f"][:, g * H:(g + 1) * H])
            W = W.at[Hp:Hp + H, (2 * g + 1) * Hp:(2 * g + 1) * Hp + H].set(
                p["whh_b"][:, g * H:(g + 1) * H])
        return W.astype(matmul_dtype)

    def pack_wih0(p, din):
        # (2*din, 6Hp): rows 0:din take x[t] -> fwd gates, rows din:2din take
        # x[T-1-t] -> bwd gates.  Kept f32 (tiny weight, odd contraction dim).
        W = jnp.zeros((2 * din, 6 * Hp), f32)
        for g in range(3):
            W = W.at[0:din, 2 * g * Hp:2 * g * Hp + H].set(
                p["wih_f"][:, g * H:(g + 1) * H])
            W = W.at[din:2 * din, (2 * g + 1) * Hp:(2 * g + 1) * Hp + H].set(
                p["wih_b"][:, g * H:(g + 1) * H])
        return W

    def pack_wih1(p):
        # (4Hp, 6Hp): input blocks [y0_f(t) | y0_b(t) | y0_f(tb) | y0_b(tb)].
        W = jnp.zeros((4 * Hp, 6 * Hp), f32)
        for g in range(3):
            for j in range(2):
                W = W.at[j * Hp:j * Hp + H, 2 * g * Hp:2 * g * Hp + H].set(
                    p["wih_f"][j * H:(j + 1) * H, g * H:(g + 1) * H])
                W = W.at[(2 + j) * Hp:(2 + j) * Hp + H,
                         (2 * g + 1) * Hp:(2 * g + 1) * Hp + H].set(
                    p["wih_b"][j * H:(j + 1) * H, g * H:(g + 1) * H])
        return W.astype(matmul_dtype)

    def pack_bgi(p):
        # b_ih with the r/z parts of b_hh folded in (exact); n-gate b_hh must
        # stay inside the r*(...) term, so it is kept separately (pack_bhn).
        b = jnp.zeros((1, 6 * Hp), f32)
        for g in range(3):
            bf = p["bih_f"][:, g * H:(g + 1) * H]
            bb = p["bih_b"][:, g * H:(g + 1) * H]
            if g < 2:
                bf = bf + p["bhh_f"][:, g * H:(g + 1) * H]
                bb = bb + p["bhh_b"][:, g * H:(g + 1) * H]
            b = b.at[:, 2 * g * Hp:2 * g * Hp + H].set(bf)
            b = b.at[:, (2 * g + 1) * Hp:(2 * g + 1) * Hp + H].set(bb)
        return b

    def pack_bhn(p):
        b = jnp.zeros((1, 2 * Hp), f32)
        b = b.at[:, 0:H].set(p["bhh_f"][:, 2 * H:3 * H])
        b = b.at[:, Hp:Hp + H].set(p["bhh_b"][:, 2 * H:3 * H])
        return b

    def pack_head(w, b, nblocks):
        # Row blocks padded to Hp slots; columns zero-padded to a lane-dense
        # multiple of 128 so the output writeback is an unmasked store.
        dout = w.shape[1]
        Cp = _round_up(dout, 128)
        W = jnp.zeros((nblocks * Hp, Cp), f32)
        for j in range(nblocks):
            W = W.at[j * Hp:j * Hp + H, 0:dout].set(w[j * H:(j + 1) * H, :])
        bias = jnp.zeros((1, Cp), f32).at[:, 0:dout].set(b)
        return W.astype(matmul_dtype), bias

    din = params["gru_l0"]["wih_f"].shape[0]
    packed = dict(
        w_ih0=pack_wih0(params["gru_l0"], din),
        b_gi0=pack_bgi(params["gru_l0"]),
        w_hh0=pack_whh(params["gru_l0"]),
        b_hn0=pack_bhn(params["gru_l0"]),
        w_ih1=pack_wih1(params["gru_l1"]),
        b_gi1=pack_bgi(params["gru_l1"]),
        w_hh1=pack_whh(params["gru_l1"]),
        b_hn1=pack_bhn(params["gru_l1"]),
    )
    packed["w_qz0"], packed["b_qz0"] = pack_head(params["w_qz0"], params["b_qz0"], 4)
    if context_mode == "full":
        packed["w_lin"], packed["b_lin"] = pack_head(params["w_lin"], params["b_lin"], 2)
    elif context_mode == "constant":
        packed["w_lin"], packed["b_lin"] = pack_head(params["w_lin"], params["b_lin"], 4)
    return packed


# =============================================================================
# Encoder forward (mirrors Encoder.forward)
# =============================================================================
def encoder_forward(inp, packed, *, context_mode="full", context_size=None,
                    latent_size=None):
    """inp: (T, B, input_size) time-major. Returns (ctx, qz0_params)."""
    T, B, Din = inp.shape
    Hp = packed["w_hh0"].shape[0] // 2
    Bp = _round_up(B, 8)
    Cq = packed["w_qz0"].shape[1]

    # Feed [x_t | x_{T-1-t}] so ONE matmul yields forward gate inputs and the
    # time-reversed backward gate inputs; pad batch to a full sublane tile.
    # TODO(synk): batch more independent sequences per call (free up to Bp=8)
    # to amortize the per-call launch + weight-DMA cost.
    x = inp.astype(jnp.float32)
    xcat = jnp.concatenate([x, x[::-1]], axis=-1)                  # (T, B, 2Din)
    x2d = jnp.pad(xcat, ((0, 0), (0, Bp - B), (0, 0))).reshape(T * Bp, 2 * Din)

    vmem = pl.BlockSpec(memory_space=pltpu.MemorySpace.VMEM)
    kern = functools.partial(_encoder_kernel, context_mode=context_mode,
                             T=T, Bp=Bp, Hp=Hp)
    common = (x2d,
              packed["w_ih0"], packed["b_gi0"], packed["w_hh0"], packed["b_hn0"],
              packed["w_ih1"], packed["b_gi1"], packed["w_hh1"], packed["b_hn1"],
              packed["w_qz0"], packed["b_qz0"])
    scratch = [pltpu.VMEM((T * Bp, 6 * Hp), jnp.float32),   # gate pre-activations
               pltpu.VMEM((T * Bp, 4 * Hp), jnp.float32)]   # layer-0 out (orig+rev)

    if context_mode == "full":
        Cc = packed["w_lin"].shape[1]
        ctx2d, qz = pl.pallas_call(
            kern,
            out_shape=(jax.ShapeDtypeStruct((T * Bp, Cc), jnp.float32),
                       jax.ShapeDtypeStruct((Bp, Cq), jnp.float32)),
            in_specs=[vmem] * 13,
            out_specs=(vmem, vmem),
            scratch_shapes=scratch + [pltpu.VMEM((T * Bp, 2 * Hp), jnp.float32)],
        )(*common, packed["w_lin"], packed["b_lin"])
        ctx = ctx2d.reshape(T, Bp, Cc)[:, :B, :context_size]
    elif context_mode == "constant":
        Cc = packed["w_lin"].shape[1]
        ctxp, qz = pl.pallas_call(
            kern,
            out_shape=(jax.ShapeDtypeStruct((Bp, Cc), jnp.float32),
                       jax.ShapeDtypeStruct((Bp, Cq), jnp.float32)),
            in_specs=[vmem] * 13,
            out_specs=(vmem, vmem),
            scratch_shapes=scratch,
        )(*common, packed["w_lin"], packed["b_lin"])
        ctx = ctxp[:B, :context_size]
    else:  # 'ic_only': NaN-filled context is plain JAX glue, nothing to kernelize.
        qz = pl.pallas_call(
            kern,
            out_shape=jax.ShapeDtypeStruct((Bp, Cq), jnp.float32),
            in_specs=[vmem] * 11,
            out_specs=vmem,
            scratch_shapes=scratch,
        )(*common)
        ctx = jnp.full((T, B, context_size), jnp.nan, dtype=jnp.float32)
    return ctx, qz[:B, :2 * latent_size]


# =============================================================================
# Deterministic parameter construction (matches nn.GRU / nn.Linear shapes)
# =============================================================================
def _init_gru_dir(key, din, H):
    k = 1.0 / jnp.sqrt(jnp.float32(H))
    ks = jax.random.split(key, 4)
    return dict(
        wih=jax.random.uniform(ks[0], (din, 3 * H), jnp.float32, -k, k),
        whh=jax.random.uniform(ks[1], (H, 3 * H), jnp.float32, -k, k),
        bih=jax.random.uniform(ks[2], (1, 3 * H), jnp.float32, -k, k),
        bhh=jax.random.uniform(ks[3], (1, 3 * H), jnp.float32, -k, k),
    )


def _init_gru_layer(key, din, H):
    kf, kb = jax.random.split(key)
    f = _init_gru_dir(kf, din, H)
    b = _init_gru_dir(kb, din, H)
    return dict(wih_f=f["wih"], whh_f=f["whh"], bih_f=f["bih"], bhh_f=f["bhh"],
                wih_b=b["wih"], whh_b=b["whh"], bih_b=b["bih"], bhh_b=b["bhh"])


def _init_linear(key, din, dout):
    k = 1.0 / jnp.sqrt(jnp.float32(din))
    kw, kb = jax.random.split(key)
    w = jax.random.uniform(kw, (din, dout), jnp.float32, -k, k)
    b = jax.random.uniform(kb, (1, dout), jnp.float32, -k, k)
    return w, b


def make_encoder_params(key, input_size, hidden_size, context_size,
                        latent_size, num_layers=2, context_mode="full"):
    assert num_layers == 2
    k0, k1, k2, k3 = jax.random.split(key, 4)
    params = {
        "gru_l0": _init_gru_layer(k0, input_size, hidden_size),
        "gru_l1": _init_gru_layer(k1, 2 * hidden_size, hidden_size),
    }
    w_qz0, b_qz0 = _init_linear(k2, hidden_size * num_layers * 2, latent_size * 2)
    params["w_qz0"], params["b_qz0"] = w_qz0, b_qz0
    if context_mode == "full":
        params["w_lin"], params["b_lin"] = _init_linear(k3, hidden_size * 2, context_size)
    elif context_mode == "constant":
        params["w_lin"], params["b_lin"] = _init_linear(
            k3, hidden_size * num_layers * 2, context_size)
    return params


# =============================================================================
# Pure-JAX f32 reference of the PyTorch module (for correctness check)
# =============================================================================
def _encoder_forward_ref(inp, params, H, context_mode, context_size):
    T, B, _ = inp.shape
    dot = functools.partial(jnp.dot, precision="highest")

    def cell(x, h, wih, whh, bih, bhh):
        gi = dot(x, wih) + bih
        gh = dot(h, whh) + bhh
        r = jax.nn.sigmoid(gi[:, :H] + gh[:, :H])
        z = jax.nn.sigmoid(gi[:, H:2 * H] + gh[:, H:2 * H])
        n = jnp.tanh(gi[:, 2 * H:] + r * gh[:, 2 * H:])
        return (1.0 - z) * n + z * h

    def bidir(x, p):
        hf = jnp.zeros((B, H), jnp.float32)
        hb = jnp.zeros((B, H), jnp.float32)
        yf = [None] * T
        yb = [None] * T
        for t in range(T):
            tb = T - 1 - t
            hf = cell(x[t], hf, p["wih_f"], p["whh_f"], p["bih_f"], p["bhh_f"])
            hb = cell(x[tb], hb, p["wih_b"], p["whh_b"], p["bih_b"], p["bhh_b"])
            yf[t] = hf
            yb[tb] = hb
        return jnp.concatenate([jnp.stack(yf), jnp.stack(yb)], axis=-1), hf, hb

    y0, hf0, hb0 = bidir(inp.astype(jnp.float32), params["gru_l0"])
    y1, hf1, hb1 = bidir(y0, params["gru_l1"])
    fin = jnp.concatenate([hf0, hb0, hf1, hb1], axis=-1)
    qz0 = dot(fin, params["w_qz0"]) + params["b_qz0"]
    if context_mode == "full":
        ctx = dot(y1, params["w_lin"]) + params["b_lin"]
    elif context_mode == "constant":
        ctx = dot(fin, params["w_lin"]) + params["b_lin"]
    else:
        ctx = jnp.full((T, B, context_size), jnp.nan, jnp.float32)
    return ctx, qz0


if __name__ == "__main__":
    T, B = 8, 2
    input_size, hidden_size, context_size, latent_size = 6, 32, 16, 8
    context_mode = "full"

    key = jax.random.PRNGKey(0)
    kp, kx = jax.random.split(key)
    params = make_encoder_params(kp, input_size, hidden_size, context_size,
                                 latent_size, 2, context_mode)
    packed = pack_encoder_params(params, hidden_size, context_mode)
    inp = jax.random.normal(kx, (T, B, input_size), dtype=jnp.float32)

    fwd = jax.jit(functools.partial(encoder_forward,
                                    context_mode=context_mode,
                                    context_size=context_size,
                                    latent_size=latent_size))
    ctx, qz0_params = fwd(inp, packed)
    jax.block_until_ready((ctx, qz0_params))

    assert ctx.shape == (T, B, context_size), ctx.shape
    assert qz0_params.shape == (B, 2 * latent_size), qz0_params.shape
    assert bool(jnp.all(jnp.isfinite(ctx)))
    assert bool(jnp.all(jnp.isfinite(qz0_params)))

    # Correctness vs. a pure-JAX f32 reference of the PyTorch module.
    # bf16 matmul operands (per perf review) give ~1e-2-scale deviations after
    # two recurrent layers; 3e-2 still catches any layout / gate-order bug.
    ctx_ref, qz0_ref = _encoder_forward_ref(inp, params, hidden_size,
                                            context_mode, context_size)
    assert bool(jnp.allclose(ctx, ctx_ref, rtol=3e-2, atol=3e-2)), \
        float(jnp.max(jnp.abs(ctx - ctx_ref)))
    assert bool(jnp.allclose(qz0_params, qz0_ref, rtol=3e-2, atol=3e-2)), \
        float(jnp.max(jnp.abs(qz0_params - qz0_ref)))

    print("KERNEL_OK")
</pallas_src>

<mosaic_0001>
module attributes {stable_mosaic.version = 11 : i64} {
  func.func @_encoder_kernel(%arg0: memref<64x12xf32, #tpu.memory_space<vmem>>, %arg1: memref<12x768xf32, #tpu.memory_space<vmem>>, %arg2: memref<1x768xf32, #tpu.memory_space<vmem>>, %arg3: memref<256x768xbf16, #tpu.memory_space<vmem>>, %arg4: memref<1x256xf32, #tpu.memory_space<vmem>>, %arg5: memref<512x768xbf16, #tpu.memory_space<vmem>>, %arg6: memref<1x768xf32, #tpu.memory_space<vmem>>, %arg7: memref<256x768xbf16, #tpu.memory_space<vmem>>, %arg8: memref<1x256xf32, #tpu.memory_space<vmem>>, %arg9: memref<512x128xbf16, #tpu.memory_space<vmem>>, %arg10: memref<1x128xf32, #tpu.memory_space<vmem>>, %arg11: memref<256x128xbf16, #tpu.memory_space<vmem>>, %arg12: memref<1x128xf32, #tpu.memory_space<vmem>>, %arg13: memref<64x128xf32, #tpu.memory_space<vmem>>, %arg14: memref<8x128xf32, #tpu.memory_space<vmem>>, %arg15: memref<64x768xf32, #tpu.memory_space<vmem>>, %arg16: memref<64x512xf32, #tpu.memory_space<vmem>>, %arg17: memref<64x256xf32, #tpu.memory_space<vmem>>) attributes {dimension_semantics = [], scalar_prefetch = 0 : i64, scratch_operands = 3 : i64, tpu.core_type = #tpu.core_type<tc>} {
    %c0 = arith.constant 0 : index
    %c0_0 = arith.constant 0 : index
    %0 = vector.load %arg0[%c0, %c0_0] : memref<64x12xf32, #tpu.memory_space<vmem>>, vector<64x12xf32>
    %c0_1 = arith.constant 0 : index
    %c0_2 = arith.constant 0 : index
    %1 = vector.load %arg1[%c0_1, %c0_2] : memref<12x768xf32, #tpu.memory_space<vmem>>, vector<12x768xf32>
    %cst = arith.constant dense<0.000000e+00> : vector<64x768xf32>
    %2 = tpu.matmul %0, %1, %cst {dimension_numbers = #tpu.dot_dimension_numbers<[1], [0], [0], [1], [0, 0, 1, 1], [], []>} : vector<64x12xf32>, vector<12x768xf32>, vector<64x768xf32> -> vector<64x768xf32>
    %c0_3 = arith.constant 0 : index
    %c0_4 = arith.constant 0 : index
    %3 = vector.load %arg2[%c0_3, %c0_4] : memref<1x768xf32, #tpu.memory_space<vmem>>, vector<1x768xf32>
    %4 = vector.broadcast %3 : vector<1x768xf32> to vector<64x768xf32>
    %5 = arith.addf %2, %4 : vector<64x768xf32>
    %c0_5 = arith.constant 0 : index
    %c0_6 = arith.constant 0 : index
    %6 = vector.load %arg15[%c0_5, %c0_6] : memref<64x768xf32, #tpu.memory_space<vmem>>, vector<64x768xf32>
    tpu.vector_store %arg15[%c0_5, %c0_6], %5 {strides = array<i32>} : memref<64x768xf32, #tpu.memory_space<vmem>>, vector<64x768xf32>,
    %c0_7 = arith.constant 0 : index
    %c0_8 = arith.constant 0 : index
    %7 = vector.load %arg3[%c0_7, %c0_8] : memref<256x768xbf16, #tpu.memory_space<vmem>>, vector<256x768xbf16>
    %c0_9 = arith.constant 0 : index
    %c0_10 = arith.constant 0 : index
    %8 = vector.load %arg4[%c0_9, %c0_10] : memref<1x256xf32, #tpu.memory_space<vmem>>, vector<1x256xf32>
    %9 = vector.shape_cast %8 : vector<1x256xf32> to vector<1x256xf32>
    %10 = vector.broadcast %9 : vector<1x256xf32> to vector<8x256xf32>
    %cst_11 = arith.constant 0.000000e+00 : f32
    %11 = vector.broadcast %cst_11 : f32 to vector<8x256xf32>
    %c0_12 = arith.constant 0 : index
    %c0_13 = arith.constant 0 : index
    %12 = vector.load %arg15[%c0_12, %c0_13] : memref<64x768xf32, #tpu.memory_space<vmem>>, vector<8x768xf32>
    %13 = arith.truncf %11 : vector<8x256xf32> to vector<8x256xbf16>
    %cst_14 = arith.constant dense<0.000000e+00> : vector<8x768xf32>
    %14 = tpu.matmul %13, %7, %cst_14 {dimension_numbers = #tpu.dot_dimension_numbers<[1], [0], [0], [1], [0, 0, 1, 1], [], []>} : vector<8x256xbf16>, vector<256x768xbf16>, vector<8x768xf32> -> vector<8x768xf32>
    %15 = vector.extract_strided_slice %12 {offsets = [0, 0], sizes = [8, 512], strides = [1, 1]} : vector<8x768xf32> to vector<8x512xf32>
    %16 = vector.extract_strided_slice %14 {offsets = [0, 0], sizes = [8, 512], strides = [1, 1]} : vector<8x768xf32> to vector<8x512xf32>
    %17 = arith.addf %15, %16 : vector<8x512xf32>
    %18 = arith.negf %17 : vector<8x512xf32>
    %19 = math.exp %18 : vector<8x512xf32>
    %cst_15 = arith.constant 1.000000e+00 : f32
    %20 = vector.broadcast %cst_15 : f32 to vector<8x512xf32>
    %21 = arith.addf %20, %19 : vector<8x512xf32>
    %22 = arith.divf %20, %21 : vector<8x512xf32>
    %23 = vector.extract_strided_slice %22 {offsets = [0, 0], sizes = [8, 256], strides = [1, 1]} : vector<8x512xf32> to vector<8x256xf32>
    %24 = vector.extract_strided_slice %22 {offsets = [0, 256], sizes = [8, 256], strides = [1, 1]} : vector<8x512xf32> to vector<8x256xf32>
    %25 = vector.extract_strided_slice %12 {offsets = [0, 512], sizes = [8, 256], strides = [1, 1]} : vector<8x768xf32> to vector<8x256xf32>
    %26 = vector.extract_strided_slice %14 {offsets = [0, 512], sizes = [8, 256], strides = [1, 1]} : vector<8x768xf32> to vector<8x256xf32>
    %27 = arith.addf %26, %10 : vector<8x256xf32>
    %28 = arith.mulf %23, %27 : vector<8x256xf32>
    %29 = arith.addf %25, %28 : vector<8x256xf32>
    %30 = math.tanh %29 : vector<8x256xf32>
    %31 = arith.subf %11, %30 : vector<8x256xf32>
    %32 = arith.mulf %24, %31 : vector<8x256xf32>
    %33 = arith.addf %30, %32 : vector<8x256xf32>
    %34 = vector.extract_strided_slice %33 {offsets = [0, 0], sizes = [8, 128], strides = [1, 1]} : vector<8x256xf32> to vector<8x128xf32>
    %c0_16 = arith.constant 0 : index
    %c0_17 = arith.constant 0 : index
    %35 = vector.load %arg16[%c0_16, %c0_17] : memref<64x512xf32, #tpu.memory_space<vmem>>, vector<8x128xf32>
    tpu.vector_store %arg16[%c0_16, %c0_17], %34 {strides = array<i32>} : memref<64x512xf32, #tpu.memory_space<vmem>>, vector<8x128xf32>,
    %36 = vector.extract_strided_slice %33 {offsets = [0, 128], sizes = [8, 128], strides = [1, 1]} : vector<8x256xf32> to vector<8x128xf32>
    %c56 = arith.constant 56 : index
    %c128 = arith.constant 128 : index
    %37 = vector.load %arg16[%c56, %c128] : memref<64x512xf32, #tpu.memory_space<vmem>>, vector<8x128xf32>
    tpu.vector_store %arg16[%c56, %c128], %36 {strides = array<i32>} : memref<64x512xf32, #tpu.memory_space<vmem>>, vector<8x128xf32>,
    %38 = vector.extract_strided_slice %33 {offsets = [0, 0], sizes = [8, 128], strides = [1, 1]} : vector<8x256xf32> to vector<8x128xf32>
    %c56_18 = arith.constant 56 : index
    %c256 = arith.constant 256 : index
    %39 = vector.load %arg16[%c56_18, %c256] : memref<64x512xf32, #tpu.memory_space<vmem>>, vector<8x128xf32>
    tpu.vector_store %arg16[%c56_18, %c256], %38 {strides = array<i32>} : memref<64x512xf32, #tpu.memory_space<vmem>>, vector<8x128xf32>,
    %40 = vector.extract_strided_slice %33 {offsets = [0, 128], sizes = [8, 128], strides = [1, 1]} : vector<8x256xf32> to vector<8x128xf32>
    %c0_19 = arith.constant 0 : index
    %c384 = arith.constant 384 : index
    %41 = vector.load %arg16[%c0_19, %c384] : memref<64x512xf32, #tpu.memory_space<vmem>>, vector<8x128xf32>
    tpu.vector_store %arg16[%c0_19, %c384], %40 {strides = array<i32>} : memref<64x512xf32, #tpu.memory_space<vmem>>, vector<8x128xf32>,
    %c8 = arith.constant 8 : index
    %c0_20 = arith.constant 0 : index
    %42 = vector.load %arg15[%c8, %c0_20] : memref<64x768xf32, #tpu.memory_space<vmem>>, vector<8x768xf32>
    %43 = arith.truncf %33 : vector<8x256xf32> to vector<8x256xbf16>
    %cst_21 = arith.constant dense<0.000000e+00> : vector<8x768xf32>
    %44 = tpu.matmul %43, %7, %cst_21 {dimension_numbers = #tpu.dot_dimension_numbers<[1], [0], [0], [1], [0, 0, 1, 1], [], []>} : vector<8x256xbf16>, vector<256x768xbf16>, vector<8x768xf32> -> vector<8x768xf32>
    %45 = vector.extract_strided_slice %42 {offsets = [0, 0], sizes = [8, 512], strides = [1, 1]} : vector<8x768xf32> to vector<8x512xf32>
    %46 = vector.extract_strided_slice %44 {offsets = [0, 0], sizes = [8, 512], strides = [1, 1]} : vector<8x768xf32> to vector<8x512xf32>
    %47 = arith.addf %45, %46 : vector<8x512xf32>
    %48 = arith.negf %47 : vector<8x512xf32>
    %49 = math.exp %48 : vector<8x512xf32>
    %cst_22 = arith.constant 1.000000e+00 : f32
    %50 = vector.broadcast %cst_22 : f32 to vector<8x512xf32>
    %51 = arith.addf %50, %49 : vector<8x512xf32>
    %52 = arith.divf %50, %51 : vector<8x512xf32>
    %53 = vector.extract_strided_slice %52 {offsets = [0, 0], sizes = [8, 256], strides = [1, 1]} : vector<8x512xf32> to vector<8x256xf32>
    %54 = vector.extract_strided_slice %52 {offsets = [0, 256], sizes = [8, 256], strides = [1, 1]} : vector<8x512xf32> to vector<8x256xf32>
    %55 = vector.extract_strided_slice %42 {offsets = [0, 512], sizes = [8, 256], strides = [1, 1]} : vector<8x768xf32> to vector<8x256xf32>
    %56 = vector.extract_strided_slice %44 {offsets = [0, 512], sizes = [8, 256], strides = [1, 1]} : vector<8x768xf32> to vector<8x256xf32>
    %57 = arith.addf %56, %10 : vector<8x256xf32>
    %58 = arith.mulf %53, %57 : vector<8x256xf32>
    %59 = arith.addf %55, %58 : vector<8x256xf32>
    %60 = math.tanh %59 : vector<8x256xf32>
    %61 = arith.subf %33, %60 : vector<8x256xf32>
    %62 = arith.mulf %54, %61 : vector<8x256xf32>
    %63 = arith.addf %60, %62 : vector<8x256xf32>
    %64 = vector.extract_strided_slice %63 {offsets = [0, 0], sizes = [8, 128], strides = [1, 1]} : vector<8x256xf32> to vector<8x128xf32>
    %c8_23 = arith.constant 8 : index
    %c0_24 = arith.constant 0 : index
    %65 = vector.load %arg16[%c8_23, %c0_24] : memref<64x512xf32, #tpu.memory_space<vmem>>, vector<8x128xf32>
    tpu.vector_store %arg16[%c8_23, %c0_24], %64 {strides = array<i32>} : memref<64x512xf32, #tpu.memory_space<vmem>>, vector<8x128xf32>,
    %66 = vector.extract_strided_slice %63 {offsets = [0, 128], sizes = [8, 128], strides = [1, 1]} : vector<8x256xf32> to vector<8x128xf32>
    %c48 = arith.constant 48 : index
    %c128_25 = arith.constant 128 : index
    %67 = vector.load %arg16[%c48, %c128_25] : memref<64x512xf32, #tpu.memory_space<vmem>>, vector<8x128xf32>
    tpu.vector_store %arg16[%c48, %c128_25], %66 {strides = array<i32>} : memref<64x512xf32, #tpu.memory_space<vmem>>, vector<8x128xf32>,
    %68 = vector.extract_strided_slice %63 {offsets = [0, 0], sizes = [8, 128], strides = [1, 1]} : vector<8x256xf32> to vector<8x128xf32>
    %c48_26 = arith.constant 48 : index
    %c256_27 = arith.constant 256 : index
    %69 = vector.load %arg16[%c48_26, %c256_27] : memref<64x512xf32, #tpu.memory_space<vmem>>, vector<8x128xf32>
    tpu.vector_store %arg16[%c48_26, %c256_27], %68 {strides = array<i32>} : memref<64x512xf32, #tpu.memory_space<vmem>>, vector<8x128xf32>,
    %70 = vector.extract_strided_slice %63 {offsets = [0, 128], sizes = [8, 128], strides = [1, 1]} : vector<8x256xf32> to vector<8x128xf32>
    %c8_28 = arith.constant 8 : index
    %c384_29 = arith.constant 384 : index
    %71 = vector.load %arg16[%c8_28, %c384_29] : memref<64x512xf32, #tpu.memory_space<vmem>>, vector<8x128xf32>
    tpu.vector_store %arg16[%c8_28, %c384_29], %70 {strides = array<i32>} : memref<64x512xf32, #tpu.memory_space<vmem>>, vector<8x128xf32>,
    %c16 = arith.constant 16 : index
    %c0_30 = arith.constant 0 : index
    %72 = vector.load %arg15[%c16, %c0_30] : memref<64x768xf32, #tpu.memory_space<vmem>>, vector<8x768xf32>
    %73 = arith.truncf %63 : vector<8x256xf32> to vector<8x256xbf16>
    %cst_31 = arith.constant dense<0.000000e+00> : vector<8x768xf32>
    %74 = tpu.matmul %73, %7, %cst_31 {dimension_numbers = #tpu.dot_dimension_numbers<[1], [0], [0], [1], [0, 0, 1, 1], [], []>} : vector<8x256xbf16>, vector<256x768xbf16>, vector<8x768xf32> -> vector<8x768xf32>
    %75 = vector.extract_strided_slice %72 {offsets = [0, 0], sizes = [8, 512], strides = [1, 1]} : vector<8x768xf32> to vector<8x512xf32>
    %76 = vector.extract_strided_slice %74 {offsets = [0, 0], sizes = [8, 512], strides = [1, 1]} : vector<8x768xf32> to vector<8x512xf32>
    %77 = arith.addf %75, %76 : vector<8x512xf32>
    %78 = arith.negf %77 : vector<8x512xf32>
    %79 = math.exp %78 : vector<8x512xf32>
    %cst_32 = arith.constant 1.000000e+00 : f32
    %80 = vector.broadcast %cst_32 : f32 to vector<8x512xf32>
    %81 = arith.addf %80, %79 : vector<8x512xf32>
    %82 = arith.divf %80, %81 : vector<8x512xf32>
    %83 = vector.extract_strided_slice %82 {offsets = [0, 0], sizes = [8, 256], strides = [1, 1]} : vector<8x512xf32> to vector<8x256xf32>
    %84 = vector.extract_strided_slice %82 {offsets = [0, 256], sizes = [8, 256], strides = [1, 1]} : vector<8x512xf32> to vector<8x256xf32>
    %85 = vector.extract_strided_slice %72 {offsets = [0, 512], sizes = [8, 256], strides = [1, 1]} : vector<8x768xf32> to vector<8x256xf32>
    %86 = vector.extract_strided_slice %74 {offsets = [0, 512], sizes = [8, 256], strides = [1, 1]} : vector<8x768xf32> to vector<8x256xf32>
    %87 = arith.addf %86, %10 : vector<8x256xf32>
    %88 = arith.mulf %83, %87 : vector<8x256xf32>
    %89 = arith.addf %85, %88 : vector<8x256xf32>
    %90 = math.tanh %89 : vector<8x256xf32>
    %91 = arith.subf %63, %90 : vector<8x256xf32>
    %92 = arith.mulf %84, %91 : vector<8x256xf32>
    %93 = arith.addf %90, %92 : vector<8x256xf32>
    %94 = vector.extract_strided_slice %93 {offsets = [0, 0], sizes = [8, 128], strides = [1, 1]} : vector<8x256xf32> to vector<8x128xf32>
    %c16_33 = arith.constant 16 : index
    %c0_34 = arith.constant 0 : index
    %95 = vector.load %arg16[%c16_33, %c0_34] : memref<64x512xf32, #tpu.memory_space<vmem>>, vector<8x128xf32>
    tpu.vector_store %arg16[%c16_33, %c0_34], %94 {strides = array<i32>} : memref<64x512xf32, #tpu.memory_space<vmem>>, vector<8x128xf32>,
    %96 = vector.extract_strided_slice %93 {offsets = [0, 128], sizes = [8, 128], strides = [1, 1]} : vector<8x256xf32> to vector<8x128xf32>
    %c40 = arith.constant 40 : index
    %c128_35 = arith.constant 128 : index
    %97 = vector.load %arg16[%c40, %c128_35] : memref<64x512xf32, #tpu.memory_space<vmem>>, vector<8x128xf32>
    tpu.vector_store %arg16[%c40, %c128_35], %96 {strides = array<i32>} : memref<64x512xf32, #tpu.memory_space<vmem>>, vector<8x128xf32>,
    %98 = vector.extract_strided_slice %93 {offsets = [0, 0], sizes = [8, 128], strides = [1, 1]} : vector<8x256xf32> to vector<8x128xf32>
    %c40_36 = arith.constant 40 : index
    %c256_37 = arith.constant 256 : index
    %99 = vector.load %arg16[%c40_36, %c256_37] : memref<64x512xf32, #tpu.memory_space<vmem>>, vector<8x128xf32>
    tpu.vector_store %arg16[%c40_36, %c256_37], %98 {strides = array<i32>} : memref<64x512xf32, #tpu.memory_space<vmem>>, vector<8x128xf32>,
    %100 = vector.extract_strided_slice %93 {offsets = [0, 128], sizes = [8, 128], strides = [1, 1]} : vector<8x256xf32> to vector<8x128xf32>
    %c16_38 = arith.constant 16 : index
    %c384_39 = arith.constant 384 : index
    %101 = vector.load %arg16[%c16_38, %c384_39] : memref<64x512xf32, #tpu.memory_space<vmem>>, vector<8x128xf32>
    tpu.vector_store %arg16[%c16_38, %c384_39], %100 {strides = array<i32>} : memref<64x512xf32, #tpu.memory_space<vmem>>, vector<8x128xf32>,
    %c24 = arith.constant 24 : index
    %c0_40 = arith.constant 0 : index
    %102 = vector.load %arg15[%c24, %c0_40] : memref<64x768xf32, #tpu.memory_space<vmem>>, vector<8x768xf32>
    %103 = arith.truncf %93 : vector<8x256xf32> to vector<8x256xbf16>
    %cst_41 = arith.constant dense<0.000000e+00> : vector<8x768xf32>
    %104 = tpu.matmul %103, %7, %cst_41 {dimension_numbers = #tpu.dot_dimension_numbers<[1], [0], [0], [1], [0, 0, 1, 1], [], []>} : vector<8x256xbf16>, vector<256x768xbf16>, vector<8x768xf32> -> vector<8x768xf32>
    %105 = vector.extract_strided_slice %102 {offsets = [0, 0], sizes = [8, 512], strides = [1, 1]} : vector<8x768xf32> to vector<8x512xf32>
    %106 = vector.extract_strided_slice %104 {offsets = [0, 0], sizes = [8, 512], strides = [1, 1]} : vector<8x768xf32> to vector<8x512xf32>
    %107 = arith.addf %105, %106 : vector<8x512xf32>
    %108 = arith.negf %107 : vector<8x512xf32>
    %109 = math.exp %108 : vector<8x512xf32>
    %cst_42 = arith.constant 1.000000e+00 : f32
    %110 = vector.broadcast %cst_42 : f32 to vector<8x512xf32>
    %111 = arith.addf %110, %109 : vector<8x512xf32>
    %112 = arith.divf %110, %111 : vector<8x512xf32>
    %113 = vector.extract_strided_slice %112 {offsets = [0, 0], sizes = [8, 256], strides = [1, 1]} : vector<8x512xf32> to vector<8x256xf32>
    %114 = vector.extract_strided_slice %112 {offsets = [0, 256], sizes = [8, 256], strides = [1, 1]} : vector<8x512xf32> to vector<8x256xf32>
    %115 = vector.extract_strided_slice %102 {offsets = [0, 512], sizes = [8, 256], strides = [1, 1]} : vector<8x768xf32> to vector<8x256xf32>
    %116 = vector.extract_strided_slice %104 {offsets = [0, 512], sizes = [8, 256], strides = [1, 1]} : vector<8x768xf32> to vector<8x256xf32>
    %117 = arith.addf %116, %10 : vector<8x256xf32>
    %118 = arith.mulf %113, %117 : vector<8x256xf32>
    %119 = arith.addf %115, %118 : vector<8x256xf32>
    %120 = math.tanh %119 : vector<8x256xf32>
    %121 = arith.subf %93, %120 : vector<8x256xf32>
    %122 = arith.mulf %114, %121 : vector<8x256xf32>
    %123 = arith.addf %120, %122 : vector<8x256xf32>
    %124 = vector.extract_strided_slice %123 {offsets = [0, 0], sizes = [8, 128], strides = [1, 1]} : vector<8x256xf32> to vector<8x128xf32>
    %c24_43 = arith.constant 24 : index
    %c0_44 = arith.constant 0 : index
    %125 = vector.load %arg16[%c24_43, %c0_44] : memref<64x512xf32, #tpu.memory_space<vmem>>, vector<8x128xf32>
    tpu.vector_store %arg16[%c24_43, %c0_44], %124 {strides = array<i32>} : memref<64x512xf32, #tpu.memory_space<vmem>>, vector<8x128xf32>,
    %126 = vector.extract_strided_slice %123 {offsets = [0, 128], sizes = [8, 128], strides = [1, 1]} : vector<8x256xf32> to vector<8x128xf32>
    %c32 = arith.constant 32 : index
    %c128_45 = arith.constant 128 : index
    %127 = vector.load %arg16[%c32, %c128_45] : memref<64x512xf32, #tpu.memory_space<vmem>>, vector<8x128xf32>
    tpu.vector_store %arg16[%c32, %c128_45], %126 {strides = array<i32>} : memref<64x512xf32, #tpu.memory_space<vmem>>, vector<8x128xf32>,
    %128 = vector.extract_strided_slice %123 {offsets = [0, 0], sizes = [8, 128], strides = [1, 1]} : vector<8x256xf32> to vector<8x128xf32>
    %c32_46 = arith.constant 32 : index
    %c256_47 = arith.constant 256 : index
    %129 = vector.load %arg16[%c32_46, %c256_47] : memref<64x512xf32, #tpu.memory_space<vmem>>, vector<8x128xf32>
    tpu.vector_store %arg16[%c32_46, %c256_47], %128 {strides = array<i32>} : memref<64x512xf32, #tpu.memory_space<vmem>>, vector<8x128xf32>,
    %130 = vector.extract_strided_slice %123 {offsets = [0, 128], sizes = [8, 128], strides = [1, 1]} : vector<8x256xf32> to vector<8x128xf32>
    %c24_48 = arith.constant 24 : index
    %c384_49 = arith.constant 384 : index
    %131 = vector.load %arg16[%c24_48, %c384_49] : memref<64x512xf32, #tpu.memory_space<vmem>>, vector<8x128xf32>
    tpu.vector_store %arg16[%c24_48, %c384_49], %130 {strides = array<i32>} : memref<64x512xf32, #tpu.memory_space<vmem>>, vector<8x128xf32>,
    %c32_50 = arith.constant 32 : index
    %c0_51 = arith.constant 0 : index
    %132 = vector.load %arg15[%c32_50, %c0_51] : memref<64x768xf32, #tpu.memory_space<vmem>>, vector<8x768xf32>
    %133 = arith.truncf %123 : vector<8x256xf32> to vector<8x256xbf16>
    %cst_52 = arith.constant dense<0.000000e+00> : vector<8x768xf32>
    %134 = tpu.matmul %133, %7, %cst_52 {dimension_numbers = #tpu.dot_dimension_numbers<[1], [0], [0], [1], [0, 0, 1, 1], [], []>} : vector<8x256xbf16>, vector<256x768xbf16>, vector<8x768xf32> -> vector<8x768xf32>
    %135 = vector.extract_strided_slice %132 {offsets = [0, 0], sizes = [8, 512], strides = [1, 1]} : vector<8x768xf32> to vector<8x512xf32>
    %136 = vector.extract_strided_slice %134 {offsets = [0, 0], sizes = [8, 512], strides = [1, 1]} : vector<8x768xf32> to vector<8x512xf32>
    %137 = arith.addf %135, %136 : vector<8x512xf32>
    %138 = arith.negf %137 : vector<8x512xf32>
    %139 = math.exp %138 : vector<8x512xf32>
    %cst_53 = arith.constant 1.000000e+00 : f32
    %140 = vector.broadcast %cst_53 : f32 to vector<8x512xf32>
    %141 = arith.addf %140, %139 : vector<8x512xf32>
    %142 = arith.divf %140, %141 : vector<8x512xf32>
    %143 = vector.extract_strided_slice %142 {offsets = [0, 0], sizes = [8, 256], strides = [1, 1]} : vector<8x512xf32> to vector<8x256xf32>
    %144 = vector.extract_strided_slice %142 {offsets = [0, 256], sizes = [8, 256], strides = [1, 1]} : vector<8x512xf32> to vector<8x256xf32>
    %145 = vector.extract_strided_slice %132 {offsets = [0, 512], sizes = [8, 256], strides = [1, 1]} : vector<8x768xf32> to vector<8x256xf32>
    %146 = vector.extract_strided_slice %134 {offsets = [0, 512], sizes = [8, 256], strides = [1, 1]} : vector<8x768xf32> to vector<8x256xf32>
    %147 = arith.addf %146, %10 : vector<8x256xf32>
    %148 = arith.mulf %143, %147 : vector<8x256xf32>
    %149 = arith.addf %145, %148 : vector<8x256xf32>
    %150 = math.tanh %149 : vector<8x256xf32>
    %151 = arith.subf %123, %150 : vector<8x256xf32>
    %152 = arith.mulf %144, %151 : vector<8x256xf32>
    %153 = arith.addf %150, %152 : vector<8x256xf32>
    %154 = vector.extract_strided_slice %153 {offsets = [0, 0], sizes = [8, 128], strides = [1, 1]} : vector<8x256xf32> to vector<8x128xf32>
    %c32_54 = arith.constant 32 : index
    %c0_55 = arith.constant 0 : index
    %155 = vector.load %arg16[%c32_54, %c0_55] : memref<64x512xf32, #tpu.memory_space<vmem>>, vector<8x128xf32>
    tpu.vector_store %arg16[%c32_54, %c0_55], %154 {strides = array<i32>} : memref<64x512xf32, #tpu.memory_space<vmem>>, vector<8x128xf32>,
    %156 = vector.extract_strided_slice %153 {offsets = [0, 128], sizes = [8, 128], strides = [1, 1]} : vector<8x256xf32> to vector<8x128xf32>
    %c24_56 = arith.constant 24 : index
    %c128_57 = arith.constant 128 : index
    %157 = vector.load %arg16[%c24_56, %c128_57] : memref<64x512xf32, #tpu.memory_space<vmem>>, vector<8x128xf32>
    tpu.vector_store %arg16[%c24_56, %c128_57], %156 {strides = array<i32>} : memref<64x512xf32, #tpu.memory_space<vmem>>, vector<8x128xf32>,
    %158 = vector.extract_strided_slice %153 {offsets = [0, 0], sizes = [8, 128], strides = [1, 1]} : vector<8x256xf32> to vector<8x128xf32>
    %c24_58 = arith.constant 24 : index
    %c256_59 = arith.constant 256 : index
    %159 = vector.load %arg16[%c24_58, %c256_59] : memref<64x512xf32, #tpu.memory_space<vmem>>, vector<8x128xf32>
    tpu.vector_store %arg16[%c24_58, %c256_59], %158 {strides = array<i32>} : memref<64x512xf32, #tpu.memory_space<vmem>>, vector<8x128xf32>,
    %160 = vector.extract_strided_slice %153 {offsets = [0, 128], sizes = [8, 128], strides = [1, 1]} : vector<8x256xf32> to vector<8x128xf32>
    %c32_60 = arith.constant 32 : index
    %c384_61 = arith.constant 384 : index
    %161 = vector.load %arg16[%c32_60, %c384_61] : memref<64x512xf32, #tpu.memory_space<vmem>>, vector<8x128xf32>
    tpu.vector_store %arg16[%c32_60, %c384_61], %160 {strides = array<i32>} : memref<64x512xf32, #tpu.memory_space<vmem>>, vector<8x128xf32>,
    %c40_62 = arith.constant 40 : index
    %c0_63 = arith.constant 0 : index
    %162 = vector.load %arg15[%c40_62, %c0_63] : memref<64x768xf32, #tpu.memory_space<vmem>>, vector<8x768xf32>
    %163 = arith.truncf %153 : vector<8x256xf32> to vector<8x256xbf16>
    %cst_64 = arith.constant dense<0.000000e+00> : vector<8x768xf32>
    %164 = tpu.matmul %163, %7, %cst_64 {dimension_numbers = #tpu.dot_dimension_numbers<[1], [0], [0], [1], [0, 0, 1, 1], [], []>} : vector<8x256xbf16>, vector<256x768xbf16>, vector<8x768xf32> -> vector<8x768xf32>
    %165 = vector.extract_strided_slice %162 {offsets = [0, 0], sizes = [8, 512], strides = [1, 1]} : vector<8x768xf32> to vector<8x512xf32>
    %166 = vector.extract_strided_slice %164 {offsets = [0, 0], sizes = [8, 512], strides = [1, 1]} : vector<8x768xf32> to vector<8x512xf32>
    %167 = arith.addf %165, %166 : vector<8x512xf32>
    %168 = arith.negf %167 : vector<8x512xf32>
    %169 = math.exp %168 : vector<8x512xf32>
    %cst_65 = arith.constant 1.000000e+00 : f32
    %170 = vector.broadcast %cst_65 : f32 to vector<8x512xf32>
    %171 = arith.addf %170, %169 : vector<8x512xf32>
    %172 = arith.divf %170, %171 : vector<8x512xf32>
    %173 = vector.extract_strided_slice %172 {offsets = [0, 0], sizes = [8, 256], strides = [1, 1]} : vector<8x512xf32> to vector<8x256xf32>
    %174 = vector.extract_strided_slice %172 {offsets = [0, 256], sizes = [8, 256], strides = [1, 1]} : vector<8x512xf32> to vector<8x256xf32>
    %175 = vector.extract_strided_slice %162 {offsets = [0, 512], sizes = [8, 256], strides = [1, 1]} : vector<8x768xf32> to vector<8x256xf32>
    %176 = vector.extract_strided_slice %164 {offsets = [0, 512], sizes = [8, 256], strides = [1, 1]} : vector<8x768xf32> to vector<8x256xf32>
    %177 = arith.addf %176, %10 : vector<8x256xf32>
    %178 = arith.mulf %173, %177 : vector<8x256xf32>
    %179 = arith.addf %175, %178 : vector<8x256xf32>
    %180 = math.tanh %179 : vector<8x256xf32>
    %181 = arith.subf %153, %180 : vector<8x256xf32>
    %182 = arith.mulf %174, %181 : vector<8x256xf32>
    %183 = arith.addf %180, %182 : vector<8x256xf32>
    %184 = vector.extract_strided_slice %183 {offsets = [0, 0], sizes = [8, 128], strides = [1, 1]} : vector<8x256xf32> to vector<8x128xf32>
    %c40_66 = arith.constant 40 : index
    %c0_67 = arith.constant 0 : index
    %185 = vector.load %arg16[%c40_66, %c0_67] : memref<64x512xf32, #tpu.memory_space<vmem>>, vector<8x128xf32>
    tpu.vector_store %arg16[%c40_66, %c0_67], %184 {strides = array<i32>} : memref<64x512xf32, #tpu.memory_space<vmem>>, vector<8x128xf32>,
    %186 = vector.extract_strided_slice %183 {offsets = [0, 128], sizes = [8, 128], strides = [1, 1]} : vector<8x256xf32> to vector<8x128xf32>
    %c16_68 = arith.constant 16 : index
    %c128_69 = arith.constant 128 : index
    %187 = vector.load %arg16[%c16_68, %c128_69] : memref<64x512xf32, #tpu.memory_space<vmem>>, vector<8x128xf32>
    tpu.vector_store %arg16[%c16_68, %c128_69], %186 {strides = array<i32>} : memref<64x512xf32, #tpu.memory_space<vmem>>, vector<8x128xf32>,
    %188 = vector.extract_strided_slice %183 {offsets = [0, 0], sizes = [8, 128], strides = [1, 1]} : vector<8x256xf32> to vector<8x128xf32>
    %c16_70 = arith.constant 16 : index
    %c256_71 = arith.constant 256 : index
    %189 = vector.load %arg16[%c16_70, %c256_71] : memref<64x512xf32, #tpu.memory_space<vmem>>, vector<8x128xf32>
    tpu.vector_store %arg16[%c16_70, %c256_71], %188 {strides = array<i32>} : memref<64x512xf32, #tpu.memory_space<vmem>>, vector<8x128xf32>,
    %190 = vector.extract_strided_slice %183 {offsets = [0, 128], sizes = [8, 128], strides = [1, 1]} : vector<8x256xf32> to vector<8x128xf32>
    %c40_72 = arith.constant 40 : index
    %c384_73 = arith.constant 384 : index
    %191 = vector.load %arg16[%c40_72, %c384_73] : memref<64x512xf32, #tpu.memory_space<vmem>>, vector<8x128xf32>
    tpu.vector_store %arg16[%c40_72, %c384_73], %190 {strides = array<i32>} : memref<64x512xf32, #tpu.memory_space<vmem>>, vector<8x128xf32>,
    %c48_74 = arith.constant 48 : index
    %c0_75 = arith.constant 0 : index
    %192 = vector.load %arg15[%c48_74, %c0_75] : memref<64x768xf32, #tpu.memory_space<vmem>>, vector<8x768xf32>
    %193 = arith.truncf %183 : vector<8x256xf32> to vector<8x256xbf16>
    %cst_76 = arith.constant dense<0.000000e+00> : vector<8x768xf32>
    %194 = tpu.matmul %193, %7, %cst_76 {dimension_numbers = #tpu.dot_dimension_numbers<[1], [0], [0], [1], [0, 0, 1, 1], [], []>} : vector<8x256xbf16>, vector<256x768xbf16>, vector<8x768xf32> -> vector<8x768xf32>
    %195 = vector.extract_strided_slice %192 {offsets = [0, 0], sizes = [8, 512], strides = [1, 1]} : vector<8x768xf32> to vector<8x512xf32>
    %196 = vector.extract_strided_slice %194 {offsets = [0, 0], sizes = [8, 512], strides = [1, 1]} : vector<8x768xf32> to vector<8x512xf32>
    %197 = arith.addf %195, %196 : vector<8x512xf32>
    %198 = arith.negf %197 : vector<8x512xf32>
    %199 = math.exp %198 : vector<8x512xf32>
    %cst_77 = arith.constant 1.000000e+00 : f32
    %200 = vector.broadcast %cst_77 : f32 to vector<8x512xf32>
    %201 = arith.addf %200, %199 : vector<8x512xf32>
    %202 = arith.divf %200, %201 : vector<8x512xf32>
    %203 = vector.extract_strided_slice %202 {offsets = [0, 0], sizes = [8, 256], strides = [1, 1]} : vector<8x512xf32> to vector<8x256xf32>
    %204 = vector.extract_strided_slice %202 {offsets = [0, 256], sizes = [8, 256], strides = [1, 1]} : vector<8x512xf32> to vector<8x256xf32>
    %205 = vector.extract_strided_slice %192 {offsets = [0, 512], sizes = [8, 256], strides = [1, 1]} : vector<8x768xf32> to vector<8x256xf32>
    %206 = vector.extract_strided_slice %194 {offsets = [0, 512], sizes = [8, 256], strides = [1, 1]} : vector<8x768xf32> to vector<8x256xf32>
    %207 = arith.addf %206, %10 : vector<8x256xf32>
    %208 = arith.mulf %203, %207 : vector<8x256xf32>
    %209 = arith.addf %205, %208 : vector<8x256xf32>
    %210 = math.tanh %209 : vector<8x256xf32>
    %211 = arith.subf %183, %210 : vector<8x256xf32>
    %212 = arith.mulf %204, %211 : vector<8x256xf32>
    %213 = arith.addf %210, %212 : vector<8x256xf32>
    %214 = vector.extract_strided_slice %213 {offsets = [0, 0], sizes = [8, 128], strides = [1, 1]} : vector<8x256xf32> to vector<8x128xf32>
    %c48_78 = arith.constant 48 : index
    %c0_79 = arith.constant 0 : index
    %215 = vector.load %arg16[%c48_78, %c0_79] : memref<64x512xf32, #tpu.memory_space<vmem>>, vector<8x128xf32>
    tpu.vector_store %arg16[%c48_78, %c0_79], %214 {strides = array<i32>} : memref<64x512xf32, #tpu.memory_space<vmem>>, vector<8x128xf32>,
    %216 = vector.extract_strided_slice %213 {offsets = [0, 128], sizes = [8, 128], strides = [1, 1]} : vector<8x256xf32> to vector<8x128xf32>
    %c8_80 = arith.constant 8 : index
    %c128_81 = arith.constant 128 : index
    %217 = vector.load %arg16[%c8_80, %c128_81] : memref<64x512xf32, #tpu.memory_space<vmem>>, vector<8x128xf32>
    tpu.vector_store %arg16[%c8_80, %c128_81], %216 {strides = array<i32>} : memref<64x512xf32, #tpu.memory_space<vmem>>, vector<8x128xf32>,
    %218 = vector.extract_strided_slice %213 {offsets = [0, 0], sizes = [8, 128], strides = [1, 1]} : vector<8x256xf32> to vector<8x128xf32>
    %c8_82 = arith.constant 8 : index
    %c256_83 = arith.constant 256 : index
    %219 = vector.load %arg16[%c8_82, %c256_83] : memref<64x512xf32, #tpu.memory_space<vmem>>, vector<8x128xf32>
    tpu.vector_store %arg16[%c8_82, %c256_83], %218 {strides = array<i32>} : memref<64x512xf32, #tpu.memory_space<vmem>>, vector<8x128xf32>,
    %220 = vector.extract_strided_slice %213 {offsets = [0, 128], sizes = [8, 128], strides = [1, 1]} : vector<8x256xf32> to vector<8x128xf32>
    %c48_84 = arith.constant 48 : index
    %c384_85 = arith.constant 384 : index
    %221 = vector.load %arg16[%c48_84, %c384_85] : memref<64x512xf32, #tpu.memory_space<vmem>>, vector<8x128xf32>
    tpu.vector_store %arg16[%c48_84, %c384_85], %220 {strides = array<i32>} : memref<64x512xf32, #tpu.memory_space<vmem>>, vector<8x128xf32>,
    %c56_86 = arith.constant 56 : index
    %c0_87 = arith.constant 0 : index
    %222 = vector.load %arg15[%c56_86, %c0_87] : memref<64x768xf32, #tpu.memory_space<vmem>>, vector<8x768xf32>
    %223 = arith.truncf %213 : vector<8x256xf32> to vector<8x256xbf16>
    %cst_88 = arith.constant dense<0.000000e+00> : vector<8x768xf32>
    %224 = tpu.matmul %223, %7, %cst_88 {dimension_numbers = #tpu.dot_dimension_numbers<[1], [0], [0], [1], [0, 0, 1, 1], [], []>} : vector<8x256xbf16>, vector<256x768xbf16>, vector<8x768xf32> -> vector<8x768xf32>
    %225 = vector.extract_strided_slice %222 {offsets = [0, 0], sizes = [8, 512], strides = [1, 1]} : vector<8x768xf32> to vector<8x512xf32>
    %226 = vector.extract_strided_slice %224 {offsets = [0, 0], sizes = [8, 512], strides = [1, 1]} : vector<8x768xf32> to vector<8x512xf32>
    %227 = arith.addf %225, %226 : vector<8x512xf32>
    %228 = arith.negf %227 : vector<8x512xf32>
    %229 = math.exp %228 : vector<8x512xf32>
    %cst_89 = arith.constant 1.000000e+00 : f32
    %230 = vector.broadcast %cst_89 : f32 to vector<8x512xf32>
    %231 = arith.addf %230, %229 : vector<8x512xf32>
    %232 = arith.divf %230, %231 : vector<8x512xf32>
    %233 = vector.extract_strided_slice %232 {offsets = [0, 0], sizes = [8, 256], strides = [1, 1]} : vector<8x512xf32> to vector<8x256xf32>
    %234 = vector.extract_strided_slice %232 {offsets = [0, 256], sizes = [8, 256], strides = [1, 1]} : vector<8x512xf32> to vector<8x256xf32>
    %235 = vector.extract_strided_slice %222 {offsets = [0, 512], sizes = [8, 256], strides = [1, 1]} : vector<8x768xf32> to vector<8x256xf32>
    %236 = vector.extract_strided_slice %224 {offsets = [0, 512], sizes = [8, 256], strides = [1, 1]} : vector<8x768xf32> to vector<8x256xf32>
    %237 = arith.addf %236, %10 : vector<8x256xf32>
    %238 = arith.mulf %233, %237 : vector<8x256xf32>
    %239 = arith.addf %235, %238 : vector<8x256xf32>
    %240 = math.tanh %239 : vector<8x256xf32>
    %241 = arith.subf %213, %240 : vector<8x256xf32>
    %242 = arith.mulf %234, %241 : vector<8x256xf32>
    %243 = arith.addf %240, %242 : vector<8x256xf32>
    %244 = vector.extract_strided_slice %243 {offsets = [0, 0], sizes = [8, 128], strides = [1, 1]} : vector<8x256xf32> to vector<8x128xf32>
    %c56_90 = arith.constant 56 : index
    %c0_91 = arith.constant 0 : index
    %245 = vector.load %arg16[%c56_90, %c0_91] : memref<64x512xf32, #tpu.memory_space<vmem>>, vector<8x128xf32>
    tpu.vector_store %arg16[%c56_90, %c0_91], %244 {strides = array<i32>} : memref<64x512xf32, #tpu.memory_space<vmem>>, vector<8x128xf32>,
    %246 = vector.extract_strided_slice %243 {offsets = [0, 128], sizes = [8, 128], strides = [1, 1]} : vector<8x256xf32> to vector<8x128xf32>
    %c0_92 = arith.constant 0 : index
    %c128_93 = arith.constant 128 : index
    %247 = vector.load %arg16[%c0_92, %c128_93] : memref<64x512xf32, #tpu.memory_space<vmem>>, vector<8x128xf32>
    tpu.vector_store %arg16[%c0_92, %c128_93], %246 {strides = array<i32>} : memref<64x512xf32, #tpu.memory_space<vmem>>, vector<8x128xf32>,
    %248 = vector.extract_strided_slice %243 {offsets = [0, 0], sizes = [8, 128], strides = [1, 1]} : vector<8x256xf32> to vector<8x128xf32>
    %c0_94 = arith.constant 0 : index
    %c256_95 = arith.constant 256 : index
    %249 = vector.load %arg16[%c0_94, %c256_95] : memref<64x512xf32, #tpu.memory_space<vmem>>, vector<8x128xf32>
    tpu.vector_store %arg16[%c0_94, %c256_95], %248 {strides = array<i32>} : memref<64x512xf32, #tpu.memory_space<vmem>>, vector<8x128xf32>,
    %250 = vector.extract_strided_slice %243 {offsets = [0, 128], sizes = [8, 128], strides = [1, 1]} : vector<8x256xf32> to vector<8x128xf32>
    %c56_96 = arith.constant 56 : index
    %c384_97 = arith.constant 384 : index
    %251 = vector.load %arg16[%c56_96, %c384_97] : memref<64x512xf32, #tpu.memory_space<vmem>>, vector<8x128xf32>
    tpu.vector_store %arg16[%c56_96, %c384_97], %250 {strides = array<i32>} : memref<64x512xf32, #tpu.memory_space<vmem>>, vector<8x128xf32>,
    %c0_98 = arith.constant 0 : index
    %c0_99 = arith.constant 0 : index
    %252 = vector.load %arg5[%c0_98, %c0_99] : memref<512x768xbf16, #tpu.memory_space<vmem>>, vector<512x768xbf16>
    %c0_100 = arith.constant 0 : index
    %c0_101 = arith.constant 0 : index
    %253 = vector.load %arg16[%c0_100, %c0_101] : memref<64x512xf32, #tpu.memory_space<vmem>>, vector<64x512xf32>
    %254 = arith.truncf %253 : vector<64x512xf32> to vector<64x512xbf16>
    %cst_102 = arith.constant dense<0.000000e+00> : vector<64x768xf32>
    %255 = tpu.matmul %254, %252, %cst_102 {dimension_numbers = #tpu.dot_dimension_numbers<[1], [0], [0], [1], [0, 0, 1, 1], [], []>} : vector<64x512xbf16>, vector<512x768xbf16>, vector<64x768xf32> -> vector<64x768xf32>
    %c0_103 = arith.constant 0 : index
    %c0_104 = arith.constant 0 : index
    %256 = vector.load %arg6[%c0_103, %c0_104] : memref<1x768xf32, #tpu.memory_space<vmem>>, vector<1x768xf32>
    %257 = vector.broadcast %256 : vector<1x768xf32> to vector<64x768xf32>
    %258 = arith.addf %255, %257 : vector<64x768xf32>
    %c0_105 = arith.constant 0 : index
    %c0_106 = arith.constant 0 : index
    %259 = vector.load %arg15[%c0_105, %c0_106] : memref<64x768xf32, #tpu.memory_space<vmem>>, vector<64x768xf32>
    tpu.vector_store %arg15[%c0_105, %c0_106], %258 {strides = array<i32>} : memref<64x768xf32, #tpu.memory_space<vmem>>, vector<64x768xf32>,
    %c0_107 = arith.constant 0 : index
    %c0_108 = arith.constant 0 : index
    %260 = vector.load %arg7[%c0_107, %c0_108] : memref<256x768xbf16, #tpu.memory_space<vmem>>, vector<256x768xbf16>
    %c0_109 = arith.constant 0 : index
    %c0_110 = arith.constant 0 : index
    %261 = vector.load %arg8[%c0_109, %c0_110] : memref<1x256xf32, #tpu.memory_space<vmem>>, vector<1x256xf32>
    %262 = vector.shape_cast %261 : vector<1x256xf32> to vector<1x256xf32>
    %263 = vector.broadcast %262 : vector<1x256xf32> to vector<8x256xf32>
    %cst_111 = arith.constant 0.000000e+00 : f32
    %264 = vector.broadcast %cst_111 : f32 to vector<8x256xf32>
    %c0_112 = arith.constant 0 : index
    %c0_113 = arith.constant 0 : index
    %265 = vector.load %arg15[%c0_112, %c0_113] : memref<64x768xf32, #tpu.memory_space<vmem>>, vector<8x768xf32>
    %266 = arith.truncf %264 : vector<8x256xf32> to vector<8x256xbf16>
    %cst_114 = arith.constant dense<0.000000e+00> : vector<8x768xf32>
    %267 = tpu.matmul %266, %260, %cst_114 {dimension_numbers = #tpu.dot_dimension_numbers<[1], [0], [0], [1], [0, 0, 1, 1], [], []>} : vector<8x256xbf16>, vector<256x768xbf16>, vector<8x768xf32> -> vector<8x768xf32>
    %268 = vector.extract_strided_slice %265 {offsets = [0, 0], sizes = [8, 512], strides = [1, 1]} : vector<8x768xf32> to vector<8x512xf32>
    %269 = vector.extract_strided_slice %267 {offsets = [0, 0], sizes = [8, 512], strides = [1, 1]} : vector<8x768xf32> to vector<8x512xf32>
    %270 = arith.addf %268, %269 : vector<8x512xf32>
    %271 = arith.negf %270 : vector<8x512xf32>
    %272 = math.exp %271 : vector<8x512xf32>
    %cst_115 = arith.constant 1.000000e+00 : f32
    %273 = vector.broadcast %cst_115 : f32 to vector<8x512xf32>
    %274 = arith.addf %273, %272 : vector<8x512xf32>
    %275 = arith.divf %273, %274 : vector<8x512xf32>
    %276 = vector.extract_strided_slice %275 {offsets = [0, 0], sizes = [8, 256], strides = [1, 1]} : vector<8x512xf32> to vector<8x256xf32>
    %277 = vector.extract_strided_slice %275 {offsets = [0, 256], sizes = [8, 256], strides = [1, 1]} : vector<8x512xf32> to vector<8x256xf32>
    %278 = vector.extract_strided_slice %265 {offsets = [0, 512], sizes = [8, 256], strides = [1, 1]} : vector<8x768xf32> to vector<8x256xf32>
    %279 = vector.extract_strided_slice %267 {offsets = [0, 512], sizes = [8, 256], strides = [1, 1]} : vector<8x768xf32> to vector<8x256xf32>
    %280 = arith.addf %279, %263 : vector<8x256xf32>
    %281 = arith.mulf %276, %280 : vector<8x256xf32>
    %282 = arith.addf %278, %281 : vector<8x256xf32>
    %283 = math.tanh %282 : vector<8x256xf32>
    %284 = arith.subf %264, %283 : vector<8x256xf32>
    %285 = arith.mulf %277, %284 : vector<8x256xf32>
    %286 = arith.addf %283, %285 : vector<8x256xf32>
    %287 = vector.extract_strided_slice %286 {offsets = [0, 0], sizes = [8, 128], strides = [1, 1]} : vector<8x256xf32> to vector<8x128xf32>
    %c0_116 = arith.constant 0 : index
    %c0_117 = arith.constant 0 : index
    %288 = vector.load %arg17[%c0_116, %c0_117] : memref<64x256xf32, #tpu.memory_space<vmem>>, vector<8x128xf32>
    tpu.vector_store %arg17[%c0_116, %c0_117], %287 {strides = array<i32>} : memref<64x256xf32, #tpu.memory_space<vmem>>, vector<8x128xf32>,
    %289 = vector.extract_strided_slice %286 {offsets = [0, 128], sizes = [8, 128], strides = [1, 1]} : vector<8x256xf32> to vector<8x128xf32>
    %c56_118 = arith.constant 56 : index
    %c128_119 = arith.constant 128 : index
    %290 = vector.load %arg17[%c56_118, %c128_119] : memref<64x256xf32, #tpu.memory_space<vmem>>, vector<8x128xf32>
    tpu.vector_store %arg17[%c56_118, %c128_119], %289 {strides = array<i32>} : memref<64x256xf32, #tpu.memory_space<vmem>>, vector<8x128xf32>,
    %c8_120 = arith.constant 8 : index
    %c0_121 = arith.constant 0 : index
    %291 = vector.load %arg15[%c8_120, %c0_121] : memref<64x768xf32, #tpu.memory_space<vmem>>, vector<8x768xf32>
    %292 = arith.truncf %286 : vector<8x256xf32> to vector<8x256xbf16>
    %cst_122 = arith.constant dense<0.000000e+00> : vector<8x768xf32>
    %293 = tpu.matmul %292, %260, %cst_122 {dimension_numbers = #tpu.dot_dimension_numbers<[1], [0], [0], [1], [0, 0, 1, 1], [], []>} : vector<8x256xbf16>, vector<256x768xbf16>, vector<8x768xf32> -> vector<8x768xf32>
    %294 = vector.extract_strided_slice %291 {offsets = [0, 0], sizes = [8, 512], strides = [1, 1]} : vector<8x768xf32> to vector<8x512xf32>
    %295 = vector.extract_strided_slice %293 {offsets = [0, 0], sizes = [8, 512], strides = [1, 1]} : vector<8x768xf32> to vector<8x512xf32>
    %296 = arith.addf %294, %295 : vector<8x512xf32>
    %297 = arith.negf %296 : vector<8x512xf32>
    %298 = math.exp %297 : vector<8x512xf32>
    %cst_123 = arith.constant 1.000000e+00 : f32
    %299 = vector.broadcast %cst_123 : f32 to vector<8x512xf32>
    %300 = arith.addf %299, %298 : vector<8x512xf32>
    %301 = arith.divf %299, %300 : vector<8x512xf32>
    %302 = vector.extract_strided_slice %301 {offsets = [0, 0], sizes = [8, 256], strides = [1, 1]} : vector<8x512xf32> to vector<8x256xf32>
    %303 = vector.extract_strided_slice %301 {offsets = [0, 256], sizes = [8, 256], strides = [1, 1]} : vector<8x512xf32> to vector<8x256xf32>
    %304 = vector.extract_strided_slice %291 {offsets = [0, 512], sizes = [8, 256], strides = [1, 1]} : vector<8x768xf32> to vector<8x256xf32>
    %305 = vector.extract_strided_slice %293 {offsets = [0, 512], sizes = [8, 256], strides = [1, 1]} : vector<8x768xf32> to vector<8x256xf32>
    %306 = arith.addf %305, %263 : vector<8x256xf32>
    %307 = arith.mulf %302, %306 : vector<8x256xf32>
    %308 = arith.addf %304, %307 : vector<8x256xf32>
    %309 = math.tanh %308 : vector<8x256xf32>
    %310 = arith.subf %286, %309 : vector<8x256xf32>
    %311 = arith.mulf %303, %310 : vector<8x256xf32>
    %312 = arith.addf %309, %311 : vector<8x256xf32>
    %313 = vector.extract_strided_slice %312 {offsets = [0, 0], sizes = [8, 128], strides = [1, 1]} : vector<8x256xf32> to vector<8x128xf32>
    %c8_124 = arith.constant 8 : index
    %c0_125 = arith.constant 0 : index
    %314 = vector.load %arg17[%c8_124, %c0_125] : memref<64x256xf32, #tpu.memory_space<vmem>>, vector<8x128xf32>
    tpu.vector_store %arg17[%c8_124, %c0_125], %313 {strides = array<i32>} : memref<64x256xf32, #tpu.memory_space<vmem>>, vector<8x128xf32>,
    %315 = vector.extract_strided_slice %312 {offsets = [0, 128], sizes = [8, 128], strides = [1, 1]} : vector<8x256xf32> to vector<8x128xf32>
    %c48_126 = arith.constant 48 : index
    %c128_127 = arith.constant 128 : index
    %316 = vector.load %arg17[%c48_126, %c128_127] : memref<64x256xf32, #tpu.memory_space<vmem>>, vector<8x128xf32>
    tpu.vector_store %arg17[%c48_126, %c128_127], %315 {strides = array<i32>} : memref<64x256xf32, #tpu.memory_space<vmem>>, vector<8x128xf32>,
    %c16_128 = arith.constant 16 : index
    %c0_129 = arith.constant 0 : index
    %317 = vector.load %arg15[%c16_128, %c0_129] : memref<64x768xf32, #tpu.memory_space<vmem>>, vector<8x768xf32>
    %318 = arith.truncf %312 : vector<8x256xf32> to vector<8x256xbf16>
    %cst_130 = arith.constant dense<0.000000e+00> : vector<8x768xf32>
    %319 = tpu.matmul %318, %260, %cst_130 {dimension_numbers = #tpu.dot_dimension_numbers<[1], [0], [0], [1], [0, 0, 1, 1], [], []>} : vector<8x256xbf16>, vector<256x768xbf16>, vector<8x768xf32> -> vector<8x768xf32>
    %320 = vector.extract_strided_slice %317 {offsets = [0, 0], sizes = [8, 512], strides = [1, 1]} : vector<8x768xf32> to vector<8x512xf32>
    %321 = vector.extract_strided_slice %319 {offsets = [0, 0], sizes = [8, 512], strides = [1, 1]} : vector<8x768xf32> to vector<8x512xf32>
    %322 = arith.addf %320, %321 : vector<8x512xf32>
    %323 = arith.negf %322 : vector<8x512xf32>
    %324 = math.exp %323 : vector<8x512xf32>
    %cst_131 = arith.constant 1.000000e+00 : f32
    %325 = vector.broadcast %cst_131 : f32 to vector<8x512xf32>
    %326 = arith.addf %325, %324 : vector<8x512xf32>
    %327 = arith.divf %325, %326 : vector<8x512xf32>
    %328 = vector.extract_strided_slice %327 {offsets = [0, 0], sizes = [8, 256], strides = [1, 1]} : vector<8x512xf32> to vector<8x256xf32>
    %329 = vector.extract_strided_slice %327 {offsets = [0, 256], sizes = [8, 256], strides = [1, 1]} : vector<8x512xf32> to vector<8x256xf32>
    %330 = vector.extract_strided_slice %317 {offsets = [0, 512], sizes = [8, 256], strides = [1, 1]} : vector<8x768xf32> to vector<8x256xf32>
    %331 = vector.extract_strided_slice %319 {offsets = [0, 512], sizes = [8, 256], strides = [1, 1]} : vector<8x768xf32> to vector<8x256xf32>
    %332 = arith.addf %331, %263 : vector<8x256xf32>
    %333 = arith.mulf %328, %332 : vector<8x256xf32>
    %334 = arith.addf %330, %333 : vector<8x256xf32>
    %335 = math.tanh %334 : vector<8x256xf32>
    %336 = arith.subf %312, %335 : vector<8x256xf32>
    %337 = arith.mulf %329, %336 : vector<8x256xf32>
    %338 = arith.addf %335, %337 : vector<8x256xf32>
    %339 = vector.extract_strided_slice %338 {offsets = [0, 0], sizes = [8, 128], strides = [1, 1]} : vector<8x256xf32> to vector<8x128xf32>
    %c16_132 = arith.constant 16 : index
    %c0_133 = arith.constant 0 : index
    %340 = vector.load %arg17[%c16_132, %c0_133] : memref<64x256xf32, #tpu.memory_space<vmem>>, vector<8x128xf32>
    tpu.vector_store %arg17[%c16_132, %c0_133], %339 {strides = array<i32>} : memref<64x256xf32, #tpu.memory_space<vmem>>, vector<8x128xf32>,
    %341 = vector.extract_strided_slice %338 {offsets = [0, 128], sizes = [8, 128], strides = [1, 1]} : vector<8x256xf32> to vector<8x128xf32>
    %c40_134 = arith.constant 40 : index
    %c128_135 = arith.constant 128 : index
    %342 = vector.load %arg17[%c40_134, %c128_135] : memref<64x256xf32, #tpu.memory_space<vmem>>, vector<8x128xf32>
    tpu.vector_store %arg17[%c40_134, %c128_135], %341 {strides = array<i32>} : memref<64x256xf32, #tpu.memory_space<vmem>>, vector<8x128xf32>,
    %c24_136 = arith.constant 24 : index
    %c0_137 = arith.constant 0 : index
    %343 = vector.load %arg15[%c24_136, %c0_137] : memref<64x768xf32, #tpu.memory_space<vmem>>, vector<8x768xf32>
    %344 = arith.truncf %338 : vector<8x256xf32> to vector<8x256xbf16>
    %cst_138 = arith.constant dense<0.000000e+00> : vector<8x768xf32>
    %345 = tpu.matmul %344, %260, %cst_138 {dimension_numbers = #tpu.dot_dimension_numbers<[1], [0], [0], [1], [0, 0, 1, 1], [], []>} : vector<8x256xbf16>, vector<256x768xbf16>, vector<8x768xf32> -> vector<8x768xf32>
    %346 = vector.extract_strided_slice %343 {offsets = [0, 0], sizes = [8, 512], strides = [1, 1]} : vector<8x768xf32> to vector<8x512xf32>
    %347 = vector.extract_strided_slice %345 {offsets = [0, 0], sizes = [8, 512], strides = [1, 1]} : vector<8x768xf32> to vector<8x512xf32>
    %348 = arith.addf %346, %347 : vector<8x512xf32>
    %349 = arith.negf %348 : vector<8x512xf32>
    %350 = math.exp %349 : vector<8x512xf32>
    %cst_139 = arith.constant 1.000000e+00 : f32
    %351 = vector.broadcast %cst_139 : f32 to vector<8x512xf32>
    %352 = arith.addf %351, %350 : vector<8x512xf32>
    %353 = arith.divf %351, %352 : vector<8x512xf32>
    %354 = vector.extract_strided_slice %353 {offsets = [0, 0], sizes = [8, 256], strides = [1, 1]} : vector<8x512xf32> to vector<8x256xf32>
    %355 = vector.extract_strided_slice %353 {offsets = [0, 256], sizes = [8, 256], strides = [1, 1]} : vector<8x512xf32> to vector<8x256xf32>
    %356 = vector.extract_strided_slice %343 {offsets = [0, 512], sizes = [8, 256], strides = [1, 1]} : vector<8x768xf32> to vector<8x256xf32>
    %357 = vector.extract_strided_slice %345 {offsets = [0, 512], sizes = [8, 256], strides = [1, 1]} : vector<8x768xf32> to vector<8x256xf32>
    %358 = arith.addf %357, %263 : vector<8x256xf32>
    %359 = arith.mulf %354, %358 : vector<8x256xf32>
    %360 = arith.addf %356, %359 : vector<8x256xf32>
    %361 = math.tanh %360 : vector<8x256xf32>
    %362 = arith.subf %338, %361 : vector<8x256xf32>
    %363 = arith.mulf %355, %362 : vector<8x256xf32>
    %364 = arith.addf %361, %363 : vector<8x256xf32>
    %365 = vector.extract_strided_slice %364 {offsets = [0, 0], sizes = [8, 128], strides = [1, 1]} : vector<8x256xf32> to vector<8x128xf32>
    %c24_140 = arith.constant 24 : index
    %c0_141 = arith.constant 0 : index
    %366 = vector.load %arg17[%c24_140, %c0_141] : memref<64x256xf32, #tpu.memory_space<vmem>>, vector<8x128xf32>
    tpu.vector_store %arg17[%c24_140, %c0_141], %365 {strides = array<i32>} : memref<64x256xf32, #tpu.memory_space<vmem>>, vector<8x128xf32>,
    %367 = vector.extract_strided_slice %364 {offsets = [0, 128], sizes = [8, 128], strides = [1, 1]} : vector<8x256xf32> to vector<8x128xf32>
    %c32_142 = arith.constant 32 : index
    %c128_143 = arith.constant 128 : index
    %368 = vector.load %arg17[%c32_142, %c128_143] : memref<64x256xf32, #tpu.memory_space<vmem>>, vector<8x128xf32>
    tpu.vector_store %arg17[%c32_142, %c128_143], %367 {strides = array<i32>} : memref<64x256xf32, #tpu.memory_space<vmem>>, vector<8x128xf32>,
    %c32_144 = arith.constant 32 : index
    %c0_145 = arith.constant 0 : index
    %369 = vector.load %arg15[%c32_144, %c0_145] : memref<64x768xf32, #tpu.memory_space<vmem>>, vector<8x768xf32>
    %370 = arith.truncf %364 : vector<8x256xf32> to vector<8x256xbf16>
    %cst_146 = arith.constant dense<0.000000e+00> : vector<8x768xf32>
    %371 = tpu.matmul %370, %260, %cst_146 {dimension_numbers = #tpu.dot_dimension_numbers<[1], [0], [0], [1], [0, 0, 1, 1], [], []>} : vector<8x256xbf16>, vector<256x768xbf16>, vector<8x768xf32> -> vector<8x768xf32>
    %372 = vector.extract_strided_slice %369 {offsets = [0, 0], sizes = [8, 512], strides = [1, 1]} : vector<8x768xf32> to vector<8x512xf32>
    %373 = vector.extract_strided_slice %371 {offsets = [0, 0], sizes = [8, 512], strides = [1, 1]} : vector<8x768xf32> to vector<8x512xf32>
    %374 = arith.addf %372, %373 : vector<8x512xf32>
    %375 = arith.negf %374 : vector<8x512xf32>
    %376 = math.exp %375 : vector<8x512xf32>
    %cst_147 = arith.constant 1.000000e+00 : f32
    %377 = vector.broadcast %cst_147 : f32 to vector<8x512xf32>
    %378 = arith.addf %377, %376 : vector<8x512xf32>
    %379 = arith.divf %377, %378 : vector<8x512xf32>
    %380 = vector.extract_strided_slice %379 {offsets = [0, 0], sizes = [8, 256], strides = [1, 1]} : vector<8x512xf32> to vector<8x256xf32>
    %381 = vector.extract_strided_slice %379 {offsets = [0, 256], sizes = [8, 256], strides = [1, 1]} : vector<8x512xf32> to vector<8x256xf32>
    %382 = vector.extract_strided_slice %369 {offsets = [0, 512], sizes = [8, 256], strides = [1, 1]} : vector<8x768xf32> to vector<8x256xf32>
    %383 = vector.extract_strided_slice %371 {offsets = [0, 512], sizes = [8, 256], strides = [1, 1]} : vector<8x768xf32> to vector<8x256xf32>
    %384 = arith.addf %383, %263 : vector<8x256xf32>
    %385 = arith.mulf %380, %384 : vector<8x256xf32>
    %386 = arith.addf %382, %385 : vector<8x256xf32>
    %387 = math.tanh %386 : vector<8x256xf32>
    %388 = arith.subf %364, %387 : vector<8x256xf32>
    %389 = arith.mulf %381, %388 : vector<8x256xf32>
    %390 = arith.addf %387, %389 : vector<8x256xf32>
    %391 = vector.extract_strided_slice %390 {offsets = [0, 0], sizes = [8, 128], strides = [1, 1]} : vector<8x256xf32> to vector<8x128xf32>
    %c32_148 = arith.constant 32 : index
    %c0_149 = arith.constant 0 : index
    %392 = vector.load %arg17[%c32_148, %c0_149] : memref<64x256xf32, #tpu.memory_space<vmem>>, vector<8x128xf32>
    tpu.vector_store %arg17[%c32_148, %c0_149], %391 {strides = array<i32>} : memref<64x256xf32, #tpu.memory_space<vmem>>, vector<8x128xf32>,
    %393 = vector.extract_strided_slice %390 {offsets = [0, 128], sizes = [8, 128], strides = [1, 1]} : vector<8x256xf32> to vector<8x128xf32>
    %c24_150 = arith.constant 24 : index
    %c128_151 = arith.constant 128 : index
    %394 = vector.load %arg17[%c24_150, %c128_151] : memref<64x256xf32, #tpu.memory_space<vmem>>, vector<8x128xf32>
    tpu.vector_store %arg17[%c24_150, %c128_151], %393 {strides = array<i32>} : memref<64x256xf32, #tpu.memory_space<vmem>>, vector<8x128xf32>,
    %c40_152 = arith.constant 40 : index
    %c0_153 = arith.constant 0 : index
    %395 = vector.load %arg15[%c40_152, %c0_153] : memref<64x768xf32, #tpu.memory_space<vmem>>, vector<8x768xf32>
    %396 = arith.truncf %390 : vector<8x256xf32> to vector<8x256xbf16>
    %cst_154 = arith.constant dense<0.000000e+00> : vector<8x768xf32>
    %397 = tpu.matmul %396, %260, %cst_154 {dimension_numbers = #tpu.dot_dimension_numbers<[1], [0], [0], [1], [0, 0, 1, 1], [], []>} : vector<8x256xbf16>, vector<256x768xbf16>, vector<8x768xf32> -> vector<8x768xf32>
    %398 = vector.extract_strided_slice %395 {offsets = [0, 0], sizes = [8, 512], strides = [1, 1]} : vector<8x768xf32> to vector<8x512xf32>
    %399 = vector.extract_strided_slice %397 {offsets = [0, 0], sizes = [8, 512], strides = [1, 1]} : vector<8x768xf32> to vector<8x512xf32>
    %400 = arith.addf %398, %399 : vector<8x512xf32>
    %401 = arith.negf %400 : vector<8x512xf32>
    %402 = math.exp %401 : vector<8x512xf32>
    %cst_155 = arith.constant 1.000000e+00 : f32
    %403 = vector.broadcast %cst_155 : f32 to vector<8x512xf32>
    %404 = arith.addf %403, %402 : vector<8x512xf32>
    %405 = arith.divf %403, %404 : vector<8x512xf32>
    %406 = vector.extract_strided_slice %405 {offsets = [0, 0], sizes = [8, 256], strides = [1, 1]} : vector<8x512xf32> to vector<8x256xf32>
    %407 = vector.extract_strided_slice %405 {offsets = [0, 256], sizes = [8, 256], strides = [1, 1]} : vector<8x512xf32> to vector<8x256xf32>
    %408 = vector.extract_strided_slice %395 {offsets = [0, 512], sizes = [8, 256], strides = [1, 1]} : vector<8x768xf32> to vector<8x256xf32>
    %409 = vector.extract_strided_slice %397 {offsets = [0, 512], sizes = [8, 256], strides = [1, 1]} : vector<8x768xf32> to vector<8x256xf32>
    %410 = arith.addf %409, %263 : vector<8x256xf32>
    %411 = arith.mulf %406, %410 : vector<8x256xf32>
    %412 = arith.addf %408, %411 : vector<8x256xf32>
    %413 = math.tanh %412 : vector<8x256xf32>
    %414 = arith.subf %390, %413 : vector<8x256xf32>
    %415 = arith.mulf %407, %414 : vector<8x256xf32>
    %416 = arith.addf %413, %415 : vector<8x256xf32>
    %417 = vector.extract_strided_slice %416 {offsets = [0, 0], sizes = [8, 128], strides = [1, 1]} : vector<8x256xf32> to vector<8x128xf32>
    %c40_156 = arith.constant 40 : index
    %c0_157 = arith.constant 0 : index
    %418 = vector.load %arg17[%c40_156, %c0_157] : memref<64x256xf32, #tpu.memory_space<vmem>>, vector<8x128xf32>
    tpu.vector_store %arg17[%c40_156, %c0_157], %417 {strides = array<i32>} : memref<64x256xf32, #tpu.memory_space<vmem>>, vector<8x128xf32>,
    %419 = vector.extract_strided_slice %416 {offsets = [0, 128], sizes = [8, 128], strides = [1, 1]} : vector<8x256xf32> to vector<8x128xf32>
    %c16_158 = arith.constant 16 : index
    %c128_159 = arith.constant 128 : index
    %420 = vector.load %arg17[%c16_158, %c128_159] : memref<64x256xf32, #tpu.memory_space<vmem>>, vector<8x128xf32>
    tpu.vector_store %arg17[%c16_158, %c128_159], %419 {strides = array<i32>} : memref<64x256xf32, #tpu.memory_space<vmem>>, vector<8x128xf32>,
    %c48_160 = arith.constant 48 : index
    %c0_161 = arith.constant 0 : index
    %421 = vector.load %arg15[%c48_160, %c0_161] : memref<64x768xf32, #tpu.memory_space<vmem>>, vector<8x768xf32>
    %422 = arith.truncf %416 : vector<8x256xf32> to vector<8x256xbf16>
    %cst_162 = arith.constant dense<0.000000e+00> : vector<8x768xf32>
    %423 = tpu.matmul %422, %260, %cst_162 {dimension_numbers = #tpu.dot_dimension_numbers<[1], [0], [0], [1], [0, 0, 1, 1], [], []>} : vector<8x256xbf16>, vector<256x768xbf16>, vector<8x768xf32> -> vector<8x768xf32>
    %424 = vector.extract_strided_slice %421 {offsets = [0, 0], sizes = [8, 512], strides = [1, 1]} : vector<8x768xf32> to vector<8x512xf32>
    %425 = vector.extract_strided_slice %423 {offsets = [0, 0], sizes = [8, 512], strides = [1, 1]} : vector<8x768xf32> to vector<8x512xf32>
    %426 = arith.addf %424, %425 : vector<8x512xf32>
    %427 = arith.negf %426 : vector<8x512xf32>
    %428 = math.exp %427 : vector<8x512xf32>
    %cst_163 = arith.constant 1.000000e+00 : f32
    %429 = vector.broadcast %cst_163 : f32 to vector<8x512xf32>
    %430 = arith.addf %429, %428 : vector<8x512xf32>
    %431 = arith.divf %429, %430 : vector<8x512xf32>
    %432 = vector.extract_strided_slice %431 {offsets = [0, 0], sizes = [8, 256], strides = [1, 1]} : vector<8x512xf32> to vector<8x256xf32>
    %433 = vector.extract_strided_slice %431 {offsets = [0, 256], sizes = [8, 256], strides = [1, 1]} : vector<8x512xf32> to vector<8x256xf32>
    %434 = vector.extract_strided_slice %421 {offsets = [0, 512], sizes = [8, 256], strides = [1, 1]} : vector<8x768xf32> to vector<8x256xf32>
    %435 = vector.extract_strided_slice %423 {offsets = [0, 512], sizes = [8, 256], strides = [1, 1]} : vector<8x768xf32> to vector<8x256xf32>
    %436 = arith.addf %435, %263 : vector<8x256xf32>
    %437 = arith.mulf %432, %436 : vector<8x256xf32>
    %438 = arith.addf %434, %437 : vector<8x256xf32>
    %439 = math.tanh %438 : vector<8x256xf32>
    %440 = arith.subf %416, %439 : vector<8x256xf32>
    %441 = arith.mulf %433, %440 : vector<8x256xf32>
    %442 = arith.addf %439, %441 : vector<8x256xf32>
    %443 = vector.extract_strided_slice %442 {offsets = [0, 0], sizes = [8, 128], strides = [1, 1]} : vector<8x256xf32> to vector<8x128xf32>
    %c48_164 = arith.constant 48 : index
    %c0_165 = arith.constant 0 : index
    %444 = vector.load %arg17[%c48_164, %c0_165] : memref<64x256xf32, #tpu.memory_space<vmem>>, vector<8x128xf32>
    tpu.vector_store %arg17[%c48_164, %c0_165], %443 {strides = array<i32>} : memref<64x256xf32, #tpu.memory_space<vmem>>, vector<8x128xf32>,
    %445 = vector.extract_strided_slice %442 {offsets = [0, 128], sizes = [8, 128], strides = [1, 1]} : vector<8x256xf32> to vector<8x128xf32>
    %c8_166 = arith.constant 8 : index
    %c128_167 = arith.constant 128 : index
    %446 = vector.load %arg17[%c8_166, %c128_167] : memref<64x256xf32, #tpu.memory_space<vmem>>, vector<8x128xf32>
    tpu.vector_store %arg17[%c8_166, %c128_167], %445 {strides = array<i32>} : memref<64x256xf32, #tpu.memory_space<vmem>>, vector<8x128xf32>,
    %c56_168 = arith.constant 56 : index
    %c0_169 = arith.constant 0 : index
    %447 = vector.load %arg15[%c56_168, %c0_169] : memref<64x768xf32, #tpu.memory_space<vmem>>, vector<8x768xf32>
    %448 = arith.truncf %442 : vector<8x256xf32> to vector<8x256xbf16>
    %cst_170 = arith.constant dense<0.000000e+00> : vector<8x768xf32>
    %449 = tpu.matmul %448, %260, %cst_170 {dimension_numbers = #tpu.dot_dimension_numbers<[1], [0], [0], [1], [0, 0, 1, 1], [], []>} : vector<8x256xbf16>, vector<256x768xbf16>, vector<8x768xf32> -> vector<8x768xf32>
    %450 = vector.extract_strided_slice %447 {offsets = [0, 0], sizes = [8, 512], strides = [1, 1]} : vector<8x768xf32> to vector<8x512xf32>
    %451 = vector.extract_strided_slice %449 {offsets = [0, 0], sizes = [8, 512], strides = [1, 1]} : vector<8x768xf32> to vector<8x512xf32>
    %452 = arith.addf %450, %451 : vector<8x512xf32>
    %453 = arith.negf %452 : vector<8x512xf32>
    %454 = math.exp %453 : vector<8x512xf32>
    %cst_171 = arith.constant 1.000000e+00 : f32
    %455 = vector.broadcast %cst_171 : f32 to vector<8x512xf32>
    %456 = arith.addf %455, %454 : vector<8x512xf32>
    %457 = arith.divf %455, %456 : vector<8x512xf32>
    %458 = vector.extract_strided_slice %457 {offsets = [0, 0], sizes = [8, 256], strides = [1, 1]} : vector<8x512xf32> to vector<8x256xf32>
    %459 = vector.extract_strided_slice %457 {offsets = [0, 256], sizes = [8, 256], strides = [1, 1]} : vector<8x512xf32> to vector<8x256xf32>
    %460 = vector.extract_strided_slice %447 {offsets = [0, 512], sizes = [8, 256], strides = [1, 1]} : vector<8x768xf32> to vector<8x256xf32>
    %461 = vector.extract_strided_slice %449 {offsets = [0, 512], sizes = [8, 256], strides = [1, 1]} : vector<8x768xf32> to vector<8x256xf32>
    %462 = arith.addf %461, %263 : vector<8x256xf32>
    %463 = arith.mulf %458, %462 : vector<8x256xf32>
    %464 = arith.addf %460, %463 : vector<8x256xf32>
    %465 = math.tanh %464 : vector<8x256xf32>
    %466 = arith.subf %442, %465 : vector<8x256xf32>
    %467 = arith.mulf %459, %466 : vector<8x256xf32>
    %468 = arith.addf %465, %467 : vector<8x256xf32>
    %469 = vector.extract_strided_slice %468 {offsets = [0, 0], sizes = [8, 128], strides = [1, 1]} : vector<8x256xf32> to vector<8x128xf32>
    %c56_172 = arith.constant 56 : index
    %c0_173 = arith.constant 0 : index
    %470 = vector.load %arg17[%c56_172, %c0_173] : memref<64x256xf32, #tpu.memory_space<vmem>>, vector<8x128xf32>
    tpu.vector_store %arg17[%c56_172, %c0_173], %469 {strides = array<i32>} : memref<64x256xf32, #tpu.memory_space<vmem>>, vector<8x128xf32>,
    %471 = vector.extract_strided_slice %468 {offsets = [0, 128], sizes = [8, 128], strides = [1, 1]} : vector<8x256xf32> to vector<8x128xf32>
    %c0_174 = arith.constant 0 : index
    %c128_175 = arith.constant 128 : index
    %472 = vector.load %arg17[%c0_174, %c128_175] : memref<64x256xf32, #tpu.memory_space<vmem>>, vector<8x128xf32>
    tpu.vector_store %arg17[%c0_174, %c128_175], %471 {strides = array<i32>} : memref<64x256xf32, #tpu.memory_space<vmem>>, vector<8x128xf32>,
    %c0_176 = arith.constant 0 : index
    %c0_177 = arith.constant 0 : index
    %473 = vector.load %arg9[%c0_176, %c0_177] : memref<512x128xbf16, #tpu.memory_space<vmem>>, vector<512x128xbf16>
    %474 = tpu.concatenate %243, %468 in 1 : vector<8x256xf32>, vector<8x256xf32> -> vector<8x512xf32>
    %475 = arith.truncf %474 : vector<8x512xf32> to vector<8x512xbf16>
    %cst_178 = arith.constant dense<0.000000e+00> : vector<8x128xf32>
    %476 = tpu.matmul %475, %473, %cst_178 {dimension_numbers = #tpu.dot_dimension_numbers<[1], [0], [0], [1], [0, 0, 1, 1], [], []>} : vector<8x512xbf16>, vector<512x128xbf16>, vector<8x128xf32> -> vector<8x128xf32>
    %c0_179 = arith.constant 0 : index
    %c0_180 = arith.constant 0 : index
    %477 = vector.load %arg10[%c0_179, %c0_180] : memref<1x128xf32, #tpu.memory_space<vmem>>, vector<1x128xf32>
    %478 = vector.broadcast %477 : vector<1x128xf32> to vector<8x128xf32>
    %479 = arith.addf %476, %478 : vector<8x128xf32>
    %c0_181 = arith.constant 0 : index
    %c0_182 = arith.constant 0 : index
    %480 = vector.load %arg14[%c0_181, %c0_182] : memref<8x128xf32, #tpu.memory_space<vmem>>, vector<8x128xf32>
    tpu.vector_store %arg14[%c0_181, %c0_182], %479 {strides = array<i32>} : memref<8x128xf32, #tpu.memory_space<vmem>>, vector<8x128xf32>,
    %c0_183 = arith.constant 0 : index
    %c0_184 = arith.constant 0 : index
    %481 = vector.load %arg11[%c0_183, %c0_184] : memref<256x128xbf16, #tpu.memory_space<vmem>>, vector<256x128xbf16>
    %c0_185 = arith.constant 0 : index
    %c0_186 = arith.constant 0 : index
    %482 = vector.load %arg17[%c0_185, %c0_186] : memref<64x256xf32, #tpu.memory_space<vmem>>, vector<64x256xf32>
    %483 = arith.truncf %482 : vector<64x256xf32> to vector<64x256xbf16>
    %cst_187 = arith.constant dense<0.000000e+00> : vector<64x128xf32>
    %484 = tpu.matmul %483, %481, %cst_187 {dimension_numbers = #tpu.dot_dimension_numbers<[1], [0], [0], [1], [0, 0, 1, 1], [], []>} : vector<64x256xbf16>, vector<256x128xbf16>, vector<64x128xf32> -> vector<64x128xf32>
    %c0_188 = arith.constant 0 : index
    %c0_189 = arith.constant 0 : index
    %485 = vector.load %arg12[%c0_188, %c0_189] : memref<1x128xf32, #tpu.memory_space<vmem>>, vector<1x128xf32>
    %486 = vector.broadcast %485 : vector<1x128xf32> to vector<64x128xf32>
    %487 = arith.addf %484, %486 : vector<64x128xf32>
    %c0_190 = arith.constant 0 : index
    %c0_191 = arith.constant 0 : index
    %488 = vector.load %arg13[%c0_190, %c0_191] : memref<64x128xf32, #tpu.memory_space<vmem>>, vector<64x128xf32>
    tpu.vector_store %arg13[%c0_190, %c0_191], %487 {strides = array<i32>} : memref<64x128xf32, #tpu.memory_space<vmem>>, vector<64x128xf32>,
    return
  }
}

</mosaic_0001>

<bundles_post_ra>
// kernel: encoder_forward.1
= control target key start
LH: loop header
LB: loop body
LE: loop exit
PB: predicated region body
PF: predicated region fallthrough
CT: control target
= control target key end

     0   :  { %20 = vsyncpa [#allocation6], 0  ;;  %s12916_s0 = inlined_call_operand.vmem [shape: f32[64,12], index: 0, kind: input, shape index: {}]   ;;  %s12917_s1 = inlined_call_operand.vmem [shape: f32[12,768], index: 1, kind: input, shape index: {}]   ;;  %s12918_s2 = inlined_call_operand.hbm [shape: f32[1,768], index: 2, kind: input, shape index: {}]   ;;  %s12919_s3 = inlined_call_operand.hbm [shape: bf16[256,768], index: 3, kind: input, shape index: {}]   ;;  %s12920_s4 = inlined_call_operand.hbm [shape: f32[1,256], index: 4, kind: input, shape index: {}]   ;;  %s12921_s5 = inlined_call_operand.hbm [shape: bf16[512,768], index: 5, kind: input, shape index: {}]   ;;  %s12922_s6 = inlined_call_operand.hbm [shape: f32[1,768], index: 6, kind: input, shape index: {}]   ;;  %s12923_s7 = inlined_call_operand.hbm [shape: bf16[256,768], index: 7, kind: input, shape index: {}]   ;;  %s12924_s8 = inlined_call_operand.hbm [shape: f32[1,256], index: 8, kind: input, shape index: {}]   ;;  %s12925_s9 = inlined_call_operand.hbm [shape: bf16[512,128], index: 9, kind: input, shape index: {}]   ;;  %s12926_s10 = inlined_call_operand.vmem [shape: f32[1,128], index: 10, kind: input, shape index: {}]   ;;  %s12927_s11 = inlined_call_operand.vmem [shape: bf16[256,128], index: 11, kind: input, shape index: {}]   ;;  %s12928_s12 = inlined_call_operand.hbm [shape: f32[1,128], index: 12, kind: input, shape index: {}]   ;;  %s12929_s13 = inlined_call_operand.vmem [shape: f32[64,128], index: 13, kind: output, shape index: {0}]   ;;  %s12930_s14 = inlined_call_operand.vmem [shape: f32[8,128], index: 14, kind: output, shape index: {1}]  }
   0x1   :  { %21 = vsyncpa [#allocation8], 0 }
   0x2   :  { %22 = vsyncpa [#allocation11], 0 }
   0x3   :  { %23 = vsyncpa [#allocation14], 0 }
   0x4   :  { %24 = vsyncpa [#allocation17], 0  ;;  %s9219_s29 = smov [#allocation7]   ;;  %s9011_s17 = scalar_lea.hbm %s12919_s3, 12288 }
   0x5   :  { %s44_s30 = sshll.u32 %s9219_s29, 4  ;;  %p9012_p0 = scmp.ne.s32.totalorder %s12919_s3, %s9011_s17  ;;  %s45_s30 = int_to_ptr.vmem [resolvable:$true] %s44_s30 }
   0x6   :  { %p9015_p1 = scmp.lt.u32.totalorder %s9011_s17, %s12919_s3 }
   0x8   :  { %p9017_p2 = pnand %p9015_p1, %p9012_p0 }
   0xa   :  { %9020 = shalt.err (!%p9017_p2)
}
   0xb   :  { %s9021_s22 = scalar_lea.vmem %s45_s30, 12288  ;;  %p9026_p4 = scmp.lt.s32.totalorder %s45_s30, %s45_s30 }
   0xc   :  { %p9022_p3 = scmp.ne.s32.totalorder %s45_s30, %s9021_s22  ;;  %p9027_p5 = scmp.lt.s32.totalorder %s9021_s22, %s9021_s22 }
   0xe   :  { %p9028_p6 = por %p9027_p5, %p9026_p4 }
  0x10   :  { %p9029_p7 = pnand %p9028_p6, %p9022_p3 }
  0x12   :  { %9032 = shalt.err (!%p9029_p7)
}
  0x13   :  { %s9220_s23 = smov 384   ;;  %s9221_s24 = smov 24  }
  0x14   :  { %50 = dma.hbm_to_vmem [thread:$0]  %s12919_s3, 12288, %s45_s30, [#allocation8], %s9220_s23, %s9220_s23, %s9221_s24  }
  0x15   :  { %s9222_s27 = smov [#allocation10]   ;;  %s9223_s29 = smov [#allocation13]  }
  0x16   :  { %s66_s28 = sshll.u32 %s9222_s27, 4  ;;  %s88_s15 = sshll.u32 %s9223_s29, 4  ;;  %s67_s28 = int_to_ptr.vmem [resolvable:$true] %s66_s28  ;;  %s89_s15 = int_to_ptr.vmem [resolvable:$true] %s88_s15 }
  0x17   :  { %s9033_s18 = scalar_lea.hbm %s12921_s5, 24576 }
  0x18   :  { %p9034_p8 = scmp.ne.s32.totalorder %s12921_s5, %s9033_s18  ;;  %p9037_p9 = scmp.lt.u32.totalorder %s9033_s18, %s12921_s5 }
  0x1a   :  { %p9039_p10 = pnand %p9037_p9, %p9034_p8 }
  0x1c   :  { %9042 = shalt.err (!%p9039_p10)
}
  0x1d   :  { %s9043_s3 = scalar_lea.vmem %s67_s28, 24576  ;;  %p9048_p12 = scmp.lt.s32.totalorder %s67_s28, %s67_s28 }
  0x1e   :  { %p9044_p11 = scmp.ne.s32.totalorder %s67_s28, %s9043_s3  ;;  %p9049_p13 = scmp.lt.s32.totalorder %s9043_s3, %s9043_s3 }
  0x20   :  { %p9050_p0 = por %p9049_p13, %p9048_p12 }
  0x22   :  { %p9051_p1 = pnand %p9050_p0, %p9044_p11 }
  0x24   :  { %9054 = shalt.err (!%p9051_p1)
}
  0x25   :  { %72 = dma.hbm_to_vmem [thread:$0]  %s12921_s5, 24576, %s67_s28, [#allocation11], %s9220_s23, %s9220_s23, %s9221_s24  }
  0x26   :  { %s9055_s29 = scalar_lea.hbm %s12923_s7, 12288 }
  0x27   :  { %p9056_p2 = scmp.ne.s32.totalorder %s12923_s7, %s9055_s29  ;;  %p9059_p3 = scmp.lt.u32.totalorder %s9055_s29, %s12923_s7 }
  0x29   :  { %p9061_p4 = pnand %p9059_p3, %p9056_p2 }
  0x2b   :  { %9064 = shalt.err (!%p9061_p4)
}
  0x2c   :  { %s9065_s20 = scalar_lea.vmem %s89_s15, 12288  ;;  %p9070_p6 = scmp.lt.s32.totalorder %s89_s15, %s89_s15 }
  0x2d   :  { %p9066_p5 = scmp.ne.s32.totalorder %s89_s15, %s9065_s20  ;;  %p9071_p7 = scmp.lt.s32.totalorder %s9065_s20, %s9065_s20 }
  0x2f   :  { %p9072_p8 = por %p9071_p7, %p9070_p6 }
  0x31   :  { %p9073_p9 = pnand %p9072_p8, %p9066_p5 }
  0x33   :  { %9076 = shalt.err (!%p9073_p9)
}
  0x34   :  { %94 = dma.hbm_to_vmem [thread:$0]  %s12923_s7, 12288, %s89_s15, [#allocation14], %s9220_s23, %s9220_s23, %s9221_s24  }
  0x35   :  { %s9224_s21 = smov [#allocation16]   ;;  %s9077_s25 = scalar_lea.hbm %s12925_s9, 4096 }
  0x36   :  { %s110_s22 = sshll.u32 %s9224_s21, 4  ;;  %p9078_p10 = scmp.ne.s32.totalorder %s12925_s9, %s9077_s25  ;;  %s111_s22 = int_to_ptr.vmem [resolvable:$true] %s110_s22 }
  0x37   :  { %p9081_p11 = scmp.lt.u32.totalorder %s9077_s25, %s12925_s9 }
  0x39   :  { %p9083_p12 = pnand %p9081_p11, %p9078_p10 }
  0x3b   :  { %9086 = shalt.err (!%p9083_p12)
}
  0x3c   :  { %s9087_s17 = scalar_lea.vmem %s111_s22, 4096  ;;  %p9092_p0 = scmp.lt.s32.totalorder %s111_s22, %s111_s22 }
  0x3d   :  { %p9088_p13 = scmp.ne.s32.totalorder %s111_s22, %s9087_s17  ;;  %p9093_p1 = scmp.lt.s32.totalorder %s9087_s17, %s9087_s17 }
  0x3f   :  { %p9094_p2 = por %p9093_p1, %p9092_p0 }
  0x41   :  { %p9095_p3 = pnand %p9094_p2, %p9088_p13 }
  0x43   :  { %9098 = shalt.err (!%p9095_p3)
}
  0x44   :  { %s9225_s7 = smov 64   ;;  %s9226_s23 = smov 4  }
  0x45   :  { %116 = dma.hbm_to_vmem [thread:$0]  %s12925_s9, 4096, %s111_s22, [#allocation17], %s9225_s7, %s9225_s7, %s9226_s23  }
  0x46   :  { %s9227_s18 = smov [#allocation5]   ;;  %s9228_s20 = smov [#allocation9]  }
  0x47   :  { %s35_s19 = sshll.u32 %s9227_s18, 4  ;;  %s57_s5 = sshll.u32 %s9228_s20, 4  ;;  %s36_s19 = int_to_ptr.vmem [resolvable:$true] %s35_s19  ;;  %s58_s5 = int_to_ptr.vmem [resolvable:$true] %s57_s5 }
  0x48   :  { %s9099_s3 = scalar_lea.hbm %s12918_s2, 96 }
  0x49   :  { %p9100_p4 = scmp.ne.s32.totalorder %s12918_s2, %s9099_s3  ;;  %p9103_p5 = scmp.lt.u32.totalorder %s9099_s3, %s12918_s2 }
  0x4b   :  { %p9105_p6 = pnand %p9103_p5, %p9100_p4 }
  0x4d   :  { %9108 = shalt.err (!%p9105_p6)
}
  0x4e   :  { %s9109_s9 = scalar_lea.vmem %s36_s19, 96  ;;  %p9114_p8 = scmp.lt.s32.totalorder %s36_s19, %s36_s19 }
  0x4f   :  { %p9110_p7 = scmp.ne.s32.totalorder %s36_s19, %s9109_s9  ;;  %p9115_p9 = scmp.lt.s32.totalorder %s9109_s9, %s9109_s9 }
  0x51   :  { %p9116_p10 = por %p9115_p9, %p9114_p8 }
  0x53   :  { %p9117_p11 = pnand %p9116_p10, %p9110_p7 }
  0x55   :  { %9120 = shalt.err (!%p9117_p11)
}
  0x56   :  { %38 = dma.hbm_to_vmem [thread:$0]  %s12918_s2, 96, %s36_s19, [#allocation6]  }
  0x57   :  { %s9121_s7 = scalar_lea.hbm %s12920_s4, 32 }
  0x58   :  { %p9122_p12 = scmp.ne.s32.totalorder %s12920_s4, %s9121_s7  ;;  %p9125_p13 = scmp.lt.u32.totalorder %s9121_s7, %s12920_s4 }
  0x5a   :  { %p9127_p0 = pnand %p9125_p13, %p9122_p12 }
  0x5c   :  { %9130 = shalt.err (!%p9127_p0)
}
  0x5d   :  { %s9131_s20 = scalar_lea.vmem %s58_s5, 32  ;;  %p9136_p2 = scmp.lt.s32.totalorder %s58_s5, %s58_s5 }
  0x5e   :  { %p9132_p1 = scmp.ne.s32.totalorder %s58_s5, %s9131_s20  ;;  %p9137_p3 = scmp.lt.s32.totalorder %s9131_s20, %s9131_s20 }
  0x60   :  { %p9138_p4 = por %p9137_p3, %p9136_p2 }
  0x62   :  { %p9139_p5 = pnand %p9138_p4, %p9132_p1 }
  0x64   :  { %9142 = shalt.err (!%p9139_p5)
}
  0x65   :  { %60 = dma.hbm_to_vmem [thread:$0]  %s12920_s4, 32, %s58_s5, [#allocation8]  }
  0x66   :  { %s9229_s28 = smov [#allocation12]   ;;  %s9230_s3 = smov [#allocation15]  }
  0x67   :  { %s79_s21 = sshll.u32 %s9229_s28, 4  ;;  %s101_s30 = sshll.u32 %s9230_s3, 4  ;;  %s80_s21 = int_to_ptr.vmem [resolvable:$true] %s79_s21  ;;  %s102_s30 = int_to_ptr.vmem [resolvable:$true] %s101_s30 }
  0x68   :  { %s9143_s27 = scalar_lea.hbm %s12922_s6, 96 }
  0x69   :  { %p9144_p6 = scmp.ne.s32.totalorder %s12922_s6, %s9143_s27  ;;  %p9147_p7 = scmp.lt.u32.totalorder %s9143_s27, %s12922_s6 }
  0x6b   :  { %p9149_p8 = pnand %p9147_p7, %p9144_p6 }
  0x6d   :  { %9152 = shalt.err (!%p9149_p8)
}
  0x6e   :  { %s9153_s4 = scalar_lea.vmem %s80_s21, 96  ;;  %p9158_p10 = scmp.lt.s32.totalorder %s80_s21, %s80_s21 }
  0x6f   :  { %p9154_p9 = scmp.ne.s32.totalorder %s80_s21, %s9153_s4  ;;  %p9159_p11 = scmp.lt.s32.totalorder %s9153_s4, %s9153_s4 }
  0x71   :  { %p9160_p12 = por %p9159_p11, %p9158_p10 }
  0x73   :  { %p9161_p13 = pnand %p9160_p12, %p9154_p9 }
  0x75   :  { %9164 = shalt.err (!%p9161_p13)
}
  0x76   :  { %82 = dma.hbm_to_vmem [thread:$0]  %s12922_s6, 96, %s80_s21, [#allocation11]  }
  0x77   :  { %s9165_s24 = scalar_lea.hbm %s12924_s8, 32 }
  0x78   :  { %p9166_p0 = scmp.ne.s32.totalorder %s12924_s8, %s9165_s24  ;;  %p9169_p1 = scmp.lt.u32.totalorder %s9165_s24, %s12924_s8 }
  0x7a   :  { %p9171_p2 = pnand %p9169_p1, %p9166_p0 }
  0x7c   :  { %9174 = shalt.err (!%p9171_p2)
}
  0x7d   :  { %s9175_s19 = scalar_lea.vmem %s102_s30, 32  ;;  %p9180_p4 = scmp.lt.s32.totalorder %s102_s30, %s102_s30 }
  0x7e   :  { %p9176_p3 = scmp.ne.s32.totalorder %s102_s30, %s9175_s19  ;;  %p9181_p5 = scmp.lt.s32.totalorder %s9175_s19, %s9175_s19 }
  0x80   :  { %p9182_p6 = por %p9181_p5, %p9180_p4 }
  0x82   :  { %p9183_p7 = pnand %p9182_p6, %p9176_p3 }
  0x84   :  { %9186 = shalt.err (!%p9183_p7)
}
  0x85   :  { %104 = dma.hbm_to_vmem [thread:$0]  %s12924_s8, 32, %s102_s30, [#allocation14]  }
  0x86   :  { %s9231_s21 = smov [#allocation18]   ;;  %s9187_s27 = scalar_lea.hbm %s12928_s12, 16 }
  0x87   :  { %s127_s3 = sshll.u32 %s9231_s21, 4  ;;  %p9188_p8 = scmp.ne.s32.totalorder %s12928_s12, %s9187_s27  ;;  %s128_s3 = int_to_ptr.vmem [resolvable:$true] %s127_s3 }
  0x88   :  { %p9191_p9 = scmp.lt.u32.totalorder %s9187_s27, %s12928_s12 }
  0x8a   :  { %p9193_p10 = pnand %p9191_p9, %p9188_p8 }
  0x8c   :  { %9196 = shalt.err (!%p9193_p10)
}
  0x8d   :  { %s9197_s4 = scalar_lea.vmem %s128_s3, 16  ;;  %s9201_s8 = scalar_lea.vmem %s128_s3, 32 }
  0x8e   :  { %p9198_p11 = scmp.ne.s32.totalorder %s128_s3, %s9197_s4  ;;  %p9202_p12 = scmp.lt.s32.totalorder %s128_s3, %s128_s3 }
  0x8f   :  { %p9203_p13 = scmp.lt.s32.totalorder %s9201_s8, %s9197_s4 }
  0x91   :  { %p9204_p0 = por %p9203_p13, %p9202_p12 }
  0x93   :  { %p9205_p1 = pnand %p9204_p0, %p9198_p11 }
  0x95   :  { %9208 = shalt.err (!%p9205_p1)
}
  0x96   :  { %130 = dma.hbm_to_vmem [thread:$0]  %s12928_s12, 16, %s128_s3, [#allocation17]  }
  0x97   :  { %9209 = dma.done.wait [#allocation6], 96  }
  0x98   :  { %9210 = vsyncadd [#allocation6], 4294967200 }
  0x99   :  { %9211 = dma.done.wait [#allocation8], 12320  }
  0x9a   :  { %9212 = vsyncadd [#allocation8], 4294954976 }
  0x9b   :  { %9213 = dma.done.wait [#allocation11], 24672  }
  0x9c   :  { %9214 = vsyncadd [#allocation11], 4294942624 }
  0x9d   :  { %9215 = dma.done.wait [#allocation14], 12320  }
  0x9e   :  { %9216 = vsyncadd [#allocation14], 4294954976 }
  0x9f   :  { %9217 = dma.done.wait [#allocation17], 4112  }
  0xa0   :  { %9218 = vsyncadd [#allocation17], 4294963184  ;;  %v9232_v0 = vmov 0.0   ;;  %vm236_vm0 = vcmask 1043456   ;;  %vm9233_vm1 = vmmov 1   ;;  %v168_v2 = vld [vmem:[%s12917_s1 + $0x8] sm:$0xff] }
  0xa1   :  { %319 = vmatprep.mubr.f32.mxu0 %v9232_v0  ;;  %432 = vmatprep.mubr.f32.mxu1 %v9232_v0  ;;  %vm9429_vm2 = vmpackc.low %vm236_vm0, %vm9233_vm1  ;;  %v174_v3 = vld [vmem:[%s12917_s1 + $0x38] sm:$0xf]  ;;  %v176_v6 = vld [vmem:[%s12917_s1 + $0x48] sm:$0xf]  ;;  %vm211_vm3 = vcmask 97280   ;;  %v12932_v51 = vmov 0  }
  0xa2   :  { %v170_v4 = vld [vmem:[%s12917_s1 + $0x18] sm:$0xff]  ;;  %v7553_v5 = vpack.c.bf16 %v174_v3, %v168_v2  ;;  %v167_v7 = vld [vmem:[%s12917_s1] sm:$0xff]  ;;  %v173_v8 = vld [vmem:[%s12917_s1 + $0x30] sm:$0xf] }
  0xa3   :  { %v7559_v9 = vpack.c.bf16 %v176_v6, %v170_v4  ;;  %v7556_v10 = vpack.c.bf16 %v173_v8, %v167_v7  ;;  %v169_v11 = vld [vmem:[%s12917_s1 + $0x10] sm:$0xff]  ;;  %v175_v12 = vld [vmem:[%s12917_s1 + $0x40] sm:$0xf]  ;;  %v9485_v18 = vld [vmem:[%s12916_s0 + $0x8] sm:$0xff] }
  0xa4   :  { %7555 = vmatprep.subr.msk.bf16.mxu0 %vm9429_vm2, %v7553_v5  ;;  %v7562_v13 = vpack.c.bf16 %v175_v12, %v169_v11  ;;  %v9459_v14 = vld [vmem:[#allocation7 + $0x4] ss:$24 sps:$4 sm:$0xff]   ;;  %v9472_v16 = vld [vmem:[#allocation7] ss:$24 sps:$4 sm:$0xff]   ;;  %v9475_v17 = vld [vmem:[#allocation7 + $0x34] ss:$24 sps:$4 sm:$0xff]  }
  0xa5   :  { %7561 = vmatprep.subr.msk.bf16.mxu1 %vm9429_vm2, %v7559_v9  ;;  %7558 = vmatpush1.bf16.msk.msra.mxu0 %vm9429_vm2, %v7556_v10  ;;  %v9468_v15 = vld [vmem:[%s12916_s0] sm:$0xff]  ;;  %v9488_v19 = vld [vmem:[#allocation7 + $0x30] ss:$24 sps:$4 sm:$0xff]   ;;  %v9510_v24 = vld [vmem:[#allocation7 + $0x94] ss:$24 sps:$4 sm:$0xff]  }
  0xa6   :  { %7564 = vmatpush1.bf16.msk.msra.mxu1 %vm9429_vm2, %v7562_v13  ;;  %v9492_v20 = vld [vmem:[#allocation7 + $0x64] ss:$24 sps:$4 sm:$0xff]   ;;  %v9500_v21 = vld [vmem:[%s12916_s0 + $0x10] sm:$0xff]  ;;  %v9502_v22 = vld [vmem:[#allocation7 + $0x60] ss:$24 sps:$4 sm:$0xff]  }
  0xa7   :  { %1236 = vmatprep.subr.bf16.mxu1 %v9459_v14  ;;  %v172_v23 = vld [vmem:[%s12917_s1 + $0x28] sm:$0xff]  ;;  %v178_v25 = vld [vmem:[%s12917_s1 + $0x58] sm:$0xf]  ;;  %v171_v26 = vld [vmem:[%s12917_s1 + $0x20] sm:$0xff] }
  0xa8   :  { %6943 = vmatmul.mubr.msk.f32.vlgmr.msra.gmra.mrb[0].mxu0 %vm211_vm3, %v9468_v15  ;;  %v7565_v27 = vpack.c.bf16 %v178_v25, %v172_v23  ;;  %v177_v28 = vld [vmem:[%s12917_s1 + $0x50] sm:$0xf]  ;;  %v9528_v29 = vld [vmem:[%s12916_s0 + $0x18] sm:$0xff]  ;;  %v9536_v32 = vld [vmem:[#allocation7 + $0xc4] ss:$24 sps:$4 sm:$0xff]  }
  0xa9   :  { %6953 = vmatmul.mubr.msk.f32.vlgmr.msra.gmra.mrb[0].mxu1 %vm211_vm3, %v9468_v15  ;;  %325 = vmatprep.mubr.f32.mxu0 %v9232_v0  ;;  %v7568_v30 = vpack.c.bf16 %v177_v28, %v171_v26  ;;  %v9531_v31 = vld [vmem:[#allocation7 + $0x90] ss:$24 sps:$4 sm:$0xff]   ;;  %v9541_v33 = vld [vmem:[#allocation7 + $0xc] ss:$24 sps:$4 sm:$0xff]   ;;  %v9552_v34 = vld [vmem:[%s12916_s0 + $0x20] sm:$0xff] }
  0xaa   :  { %1237 = vmatpush1.bf16.msra.mxu1 %v9472_v16  ;;  %438 = vmatprep.mubr.f32.mxu1 %v9232_v0  ;;  %v9556_v35 = vld [vmem:[#allocation7 + $0xc0] ss:$24 sps:$4 sm:$0xff]   ;;  %v9559_v36 = vld [vmem:[#allocation7 + $0xf4] ss:$24 sps:$4 sm:$0xff]   ;;  %v9573_v38 = vld [vmem:[#allocation7 + $0xf0] ss:$24 sps:$4 sm:$0xff]  }
  0xab   :  { %1238 = vmatprep.subr.bf16.mxu1 %v9475_v17  ;;  %7567 = vmatprep.subr.msk.bf16.mxu0 %vm9429_vm2, %v7565_v27  ;;  %v9570_v37 = vld [vmem:[%s12916_s0 + $0x28] sm:$0xff]  ;;  %v9587_v40 = vld [vmem:[%s12916_s0 + $0x30] sm:$0xff]  ;;  %v9604_v43 = vld [vmem:[%s12916_s0 + $0x38] sm:$0xff] }
  0xac   :  { %6944 = vmatmul.mubr.msk.f32.gmra.mrb[2].mxu0 %vm211_vm3, %v9485_v18  ;;  %v9576_v39 = vld [vmem:[#allocation7 + $0x124] ss:$24 sps:$4 sm:$0xff]   ;;  %v9590_v41 = vld [vmem:[#allocation7 + $0x120] ss:$24 sps:$4 sm:$0xff]   ;;  %v9593_v42 = vld [vmem:[#allocation7 + $0x154] ss:$24 sps:$4 sm:$0xff]  }
  0xad   :  { %331 = vmatprep.mubr.f32.mxu0 %v9232_v0  ;;  %6954 = vmatmul.mubr.msk.f32.gmra.mrb[2].mxu1 %vm211_vm3, %v9485_v18  ;;  %v9607_v44 = vld [vmem:[#allocation7 + $0x150] ss:$24 sps:$4 sm:$0xff]   ;;  %v9610_v45 = vld [vmem:[#allocation7 + $0x184] ss:$24 sps:$4 sm:$0xff]   ;;  %v9620_v47 = vld [vmem:[#allocation7 + $0x180] ss:$24 sps:$4 sm:$0xff]  }
  0xae   :  { %1239 = vmatpush1.bf16.msra.mxu1 %v9488_v19  ;;  %444 = vmatprep.mubr.f32.mxu1 %v9232_v0  ;;  %v9616_v46 = vld [vmem:[#allocation7 + $0x8] ss:$24 sps:$4 sm:$0xff]   ;;  %v9623_v48 = vld [vmem:[#allocation7 + $0x3c] ss:$24 sps:$4 sm:$0xff]   ;;  %v9632_v50 = vld [vmem:[#allocation7 + $0x38] ss:$24 sps:$4 sm:$0xff]  }
  0xaf   :  { %1240 = vmatprep.subr.bf16.mxu1 %v9492_v20  ;;  %7570 = vmatpush1.bf16.msk.msra.mxu0 %vm9429_vm2, %v7568_v30  ;;  %v9626_v49 = vld [vmem:[#allocation7 + $0x1b4] ss:$24 sps:$4 sm:$0xff]   ;;  %v9636_v52 = vld [vmem:[#allocation7 + $0x1b0] ss:$24 sps:$4 sm:$0xff]   ;;  %v9644_v54 = vld [vmem:[#allocation7 + $0x1e4] ss:$24 sps:$4 sm:$0xff]  }
  0xb0   :  { %6945 = vmatmul.mubr.msk.f32.gmra.mrb[4].mxu0 %vm211_vm3, %v9500_v21  ;;  %1277 = vmatprep.subr.bf16.mxu0 %v9541_v33  ;;  %v9641_v53 = vld [vmem:[#allocation7 + $0x6c] ss:$24 sps:$4 sm:$0xff]   ;;  %v9646_v55 = vld [vmem:[#allocation7 + $0x68] ss:$24 sps:$4 sm:$0xff]   ;;  %v9656_v57 = vld [vmem:[#allocation7 + $0x9c] ss:$24 sps:$4 sm:$0xff]  }
  0xb1   :  { %337 = vmatprep.mubr.f32.mxu0 %v9232_v0  ;;  %6955 = vmatmul.mubr.msk.f32.gmra.mrb[4].mxu1 %vm211_vm3, %v9500_v21  ;;  %v9651_v56 = vld [vmem:[#allocation7 + $0x1e0] ss:$24 sps:$4 sm:$0xff]   ;;  %v9659_v58 = vld [vmem:[#allocation7 + $0x214] ss:$24 sps:$4 sm:$0xff]   ;;  %v9666_v60 = vld [vmem:[#allocation7 + $0x210] ss:$24 sps:$4 sm:$0xff]  }
  0xb2   :  { %1241 = vmatpush1.bf16.msra.mxu1 %v9502_v22  ;;  %450 = vmatprep.mubr.f32.mxu1 %v9232_v0  ;;  %v9661_v59 = vld [vmem:[#allocation7 + $0x98] ss:$24 sps:$4 sm:$0xff]   ;;  %v9671_v61 = vld [vmem:[#allocation7 + $0xcc] ss:$24 sps:$4 sm:$0xff]   ;;  %v9676_v63 = vld [vmem:[#allocation7 + $0xc8] ss:$24 sps:$4 sm:$0xff]  }
  0xb3   :  { %1242 = vmatprep.subr.bf16.mxu1 %v9510_v24  ;;  %v9674_v62 = vld [vmem:[#allocation7 + $0x244] ss:$24 sps:$4 sm:$0xff]   ;;  %v9681_v1 = vld [vmem:[#allocation7 + $0x240] ss:$24 sps:$4 sm:$0xff]   ;;  %v9689_v3 = vld [vmem:[#allocation7 + $0x274] ss:$24 sps:$4 sm:$0xff]  }
  0xb4   :  { %6946 = vmatmul.mubr.msk.f32.gmra.mrb[6].mxu0 %vm211_vm3, %v9528_v29  ;;  %v9686_v2 = vld [vmem:[#allocation7 + $0xfc] ss:$24 sps:$4 sm:$0xff]   ;;  %v9691_v4 = vld [vmem:[#allocation7 + $0xf8] ss:$24 sps:$4 sm:$0xff]   ;;  %v9701_v6 = vld [vmem:[#allocation7 + $0x12c] ss:$24 sps:$4 sm:$0xff]  }
  0xb5   :  { %343 = vmatprep.mubr.f32.mxu0 %v9232_v0  ;;  %6956 = vmatmul.mubr.msk.f32.gmra.mrb[6].mxu1 %vm211_vm3, %v9528_v29  ;;  %v9696_v5 = vld [vmem:[#allocation7 + $0x270] ss:$24 sps:$4 sm:$0xff]   ;;  %v9704_v7 = vld [vmem:[#allocation7 + $0x2a4] ss:$24 sps:$4 sm:$0xff]   ;;  %v9711_v9 = vld [vmem:[#allocation7 + $0x2a0] ss:$24 sps:$4 sm:$0xff]  }
  0xb6   :  { %1243 = vmatpush1.bf16.msra.mxu1 %v9531_v31  ;;  %456 = vmatprep.mubr.f32.mxu1 %v9232_v0  ;;  %v9706_v8 = vld [vmem:[#allocation7 + $0x128] ss:$24 sps:$4 sm:$0xff]   ;;  %v9716_v10 = vld [vmem:[#allocation7 + $0x15c] ss:$24 sps:$4 sm:$0xff]   ;;  %v9721_v12 = vld [vmem:[#allocation7 + $0x158] ss:$24 sps:$4 sm:$0xff]  }
  0xb7   :  { %1244 = vmatprep.subr.bf16.mxu1 %v9536_v32  ;;  %v9719_v11 = vld [vmem:[#allocation7 + $0x2d4] ss:$24 sps:$4 sm:$0xff]   ;;  %v9726_v13 = vld [vmem:[#allocation7 + $0x2d0] ss:$24 sps:$4 sm:$0xff]   ;;  %v7764_v26 = vld [vmem:[#allocation7 + $0x44] ss:$24 sps:$4 sm:$0xff]  }
  0xb8   :  { %6947 = vmatmul.mubr.msk.f32.gmra.mrb[8].mxu0 %vm211_vm3, %v9552_v34  ;;  %v7760_v23 = vld [vmem:[#allocation7 + $0x10] ss:$24 sps:$4 sm:$0xff]   ;;  %v7766_v27 = vld [vmem:[#allocation7 + $0x40] ss:$24 sps:$4 sm:$0xff]   ;;  %v9749_v28 = vld [vmem:[#allocation7 + $0x1ec] ss:$24 sps:$4 sm:$0xff]  }
  0xb9   :  { %349 = vmatprep.mubr.f32.mxu0 %v9232_v0  ;;  %6957 = vmatmul.mubr.msk.f32.gmra.mrb[8].mxu1 %vm211_vm3, %v9552_v34  ;;  %v9747_v25 = vld [vmem:[#allocation7 + $0x1b8] ss:$24 sps:$4 sm:$0xff]   ;;  %13381 = vst [vmem:[#allocation27_spill] sm:$0xff] %v9749_v28  ;;  %v9754_v30 = vld [vmem:[#allocation7 + $0x1e8] ss:$24 sps:$4 sm:$0xff]  }
  0xba   :  { %1245 = vmatpush1.bf16.msra.mxu1 %v9556_v35  ;;  %462 = vmatprep.mubr.f32.mxu1 %v9232_v0  ;;  %13380 = vst [vmem:[#allocation26_spill] sm:$0xff] %v9747_v25  ;;  %13382 = vst [vmem:[#allocation28_spill] sm:$0xff] %v9754_v30 }
  0xbb   :  { %1246 = vmatprep.subr.bf16.mxu1 %v9559_v36 }
  0xbc   :  { %6948 = vmatmul.mubr.msk.f32.gmra.mrb[10].mxu0 %vm211_vm3, %v9570_v37 }
  0xbd   :  { %355 = vmatprep.mubr.f32.mxu0 %v9232_v0  ;;  %6958 = vmatmul.mubr.msk.f32.gmra.mrb[10].mxu1 %vm211_vm3, %v9570_v37 }
  0xbe   :  { %1247 = vmatpush1.bf16.msra.mxu1 %v9573_v38  ;;  %468 = vmatprep.mubr.f32.mxu1 %v9232_v0 }
  0xbf   :  { %1248 = vmatprep.subr.bf16.mxu1 %v9576_v39 }
  0xc0   :  { %6949 = vmatmul.mubr.msk.f32.gmra.mrb[12].mxu0 %vm211_vm3, %v9587_v40 }
  0xc1   :  { %361 = vmatprep.mubr.f32.mxu0 %v9232_v0  ;;  %6959 = vmatmul.mubr.msk.f32.gmra.mrb[12].mxu1 %vm211_vm3, %v9587_v40 }
  0xc2   :  { %1249 = vmatpush1.bf16.msra.mxu1 %v9590_v41  ;;  %474 = vmatprep.mubr.f32.mxu1 %v9232_v0 }
  0xc3   :  { %1250 = vmatprep.subr.bf16.mxu1 %v9593_v42 }
  0xc4   :  { %6950 = vmatmul.mubr.msk.f32.gmra.mrb[14].mxu0 %vm211_vm3, %v9604_v43 }
  0xc5   :  { %545 = vmatprep.mubr.f32.mxu0 %v9232_v0  ;;  %6960 = vmatmul.mubr.msk.f32.gmra.mrb[14].mxu1 %vm211_vm3, %v9604_v43 }
  0xc6   :  { %1251 = vmatpush1.bf16.msra.mxu1 %v9607_v44  ;;  %1268 = vmatprep.mubr.bf16.mxu1 %v12932_v51 }
  0xc7   :  { %1252 = vmatprep.subr.bf16.mxu1 %v9610_v45 }
  0xc8   :  { %6963 = vmatmul.mubr.msk.f32.vlgmr.msra.gmra.mrb[16].mxu0 %vm211_vm3, %v9468_v15  ;;  %v9731_v15 = vld [vmem:[#allocation7 + $0x18c] ss:$24 sps:$4 sm:$0xff]  }
  0xc9   :  { %1278 = vmatpush1.bf16.msra.mxu0 %v9616_v46  ;;  %551 = vmatprep.mubr.f32.mxu0 %v9232_v0 }
  0xca   :  { %1253 = vmatpush1.bf16.msra.mxu1 %v9620_v47  ;;  %1279 = vmatprep.subr.bf16.mxu0 %v9623_v48 }
  0xcb   :  { %1254 = vmatprep.subr.bf16.mxu1 %v9626_v49 }
  0xcc   :  { %6964 = vmatmul.mubr.msk.f32.gmra.mrb[18].mxu0 %vm211_vm3, %v9485_v18  ;;  %v9734_v18 = vld [vmem:[#allocation7 + $0x14] ss:$24 sps:$4 sm:$0xff]  }
  0xcd   :  { %1280 = vmatpush1.bf16.msra.mxu0 %v9632_v50  ;;  %557 = vmatprep.mubr.f32.mxu0 %v9232_v0 }
  0xce   :  { %1255 = vmatpush1.bf16.msra.mxu1 %v9636_v52  ;;  %1281 = vmatprep.subr.bf16.mxu0 %v9641_v53 }
  0xcf   :  { %1256 = vmatprep.subr.bf16.mxu1 %v9644_v54 }
  0xd0   :  { %6965 = vmatmul.mubr.msk.f32.gmra.mrb[20].mxu0 %vm211_vm3, %v9500_v21  ;;  %v9736_v21 = vld [vmem:[#allocation7 + $0x188] ss:$24 sps:$4 sm:$0xff]  }
  0xd1   :  { %1282 = vmatpush1.bf16.msra.mxu0 %v9646_v55  ;;  %563 = vmatprep.mubr.f32.mxu0 %v9232_v0  ;;  %13378 = vst [vmem:[#allocation24_spill] sm:$0xff] %v9736_v21 }
  0xd2   :  { %1257 = vmatpush1.bf16.msra.mxu1 %v9651_v56  ;;  %1283 = vmatprep.subr.bf16.mxu0 %v9656_v57 }
  0xd3   :  { %1258 = vmatprep.subr.bf16.mxu1 %v9659_v58 }
  0xd4   :  { %6966 = vmatmul.mubr.msk.f32.gmra.mrb[22].mxu0 %vm211_vm3, %v9528_v29  ;;  %v7770_v29 = vld [vmem:[#allocation7 + $0x74] ss:$24 sps:$4 sm:$0xff]  }
  0xd5   :  { %1284 = vmatpush1.bf16.msra.mxu0 %v9661_v59  ;;  %569 = vmatprep.mubr.f32.mxu0 %v9232_v0 }
  0xd6   :  { %1259 = vmatpush1.bf16.msra.mxu1 %v9666_v60  ;;  %1285 = vmatprep.subr.bf16.mxu0 %v9671_v61 }
  0xd7   :  { %1260 = vmatprep.subr.bf16.mxu1 %v9674_v62 }
  0xd8   :  { %6967 = vmatmul.mubr.msk.f32.gmra.mrb[24].mxu0 %vm211_vm3, %v9552_v34  ;;  %v7772_v34 = vld [vmem:[#allocation7 + $0x70] ss:$24 sps:$4 sm:$0xff]  }
  0xd9   :  { %1286 = vmatpush1.bf16.msra.mxu0 %v9676_v63  ;;  %575 = vmatprep.mubr.f32.mxu0 %v9232_v0 }
  0xda   :  { %1261 = vmatpush1.bf16.msra.mxu1 %v9681_v1  ;;  %1287 = vmatprep.subr.bf16.mxu0 %v9686_v2 }
  0xdb   :  { %1262 = vmatprep.subr.bf16.mxu1 %v9689_v3 }
  0xdc   :  { %6968 = vmatmul.mubr.msk.f32.gmra.mrb[26].mxu0 %vm211_vm3, %v9570_v37  ;;  %v9757_v37 = vld [vmem:[#allocation7 + $0x21c] ss:$24 sps:$4 sm:$0xff]  }
  0xdd   :  { %1288 = vmatpush1.bf16.msra.mxu0 %v9691_v4  ;;  %581 = vmatprep.mubr.f32.mxu0 %v9232_v0  ;;  %13383 = vst [vmem:[#allocation29_spill] sm:$0xff] %v9757_v37 }
  0xde   :  { %1263 = vmatpush1.bf16.msra.mxu1 %v9696_v5  ;;  %1289 = vmatprep.subr.bf16.mxu0 %v9701_v6 }
  0xdf   :  { %1264 = vmatprep.subr.bf16.mxu1 %v9704_v7 }
  0xe0   :  { %6969 = vmatmul.mubr.msk.f32.gmra.mrb[28].mxu0 %vm211_vm3, %v9587_v40  ;;  %v7776_v40 = vld [vmem:[#allocation7 + $0xa4] ss:$24 sps:$4 sm:$0xff]  }
  0xe1   :  { %1290 = vmatpush1.bf16.msra.mxu0 %v9706_v8  ;;  %587 = vmatprep.mubr.f32.mxu0 %v9232_v0  ;;  %v9744_v0 = vld [vmem:[#allocation7 + $0x1bc] ss:$24 sps:$4 sm:$0xff]  }
  0xe2   :  { %1265 = vmatpush1.bf16.msra.mxu1 %v9711_v9  ;;  %1291 = vmatprep.subr.bf16.mxu0 %v9716_v10  ;;  %13379 = vst [vmem:[#allocation25_spill] sm:$0xff] %v9744_v0 }
  0xe3   :  { %1266 = vmatprep.subr.bf16.mxu1 %v9719_v11 }
  0xe4   :  { %6970 = vmatmul.mubr.msk.f32.gmra.mrb[30].mxu0 %vm211_vm3, %v9604_v43  ;;  %v9761_v43 = vld [vmem:[#allocation7 + $0x218] ss:$24 sps:$4 sm:$0xff]  }
  0xe5   :  { %1292 = vmatpush1.bf16.msra.mxu0 %v9721_v12  ;;  %1309 = vmatprep.mubr.bf16.mxu0 %v12932_v51  ;;  %13384 = vst [vmem:[#allocation30_spill] sm:$0xff] %v9761_v43 }
  0xe6   :  { %1267 = vmatpush1.bf16.msra.mxu1 %v9726_v13  ;;  %1293 = vmatprep.subr.bf16.mxu0 %v9731_v15 }
  0xe7   :  { %1318 = vmatprep.subr.bf16.mxu1 %v9734_v18 }
  0xe9   :  { %1269 = vmatmul.mubr.bf16.vlgmr.msra.gmra.mrb[16].mxu1 %v12932_v51  ;;  %1294 = vmatpush1.bf16.msra.mxu0 %v9736_v21  ;;  %v9763_v21 = vld [vmem:[#allocation7 + $0x24c] ss:$24 sps:$4 sm:$0xff]  }
  0xea   :  { %1319 = vmatpush1.bf16.msra.mxu1 %v7760_v23  ;;  %1295 = vmatprep.subr.bf16.mxu0 %v9744_v0  ;;  %v7778_v23 = vld [vmem:[#allocation7 + $0xa0] ss:$24 sps:$4 sm:$0xff]   ;;  %v9769_v0 = vld [vmem:[#allocation7 + $0x27c] ss:$24 sps:$4 sm:$0xff]  }
  0xeb   :  { %1320 = vmatprep.subr.bf16.mxu1 %v7764_v26  ;;  %1350 = vmatprep.mubr.bf16.mxu1 %v12932_v51  ;;  %v7782_v26 = vld [vmem:[#allocation7 + $0xd4] ss:$24 sps:$4 sm:$0xff]   ;;  %v9767_v51 = vld [vmem:[#allocation7 + $0x248] ss:$24 sps:$4 sm:$0xff]   ;;  %13386 = vst [vmem:[#allocation32_spill] sm:$0xff] %v9769_v0 }
  0xec   :  { %13385 = vst [vmem:[#allocation31_spill] sm:$0xff] %v9767_v51 }
  0xed   :  { %1296 = vmatpush1.bf16.msra.mxu0 %v9747_v25  ;;  %v7784_v25 = vld [vmem:[#allocation7 + $0xd0] ss:$24 sps:$4 sm:$0xff]  }
  0xee   :  { %1321 = vmatpush1.bf16.msra.mxu1 %v7766_v27  ;;  %1297 = vmatprep.subr.bf16.mxu0 %v9749_v28  ;;  %v7788_v27 = vld [vmem:[#allocation7 + $0x104] ss:$24 sps:$4 sm:$0xff]  }
  0xef   :  { %1322 = vmatprep.subr.bf16.mxu1 %v7770_v29  ;;  %v9773_v29 = vld [vmem:[#allocation7 + $0x278] ss:$24 sps:$4 sm:$0xff]   ;;  %v9775_v28 = vld [vmem:[#allocation7 + $0x2ac] ss:$24 sps:$4 sm:$0xff]  }
  0xf0   :  { %13387 = vst [vmem:[#allocation33_spill] sm:$0xff] %v9775_v28 }
  0xf1   :  { %1298 = vmatpush1.bf16.msra.mxu0 %v9754_v30  ;;  %v7790_v30 = vld [vmem:[#allocation7 + $0x100] ss:$24 sps:$4 sm:$0xff]  }
  0xf2   :  { %1323 = vmatpush1.bf16.msra.mxu1 %v7772_v34  ;;  %1299 = vmatprep.subr.bf16.mxu0 %v9757_v37  ;;  %v7794_v34 = vld [vmem:[#allocation7 + $0x134] ss:$24 sps:$4 sm:$0xff]  }
  0xf3   :  { %1324 = vmatprep.subr.bf16.mxu1 %v7776_v40  ;;  %v9779_v40 = vld [vmem:[#allocation7 + $0x2a8] ss:$24 sps:$4 sm:$0xff]   ;;  %v9781_v37 = vld [vmem:[#allocation7 + $0x2dc] ss:$24 sps:$4 sm:$0xff]  }
  0xf5   :  { %1300 = vmatpush1.bf16.msra.mxu0 %v9761_v43  ;;  %v7796_v43 = vld [vmem:[#allocation7 + $0x130] ss:$24 sps:$4 sm:$0xff]  }
  0xf6   :  { %1325 = vmatpush1.bf16.msra.mxu1 %v7778_v23  ;;  %1301 = vmatprep.subr.bf16.mxu0 %v9763_v21  ;;  %v7800_v23 = vld [vmem:[#allocation7 + $0x164] ss:$24 sps:$4 sm:$0xff]  }
  0xf7   :  { %1326 = vmatprep.subr.bf16.mxu1 %v7782_v26  ;;  %v9785_v26 = vld [vmem:[#allocation7 + $0x2d8] ss:$24 sps:$4 sm:$0xff]  }
  0xf9   :  { %1302 = vmatpush1.bf16.msra.mxu0 %v9767_v51  ;;  %v7802_v51 = vld [vmem:[#allocation7 + $0x160] ss:$24 sps:$4 sm:$0xff]  }
  0xfa   :  { %1327 = vmatpush1.bf16.msra.mxu1 %v7784_v25  ;;  %1303 = vmatprep.subr.bf16.mxu0 %v9769_v0  ;;  %v7803_v25 = vld [vmem:[#allocation7 + $0x194] ss:$24 sps:$4 sm:$0xff]   ;;  %v7806_v0 = vld [vmem:[#allocation7 + $0x1c4] ss:$24 sps:$4 sm:$0xff]  }
  0xfb   :  { %1328 = vmatprep.subr.bf16.mxu1 %v7788_v27  ;;  %v7805_v27 = vld [vmem:[#allocation7 + $0x190] ss:$24 sps:$4 sm:$0xff]  }
  0xfd   :  { %1304 = vmatpush1.bf16.msra.mxu0 %v9773_v29 }
  0xfe   :  { %1329 = vmatpush1.bf16.msra.mxu1 %v7790_v30  ;;  %1305 = vmatprep.subr.bf16.mxu0 %v9775_v28  ;;  %v13388_v30 = vmov 0   ;;  %v7809_v28 = vld [vmem:[#allocation7 + $0x1f4] ss:$24 sps:$4 sm:$0xff]  }
  0xff   :  { %1330 = vmatprep.subr.bf16.mxu1 %v7794_v34  ;;  %v7808_v34 = vld [vmem:[#allocation7 + $0x1c0] ss:$24 sps:$4 sm:$0xff]  }
 0x101   :  { %1306 = vmatpush1.bf16.msra.mxu0 %v9779_v40 }
 0x102   :  { %1331 = vmatpush1.bf16.msra.mxu1 %v7796_v43  ;;  %1307 = vmatprep.subr.bf16.mxu0 %v9781_v37  ;;  %v7811_v43 = vld [vmem:[#allocation7 + $0x1f0] ss:$24 sps:$4 sm:$0xff]  }
 0x103   :  { %1332 = vmatprep.subr.bf16.mxu1 %v7800_v23  ;;  %v7812_v23 = vld [vmem:[#allocation7 + $0x224] ss:$24 sps:$4 sm:$0xff]  }
 0x105   :  { %1308 = vmatpush1.bf16.msra.mxu0 %v9785_v26 }
 0x106   :  { %1333 = vmatpush1.bf16.msra.mxu1 %v7802_v51  ;;  %1413 = vmatprep.subr.bf16.mxu0 %v9459_v14  ;;  %v7814_v14 = vld [vmem:[#allocation7 + $0x220] ss:$24 sps:$4 sm:$0xff]   ;;  %v7815_v51 = vld [vmem:[#allocation7 + $0x254] ss:$24 sps:$4 sm:$0xff]  }
 0x107   :  { %1334 = vmatprep.subr.bf16.mxu1 %v7803_v25  ;;  %v7818_v25 = vld [vmem:[#allocation7 + $0x284] ss:$24 sps:$4 sm:$0xff]  }
 0x108   :  { %1310 = vmatmul.mubr.bf16.vlgmr.msra.gmra.mrb[32].mxu0 %v13388_v30 }
 0x109   :  { %1414 = vmatpush1.bf16.msra.mxu0 %v9472_v16  ;;  %v7817_v16 = vld [vmem:[#allocation7 + $0x250] ss:$24 sps:$4 sm:$0xff]  }
 0x10a   :  { %1335 = vmatpush1.bf16.msra.mxu1 %v7805_v27  ;;  %1415 = vmatprep.subr.bf16.mxu0 %v9475_v17  ;;  %v7820_v17 = vld [vmem:[#allocation7 + $0x280] ss:$24 sps:$4 sm:$0xff]  }
 0x10b   :  { %1336 = vmatprep.subr.bf16.mxu1 %v7806_v0 }
 0x10d   :  { %1416 = vmatpush1.bf16.msra.mxu0 %v9488_v19  ;;  %v7821_v19 = vld [vmem:[#allocation7 + $0x2b4] ss:$24 sps:$4 sm:$0xff]  }
 0x10e   :  { %1337 = vmatpush1.bf16.msra.mxu1 %v7808_v34  ;;  %1417 = vmatprep.subr.bf16.mxu0 %v9492_v20  ;;  %v7823_v20 = vld [vmem:[#allocation7 + $0x2b0] ss:$24 sps:$4 sm:$0xff]  }
 0x10f   :  { %1338 = vmatprep.subr.bf16.mxu1 %v7809_v28 }
 0x111   :  { %1418 = vmatpush1.bf16.msra.mxu0 %v9502_v22  ;;  %v7824_v22 = vld [vmem:[#allocation7 + $0x2e4] ss:$24 sps:$4 sm:$0xff]  }
 0x112   :  { %1339 = vmatpush1.bf16.msra.mxu1 %v7811_v43  ;;  %1419 = vmatprep.subr.bf16.mxu0 %v9510_v24  ;;  %v9804_v24 = vld [vmem:[#allocation7 + $0x2e0] ss:$24 sps:$4 sm:$0xff]  }
 0x113   :  { %1340 = vmatprep.subr.bf16.mxu1 %v7812_v23 }
 0x115   :  { %1420 = vmatpush1.bf16.msra.mxu0 %v9531_v31  ;;  %v13389_v31 = vld [vmem:[#allocation24_spill] sm:$0xff] }
 0x116   :  { %1341 = vmatpush1.bf16.msra.mxu1 %v7814_v14  ;;  %1421 = vmatprep.subr.bf16.mxu0 %v9536_v32  ;;  %v13390_v32 = vld [vmem:[#allocation25_spill] sm:$0xff] }
 0x117   :  { %1342 = vmatprep.subr.bf16.mxu1 %v7815_v51 }
 0x119   :  { %1422 = vmatpush1.bf16.msra.mxu0 %v9556_v35  ;;  %v13392_v35 = vld [vmem:[#allocation27_spill] sm:$0xff] }
 0x11a   :  { %1343 = vmatpush1.bf16.msra.mxu1 %v7817_v16  ;;  %1423 = vmatprep.subr.bf16.mxu0 %v9559_v36  ;;  %v13393_v36 = vld [vmem:[#allocation28_spill] sm:$0xff] }
 0x11b   :  { %1344 = vmatprep.subr.bf16.mxu1 %v7818_v25 }
 0x11d   :  { %1424 = vmatpush1.bf16.msra.mxu0 %v9573_v38  ;;  %v13394_v38 = vld [vmem:[#allocation29_spill] sm:$0xff] }
 0x11e   :  { %1345 = vmatpush1.bf16.msra.mxu1 %v7820_v17  ;;  %1425 = vmatprep.subr.bf16.mxu0 %v9576_v39  ;;  %v13395_v39 = vld [vmem:[#allocation30_spill] sm:$0xff] }
 0x11f   :  { %1346 = vmatprep.subr.bf16.mxu1 %v7821_v19 }
 0x121   :  { %1426 = vmatpush1.bf16.msra.mxu0 %v9590_v41  ;;  %v13396_v41 = vld [vmem:[#allocation31_spill] sm:$0xff] }
 0x122   :  { %1347 = vmatpush1.bf16.msra.mxu1 %v7823_v20  ;;  %1427 = vmatprep.subr.bf16.mxu0 %v9593_v42  ;;  %v13397_v42 = vld [vmem:[#allocation32_spill] sm:$0xff] }
 0x123   :  { %1348 = vmatprep.subr.bf16.mxu1 %v7824_v22 }
 0x125   :  { %1428 = vmatpush1.bf16.msra.mxu0 %v9607_v44  ;;  %v13398_v44 = vld [vmem:[#allocation33_spill] sm:$0xff] }
 0x126   :  { %1349 = vmatpush1.bf16.msra.mxu1 %v9804_v24  ;;  %1429 = vmatprep.subr.bf16.mxu0 %v9610_v45  ;;  %v9860_v45 = vld [vmem:[#allocation7 + $0x4] ss:$24 sps:$4 sm:$0xff]  }
 0x127   :  { %1454 = vmatprep.subr.bf16.mxu1 %v9541_v33  ;;  %v13391_v33 = vld [vmem:[#allocation26_spill] sm:$0xff]  ;;  %13399 = vst [vmem:[#allocation24_spill] sm:$0xff] %v9860_v45 }
 0x129   :  { %1351 = vmatmul.mubr.bf16.vlgmr.msra.gmra.mrb[20].mxu1 %v13388_v30  ;;  %1430 = vmatpush1.bf16.msra.mxu0 %v9620_v47 }
 0x12a   :  { %1455 = vmatpush1.bf16.msra.mxu1 %v9616_v46  ;;  %1431 = vmatprep.subr.bf16.mxu0 %v9626_v49  ;;  %v181_v46 = vlaneseq }
 0x12b   :  { %1456 = vmatprep.subr.bf16.mxu1 %v9623_v48 }
 0x12c   :  { %v9863_v47 = vshrl.u32 %v181_v46, 7 }
 0x12d   :  { %1432 = vmatpush1.bf16.msra.mxu0 %v9636_v52 }
 0x12e   :  { %1457 = vmatpush1.bf16.msra.mxu1 %v9632_v50  ;;  %1433 = vmatprep.subr.bf16.mxu0 %v9644_v54  ;;  %13400 = vst [vmem:[#allocation25_spill] sm:$0xff] %v9863_v47  ;;  %v9866_v48 = vsub.s32 0, %v9863_v47  ;;  %v12946_v49 = vsub.s32 2, %v9863_v47  ;;  %v9872_v52 = vsub.s32 1, %v9863_v47 }
 0x12f   :  { %1458 = vmatprep.subr.bf16.mxu1 %v9641_v53  ;;  %v9874_v53 = vld [vmem:[#allocation5] sm:$0x3f] }
 0x130   :  { %13401 = vst [vmem:[#allocation26_spill] sm:$0xff] %v9866_v48  ;;  %13402 = vst [vmem:[#allocation27_spill] sm:$0xff] %v9872_v52 }
 0x131   :  { %1434 = vmatpush1.bf16.msra.mxu0 %v9651_v56 }
 0x132   :  { %1459 = vmatpush1.bf16.msra.mxu1 %v9646_v55  ;;  %1435 = vmatprep.subr.bf16.mxu0 %v9659_v58  ;;  %v12945_v55 = vsub.s32 3, %v9863_v47  ;;  %v9885_v58 = vrot.slane %v9874_v53, %v9866_v48 }
 0x133   :  { %1460 = vmatprep.subr.bf16.mxu1 %v9656_v57 }
 0x135   :  { %1436 = vmatpush1.bf16.msra.mxu0 %v9666_v60  ;;  %v9894_v60 = vrot.slane %v9874_v53, %v9872_v52 }
 0x136   :  { %1461 = vmatpush1.bf16.msra.mxu1 %v9661_v59  ;;  %1437 = vmatprep.subr.bf16.mxu0 %v9674_v62  ;;  %v9890_v59 = vrot.slane %v9874_v53, %v12946_v49  ;;  %v9899_v62 = vrot.slane %v9874_v53, %v12945_v55 }
 0x137   :  { %1462 = vmatprep.subr.bf16.mxu1 %v9671_v61 }
 0x139   :  { %1438 = vmatpush1.bf16.msra.mxu0 %v9681_v1 }
 0x13a   :  { %1463 = vmatpush1.bf16.msra.mxu1 %v9676_v63  ;;  %1439 = vmatprep.subr.bf16.mxu0 %v9689_v3 }
 0x13b   :  { %1464 = vmatprep.subr.bf16.mxu1 %v9686_v2 }
 0x13d   :  { %1440 = vmatpush1.bf16.msra.mxu0 %v9696_v5 }
 0x13e   :  { %1465 = vmatpush1.bf16.msra.mxu1 %v9691_v4  ;;  %1441 = vmatprep.subr.bf16.mxu0 %v9704_v7 }
 0x13f   :  { %1466 = vmatprep.subr.bf16.mxu1 %v9701_v6 }
 0x141   :  { %1442 = vmatpush1.bf16.msra.mxu0 %v9711_v9 }
 0x142   :  { %1467 = vmatpush1.bf16.msra.mxu1 %v9706_v8  ;;  %1443 = vmatprep.subr.bf16.mxu0 %v9719_v11 }
 0x143   :  { %1468 = vmatprep.subr.bf16.mxu1 %v9716_v10 }
 0x145   :  { %1444 = vmatpush1.bf16.msra.mxu0 %v9726_v13 }
 0x146   :  { %1469 = vmatpush1.bf16.msra.mxu1 %v9721_v12  ;;  %1495 = vmatprep.subr.bf16.mxu0 %v9734_v18 }
 0x147   :  { %1470 = vmatprep.subr.bf16.mxu1 %v9731_v15 }
 0x14a   :  { %1471 = vmatpush1.bf16.msra.mxu1 %v13389_v31 }
 0x14b   :  { %1472 = vmatprep.subr.bf16.mxu1 %v13390_v32 }
 0x14e   :  { %1473 = vmatpush1.bf16.msra.mxu1 %v13391_v33 }
 0x14f   :  { %1474 = vmatprep.subr.bf16.mxu1 %v13392_v35 }
 0x152   :  { %1475 = vmatpush1.bf16.msra.mxu1 %v13393_v36 }
 0x153   :  { %1476 = vmatprep.subr.bf16.mxu1 %v13394_v38 }
 0x156   :  { %1477 = vmatpush1.bf16.msra.mxu1 %v13395_v39 }
 0x157   :  { %1478 = vmatprep.subr.bf16.mxu1 %v9763_v21 }
 0x15a   :  { %1479 = vmatpush1.bf16.msra.mxu1 %v13396_v41 }
 0x15b   :  { %1480 = vmatprep.subr.bf16.mxu1 %v13397_v42 }
 0x15e   :  { %1481 = vmatpush1.bf16.msra.mxu1 %v9773_v29 }
 0x15f   :  { %1482 = vmatprep.subr.bf16.mxu1 %v13398_v44 }
 0x162   :  { %1483 = vmatpush1.bf16.msra.mxu1 %v9779_v40 }
 0x163   :  { %1484 = vmatprep.subr.bf16.mxu1 %v9781_v37 }
 0x166   :  { %1485 = vmatpush1.bf16.msra.mxu1 %v9785_v26 }
 0x167   :  { %1590 = vmatprep.subr.bf16.mxu1 %v9860_v45 }
 0x17b   :  { %v9869_v50 = vpop.f32.mrb[0].mxu0 }
 0x17c   :  { %v9876_v54 = vpop.f32.mrb[0].mxu1  ;;  %v9879_v56 = vpop.f32.mrb[1].mxu0 }
 0x17d   :  { %v9881_v57 = vpop.f32.mrb[1].mxu1  ;;  %v324_v30 = vadd.f32 %v9879_v56, %v9894_v60 }
 0x17f   :  { %v327_v61 = vpop.f32.mrb[2].mxu0 }
 0x180   :  { %v9902_v63 = vadd.f32 %v327_v61, %v9885_v58  ;;  %v329_v1 = vpop.f32.mrb[3].mxu0  ;;  %v440_v2 = vpop.f32.mrb[2].mxu1 }
 0x181   :  { %v9905_v3 = vadd.f32 %v329_v1, %v9894_v60  ;;  %v9908_v4 = vadd.f32 %v440_v2, %v9890_v59  ;;  %v442_v5 = vpop.f32.mrb[3].mxu1 }
 0x182   :  { %v9911_v6 = vadd.f32 %v442_v5, %v9899_v62 }
 0x183   :  { %v333_v7 = vpop.f32.mrb[4].mxu0 }
 0x184   :  { %v9914_v8 = vadd.f32 %v333_v7, %v9885_v58  ;;  %v335_v9 = vpop.f32.mrb[5].mxu0  ;;  %v446_v11 = vpop.f32.mrb[4].mxu1 }
 0x185   :  { %v9917_v10 = vadd.f32 %v335_v9, %v9894_v60  ;;  %v9920_v13 = vadd.f32 %v446_v11, %v9890_v59  ;;  %v448_v15 = vpop.f32.mrb[5].mxu1  ;;  %v12944_v9 = vsub.s32 4, %v9863_v47 }
 0x186   :  { %13403 = vst [vmem:[#allocation28_spill] sm:$0xff] %v9914_v8  ;;  %v9926_v0 = vadd.f32 %v448_v15, %v9899_v62  ;;  %v12943_v15 = vsub.s32 5, %v9863_v47  ;;  %v10225_v8 = vld [vmem:[#allocation7 + $0x240] ss:$24 sps:$4 sm:$0xff]  }
 0x187   :  { %13404 = vst [vmem:[#allocation29_spill] sm:$0xff] %v9917_v10  ;;  %v339_v12 = vpop.f32.mrb[6].mxu0  ;;  %13405 = vst [vmem:[#allocation30_spill] sm:$0xff] %v9920_v13  ;;  %v10219_v10 = vld [vmem:[#allocation7 + $0x250] ss:$24 sps:$4 sm:$0xff]  }
 0x188   :  { %v9923_v18 = vadd.f32 %v339_v12, %v9885_v58  ;;  %v341_v21 = vpop.f32.mrb[7].mxu0  ;;  %13407 = vst [vmem:[#allocation32_spill] sm:$0xff] %v9926_v0  ;;  %v452_v37 = vpop.f32.mrb[6].mxu1  ;;  %v10216_v0 = vld [vmem:[#allocation7 + $0x244] ss:$24 sps:$4 sm:$0xff]   ;;  %13452 = vst [vmem:[#allocation77_spill] sm:$0xff] %v10219_v10 }
 0x189   :  { %v9929_v28 = vadd.f32 %v341_v21, %v9894_v60  ;;  %v9932_v40 = vadd.f32 %v452_v37, %v9890_v59  ;;  %v454_v26 = vpop.f32.mrb[7].mxu1  ;;  %13451 = vst [vmem:[#allocation76_spill] sm:$0xff] %v10216_v0  ;;  %v10222_v13 = vld [vmem:[#allocation7 + $0x284] ss:$24 sps:$4 sm:$0xff]   ;;  %13454 = vst [vmem:[#allocation79_spill] sm:$0xff] %v10225_v8 }
 0x18a   :  { %13406 = vst [vmem:[#allocation31_spill] sm:$0xff] %v9923_v18  ;;  %v9938_v43 = vadd.f32 %v454_v26, %v9899_v62  ;;  %v10207_v18 = vld [vmem:[#allocation7 + $0x220] ss:$24 sps:$4 sm:$0xff]   ;;  %13453 = vst [vmem:[#allocation78_spill] sm:$0xff] %v10222_v13 }
 0x18b   :  { %13408 = vst [vmem:[#allocation33_spill] sm:$0xff] %v9929_v28  ;;  %v345_v29 = vpop.f32.mrb[8].mxu0  ;;  %13409 = vst [vmem:[#allocation34_spill] sm:$0xff] %v9932_v40  ;;  %v10201_v28 = vld [vmem:[#allocation7 + $0x1e0] ss:$24 sps:$4 sm:$0xff]  }
 0x18c   :  { %v9935_v27 = vadd.f32 %v345_v29, %v9885_v58  ;;  %v347_v34 = vpop.f32.mrb[9].mxu0  ;;  %13411 = vst [vmem:[#allocation36_spill] sm:$0xff] %v9938_v43  ;;  %v458_v14 = vpop.f32.mrb[8].mxu1  ;;  %v10198_v43 = vld [vmem:[#allocation7 + $0x224] ss:$24 sps:$4 sm:$0xff]   ;;  %13446 = vst [vmem:[#allocation71_spill] sm:$0xff] %v10201_v28 }
 0x18d   :  { %v9941_v23 = vadd.f32 %v347_v34, %v9894_v60  ;;  %v9944_v16 = vadd.f32 %v458_v14, %v9890_v59  ;;  %v460_v25 = vpop.f32.mrb[9].mxu1  ;;  %v9994_v34 = vrot.slane %v9874_v53, %v12944_v9  ;;  %v9999_v14 = vrot.slane %v9874_v53, %v12943_v15  ;;  %13445 = vst [vmem:[#allocation70_spill] sm:$0xff] %v10198_v43  ;;  %v10204_v40 = vld [vmem:[#allocation7 + $0x214] ss:$24 sps:$4 sm:$0xff]  }
 0x18e   :  { %13410 = vst [vmem:[#allocation35_spill] sm:$0xff] %v9935_v27  ;;  %v9950_v20 = vadd.f32 %v460_v25, %v9899_v62  ;;  %v10189_v27 = vld [vmem:[#allocation7 + $0x1b0] ss:$24 sps:$4 sm:$0xff]   ;;  %13447 = vst [vmem:[#allocation72_spill] sm:$0xff] %v10204_v40 }
 0x18f   :  { %13412 = vst [vmem:[#allocation37_spill] sm:$0xff] %v9941_v23  ;;  %v351_v51 = vpop.f32.mrb[10].mxu0  ;;  %13413 = vst [vmem:[#allocation38_spill] sm:$0xff] %v9944_v16  ;;  %v10183_v23 = vld [vmem:[#allocation7 + $0x1c0] ss:$24 sps:$4 sm:$0xff]  }
 0x190   :  { %v9947_v17 = vadd.f32 %v351_v51, %v9885_v58  ;;  %v353_v19 = vpop.f32.mrb[11].mxu0  ;;  %13415 = vst [vmem:[#allocation40_spill] sm:$0xff] %v9950_v20  ;;  %v464_v31 = vpop.f32.mrb[10].mxu1  ;;  %v10180_v20 = vld [vmem:[#allocation7 + $0x1b4] ss:$24 sps:$4 sm:$0xff]   ;;  %13442 = vst [vmem:[#allocation67_spill] sm:$0xff] %v10189_v27 }
 0x191   :  { %v9953_v22 = vadd.f32 %v353_v19, %v9894_v60  ;;  %v9956_v33 = vadd.f32 %v464_v31, %v9890_v59  ;;  %v466_v35 = vpop.f32.mrb[11].mxu1  ;;  %v10186_v16 = vld [vmem:[#allocation7 + $0x1f4] ss:$24 sps:$4 sm:$0xff]   ;;  %13448 = vst [vmem:[#allocation73_spill] sm:$0xff] %v10207_v18 }
 0x192   :  { %13414 = vst [vmem:[#allocation39_spill] sm:$0xff] %v9947_v17  ;;  %v9962_v39 = vadd.f32 %v466_v35, %v9899_v62  ;;  %v10171_v17 = vld [vmem:[#allocation7 + $0x190] ss:$24 sps:$4 sm:$0xff]   ;;  %13441 = vst [vmem:[#allocation66_spill] sm:$0xff] %v10186_v16 }
 0x193   :  { %13416 = vst [vmem:[#allocation41_spill] sm:$0xff] %v9953_v22  ;;  %v357_v32 = vpop.f32.mrb[12].mxu0  ;;  %13417 = vst [vmem:[#allocation42_spill] sm:$0xff] %v9956_v33  ;;  %v10165_v22 = vld [vmem:[#allocation7 + $0x150] ss:$24 sps:$4 sm:$0xff]  }
 0x194   :  { %v9959_v36 = vadd.f32 %v357_v32, %v9885_v58  ;;  %v359_v38 = vpop.f32.mrb[13].mxu0  ;;  %13419 = vst [vmem:[#allocation44_spill] sm:$0xff] %v9962_v39  ;;  %v470_v42 = vpop.f32.mrb[12].mxu1  ;;  %v10162_v39 = vld [vmem:[#allocation7 + $0x194] ss:$24 sps:$4 sm:$0xff]  }
 0x195   :  { %v9965_v41 = vadd.f32 %v359_v38, %v9894_v60  ;;  %v9968_v46 = vadd.f32 %v470_v42, %v9890_v59  ;;  %v472_v61 = vpop.f32.mrb[13].mxu1  ;;  %v10168_v33 = vld [vmem:[#allocation7 + $0x184] ss:$24 sps:$4 sm:$0xff]  }
 0x196   :  { %13418 = vst [vmem:[#allocation43_spill] sm:$0xff] %v9959_v36  ;;  %v9974_v5 = vadd.f32 %v472_v61, %v9899_v62  ;;  %v10153_v36 = vld [vmem:[#allocation7 + $0x120] ss:$24 sps:$4 sm:$0xff]  }
 0x197   :  { %13420 = vst [vmem:[#allocation45_spill] sm:$0xff] %v9965_v41  ;;  %v363_v44 = vpop.f32.mrb[14].mxu0  ;;  %13421 = vst [vmem:[#allocation46_spill] sm:$0xff] %v9968_v46  ;;  %v10147_v41 = vld [vmem:[#allocation7 + $0x130] ss:$24 sps:$4 sm:$0xff]  }
 0x198   :  { %v9971_v1 = vadd.f32 %v363_v44, %v9885_v58  ;;  %v365_v2 = vpop.f32.mrb[15].mxu0  ;;  %13423 = vst [vmem:[#allocation48_spill] sm:$0xff] %v9974_v5  ;;  %v476_v11 = vpop.f32.mrb[14].mxu1  ;;  %v10150_v46 = vld [vmem:[#allocation7 + $0x164] ss:$24 sps:$4 sm:$0xff]  }
 0x199   :  { %v9977_v7 = vadd.f32 %v365_v2, %v9894_v60  ;;  %v9984_v21 = vadd.f32 %v476_v11, %v9890_v59  ;;  %v478_v37 = vpop.f32.mrb[15].mxu1 }
 0x19a   :  { %13422 = vst [vmem:[#allocation47_spill] sm:$0xff] %v9971_v1  ;;  %v9989_v26 = vadd.f32 %v478_v37, %v9899_v62 }
 0x19b   :  { %13424 = vst [vmem:[#allocation49_spill] sm:$0xff] %v9977_v7  ;;  %v9980_v12 = vpop.f32.mrb[16].mxu0  ;;  %13425 = vst [vmem:[#allocation50_spill] sm:$0xff] %v9984_v21 }
 0x19c   :  { %v9986_v29 = vpop.f32.mrb[17].mxu0  ;;  %13426 = vst [vmem:[#allocation51_spill] sm:$0xff] %v9989_v26 }
 0x19f   :  { %v553_v51 = vpop.f32.mrb[18].mxu0 }
 0x1a0   :  { %v10002_v25 = vadd.f32 %v553_v51, %v9994_v34  ;;  %v555_v19 = vpop.f32.mrb[19].mxu0 }
 0x1a1   :  { %v10005_v31 = vadd.f32 %v555_v19, %v9999_v14 }
 0x1a3   :  { %v559_v32 = vpop.f32.mrb[20].mxu0 }
 0x1a4   :  { %v10008_v35 = vadd.f32 %v559_v32, %v9994_v34  ;;  %v561_v38 = vpop.f32.mrb[21].mxu0 }
 0x1a5   :  { %v10011_v42 = vadd.f32 %v561_v38, %v9999_v14 }
 0x1a6   :  { %13427 = vst [vmem:[#allocation52_spill] sm:$0xff] %v10008_v35  ;;  %v10213_v35 = vld [vmem:[#allocation7 + $0x210] ss:$24 sps:$4 sm:$0xff]  }
 0x1a7   :  { %13428 = vst [vmem:[#allocation53_spill] sm:$0xff] %v10011_v42  ;;  %v565_v44 = vpop.f32.mrb[22].mxu0  ;;  %v10210_v42 = vld [vmem:[#allocation7 + $0x254] ss:$24 sps:$4 sm:$0xff]   ;;  %13450 = vst [vmem:[#allocation75_spill] sm:$0xff] %v10213_v35 }
 0x1a8   :  { %v10014_v53 = vadd.f32 %v565_v44, %v9994_v34  ;;  %v567_v61 = vpop.f32.mrb[23].mxu0  ;;  %13449 = vst [vmem:[#allocation74_spill] sm:$0xff] %v10210_v42 }
 0x1a9   :  { %v10017_v2 = vadd.f32 %v567_v61, %v9999_v14 }
 0x1aa   :  { %13429 = vst [vmem:[#allocation54_spill] sm:$0xff] %v10014_v53  ;;  %v10195_v53 = vld [vmem:[#allocation7 + $0x1f0] ss:$24 sps:$4 sm:$0xff]  }
 0x1ab   :  { %13430 = vst [vmem:[#allocation55_spill] sm:$0xff] %v10017_v2  ;;  %v571_v11 = vpop.f32.mrb[24].mxu0  ;;  %v10192_v2 = vld [vmem:[#allocation7 + $0x1e4] ss:$24 sps:$4 sm:$0xff]   ;;  %13444 = vst [vmem:[#allocation69_spill] sm:$0xff] %v10195_v53 }
 0x1ac   :  { %v10020_v37 = vadd.f32 %v571_v11, %v9994_v34  ;;  %v573_v51 = vpop.f32.mrb[25].mxu0  ;;  %13443 = vst [vmem:[#allocation68_spill] sm:$0xff] %v10192_v2 }
 0x1ad   :  { %v10023_v19 = vadd.f32 %v573_v51, %v9999_v14 }
 0x1ae   :  { %13431 = vst [vmem:[#allocation56_spill] sm:$0xff] %v10020_v37  ;;  %v10177_v37 = vld [vmem:[#allocation7 + $0x180] ss:$24 sps:$4 sm:$0xff]  }
 0x1af   :  { %13432 = vst [vmem:[#allocation57_spill] sm:$0xff] %v10023_v19  ;;  %v577_v32 = vpop.f32.mrb[26].mxu0  ;;  %v10174_v19 = vld [vmem:[#allocation7 + $0x1c4] ss:$24 sps:$4 sm:$0xff]  }
 0x1b0   :  { %v10026_v38 = vadd.f32 %v577_v32, %v9994_v34  ;;  %v579_v15 = vpop.f32.mrb[27].mxu0 }
 0x1b1   :  { %v10029_v44 = vadd.f32 %v579_v15, %v9999_v14  ;;  %v322_v15 = vadd.f32 %v9869_v50, %v9885_v58 }
 0x1b2   :  { %13433 = vst [vmem:[#allocation58_spill] sm:$0xff] %v10026_v38  ;;  %v10159_v38 = vld [vmem:[#allocation7 + $0x160] ss:$24 sps:$4 sm:$0xff]  }
 0x1b3   :  { %13434 = vst [vmem:[#allocation59_spill] sm:$0xff] %v10029_v44  ;;  %v583_v9 = vpop.f32.mrb[28].mxu0  ;;  %v10156_v44 = vld [vmem:[#allocation7 + $0x154] ss:$24 sps:$4 sm:$0xff]  }
 0x1b4   :  { %v10032_v61 = vadd.f32 %v583_v9, %v9994_v34  ;;  %v585_v55 = vpop.f32.mrb[29].mxu0 }
 0x1b5   :  { %v10035_v11 = vadd.f32 %v585_v55, %v9999_v14 }
 0x1b6   :  { %13435 = vst [vmem:[#allocation60_spill] sm:$0xff] %v10032_v61 }
 0x1b7   :  { %13436 = vst [vmem:[#allocation61_spill] sm:$0xff] %v10035_v11  ;;  %v589_v49 = vpop.f32.mrb[30].mxu0 }
 0x1b8   :  { %v10038_v51 = vadd.f32 %v589_v49, %v9994_v34  ;;  %v591_v47 = vpop.f32.mrb[31].mxu0  ;;  %v435_v49 = vadd.f32 %v9876_v54, %v9890_v59  ;;  %v738_v54 = vld [vmem:[#allocation9] sm:$0x3] }
 0x1b9   :  { %v10041_v32 = vadd.f32 %v591_v47, %v9999_v14  ;;  %v10055_v59 = vrot.slane %v738_v54, %v9872_v52  ;;  %v10141_v52 = vld [vmem:[#allocation7 + $0xf0] ss:$24 sps:$4 sm:$0xff]  }
 0x1ba   :  { %13437 = vst [vmem:[#allocation62_spill] sm:$0xff] %v10038_v51  ;;  %v437_v51 = vadd.f32 %v9881_v57, %v9899_v62  ;;  %v10052_v57 = vrot.slane %v738_v54, %v9866_v48  ;;  %v10144_v48 = vld [vmem:[#allocation7 + $0x124] ss:$24 sps:$4 sm:$0xff]  }
 0x1bb   :  { %13438 = vst [vmem:[#allocation63_spill] sm:$0xff] %v10041_v32 }
 0x1bc   :  { %v1270_v9 = vpop.f32.mrb[16].mxu1 }
 0x1bd   :  { %v1359_v26 = vadd.f32 %v1270_v9, %v322_v15  ;;  %v1272_v7 = vpop.f32.mrb[17].mxu1 }
 0x1be   :  { %v1360_v21 = vadd.f32 %v1272_v7, %v324_v30  ;;  %v1274_v55 = vpop.f32.mrb[18].mxu1 }
 0x1bf   :  { %v1275_v1 = vpop.f32.mrb[19].mxu1  ;;  %v7067_v61 = vmul.f32 -1.442695, %v1359_v26 }
 0x1c0   :  { %v7068_v5 = vmul.f32 -1.442695, %v1360_v21 }
 0x1c1   :  { %8307 = vpow2.f32 %v7067_v61 }
 0x1c2   :  { %8309 = vpow2.f32 %v7068_v5 }
 0x1cb   :  { %v8308_v60 = vpop.eup %8307 }
 0x1cc   :  { %v8310_v30 = vpop.eup %8309  ;;  %v1375_v7 = vadd.f32 1.0, %v8308_v60 }
 0x1cd   :  { %v1376_v1 = vadd.f32 1.0, %v8310_v30 }
 0x1ce   :  { %8311 = vrcp.f32 %v1375_v7 }
 0x1cf   :  { %8313 = vrcp.f32 %v1376_v1 }
 0x1d8   :  { %v8312_v62 = vpop.eup %8311 }
 0x1d9   :  { %v8314_v5 = vpop.eup %8313 }
 0x1db   :  { %v1311_v47 = vpop.f32.mrb[32].mxu0 }
 0x1dc   :  { %v1361_v32 = vadd.f32 %v1311_v47, %v435_v49  ;;  %v1313_v11 = vpop.f32.mrb[33].mxu0  ;;  %v548_v49 = vadd.f32 %v9980_v12, %v9994_v34 }
 0x1dd   :  { %v1362_v50 = vadd.f32 %v1313_v11, %v437_v51  ;;  %v1315_v58 = vpop.f32.mrb[34].mxu0 }
 0x1de   :  { %v1316_v56 = vpop.f32.mrb[35].mxu0  ;;  %v7069_v15 = vmul.f32 -1.442695, %v1361_v32  ;;  %v550_v58 = vadd.f32 %v9986_v29, %v9999_v14 }
 0x1df   :  { %v7070_v9 = vmul.f32 -1.442695, %v1362_v50 }
 0x1e0   :  { %8315 = vpow2.f32 %v7069_v15 }
 0x1e1   :  { %8317 = vpow2.f32 %v7070_v9 }
 0x1ea   :  { %v8316_v11 = vpop.eup %8315 }
 0x1eb   :  { %v8318_v55 = vpop.eup %8317  ;;  %v1377_v60 = vadd.f32 1.0, %v8316_v11  ;;  %v10075_v11 = vld [vmem:[#allocation7 + $0x10] ss:$24 sps:$4 sm:$0xff]  }
 0x1ec   :  { %v1378_v7 = vadd.f32 1.0, %v8318_v55  ;;  %v10084_v55 = vld [vmem:[#allocation7 + $0x34] ss:$24 sps:$4 sm:$0xff]  }
 0x1fc   :  { %v1352_v21 = vpop.f32.mrb[20].mxu1 }
 0x1fd   :  { %v1387_v26 = vadd.f32 %v1352_v21, %v10052_v57  ;;  %v1354_v61 = vpop.f32.mrb[21].mxu1 }
 0x1fe   :  { %v1388_v51 = vadd.f32 %v1354_v61, %v10055_v59  ;;  %v1356_v32 = vpop.f32.mrb[22].mxu1 }
 0x1ff   :  { %v1389_v47 = vmul.f32 %v8312_v62, %v1387_v26  ;;  %v1357_v50 = vpop.f32.mrb[23].mxu1  ;;  %v10081_v32 = vld [vmem:[#allocation7] ss:$24 sps:$4 sm:$0xff]  }
 0x200   :  { %v1390_v56 = vmul.f32 %v8314_v5, %v1388_v51  ;;  %v10078_v51 = vld [vmem:[#allocation7 + $0x44] ss:$24 sps:$4 sm:$0xff]   ;;  %v10093_v50 = vld [vmem:[#allocation7 + $0x30] ss:$24 sps:$4 sm:$0xff]  }
 0x201   :  { %v1391_v30 = vadd.f32 %v1389_v47, %v548_v49  ;;  %v10087_v49 = vld [vmem:[#allocation7 + $0x40] ss:$24 sps:$4 sm:$0xff]   ;;  %v10090_v47 = vld [vmem:[#allocation7 + $0x74] ss:$24 sps:$4 sm:$0xff]  }
 0x202   :  { %v1392_v1 = vadd.f32 %v1390_v56, %v550_v58  ;;  %v10096_v58 = vld [vmem:[#allocation7 + $0x64] ss:$24 sps:$4 sm:$0xff]   ;;  %v10099_v56 = vld [vmem:[#allocation7 + $0x70] ss:$24 sps:$4 sm:$0xff]  }
 0x203   :  { %8319 = vtanh.f32 %v1391_v30  ;;  %v10105_v30 = vld [vmem:[#allocation7 + $0x60] ss:$24 sps:$4 sm:$0xff]  }
 0x204   :  { %8321 = vtanh.f32 %v1392_v1  ;;  %v10111_v1 = vld [vmem:[#allocation7 + $0xa0] ss:$24 sps:$4 sm:$0xff]  }
 0x205   :  { %8323 = vrcp.f32 %v1377_v60  ;;  %v10102_v60 = vld [vmem:[#allocation7 + $0xa4] ss:$24 sps:$4 sm:$0xff]  }
 0x206   :  { %8325 = vrcp.f32 %v1378_v7  ;;  %v10108_v7 = vld [vmem:[#allocation7 + $0x94] ss:$24 sps:$4 sm:$0xff]  }
 0x20d   :  { %v8320_v15 = vpop.eup %8319 }
 0x20e   :  { %v8322_v9 = vpop.eup %8321  ;;  %v1395_v54 = vsub.f32 0.0, %v8320_v15 }
 0x20f   :  { %v8324_v21 = vpop.eup %8323  ;;  %v1396_v61 = vsub.f32 0.0, %v8322_v9 }
 0x210   :  { %v8326_v12 = vpop.eup %8325  ;;  %v1397_v34 = vmul.f32 %v8324_v21, %v1395_v54  ;;  %v10120_v54 = vld [vmem:[#allocation7 + $0xc4] ss:$24 sps:$4 sm:$0xff]   ;;  %v10123_v21 = vld [vmem:[#allocation7 + $0xd0] ss:$24 sps:$4 sm:$0xff]  }
 0x211   :  { %v1398_v62 = vmul.f32 %v8326_v12, %v1396_v61  ;;  %v10126_v61 = vld [vmem:[#allocation7 + $0x104] ss:$24 sps:$4 sm:$0xff]   ;;  %v10129_v12 = vld [vmem:[#allocation7 + $0xc0] ss:$24 sps:$4 sm:$0xff]  }
 0x212   :  { %v10063_v26 = vadd.f32 %v8320_v15, %v1397_v34  ;;  %v10114_v15 = vld [vmem:[#allocation7 + $0xd4] ss:$24 sps:$4 sm:$0xff]  }
 0x213   :  { %v10065_v29 = vadd.f32 %v8322_v9, %v1398_v62  ;;  %v10117_v9 = vld [vmem:[#allocation7 + $0x90] ss:$24 sps:$4 sm:$0xff]   ;;  %v10132_v34 = vld [vmem:[#allocation7 + $0xf4] ss:$24 sps:$4 sm:$0xff]   ;;  %v10135_v62 = vld [vmem:[#allocation7 + $0x100] ss:$24 sps:$4 sm:$0xff]  }
 0x214   :  { %13439 = vst [vmem:[#allocation64_spill] sm:$0xff] %v10063_v26  ;;  %v10071_v5 = vpack.c.bf16 %v10063_v26, %v10063_v26 }
 0x215   :  { %13440 = vst [vmem:[#allocation65_spill] sm:$0xff] %v10065_v29  ;;  %v1412_v14 = vpack.c.bf16 %v10065_v29, %v10065_v29 }
 0x217   :  { %1445 = vmatprep.mubr.bf16.mxu0 %v1412_v14  ;;  %1486 = vmatprep.mubr.bf16.mxu1 %v1412_v14 }
 0x218   :  { %1446 = vmatmul.mubr.bf16.vlgmr.msra.gmra.mrb[36].mxu0 %v10071_v5  ;;  %1487 = vmatmul.mubr.bf16.vlgmr.msra.gmra.mrb[24].mxu1 %v10071_v5 }
 0x219   :  { %1496 = vmatpush1.bf16.msra.mxu0 %v10075_v11  ;;  %1527 = vmatprep.mubr.bf16.mxu0 %v1412_v14  ;;  %v10138_v14 = vld [vmem:[#allocation7 + $0x134] ss:$24 sps:$4 sm:$0xff]  }
 0x21a   :  { %1497 = vmatprep.subr.bf16.mxu0 %v10078_v51  ;;  %1591 = vmatpush1.bf16.msra.mxu1 %v10081_v32 }
 0x21b   :  { %1592 = vmatprep.subr.bf16.mxu1 %v10084_v55 }
 0x21d   :  { %1498 = vmatpush1.bf16.msra.mxu0 %v10087_v49 }
 0x21e   :  { %1499 = vmatprep.subr.bf16.mxu0 %v10090_v47  ;;  %1593 = vmatpush1.bf16.msra.mxu1 %v10093_v50 }
 0x21f   :  { %1594 = vmatprep.subr.bf16.mxu1 %v10096_v58 }
 0x221   :  { %1500 = vmatpush1.bf16.msra.mxu0 %v10099_v56 }
 0x222   :  { %1501 = vmatprep.subr.bf16.mxu0 %v10102_v60  ;;  %1595 = vmatpush1.bf16.msra.mxu1 %v10105_v30 }
 0x223   :  { %1596 = vmatprep.subr.bf16.mxu1 %v10108_v7 }
 0x225   :  { %1502 = vmatpush1.bf16.msra.mxu0 %v10111_v1 }
 0x226   :  { %1503 = vmatprep.subr.bf16.mxu0 %v10114_v15  ;;  %1597 = vmatpush1.bf16.msra.mxu1 %v10117_v9 }
 0x227   :  { %1598 = vmatprep.subr.bf16.mxu1 %v10120_v54 }
 0x229   :  { %1504 = vmatpush1.bf16.msra.mxu0 %v10123_v21 }
 0x22a   :  { %1505 = vmatprep.subr.bf16.mxu0 %v10126_v61  ;;  %1599 = vmatpush1.bf16.msra.mxu1 %v10129_v12 }
 0x22b   :  { %1600 = vmatprep.subr.bf16.mxu1 %v10132_v34 }
 0x22d   :  { %1506 = vmatpush1.bf16.msra.mxu0 %v10135_v62 }
 0x22e   :  { %1507 = vmatprep.subr.bf16.mxu0 %v10138_v14  ;;  %1601 = vmatpush1.bf16.msra.mxu1 %v10141_v52 }
 0x22f   :  { %1602 = vmatprep.subr.bf16.mxu1 %v10144_v48 }
 0x231   :  { %1508 = vmatpush1.bf16.msra.mxu0 %v10147_v41 }
 0x232   :  { %1509 = vmatprep.subr.bf16.mxu0 %v10150_v46  ;;  %1603 = vmatpush1.bf16.msra.mxu1 %v10153_v36 }
 0x233   :  { %1604 = vmatprep.subr.bf16.mxu1 %v10156_v44 }
 0x235   :  { %1510 = vmatpush1.bf16.msra.mxu0 %v10159_v38 }
 0x236   :  { %1511 = vmatprep.subr.bf16.mxu0 %v10162_v39  ;;  %1605 = vmatpush1.bf16.msra.mxu1 %v10165_v22 }
 0x237   :  { %1606 = vmatprep.subr.bf16.mxu1 %v10168_v33 }
 0x239   :  { %1512 = vmatpush1.bf16.msra.mxu0 %v10171_v17 }
 0x23a   :  { %1513 = vmatprep.subr.bf16.mxu0 %v10174_v19  ;;  %1607 = vmatpush1.bf16.msra.mxu1 %v10177_v37 }
 0x23b   :  { %1608 = vmatprep.subr.bf16.mxu1 %v10180_v20 }
 0x23d   :  { %1514 = vmatpush1.bf16.msra.mxu0 %v10183_v23 }
 0x23e   :  { %1515 = vmatprep.subr.bf16.mxu0 %v10186_v16  ;;  %1609 = vmatpush1.bf16.msra.mxu1 %v10189_v27 }
 0x23f   :  { %1610 = vmatprep.subr.bf16.mxu1 %v10192_v2 }
 0x241   :  { %1516 = vmatpush1.bf16.msra.mxu0 %v10195_v53 }
 0x242   :  { %1517 = vmatprep.subr.bf16.mxu0 %v10198_v43  ;;  %1611 = vmatpush1.bf16.msra.mxu1 %v10201_v28 }
 0x243   :  { %1612 = vmatprep.subr.bf16.mxu1 %v10204_v40 }
 0x245   :  { %1518 = vmatpush1.bf16.msra.mxu0 %v10207_v18 }
 0x246   :  { %1519 = vmatprep.subr.bf16.mxu0 %v10210_v42  ;;  %1613 = vmatpush1.bf16.msra.mxu1 %v10213_v35  ;;  %v10228_v42 = vld [vmem:[#allocation7 + $0x274] ss:$24 sps:$4 sm:$0xff]   ;;  %v10231_v35 = vld [vmem:[#allocation7 + $0x280] ss:$24 sps:$4 sm:$0xff]  }
 0x247   :  { %1614 = vmatprep.subr.bf16.mxu1 %v10216_v0  ;;  %13455 = vst [vmem:[#allocation80_spill] sm:$0xff] %v10228_v42  ;;  %13456 = vst [vmem:[#allocation81_spill] sm:$0xff] %v10231_v35  ;;  %v10234_v0 = vld [vmem:[#allocation7 + $0x2b4] ss:$24 sps:$4 sm:$0xff]  }
 0x248   :  { %13457 = vst [vmem:[#allocation82_spill] sm:$0xff] %v10234_v0 }
 0x249   :  { %1520 = vmatpush1.bf16.msra.mxu0 %v10219_v10  ;;  %v10237_v10 = vld [vmem:[#allocation7 + $0x270] ss:$24 sps:$4 sm:$0xff]  }
 0x24a   :  { %1521 = vmatprep.subr.bf16.mxu0 %v10222_v13  ;;  %1615 = vmatpush1.bf16.msra.mxu1 %v10225_v8  ;;  %13458 = vst [vmem:[#allocation83_spill] sm:$0xff] %v10237_v10  ;;  %v10240_v13 = vld [vmem:[#allocation7 + $0x2a4] ss:$24 sps:$4 sm:$0xff]   ;;  %v10243_v8 = vld [vmem:[#allocation7 + $0x2b0] ss:$24 sps:$4 sm:$0xff]  }
 0x24b   :  { %1616 = vmatprep.subr.bf16.mxu1 %v10228_v42  ;;  %13459 = vst [vmem:[#allocation84_spill] sm:$0xff] %v10240_v13  ;;  %13460 = vst [vmem:[#allocation85_spill] sm:$0xff] %v10243_v8  ;;  %v10246_v42 = vld [vmem:[#allocation7 + $0x2e4] ss:$24 sps:$4 sm:$0xff]  }
 0x24c   :  { %13461 = vst [vmem:[#allocation86_spill] sm:$0xff] %v10246_v42 }
 0x24d   :  { %1522 = vmatpush1.bf16.msra.mxu0 %v10231_v35  ;;  %v10249_v35 = vld [vmem:[#allocation7 + $0x2a0] ss:$24 sps:$4 sm:$0xff]  }
 0x24e   :  { %1523 = vmatprep.subr.bf16.mxu0 %v10234_v0  ;;  %1617 = vmatpush1.bf16.msra.mxu1 %v10237_v10  ;;  %13462 = vst [vmem:[#allocation87_spill] sm:$0xff] %v10249_v35  ;;  %v10252_v0 = vld [vmem:[#allocation7 + $0x2d4] ss:$24 sps:$4 sm:$0xff]  }
 0x24f   :  { %1618 = vmatprep.subr.bf16.mxu1 %v10240_v13  ;;  %13463 = vst [vmem:[#allocation88_spill] sm:$0xff] %v10252_v0  ;;  %v10256_v10 = vld [vmem:[#allocation7 + $0xc] ss:$24 sps:$4 sm:$0xff]   ;;  %v10259_v13 = vld [vmem:[#allocation7 + $0x2d0] ss:$24 sps:$4 sm:$0xff]  }
 0x250   :  { %13464 = vst [vmem:[#allocation89_spill] sm:$0xff] %v10256_v10  ;;  %13465 = vst [vmem:[#allocation90_spill] sm:$0xff] %v10259_v13 }
 0x251   :  { %1524 = vmatpush1.bf16.msra.mxu0 %v10243_v8  ;;  %v10262_v8 = vld [vmem:[#allocation7 + $0x14] ss:$24 sps:$4 sm:$0xff]  }
 0x252   :  { %1525 = vmatprep.subr.bf16.mxu0 %v10246_v42  ;;  %1619 = vmatpush1.bf16.msra.mxu1 %v10249_v35  ;;  %13466 = vst [vmem:[#allocation91_spill] sm:$0xff] %v10262_v8  ;;  %v10266_v35 = vld [vmem:[#allocation7 + $0x8] ss:$24 sps:$4 sm:$0xff]  }
 0x253   :  { %1620 = vmatprep.subr.bf16.mxu1 %v10252_v0  ;;  %13467 = vst [vmem:[#allocation92_spill] sm:$0xff] %v10266_v35  ;;  %v10269_v0 = vld [vmem:[#allocation7 + $0x3c] ss:$24 sps:$4 sm:$0xff]  }
 0x254   :  { %13468 = vst [vmem:[#allocation93_spill] sm:$0xff] %v10269_v0 }
 0x255   :  { %1526 = vmatpush1.bf16.msra.mxu0 %v9804_v24  ;;  %v10272_v24 = vld [vmem:[#allocation7 + $0x38] ss:$24 sps:$4 sm:$0xff]  }
 0x256   :  { %1631 = vmatprep.subr.bf16.mxu0 %v10256_v10  ;;  %1621 = vmatpush1.bf16.msra.mxu1 %v10259_v13  ;;  %13469 = vst [vmem:[#allocation94_spill] sm:$0xff] %v10272_v24  ;;  %v10275_v10 = vld [vmem:[#allocation7 + $0x6c] ss:$24 sps:$4 sm:$0xff]   ;;  %v10278_v13 = vld [vmem:[#allocation7 + $0x68] ss:$24 sps:$4 sm:$0xff]  }
 0x257   :  { %1672 = vmatprep.subr.bf16.mxu1 %v10262_v8  ;;  %13470 = vst [vmem:[#allocation95_spill] sm:$0xff] %v10275_v10  ;;  %13471 = vst [vmem:[#allocation96_spill] sm:$0xff] %v10278_v13 }
 0x258   :  { %1528 = vmatmul.mubr.bf16.vlgmr.msra.gmra.mrb[40].mxu0 %v10071_v5  ;;  %v10281_v5 = vld [vmem:[#allocation7 + $0x9c] ss:$24 sps:$4 sm:$0xff]  }
 0x259   :  { %1632 = vmatpush1.bf16.msra.mxu0 %v10266_v35  ;;  %13472 = vst [vmem:[#allocation97_spill] sm:$0xff] %v10281_v5  ;;  %v10284_v35 = vld [vmem:[#allocation7 + $0x98] ss:$24 sps:$4 sm:$0xff]  }
 0x25a   :  { %1633 = vmatprep.subr.bf16.mxu0 %v10269_v0  ;;  %13473 = vst [vmem:[#allocation98_spill] sm:$0xff] %v10284_v35  ;;  %v10287_v0 = vld [vmem:[#allocation7 + $0xcc] ss:$24 sps:$4 sm:$0xff]  }
 0x25b   :  { %13474 = vst [vmem:[#allocation99_spill] sm:$0xff] %v10287_v0 }
 0x25d   :  { %1634 = vmatpush1.bf16.msra.mxu0 %v10272_v24  ;;  %v10290_v24 = vld [vmem:[#allocation7 + $0xc8] ss:$24 sps:$4 sm:$0xff]  }
 0x25e   :  { %1635 = vmatprep.subr.bf16.mxu0 %v10275_v10  ;;  %13475 = vst [vmem:[#allocation100_spill] sm:$0xff] %v10290_v24  ;;  %v10293_v10 = vld [vmem:[#allocation7 + $0xfc] ss:$24 sps:$4 sm:$0xff]  }
 0x25f   :  { %13476 = vst [vmem:[#allocation101_spill] sm:$0xff] %v10293_v10 }
 0x261   :  { %1636 = vmatpush1.bf16.msra.mxu0 %v10278_v13  ;;  %v10296_v13 = vld [vmem:[#allocation7 + $0xf8] ss:$24 sps:$4 sm:$0xff]  }
 0x262   :  { %1637 = vmatprep.subr.bf16.mxu0 %v10281_v5  ;;  %13477 = vst [vmem:[#allocation102_spill] sm:$0xff] %v10296_v13  ;;  %v10299_v5 = vld [vmem:[#allocation7 + $0x12c] ss:$24 sps:$4 sm:$0xff]  }
 0x263   :  { %13478 = vst [vmem:[#allocation103_spill] sm:$0xff] %v10299_v5 }
 0x265   :  { %1638 = vmatpush1.bf16.msra.mxu0 %v10284_v35  ;;  %v10302_v35 = vld [vmem:[#allocation7 + $0x128] ss:$24 sps:$4 sm:$0xff]  }
 0x266   :  { %1639 = vmatprep.subr.bf16.mxu0 %v10287_v0  ;;  %13479 = vst [vmem:[#allocation104_spill] sm:$0xff] %v10302_v35  ;;  %v10305_v0 = vld [vmem:[#allocation7 + $0x15c] ss:$24 sps:$4 sm:$0xff]  }
 0x267   :  { %13480 = vst [vmem:[#allocation105_spill] sm:$0xff] %v10305_v0 }
 0x269   :  { %1640 = vmatpush1.bf16.msra.mxu0 %v10290_v24  ;;  %v10308_v24 = vld [vmem:[#allocation7 + $0x158] ss:$24 sps:$4 sm:$0xff]  }
 0x26a   :  { %1641 = vmatprep.subr.bf16.mxu0 %v10293_v10  ;;  %13481 = vst [vmem:[#allocation106_spill] sm:$0xff] %v10308_v24  ;;  %v10311_v10 = vld [vmem:[#allocation7 + $0x18c] ss:$24 sps:$4 sm:$0xff]  }
 0x26b   :  { %13482 = vst [vmem:[#allocation107_spill] sm:$0xff] %v10311_v10 }
 0x26d   :  { %1642 = vmatpush1.bf16.msra.mxu0 %v10296_v13  ;;  %v10314_v13 = vld [vmem:[#allocation7 + $0x188] ss:$24 sps:$4 sm:$0xff]  }
 0x26e   :  { %1643 = vmatprep.subr.bf16.mxu0 %v10299_v5  ;;  %13483 = vst [vmem:[#allocation108_spill] sm:$0xff] %v10314_v13  ;;  %v10317_v5 = vld [vmem:[#allocation7 + $0x1bc] ss:$24 sps:$4 sm:$0xff]  }
 0x26f   :  { %13484 = vst [vmem:[#allocation109_spill] sm:$0xff] %v10317_v5 }
 0x271   :  { %1644 = vmatpush1.bf16.msra.mxu0 %v10302_v35  ;;  %v10320_v35 = vld [vmem:[#allocation7 + $0x1b8] ss:$24 sps:$4 sm:$0xff]  }
 0x272   :  { %1645 = vmatprep.subr.bf16.mxu0 %v10305_v0  ;;  %13485 = vst [vmem:[#allocation110_spill] sm:$0xff] %v10320_v35  ;;  %v10323_v0 = vld [vmem:[#allocation7 + $0x1ec] ss:$24 sps:$4 sm:$0xff]  }
 0x273   :  { %13486 = vst [vmem:[#allocation111_spill] sm:$0xff] %v10323_v0 }
 0x275   :  { %1646 = vmatpush1.bf16.msra.mxu0 %v10308_v24  ;;  %v10326_v24 = vld [vmem:[#allocation7 + $0x1e8] ss:$24 sps:$4 sm:$0xff]  }
 0x276   :  { %1647 = vmatprep.subr.bf16.mxu0 %v10311_v10  ;;  %13487 = vst [vmem:[#allocation112_spill] sm:$0xff] %v10326_v24  ;;  %v10329_v10 = vld [vmem:[#allocation7 + $0x21c] ss:$24 sps:$4 sm:$0xff]  }
 0x277   :  { %13488 = vst [vmem:[#allocation113_spill] sm:$0xff] %v10329_v10 }
 0x279   :  { %1648 = vmatpush1.bf16.msra.mxu0 %v10314_v13  ;;  %v10332_v13 = vld [vmem:[#allocation7 + $0x218] ss:$24 sps:$4 sm:$0xff]  }
 0x27a   :  { %1649 = vmatprep.subr.bf16.mxu0 %v10317_v5  ;;  %13489 = vst [vmem:[#allocation114_spill] sm:$0xff] %v10332_v13  ;;  %v10335_v5 = vld [vmem:[#allocation7 + $0x24c] ss:$24 sps:$4 sm:$0xff]  }
 0x27b   :  { %13490 = vst [vmem:[#allocation115_spill] sm:$0xff] %v10335_v5 }
 0x27d   :  { %1650 = vmatpush1.bf16.msra.mxu0 %v10320_v35  ;;  %v10338_v35 = vld [vmem:[#allocation7 + $0x248] ss:$24 sps:$4 sm:$0xff]  }
 0x27e   :  { %1651 = vmatprep.subr.bf16.mxu0 %v10323_v0  ;;  %13491 = vst [vmem:[#allocation116_spill] sm:$0xff] %v10338_v35  ;;  %v10341_v0 = vld [vmem:[#allocation7 + $0x27c] ss:$24 sps:$4 sm:$0xff]  }
 0x27f   :  { %13492 = vst [vmem:[#allocation117_spill] sm:$0xff] %v10341_v0 }
 0x281   :  { %1652 = vmatpush1.bf16.msra.mxu0 %v10326_v24  ;;  %v10344_v24 = vld [vmem:[#allocation7 + $0x278] ss:$24 sps:$4 sm:$0xff]  }
 0x282   :  { %1653 = vmatprep.subr.bf16.mxu0 %v10329_v10  ;;  %13493 = vst [vmem:[#allocation118_spill] sm:$0xff] %v10344_v24  ;;  %v10347_v10 = vld [vmem:[#allocation7 + $0x2ac] ss:$24 sps:$4 sm:$0xff]  }
 0x283   :  { %13494 = vst [vmem:[#allocation119_spill] sm:$0xff] %v10347_v10 }
 0x285   :  { %1654 = vmatpush1.bf16.msra.mxu0 %v10332_v13  ;;  %v10350_v13 = vld [vmem:[#allocation7 + $0x2a8] ss:$24 sps:$4 sm:$0xff]  }
 0x286   :  { %1655 = vmatprep.subr.bf16.mxu0 %v10335_v5  ;;  %13495 = vst [vmem:[#allocation120_spill] sm:$0xff] %v10350_v13  ;;  %v10353_v5 = vld [vmem:[#allocation7 + $0x2dc] ss:$24 sps:$4 sm:$0xff]  }
 0x287   :  { %13496 = vst [vmem:[#allocation121_spill] sm:$0xff] %v10353_v5 }
 0x289   :  { %1656 = vmatpush1.bf16.msra.mxu0 %v10338_v35  ;;  %v10356_v35 = vld [vmem:[#allocation7 + $0x2d8] ss:$24 sps:$4 sm:$0xff]  }
 0x28a   :  { %1657 = vmatprep.subr.bf16.mxu0 %v10341_v0  ;;  %13497 = vst [vmem:[#allocation122_spill] sm:$0xff] %v10356_v35 }
 0x28d   :  { %1658 = vmatpush1.bf16.msra.mxu0 %v10344_v24 }
 0x28e   :  { %1659 = vmatprep.subr.bf16.mxu0 %v10347_v10 }
 0x291   :  { %1660 = vmatpush1.bf16.msra.mxu0 %v10350_v13 }
 0x292   :  { %1661 = vmatprep.subr.bf16.mxu0 %v10353_v5 }
 0x295   :  { %1662 = vmatpush1.bf16.msra.mxu0 %v10356_v35 }
 0x296   :  { %1767 = vmatprep.subr.bf16.mxu0 %v9860_v45 }
 0x2eb   :  { %v1447_v0 = vpop.f32.mrb[36].mxu0  ;;  %v1488_v24 = vpop.f32.mrb[24].mxu1 }
 0x2ec   :  { %v1536_v8 = vadd.f32 %v1447_v0, %v9902_v63  ;;  %v1538_v10 = vadd.f32 %v1488_v24, %v9908_v4  ;;  %v1449_v42 = vpop.f32.mrb[37].mxu0  ;;  %v1490_v18 = vpop.f32.mrb[25].mxu1 }
 0x2ed   :  { %v1537_v13 = vadd.f32 %v1449_v42, %v9905_v3  ;;  %v1539_v40 = vadd.f32 %v1490_v18, %v9911_v6  ;;  %v1451_v28 = vpop.f32.mrb[38].mxu0  ;;  %v1492_v5 = vpop.f32.mrb[26].mxu1 }
 0x2ee   :  { %v1452_v43 = vpop.f32.mrb[39].mxu0  ;;  %v1493_v53 = vpop.f32.mrb[27].mxu1  ;;  %v7071_v2 = vmul.f32 -1.442695, %v1536_v8  ;;  %v7073_v16 = vmul.f32 -1.442695, %v1538_v10 }
 0x2ef   :  { %v7072_v35 = vmul.f32 -1.442695, %v1537_v13  ;;  %v7074_v63 = vmul.f32 -1.442695, %v1539_v40 }
 0x2f0   :  { %8327 = vpow2.f32 %v7071_v2 }
 0x2f1   :  { %8329 = vpow2.f32 %v7072_v35 }
 0x2f2   :  { %8331 = vpow2.f32 %v7073_v16 }
 0x2f3   :  { %8333 = vpow2.f32 %v7074_v63 }
 0x2fa   :  { %v8328_v45 = vpop.eup %8327 }
 0x2fb   :  { %v8330_v27 = vpop.eup %8329  ;;  %v1552_v0 = vadd.f32 1.0, %v8328_v45 }
 0x2fc   :  { %v1553_v4 = vadd.f32 1.0, %v8330_v27  ;;  %v8332_v3 = vpop.eup %8331 }
 0x2fd   :  { %8335 = vrcp.f32 %v1552_v0  ;;  %v8334_v18 = vpop.eup %8333  ;;  %v1554_v45 = vadd.f32 1.0, %v8332_v3 }
 0x2fe   :  { %8337 = vrcp.f32 %v1553_v4  ;;  %v1555_v16 = vadd.f32 1.0, %v8334_v18 }
 0x307   :  { %v8336_v8 = vpop.eup %8335 }
 0x308   :  { %v8338_v42 = vpop.eup %8337 }
 0x32b   :  { %v1529_v6 = vpop.f32.mrb[40].mxu0 }
 0x32c   :  { %v1564_v28 = vadd.f32 %v1529_v6, %v10052_v57  ;;  %v1531_v43 = vpop.f32.mrb[41].mxu0 }
 0x32d   :  { %v1565_v13 = vadd.f32 %v1531_v43, %v10055_v59  ;;  %v1533_v35 = vpop.f32.mrb[42].mxu0 }
 0x32e   :  { %v1566_v53 = vmul.f32 %v8336_v8, %v1564_v28  ;;  %v1534_v10 = vpop.f32.mrb[43].mxu0  ;;  %v13500_v8 = vld [vmem:[#allocation66_spill] sm:$0xff]  ;;  %v13502_v35 = vld [vmem:[#allocation68_spill] sm:$0xff] }
 0x32f   :  { %v1567_v40 = vmul.f32 %v8338_v42, %v1565_v13  ;;  %v13501_v13 = vld [vmem:[#allocation67_spill] sm:$0xff]  ;;  %v13503_v42 = vld [vmem:[#allocation69_spill] sm:$0xff] }
 0x330   :  { %v1568_v27 = vadd.f32 %v1566_v53, %v10002_v25  ;;  %v13504_v53 = vld [vmem:[#allocation70_spill] sm:$0xff]  ;;  %v13505_v10 = vld [vmem:[#allocation71_spill] sm:$0xff] }
 0x331   :  { %v1569_v2 = vadd.f32 %v1567_v40, %v10005_v31  ;;  %v13506_v40 = vld [vmem:[#allocation72_spill] sm:$0xff] }
 0x332   :  { %8339 = vtanh.f32 %v1568_v27  ;;  %v13508_v27 = vld [vmem:[#allocation74_spill] sm:$0xff] }
 0x333   :  { %8341 = vtanh.f32 %v1569_v2  ;;  %v13510_v2 = vld [vmem:[#allocation76_spill] sm:$0xff] }
 0x334   :  { %8343 = vrcp.f32 %v1554_v45  ;;  %v13507_v45 = vld [vmem:[#allocation73_spill] sm:$0xff] }
 0x335   :  { %8345 = vrcp.f32 %v1555_v16  ;;  %v13509_v16 = vld [vmem:[#allocation75_spill] sm:$0xff] }
 0x33c   :  { %v8340_v24 = vpop.eup %8339 }
 0x33d   :  { %v8342_v5 = vpop.eup %8341  ;;  %v1572_v63 = vsub.f32 %v10063_v26, %v8340_v24  ;;  %v13521_v26 = vld [vmem:[#allocation87_spill] sm:$0xff] }
 0x33e   :  { %v8344_v0 = vpop.eup %8343  ;;  %v1573_v4 = vsub.f32 %v10065_v29, %v8342_v5  ;;  %v13520_v29 = vld [vmem:[#allocation86_spill] sm:$0xff] }
 0x33f   :  { %v8346_v6 = vpop.eup %8345  ;;  %v1574_v28 = vmul.f32 %v8344_v0, %v1572_v63  ;;  %v13513_v63 = vld [vmem:[#allocation79_spill] sm:$0xff]  ;;  %v13514_v0 = vld [vmem:[#allocation80_spill] sm:$0xff] }
 0x340   :  { %v1575_v43 = vmul.f32 %v8346_v6, %v1573_v4  ;;  %v13515_v4 = vld [vmem:[#allocation81_spill] sm:$0xff]  ;;  %v13516_v6 = vld [vmem:[#allocation82_spill] sm:$0xff] }
 0x341   :  { %v10370_v3 = vadd.f32 %v8340_v24, %v1574_v28  ;;  %v13511_v24 = vld [vmem:[#allocation77_spill] sm:$0xff]  ;;  %v13517_v28 = vld [vmem:[#allocation83_spill] sm:$0xff] }
 0x342   :  { %v10372_v25 = vadd.f32 %v8342_v5, %v1575_v43  ;;  %v13512_v5 = vld [vmem:[#allocation78_spill] sm:$0xff]  ;;  %v13518_v43 = vld [vmem:[#allocation84_spill] sm:$0xff] }
 0x343   :  { %13498 = vst [vmem:[#allocation123_spill] sm:$0xff] %v10370_v3  ;;  %v10378_v18 = vpack.c.bf16 %v10370_v3, %v10370_v3 }
 0x344   :  { %13499 = vst [vmem:[#allocation124_spill] sm:$0xff] %v10372_v25  ;;  %v1589_v31 = vpack.c.bf16 %v10372_v25, %v10372_v25 }
 0x346   :  { %1622 = vmatprep.mubr.bf16.mxu1 %v1589_v31  ;;  %1663 = vmatprep.mubr.bf16.mxu0 %v1589_v31 }
 0x347   :  { %1623 = vmatmul.mubr.bf16.vlgmr.msra.gmra.mrb[28].mxu1 %v10378_v18  ;;  %1664 = vmatmul.mubr.bf16.vlgmr.msra.gmra.mrb[44].mxu0 %v10378_v18 }
 0x348   :  { %1673 = vmatpush1.bf16.msra.mxu1 %v10075_v11  ;;  %1704 = vmatprep.mubr.bf16.mxu1 %v1589_v31  ;;  %v13519_v31 = vld [vmem:[#allocation85_spill] sm:$0xff] }
 0x349   :  { %1674 = vmatprep.subr.bf16.mxu1 %v10078_v51  ;;  %1768 = vmatpush1.bf16.msra.mxu0 %v10081_v32 }
 0x34a   :  { %1769 = vmatprep.subr.bf16.mxu0 %v10084_v55 }
 0x34c   :  { %1675 = vmatpush1.bf16.msra.mxu1 %v10087_v49 }
 0x34d   :  { %1676 = vmatprep.subr.bf16.mxu1 %v10090_v47  ;;  %1770 = vmatpush1.bf16.msra.mxu0 %v10093_v50 }
 0x34e   :  { %1771 = vmatprep.subr.bf16.mxu0 %v10096_v58 }
 0x350   :  { %1677 = vmatpush1.bf16.msra.mxu1 %v10099_v56 }
 0x351   :  { %1678 = vmatprep.subr.bf16.mxu1 %v10102_v60  ;;  %1772 = vmatpush1.bf16.msra.mxu0 %v10105_v30 }
 0x352   :  { %1773 = vmatprep.subr.bf16.mxu0 %v10108_v7 }
 0x354   :  { %1679 = vmatpush1.bf16.msra.mxu1 %v10111_v1 }
 0x355   :  { %1680 = vmatprep.subr.bf16.mxu1 %v10114_v15  ;;  %1774 = vmatpush1.bf16.msra.mxu0 %v10117_v9 }
 0x356   :  { %1775 = vmatprep.subr.bf16.mxu0 %v10120_v54 }
 0x358   :  { %1681 = vmatpush1.bf16.msra.mxu1 %v10123_v21 }
 0x359   :  { %1682 = vmatprep.subr.bf16.mxu1 %v10126_v61  ;;  %1776 = vmatpush1.bf16.msra.mxu0 %v10129_v12 }
 0x35a   :  { %1777 = vmatprep.subr.bf16.mxu0 %v10132_v34 }
 0x35c   :  { %1683 = vmatpush1.bf16.msra.mxu1 %v10135_v62 }
 0x35d   :  { %1684 = vmatprep.subr.bf16.mxu1 %v10138_v14  ;;  %1778 = vmatpush1.bf16.msra.mxu0 %v10141_v52 }
 0x35e   :  { %1779 = vmatprep.subr.bf16.mxu0 %v10144_v48 }
 0x360   :  { %1685 = vmatpush1.bf16.msra.mxu1 %v10147_v41 }
 0x361   :  { %1686 = vmatprep.subr.bf16.mxu1 %v10150_v46  ;;  %1780 = vmatpush1.bf16.msra.mxu0 %v10153_v36 }
 0x362   :  { %1781 = vmatprep.subr.bf16.mxu0 %v10156_v44 }
 0x364   :  { %1687 = vmatpush1.bf16.msra.mxu1 %v10159_v38 }
 0x365   :  { %1688 = vmatprep.subr.bf16.mxu1 %v10162_v39  ;;  %1782 = vmatpush1.bf16.msra.mxu0 %v10165_v22 }
 0x366   :  { %1783 = vmatprep.subr.bf16.mxu0 %v10168_v33 }
 0x368   :  { %1689 = vmatpush1.bf16.msra.mxu1 %v10171_v17 }
 0x369   :  { %1690 = vmatprep.subr.bf16.mxu1 %v10174_v19  ;;  %1784 = vmatpush1.bf16.msra.mxu0 %v10177_v37 }
 0x36a   :  { %1785 = vmatprep.subr.bf16.mxu0 %v10180_v20 }
 0x36c   :  { %1691 = vmatpush1.bf16.msra.mxu1 %v10183_v23 }
 0x36d   :  { %1692 = vmatprep.subr.bf16.mxu1 %v13500_v8  ;;  %1786 = vmatpush1.bf16.msra.mxu0 %v13501_v13 }
 0x36e   :  { %1787 = vmatprep.subr.bf16.mxu0 %v13502_v35 }
 0x370   :  { %1693 = vmatpush1.bf16.msra.mxu1 %v13503_v42 }
 0x371   :  { %1694 = vmatprep.subr.bf16.mxu1 %v13504_v53  ;;  %1788 = vmatpush1.bf16.msra.mxu0 %v13505_v10 }
 0x372   :  { %1789 = vmatprep.subr.bf16.mxu0 %v13506_v40 }
 0x374   :  { %1695 = vmatpush1.bf16.msra.mxu1 %v13507_v45  ;;  %v13562_v45 = vld [vmem:[#allocation32_spill] sm:$0xff] }
 0x375   :  { %1696 = vmatprep.subr.bf16.mxu1 %v13508_v27  ;;  %1790 = vmatpush1.bf16.msra.mxu0 %v13509_v16  ;;  %v13561_v27 = vld [vmem:[#allocation29_spill] sm:$0xff] }
 0x376   :  { %1791 = vmatprep.subr.bf16.mxu0 %v13510_v2  ;;  %v13560_v2 = vld [vmem:[#allocation30_spill] sm:$0xff] }
 0x378   :  { %1697 = vmatpush1.bf16.msra.mxu1 %v13511_v24  ;;  %v13522_v24 = vld [vmem:[#allocation88_spill] sm:$0xff] }
 0x379   :  { %1698 = vmatprep.subr.bf16.mxu1 %v13512_v5  ;;  %1792 = vmatpush1.bf16.msra.mxu0 %v13513_v63  ;;  %v10442_v5 = vld [vmem:[#allocation7 + $0x2e0] ss:$24 sps:$4 sm:$0xff]   ;;  %v13559_v63 = vld [vmem:[#allocation28_spill] sm:$0xff] }
 0x37a   :  { %1793 = vmatprep.subr.bf16.mxu0 %v13514_v0  ;;  %13523 = vst [vmem:[#allocation66_spill] sm:$0xff] %v10442_v5  ;;  %v13524_v0 = vld [vmem:[#allocation89_spill] sm:$0xff] }
 0x37c   :  { %1699 = vmatpush1.bf16.msra.mxu1 %v13515_v4  ;;  %v13525_v4 = vld [vmem:[#allocation90_spill] sm:$0xff] }
 0x37d   :  { %1700 = vmatprep.subr.bf16.mxu1 %v13516_v6  ;;  %1794 = vmatpush1.bf16.msra.mxu0 %v13517_v28  ;;  %v13526_v6 = vld [vmem:[#allocation91_spill] sm:$0xff]  ;;  %v13532_v28 = vld [vmem:[#allocation97_spill] sm:$0xff] }
 0x37e   :  { %1795 = vmatprep.subr.bf16.mxu0 %v13518_v43  ;;  %v13527_v43 = vld [vmem:[#allocation92_spill] sm:$0xff] }
 0x380   :  { %1701 = vmatpush1.bf16.msra.mxu1 %v13519_v31  ;;  %v13528_v31 = vld [vmem:[#allocation93_spill] sm:$0xff] }
 0x381   :  { %1702 = vmatprep.subr.bf16.mxu1 %v13520_v29  ;;  %1796 = vmatpush1.bf16.msra.mxu0 %v13521_v26  ;;  %v13529_v29 = vld [vmem:[#allocation94_spill] sm:$0xff]  ;;  %v13530_v26 = vld [vmem:[#allocation95_spill] sm:$0xff] }
 0x382   :  { %1797 = vmatprep.subr.bf16.mxu0 %v13522_v24  ;;  %v13531_v24 = vld [vmem:[#allocation96_spill] sm:$0xff] }
 0x384   :  { %1703 = vmatpush1.bf16.msra.mxu1 %v10442_v5  ;;  %v13533_v5 = vld [vmem:[#allocation98_spill] sm:$0xff] }
 0x385   :  { %1808 = vmatprep.subr.bf16.mxu1 %v13524_v0  ;;  %1798 = vmatpush1.bf16.msra.mxu0 %v13525_v4  ;;  %v13534_v0 = vld [vmem:[#allocation99_spill] sm:$0xff]  ;;  %v13535_v4 = vld [vmem:[#allocation100_spill] sm:$0xff] }
 0x386   :  { %1849 = vmatprep.subr.bf16.mxu0 %v13526_v6  ;;  %v13536_v6 = vld [vmem:[#allocation101_spill] sm:$0xff] }
 0x387   :  { %1705 = vmatmul.mubr.bf16.vlgmr.msra.gmra.mrb[32].mxu1 %v10378_v18  ;;  %v13537_v18 = vld [vmem:[#allocation102_spill] sm:$0xff] }
 0x388   :  { %1809 = vmatpush1.bf16.msra.mxu1 %v13527_v43  ;;  %v13538_v43 = vld [vmem:[#allocation103_spill] sm:$0xff] }
 0x389   :  { %1810 = vmatprep.subr.bf16.mxu1 %v13528_v31  ;;  %v13539_v31 = vld [vmem:[#allocation104_spill] sm:$0xff] }
 0x38c   :  { %1811 = vmatpush1.bf16.msra.mxu1 %v13529_v29  ;;  %v13540_v29 = vld [vmem:[#allocation105_spill] sm:$0xff] }
 0x38d   :  { %1812 = vmatprep.subr.bf16.mxu1 %v13530_v26  ;;  %v13541_v26 = vld [vmem:[#allocation106_spill] sm:$0xff] }
 0x390   :  { %1813 = vmatpush1.bf16.msra.mxu1 %v13531_v24  ;;  %v13542_v24 = vld [vmem:[#allocation107_spill] sm:$0xff] }
 0x391   :  { %1814 = vmatprep.subr.bf16.mxu1 %v13532_v28  ;;  %v13543_v28 = vld [vmem:[#allocation108_spill] sm:$0xff] }
 0x394   :  { %1815 = vmatpush1.bf16.msra.mxu1 %v13533_v5  ;;  %v13544_v5 = vld [vmem:[#allocation109_spill] sm:$0xff] }
 0x395   :  { %1816 = vmatprep.subr.bf16.mxu1 %v13534_v0  ;;  %v13545_v0 = vld [vmem:[#allocation110_spill] sm:$0xff] }
 0x398   :  { %1817 = vmatpush1.bf16.msra.mxu1 %v13535_v4  ;;  %v13546_v4 = vld [vmem:[#allocation111_spill] sm:$0xff] }
 0x399   :  { %1818 = vmatprep.subr.bf16.mxu1 %v13536_v6  ;;  %v13547_v6 = vld [vmem:[#allocation112_spill] sm:$0xff] }
 0x39c   :  { %1819 = vmatpush1.bf16.msra.mxu1 %v13537_v18  ;;  %v13548_v18 = vld [vmem:[#allocation113_spill] sm:$0xff] }
 0x39d   :  { %1820 = vmatprep.subr.bf16.mxu1 %v13538_v43  ;;  %v13549_v43 = vld [vmem:[#allocation114_spill] sm:$0xff] }
 0x3a0   :  { %1821 = vmatpush1.bf16.msra.mxu1 %v13539_v31  ;;  %v13550_v31 = vld [vmem:[#allocation115_spill] sm:$0xff] }
 0x3a1   :  { %1822 = vmatprep.subr.bf16.mxu1 %v13540_v29  ;;  %v13551_v29 = vld [vmem:[#allocation116_spill] sm:$0xff] }
 0x3a4   :  { %1823 = vmatpush1.bf16.msra.mxu1 %v13541_v26  ;;  %v13552_v26 = vld [vmem:[#allocation117_spill] sm:$0xff] }
 0x3a5   :  { %1824 = vmatprep.subr.bf16.mxu1 %v13542_v24  ;;  %v13553_v24 = vld [vmem:[#allocation118_spill] sm:$0xff] }
 0x3a8   :  { %1825 = vmatpush1.bf16.msra.mxu1 %v13543_v28  ;;  %v13554_v28 = vld [vmem:[#allocation119_spill] sm:$0xff] }
 0x3a9   :  { %1826 = vmatprep.subr.bf16.mxu1 %v13544_v5  ;;  %v13555_v5 = vld [vmem:[#allocation120_spill] sm:$0xff] }
 0x3ac   :  { %1827 = vmatpush1.bf16.msra.mxu1 %v13545_v0  ;;  %v13556_v0 = vld [vmem:[#allocation121_spill] sm:$0xff] }
 0x3ad   :  { %1828 = vmatprep.subr.bf16.mxu1 %v13546_v4  ;;  %v13557_v4 = vld [vmem:[#allocation122_spill] sm:$0xff] }
 0x3b0   :  { %1829 = vmatpush1.bf16.msra.mxu1 %v13547_v6  ;;  %v13558_v6 = vld [vmem:[#allocation24_spill] sm:$0xff] }
 0x3b1   :  { %1830 = vmatprep.subr.bf16.mxu1 %v13548_v18 }
 0x3b4   :  { %1831 = vmatpush1.bf16.msra.mxu1 %v13549_v43 }
 0x3b5   :  { %1832 = vmatprep.subr.bf16.mxu1 %v13550_v31 }
 0x3b8   :  { %1833 = vmatpush1.bf16.msra.mxu1 %v13551_v29 }
 0x3b9   :  { %1834 = vmatprep.subr.bf16.mxu1 %v13552_v26 }
 0x3bc   :  { %1835 = vmatpush1.bf16.msra.mxu1 %v13553_v24 }
 0x3bd   :  { %1836 = vmatprep.subr.bf16.mxu1 %v13554_v28 }
 0x3c0   :  { %1837 = vmatpush1.bf16.msra.mxu1 %v13555_v5 }
 0x3c1   :  { %1838 = vmatprep.subr.bf16.mxu1 %v13556_v0 }
 0x3c4   :  { %1839 = vmatpush1.bf16.msra.mxu1 %v13557_v4 }
 0x3c5   :  { %1944 = vmatprep.subr.bf16.mxu1 %v13558_v6 }
 0x41a   :  { %v1624_v18 = vpop.f32.mrb[28].mxu1  ;;  %v1665_v43 = vpop.f32.mrb[44].mxu0 }
 0x41b   :  { %v1713_v31 = vadd.f32 %v1624_v18, %v13559_v63  ;;  %v1715_v29 = vadd.f32 %v1665_v43, %v13560_v2  ;;  %v1626_v16 = vpop.f32.mrb[29].mxu1  ;;  %v1667_v26 = vpop.f32.mrb[45].mxu0 }
 0x41c   :  { %v1714_v24 = vadd.f32 %v1626_v16, %v13561_v27  ;;  %v1716_v28 = vadd.f32 %v1667_v26, %v13562_v45  ;;  %v1628_v40 = vpop.f32.mrb[30].mxu1  ;;  %v1669_v5 = vpop.f32.mrb[46].mxu0 }
 0x41d   :  { %v1629_v10 = vpop.f32.mrb[31].mxu1  ;;  %v1670_v0 = vpop.f32.mrb[47].mxu0  ;;  %v7075_v53 = vmul.f32 -1.442695, %v1713_v31  ;;  %v7077_v35 = vmul.f32 -1.442695, %v1715_v29 }
 0x41e   :  { %v7076_v4 = vmul.f32 -1.442695, %v1714_v24  ;;  %v7078_v63 = vmul.f32 -1.442695, %v1716_v28  ;;  %v13564_v31 = vld [vmem:[#allocation53_spill] sm:$0xff] }
 0x41f   :  { %8347 = vpow2.f32 %v7075_v53 }
 0x420   :  { %8349 = vpow2.f32 %v7076_v4 }
 0x421   :  { %8351 = vpow2.f32 %v7077_v35 }
 0x422   :  { %8353 = vpow2.f32 %v7078_v63 }
 0x429   :  { %v8348_v6 = vpop.eup %8347 }
 0x42a   :  { %v8350_v42 = vpop.eup %8349  ;;  %v1729_v18 = vadd.f32 1.0, %v8348_v6 }
 0x42b   :  { %v1730_v2 = vadd.f32 1.0, %v8350_v42  ;;  %v8352_v27 = vpop.eup %8351  ;;  %v13563_v42 = vld [vmem:[#allocation52_spill] sm:$0xff] }
 0x42c   :  { %8355 = vrcp.f32 %v1729_v18  ;;  %v8354_v40 = vpop.eup %8353  ;;  %v1731_v28 = vadd.f32 1.0, %v8352_v27 }
 0x42d   :  { %8357 = vrcp.f32 %v1730_v2  ;;  %v1732_v43 = vadd.f32 1.0, %v8354_v40 }
 0x436   :  { %v8356_v16 = vpop.eup %8355 }
 0x437   :  { %v8358_v5 = vpop.eup %8357 }
 0x45a   :  { %v1706_v26 = vpop.f32.mrb[32].mxu1 }
 0x45b   :  { %v1741_v10 = vadd.f32 %v1706_v26, %v10052_v57  ;;  %v1708_v45 = vpop.f32.mrb[33].mxu1 }
 0x45c   :  { %v1742_v53 = vadd.f32 %v1708_v45, %v10055_v59  ;;  %v1710_v24 = vpop.f32.mrb[34].mxu1 }
 0x45d   :  { %v1743_v0 = vmul.f32 %v8356_v16, %v1741_v10  ;;  %v1711_v29 = vpop.f32.mrb[35].mxu1 }
 0x45e   :  { %v1744_v4 = vmul.f32 %v8358_v5, %v1742_v53  ;;  %v13568_v29 = vld [vmem:[#allocation69_spill] sm:$0xff] }
 0x45f   :  { %v1745_v35 = vadd.f32 %v1743_v0, %v13563_v42  ;;  %v13567_v0 = vld [vmem:[#allocation68_spill] sm:$0xff] }
 0x460   :  { %v1746_v6 = vadd.f32 %v1744_v4, %v13564_v31  ;;  %v13569_v4 = vld [vmem:[#allocation70_spill] sm:$0xff]  ;;  %v13571_v42 = vld [vmem:[#allocation72_spill] sm:$0xff]  ;;  %v13574_v31 = vld [vmem:[#allocation75_spill] sm:$0xff] }
 0x461   :  { %8359 = vtanh.f32 %v1745_v35  ;;  %v13572_v35 = vld [vmem:[#allocation73_spill] sm:$0xff] }
 0x462   :  { %8361 = vtanh.f32 %v1746_v6  ;;  %v13575_v6 = vld [vmem:[#allocation76_spill] sm:$0xff] }
 0x463   :  { %8363 = vrcp.f32 %v1731_v28  ;;  %v13570_v28 = vld [vmem:[#allocation71_spill] sm:$0xff] }
 0x464   :  { %8365 = vrcp.f32 %v1732_v43  ;;  %v13573_v43 = vld [vmem:[#allocation74_spill] sm:$0xff] }
 0x46b   :  { %v8360_v63 = vpop.eup %8359 }
 0x46c   :  { %v8362_v18 = vpop.eup %8361  ;;  %v1749_v2 = vsub.f32 %v10370_v3, %v8360_v63  ;;  %v13586_v3 = vld [vmem:[#allocation87_spill] sm:$0xff] }
 0x46d   :  { %v8364_v26 = vpop.eup %8363  ;;  %v1750_v45 = vsub.f32 %v10372_v25, %v8362_v18  ;;  %v13585_v25 = vld [vmem:[#allocation86_spill] sm:$0xff] }
 0x46e   :  { %v8366_v10 = vpop.eup %8365  ;;  %v1751_v16 = vmul.f32 %v8364_v26, %v1749_v2  ;;  %v13578_v2 = vld [vmem:[#allocation79_spill] sm:$0xff]  ;;  %v13579_v26 = vld [vmem:[#allocation80_spill] sm:$0xff] }
 0x46f   :  { %v1752_v53 = vmul.f32 %v8366_v10, %v1750_v45  ;;  %v13580_v45 = vld [vmem:[#allocation81_spill] sm:$0xff]  ;;  %v13581_v10 = vld [vmem:[#allocation82_spill] sm:$0xff] }
 0x470   :  { %v10491_v27 = vadd.f32 %v8360_v63, %v1751_v16  ;;  %v13576_v63 = vld [vmem:[#allocation77_spill] sm:$0xff]  ;;  %v13582_v16 = vld [vmem:[#allocation83_spill] sm:$0xff] }
 0x471   :  { %v10493_v24 = vadd.f32 %v8362_v18, %v1752_v53  ;;  %v13577_v18 = vld [vmem:[#allocation78_spill] sm:$0xff]  ;;  %v13583_v53 = vld [vmem:[#allocation84_spill] sm:$0xff] }
 0x472   :  { %13565 = vst [vmem:[#allocation67_spill] sm:$0xff] %v10491_v27  ;;  %v10499_v5 = vpack.c.bf16 %v10491_v27, %v10491_v27 }
 0x473   :  { %13566 = vst [vmem:[#allocation24_spill] sm:$0xff] %v10493_v24  ;;  %v1766_v40 = vpack.c.bf16 %v10493_v24, %v10493_v24 }
 0x475   :  { %1799 = vmatprep.mubr.bf16.mxu0 %v1766_v40  ;;  %1840 = vmatprep.mubr.bf16.mxu1 %v1766_v40 }
 0x476   :  { %1800 = vmatmul.mubr.bf16.vlgmr.msra.gmra.mrb[48].mxu0 %v10499_v5  ;;  %1841 = vmatmul.mubr.bf16.vlgmr.msra.gmra.mrb[36].mxu1 %v10499_v5 }
 0x477   :  { %1850 = vmatpush1.bf16.msra.mxu0 %v10075_v11  ;;  %1881 = vmatprep.mubr.bf16.mxu0 %v1766_v40  ;;  %v13584_v40 = vld [vmem:[#allocation85_spill] sm:$0xff] }
 0x478   :  { %1851 = vmatprep.subr.bf16.mxu0 %v10078_v51  ;;  %1945 = vmatpush1.bf16.msra.mxu1 %v10081_v32 }
 0x479   :  { %1946 = vmatprep.subr.bf16.mxu1 %v10084_v55 }
 0x47b   :  { %1852 = vmatpush1.bf16.msra.mxu0 %v10087_v49 }
 0x47c   :  { %1853 = vmatprep.subr.bf16.mxu0 %v10090_v47  ;;  %1947 = vmatpush1.bf16.msra.mxu1 %v10093_v50 }
 0x47d   :  { %1948 = vmatprep.subr.bf16.mxu1 %v10096_v58 }
 0x47f   :  { %1854 = vmatpush1.bf16.msra.mxu0 %v10099_v56 }
 0x480   :  { %1855 = vmatprep.subr.bf16.mxu0 %v10102_v60  ;;  %1949 = vmatpush1.bf16.msra.mxu1 %v10105_v30 }
 0x481   :  { %1950 = vmatprep.subr.bf16.mxu1 %v10108_v7 }
 0x483   :  { %1856 = vmatpush1.bf16.msra.mxu0 %v10111_v1 }
 0x484   :  { %1857 = vmatprep.subr.bf16.mxu0 %v10114_v15  ;;  %1951 = vmatpush1.bf16.msra.mxu1 %v10117_v9 }
 0x485   :  { %1952 = vmatprep.subr.bf16.mxu1 %v10120_v54 }
 0x487   :  { %1858 = vmatpush1.bf16.msra.mxu0 %v10123_v21 }
 0x488   :  { %1859 = vmatprep.subr.bf16.mxu0 %v10126_v61  ;;  %1953 = vmatpush1.bf16.msra.mxu1 %v10129_v12 }
 0x489   :  { %1954 = vmatprep.subr.bf16.mxu1 %v10132_v34 }
 0x48b   :  { %1860 = vmatpush1.bf16.msra.mxu0 %v10135_v62 }
 0x48c   :  { %1861 = vmatprep.subr.bf16.mxu0 %v10138_v14  ;;  %1955 = vmatpush1.bf16.msra.mxu1 %v10141_v52 }
 0x48d   :  { %1956 = vmatprep.subr.bf16.mxu1 %v10144_v48 }
 0x48f   :  { %1862 = vmatpush1.bf16.msra.mxu0 %v10147_v41 }
 0x490   :  { %1863 = vmatprep.subr.bf16.mxu0 %v10150_v46  ;;  %1957 = vmatpush1.bf16.msra.mxu1 %v10153_v36 }
 0x491   :  { %1958 = vmatprep.subr.bf16.mxu1 %v10156_v44 }
 0x493   :  { %1864 = vmatpush1.bf16.msra.mxu0 %v10159_v38 }
 0x494   :  { %1865 = vmatprep.subr.bf16.mxu0 %v10162_v39  ;;  %1959 = vmatpush1.bf16.msra.mxu1 %v10165_v22 }
 0x495   :  { %1960 = vmatprep.subr.bf16.mxu1 %v10168_v33 }
 0x497   :  { %1866 = vmatpush1.bf16.msra.mxu0 %v10171_v17 }
 0x498   :  { %1867 = vmatprep.subr.bf16.mxu0 %v10174_v19  ;;  %1961 = vmatpush1.bf16.msra.mxu1 %v10177_v37 }
 0x499   :  { %1962 = vmatprep.subr.bf16.mxu1 %v10180_v20 }
 0x49b   :  { %1868 = vmatpush1.bf16.msra.mxu0 %v10183_v23 }
 0x49c   :  { %1869 = vmatprep.subr.bf16.mxu0 %v13500_v8  ;;  %1963 = vmatpush1.bf16.msra.mxu1 %v13501_v13 }
 0x49d   :  { %1964 = vmatprep.subr.bf16.mxu1 %v13567_v0 }
 0x49f   :  { %1870 = vmatpush1.bf16.msra.mxu0 %v13568_v29 }
 0x4a0   :  { %1871 = vmatprep.subr.bf16.mxu0 %v13569_v4  ;;  %1965 = vmatpush1.bf16.msra.mxu1 %v13570_v28 }
 0x4a1   :  { %1966 = vmatprep.subr.bf16.mxu1 %v13571_v42 }
 0x4a3   :  { %1872 = vmatpush1.bf16.msra.mxu0 %v13572_v35 }
 0x4a4   :  { %1873 = vmatprep.subr.bf16.mxu0 %v13573_v43  ;;  %1967 = vmatpush1.bf16.msra.mxu1 %v13574_v31  ;;  %v13626_v31 = vld [vmem:[#allocation33_spill] sm:$0xff]  ;;  %v13627_v43 = vld [vmem:[#allocation36_spill] sm:$0xff] }
 0x4a5   :  { %1968 = vmatprep.subr.bf16.mxu1 %v13575_v6 }
 0x4a7   :  { %1874 = vmatpush1.bf16.msra.mxu0 %v13576_v63  ;;  %v13587_v63 = vld [vmem:[#allocation88_spill] sm:$0xff] }
 0x4a8   :  { %1875 = vmatprep.subr.bf16.mxu0 %v13577_v18  ;;  %1969 = vmatpush1.bf16.msra.mxu1 %v13578_v2  ;;  %v13588_v18 = vld [vmem:[#allocation66_spill] sm:$0xff]  ;;  %v13589_v2 = vld [vmem:[#allocation89_spill] sm:$0xff] }
 0x4a9   :  { %1970 = vmatprep.subr.bf16.mxu1 %v13579_v26  ;;  %v13590_v26 = vld [vmem:[#allocation90_spill] sm:$0xff] }
 0x4ab   :  { %1876 = vmatpush1.bf16.msra.mxu0 %v13580_v45  ;;  %v13591_v45 = vld [vmem:[#allocation91_spill] sm:$0xff] }
 0x4ac   :  { %1877 = vmatprep.subr.bf16.mxu0 %v13581_v10  ;;  %1971 = vmatpush1.bf16.msra.mxu1 %v13582_v16  ;;  %v13592_v16 = vld [vmem:[#allocation92_spill] sm:$0xff]  ;;  %v13625_v10 = vld [vmem:[#allocation34_spill] sm:$0xff] }
 0x4ad   :  { %1972 = vmatprep.subr.bf16.mxu1 %v13583_v53  ;;  %v13593_v53 = vld [vmem:[#allocation93_spill] sm:$0xff] }
 0x4af   :  { %1878 = vmatpush1.bf16.msra.mxu0 %v13584_v40  ;;  %v13594_v40 = vld [vmem:[#allocation94_spill] sm:$0xff] }
 0x4b0   :  { %1879 = vmatprep.subr.bf16.mxu0 %v13585_v25  ;;  %1973 = vmatpush1.bf16.msra.mxu1 %v13586_v3  ;;  %v13595_v25 = vld [vmem:[#allocation95_spill] sm:$0xff]  ;;  %v13596_v3 = vld [vmem:[#allocation96_spill] sm:$0xff] }
 0x4b1   :  { %1974 = vmatprep.subr.bf16.mxu1 %v13587_v63  ;;  %v13597_v63 = vld [vmem:[#allocation97_spill] sm:$0xff] }
 0x4b3   :  { %1880 = vmatpush1.bf16.msra.mxu0 %v13588_v18  ;;  %v13598_v18 = vld [vmem:[#allocation98_spill] sm:$0xff] }
 0x4b4   :  { %1985 = vmatprep.subr.bf16.mxu0 %v13589_v2  ;;  %1975 = vmatpush1.bf16.msra.mxu1 %v13590_v26  ;;  %v13599_v2 = vld [vmem:[#allocation99_spill] sm:$0xff]  ;;  %v13600_v26 = vld [vmem:[#allocation100_spill] sm:$0xff] }
 0x4b5   :  { %2026 = vmatprep.subr.bf16.mxu1 %v13591_v45  ;;  %v13601_v45 = vld [vmem:[#allocation101_spill] sm:$0xff] }
 0x4b6   :  { %1882 = vmatmul.mubr.bf16.vlgmr.msra.gmra.mrb[52].mxu0 %v10499_v5  ;;  %v13602_v5 = vld [vmem:[#allocation102_spill] sm:$0xff] }
 0x4b7   :  { %1986 = vmatpush1.bf16.msra.mxu0 %v13592_v16  ;;  %v13603_v16 = vld [vmem:[#allocation103_spill] sm:$0xff] }
 0x4b8   :  { %1987 = vmatprep.subr.bf16.mxu0 %v13593_v53  ;;  %v13604_v53 = vld [vmem:[#allocation104_spill] sm:$0xff] }
 0x4bb   :  { %1988 = vmatpush1.bf16.msra.mxu0 %v13594_v40  ;;  %v13605_v40 = vld [vmem:[#allocation105_spill] sm:$0xff] }
 0x4bc   :  { %1989 = vmatprep.subr.bf16.mxu0 %v13595_v25  ;;  %v13606_v25 = vld [vmem:[#allocation106_spill] sm:$0xff] }
 0x4bf   :  { %1990 = vmatpush1.bf16.msra.mxu0 %v13596_v3  ;;  %v13607_v3 = vld [vmem:[#allocation107_spill] sm:$0xff] }
 0x4c0   :  { %1991 = vmatprep.subr.bf16.mxu0 %v13597_v63  ;;  %v13608_v63 = vld [vmem:[#allocation108_spill] sm:$0xff] }
 0x4c3   :  { %1992 = vmatpush1.bf16.msra.mxu0 %v13598_v18  ;;  %v13609_v18 = vld [vmem:[#allocation109_spill] sm:$0xff] }
 0x4c4   :  { %1993 = vmatprep.subr.bf16.mxu0 %v13599_v2  ;;  %v13610_v2 = vld [vmem:[#allocation110_spill] sm:$0xff] }
 0x4c7   :  { %1994 = vmatpush1.bf16.msra.mxu0 %v13600_v26  ;;  %v13611_v26 = vld [vmem:[#allocation111_spill] sm:$0xff] }
 0x4c8   :  { %1995 = vmatprep.subr.bf16.mxu0 %v13601_v45  ;;  %v13612_v45 = vld [vmem:[#allocation112_spill] sm:$0xff] }
 0x4cb   :  { %1996 = vmatpush1.bf16.msra.mxu0 %v13602_v5  ;;  %v13613_v5 = vld [vmem:[#allocation113_spill] sm:$0xff] }
 0x4cc   :  { %1997 = vmatprep.subr.bf16.mxu0 %v13603_v16  ;;  %v13614_v16 = vld [vmem:[#allocation114_spill] sm:$0xff] }
 0x4cf   :  { %1998 = vmatpush1.bf16.msra.mxu0 %v13604_v53  ;;  %v13615_v53 = vld [vmem:[#allocation115_spill] sm:$0xff] }
 0x4d0   :  { %1999 = vmatprep.subr.bf16.mxu0 %v13605_v40  ;;  %v13616_v40 = vld [vmem:[#allocation116_spill] sm:$0xff] }
 0x4d3   :  { %2000 = vmatpush1.bf16.msra.mxu0 %v13606_v25  ;;  %v13617_v25 = vld [vmem:[#allocation117_spill] sm:$0xff] }
 0x4d4   :  { %2001 = vmatprep.subr.bf16.mxu0 %v13607_v3  ;;  %v13618_v3 = vld [vmem:[#allocation118_spill] sm:$0xff] }
 0x4d7   :  { %2002 = vmatpush1.bf16.msra.mxu0 %v13608_v63  ;;  %v13619_v63 = vld [vmem:[#allocation119_spill] sm:$0xff] }
 0x4d8   :  { %2003 = vmatprep.subr.bf16.mxu0 %v13609_v18  ;;  %v13620_v18 = vld [vmem:[#allocation120_spill] sm:$0xff] }
 0x4db   :  { %2004 = vmatpush1.bf16.msra.mxu0 %v13610_v2  ;;  %v13621_v2 = vld [vmem:[#allocation121_spill] sm:$0xff] }
 0x4dc   :  { %2005 = vmatprep.subr.bf16.mxu0 %v13611_v26  ;;  %v13622_v26 = vld [vmem:[#allocation122_spill] sm:$0xff] }
 0x4df   :  { %2006 = vmatpush1.bf16.msra.mxu0 %v13612_v45  ;;  %v10599_v45 = vld [vmem:[#allocation7 + $0x4] ss:$24 sps:$4 sm:$0xff]  }
 0x4e0   :  { %2007 = vmatprep.subr.bf16.mxu0 %v13613_v5  ;;  %13623 = vst [vmem:[#allocation28_spill] sm:$0xff] %v10599_v45  ;;  %v13624_v5 = vld [vmem:[#allocation31_spill] sm:$0xff] }
 0x4e3   :  { %2008 = vmatpush1.bf16.msra.mxu0 %v13614_v16 }
 0x4e4   :  { %2009 = vmatprep.subr.bf16.mxu0 %v13615_v53 }
 0x4e7   :  { %2010 = vmatpush1.bf16.msra.mxu0 %v13616_v40 }
 0x4e8   :  { %2011 = vmatprep.subr.bf16.mxu0 %v13617_v25 }
 0x4eb   :  { %2012 = vmatpush1.bf16.msra.mxu0 %v13618_v3 }
 0x4ec   :  { %2013 = vmatprep.subr.bf16.mxu0 %v13619_v63 }
 0x4ef   :  { %2014 = vmatpush1.bf16.msra.mxu0 %v13620_v18 }
 0x4f0   :  { %2015 = vmatprep.subr.bf16.mxu0 %v13621_v2 }
 0x4f3   :  { %2016 = vmatpush1.bf16.msra.mxu0 %v13622_v26 }
 0x4f4   :  { %2121 = vmatprep.subr.bf16.mxu0 %v10599_v45 }
 0x549   :  { %v1801_v16 = vpop.f32.mrb[48].mxu0  ;;  %v1842_v53 = vpop.f32.mrb[36].mxu1 }
 0x54a   :  { %v1890_v40 = vadd.f32 %v1801_v16, %v13624_v5  ;;  %v1892_v25 = vadd.f32 %v1842_v53, %v13625_v10  ;;  %v1803_v6 = vpop.f32.mrb[49].mxu0  ;;  %v1844_v3 = vpop.f32.mrb[37].mxu1  ;;  %v13629_v53 = vld [vmem:[#allocation55_spill] sm:$0xff] }
 0x54b   :  { %v1891_v63 = vadd.f32 %v1803_v6, %v13626_v31  ;;  %v1893_v18 = vadd.f32 %v1844_v3, %v13627_v43  ;;  %v1805_v35 = vpop.f32.mrb[50].mxu0  ;;  %v1846_v2 = vpop.f32.mrb[38].mxu1 }
 0x54c   :  { %v1806_v42 = vpop.f32.mrb[51].mxu0  ;;  %v1847_v26 = vpop.f32.mrb[39].mxu1  ;;  %v7079_v28 = vmul.f32 -1.442695, %v1890_v40  ;;  %v7081_v0 = vmul.f32 -1.442695, %v1892_v25 }
 0x54d   :  { %v7080_v4 = vmul.f32 -1.442695, %v1891_v63  ;;  %v7082_v16 = vmul.f32 -1.442695, %v1893_v18 }
 0x54e   :  { %8367 = vpow2.f32 %v7079_v28 }
 0x54f   :  { %8369 = vpow2.f32 %v7080_v4 }
 0x550   :  { %8371 = vpow2.f32 %v7081_v0 }
 0x551   :  { %8373 = vpow2.f32 %v7082_v16 }
 0x558   :  { %v8368_v45 = vpop.eup %8367 }
 0x559   :  { %v8370_v29 = vpop.eup %8369  ;;  %v1906_v5 = vadd.f32 1.0, %v8368_v45 }
 0x55a   :  { %v1907_v10 = vadd.f32 1.0, %v8370_v29  ;;  %v8372_v31 = vpop.eup %8371  ;;  %v13628_v29 = vld [vmem:[#allocation54_spill] sm:$0xff] }
 0x55b   :  { %8375 = vrcp.f32 %v1906_v5  ;;  %v8374_v35 = vpop.eup %8373  ;;  %v1908_v26 = vadd.f32 1.0, %v8372_v31 }
 0x55c   :  { %8377 = vrcp.f32 %v1907_v10  ;;  %v1909_v45 = vadd.f32 1.0, %v8374_v35 }
 0x565   :  { %v8376_v6 = vpop.eup %8375 }
 0x566   :  { %v8378_v63 = vpop.eup %8377 }
 0x589   :  { %v1883_v3 = vpop.f32.mrb[52].mxu0 }
 0x58a   :  { %v1918_v42 = vadd.f32 %v1883_v3, %v10052_v57  ;;  %v1885_v43 = vpop.f32.mrb[53].mxu0 }
 0x58b   :  { %v1919_v28 = vadd.f32 %v1885_v43, %v10055_v59  ;;  %v1887_v4 = vpop.f32.mrb[54].mxu0 }
 0x58c   :  { %v1920_v2 = vmul.f32 %v8376_v6, %v1918_v42  ;;  %v1888_v25 = vpop.f32.mrb[55].mxu0 }
 0x58d   :  { %v1921_v18 = vmul.f32 %v8378_v63, %v1919_v28  ;;  %v13672_v25 = vld [vmem:[#allocation107_spill] sm:$0xff] }
 0x58e   :  { %v1922_v0 = vadd.f32 %v1920_v2, %v13628_v29  ;;  %v13671_v2 = vld [vmem:[#allocation106_spill] sm:$0xff] }
 0x58f   :  { %v1923_v40 = vadd.f32 %v1921_v18, %v13629_v53  ;;  %v13673_v18 = vld [vmem:[#allocation108_spill] sm:$0xff]  ;;  %v13675_v29 = vld [vmem:[#allocation110_spill] sm:$0xff]  ;;  %v13678_v53 = vld [vmem:[#allocation113_spill] sm:$0xff] }
 0x590   :  { %8379 = vtanh.f32 %v1922_v0  ;;  %v13676_v0 = vld [vmem:[#allocation111_spill] sm:$0xff] }
 0x591   :  { %8381 = vtanh.f32 %v1923_v40  ;;  %v13679_v40 = vld [vmem:[#allocation114_spill] sm:$0xff] }
 0x592   :  { %8383 = vrcp.f32 %v1908_v26  ;;  %v13674_v26 = vld [vmem:[#allocation109_spill] sm:$0xff] }
 0x593   :  { %8385 = vrcp.f32 %v1909_v45  ;;  %v13677_v45 = vld [vmem:[#allocation112_spill] sm:$0xff] }
 0x59a   :  { %v8380_v16 = vpop.eup %8379 }
 0x59b   :  { %v8382_v5 = vpop.eup %8381  ;;  %v1926_v10 = vsub.f32 %v10491_v27, %v8380_v16  ;;  %v10911_v27 = vld [vmem:[#allocation7 + $0x2b0] ss:$24 sps:$4 sm:$0xff]  }
 0x59c   :  { %v8384_v3 = vpop.eup %8383  ;;  %v1927_v43 = vsub.f32 %v10493_v24, %v8382_v5  ;;  %v10902_v24 = vld [vmem:[#allocation7 + $0x2b4] ss:$24 sps:$4 sm:$0xff]  }
 0x59d   :  { %v8386_v42 = vpop.eup %8385  ;;  %v1928_v6 = vmul.f32 %v8384_v3, %v1926_v10  ;;  %v13682_v10 = vld [vmem:[#allocation117_spill] sm:$0xff]  ;;  %v13683_v3 = vld [vmem:[#allocation118_spill] sm:$0xff] }
 0x59e   :  { %v1929_v28 = vmul.f32 %v8386_v42, %v1927_v43  ;;  %v13684_v43 = vld [vmem:[#allocation119_spill] sm:$0xff]  ;;  %v13685_v42 = vld [vmem:[#allocation120_spill] sm:$0xff] }
 0x59f   :  { %v10612_v31 = vadd.f32 %v8380_v16, %v1928_v6  ;;  %v13680_v16 = vld [vmem:[#allocation115_spill] sm:$0xff]  ;;  %v13686_v6 = vld [vmem:[#allocation121_spill] sm:$0xff] }
 0x5a0   :  { %v10614_v4 = vadd.f32 %v8382_v5, %v1929_v28  ;;  %v13681_v5 = vld [vmem:[#allocation116_spill] sm:$0xff]  ;;  %v13687_v28 = vld [vmem:[#allocation122_spill] sm:$0xff] }
 0x5a1   :  { %13630 = vst [vmem:[#allocation30_spill] sm:$0xff] %v10612_v31  ;;  %v10620_v63 = vpack.c.bf16 %v10612_v31, %v10612_v31 }
 0x5a2   :  { %13631 = vst [vmem:[#allocation29_spill] sm:$0xff] %v10614_v4  ;;  %v1943_v35 = vpack.c.bf16 %v10614_v4, %v10614_v4 }
 0x5a4   :  { %1976 = vmatprep.mubr.bf16.mxu1 %v1943_v35  ;;  %2017 = vmatprep.mubr.bf16.mxu0 %v1943_v35 }
 0x5a5   :  { %1977 = vmatmul.mubr.bf16.vlgmr.msra.gmra.mrb[40].mxu1 %v10620_v63  ;;  %2018 = vmatmul.mubr.bf16.vlgmr.msra.gmra.mrb[56].mxu0 %v10620_v63 }
 0x5a6   :  { %2027 = vmatpush1.bf16.msra.mxu1 %v10075_v11  ;;  %2058 = vmatprep.mubr.bf16.mxu1 %v1943_v35  ;;  %v13647_v11 = vld [vmem:[#allocation83_spill] sm:$0xff]  ;;  %v13688_v35 = vld [vmem:[#allocation28_spill] sm:$0xff] }
 0x5a7   :  { %2028 = vmatprep.subr.bf16.mxu1 %v10078_v51  ;;  %2122 = vmatpush1.bf16.msra.mxu0 %v10081_v32  ;;  %v13648_v51 = vld [vmem:[#allocation84_spill] sm:$0xff]  ;;  %v13649_v32 = vld [vmem:[#allocation85_spill] sm:$0xff] }
 0x5a8   :  { %2123 = vmatprep.subr.bf16.mxu0 %v10084_v55  ;;  %v13650_v55 = vld [vmem:[#allocation86_spill] sm:$0xff] }
 0x5aa   :  { %2029 = vmatpush1.bf16.msra.mxu1 %v10087_v49  ;;  %v13651_v49 = vld [vmem:[#allocation87_spill] sm:$0xff] }
 0x5ab   :  { %2030 = vmatprep.subr.bf16.mxu1 %v10090_v47  ;;  %2124 = vmatpush1.bf16.msra.mxu0 %v10093_v50  ;;  %v13652_v47 = vld [vmem:[#allocation88_spill] sm:$0xff]  ;;  %v13653_v50 = vld [vmem:[#allocation66_spill] sm:$0xff] }
 0x5ac   :  { %2125 = vmatprep.subr.bf16.mxu0 %v10096_v58  ;;  %v13654_v58 = vld [vmem:[#allocation89_spill] sm:$0xff] }
 0x5ae   :  { %2031 = vmatpush1.bf16.msra.mxu1 %v10099_v56  ;;  %v13655_v56 = vld [vmem:[#allocation90_spill] sm:$0xff] }
 0x5af   :  { %2032 = vmatprep.subr.bf16.mxu1 %v10102_v60  ;;  %2126 = vmatpush1.bf16.msra.mxu0 %v10105_v30  ;;  %v13656_v60 = vld [vmem:[#allocation91_spill] sm:$0xff]  ;;  %v13657_v30 = vld [vmem:[#allocation92_spill] sm:$0xff] }
 0x5b0   :  { %2127 = vmatprep.subr.bf16.mxu0 %v10108_v7  ;;  %v13658_v7 = vld [vmem:[#allocation93_spill] sm:$0xff] }
 0x5b2   :  { %2033 = vmatpush1.bf16.msra.mxu1 %v10111_v1  ;;  %v13659_v1 = vld [vmem:[#allocation94_spill] sm:$0xff] }
 0x5b3   :  { %2034 = vmatprep.subr.bf16.mxu1 %v10114_v15  ;;  %2128 = vmatpush1.bf16.msra.mxu0 %v10117_v9  ;;  %v13660_v15 = vld [vmem:[#allocation95_spill] sm:$0xff]  ;;  %v13661_v9 = vld [vmem:[#allocation96_spill] sm:$0xff] }
 0x5b4   :  { %2129 = vmatprep.subr.bf16.mxu0 %v10120_v54  ;;  %v13662_v54 = vld [vmem:[#allocation97_spill] sm:$0xff] }
 0x5b6   :  { %2035 = vmatpush1.bf16.msra.mxu1 %v10123_v21  ;;  %v13663_v21 = vld [vmem:[#allocation98_spill] sm:$0xff] }
 0x5b7   :  { %2036 = vmatprep.subr.bf16.mxu1 %v10126_v61  ;;  %2130 = vmatpush1.bf16.msra.mxu0 %v10129_v12  ;;  %v13664_v61 = vld [vmem:[#allocation99_spill] sm:$0xff]  ;;  %v13665_v12 = vld [vmem:[#allocation100_spill] sm:$0xff] }
 0x5b8   :  { %2131 = vmatprep.subr.bf16.mxu0 %v10132_v34  ;;  %v13666_v34 = vld [vmem:[#allocation101_spill] sm:$0xff] }
 0x5ba   :  { %2037 = vmatpush1.bf16.msra.mxu1 %v10135_v62  ;;  %v13667_v62 = vld [vmem:[#allocation102_spill] sm:$0xff] }
 0x5bb   :  { %2038 = vmatprep.subr.bf16.mxu1 %v10138_v14  ;;  %2132 = vmatpush1.bf16.msra.mxu0 %v10141_v52  ;;  %v13633_v52 = vld [vmem:[#allocation69_spill] sm:$0xff]  ;;  %v13668_v14 = vld [vmem:[#allocation103_spill] sm:$0xff] }
 0x5bc   :  { %2133 = vmatprep.subr.bf16.mxu0 %v10144_v48  ;;  %v13632_v48 = vld [vmem:[#allocation68_spill] sm:$0xff] }
 0x5be   :  { %2039 = vmatpush1.bf16.msra.mxu1 %v10147_v41  ;;  %v13641_v41 = vld [vmem:[#allocation77_spill] sm:$0xff] }
 0x5bf   :  { %2040 = vmatprep.subr.bf16.mxu1 %v10150_v46  ;;  %2134 = vmatpush1.bf16.msra.mxu0 %v10153_v36  ;;  %v13637_v36 = vld [vmem:[#allocation73_spill] sm:$0xff]  ;;  %v13642_v46 = vld [vmem:[#allocation78_spill] sm:$0xff] }
 0x5c0   :  { %2135 = vmatprep.subr.bf16.mxu0 %v10156_v44  ;;  %v13646_v44 = vld [vmem:[#allocation82_spill] sm:$0xff]  ;;  %13709 = vst [vmem:[#allocation73_spill] sm:$0xff] %v10902_v24 }
 0x5c2   :  { %2041 = vmatpush1.bf16.msra.mxu1 %v10159_v38  ;;  %v13645_v38 = vld [vmem:[#allocation81_spill] sm:$0xff] }
 0x5c3   :  { %2042 = vmatprep.subr.bf16.mxu1 %v10162_v39  ;;  %2136 = vmatpush1.bf16.msra.mxu0 %v10165_v22  ;;  %v13634_v22 = vld [vmem:[#allocation70_spill] sm:$0xff] }
 0x5c4   :  { %2137 = vmatprep.subr.bf16.mxu0 %v10168_v33  ;;  %v13635_v33 = vld [vmem:[#allocation71_spill] sm:$0xff]  ;;  %v13638_v39 = vld [vmem:[#allocation74_spill] sm:$0xff] }
 0x5c6   :  { %2043 = vmatpush1.bf16.msra.mxu1 %v10171_v17  ;;  %v13636_v17 = vld [vmem:[#allocation72_spill] sm:$0xff] }
 0x5c7   :  { %2044 = vmatprep.subr.bf16.mxu1 %v10174_v19  ;;  %2138 = vmatpush1.bf16.msra.mxu0 %v10177_v37  ;;  %v13643_v37 = vld [vmem:[#allocation79_spill] sm:$0xff]  ;;  %v13644_v19 = vld [vmem:[#allocation80_spill] sm:$0xff] }
 0x5c8   :  { %2139 = vmatprep.subr.bf16.mxu0 %v10180_v20  ;;  %v13639_v20 = vld [vmem:[#allocation75_spill] sm:$0xff] }
 0x5ca   :  { %2045 = vmatpush1.bf16.msra.mxu1 %v10183_v23  ;;  %v13640_v23 = vld [vmem:[#allocation76_spill] sm:$0xff] }
 0x5cb   :  { %2046 = vmatprep.subr.bf16.mxu1 %v13500_v8  ;;  %2140 = vmatpush1.bf16.msra.mxu0 %v13501_v13  ;;  %v13669_v8 = vld [vmem:[#allocation104_spill] sm:$0xff]  ;;  %v13670_v13 = vld [vmem:[#allocation105_spill] sm:$0xff]  ;;  %13712 = vst [vmem:[#allocation76_spill] sm:$0xff] %v10911_v27 }
 0x5cc   :  { %2141 = vmatprep.subr.bf16.mxu0 %v13632_v48 }
 0x5ce   :  { %2047 = vmatpush1.bf16.msra.mxu1 %v13633_v52  ;;  %v13689_v52 = vld [vmem:[#allocation35_spill] sm:$0xff] }
 0x5cf   :  { %2048 = vmatprep.subr.bf16.mxu1 %v13634_v22  ;;  %2142 = vmatpush1.bf16.msra.mxu0 %v13635_v33  ;;  %v13690_v33 = vld [vmem:[#allocation38_spill] sm:$0xff] }
 0x5d0   :  { %2143 = vmatprep.subr.bf16.mxu0 %v13636_v17 }
 0x5d2   :  { %2049 = vmatpush1.bf16.msra.mxu1 %v13637_v36 }
 0x5d3   :  { %2050 = vmatprep.subr.bf16.mxu1 %v13638_v39  ;;  %2144 = vmatpush1.bf16.msra.mxu0 %v13639_v20  ;;  %v13691_v20 = vld [vmem:[#allocation37_spill] sm:$0xff] }
 0x5d4   :  { %2145 = vmatprep.subr.bf16.mxu0 %v13640_v23 }
 0x5d6   :  { %2051 = vmatpush1.bf16.msra.mxu1 %v13641_v41  ;;  %v13692_v41 = vld [vmem:[#allocation40_spill] sm:$0xff] }
 0x5d7   :  { %2052 = vmatprep.subr.bf16.mxu1 %v13642_v46  ;;  %2146 = vmatpush1.bf16.msra.mxu0 %v13643_v37 }
 0x5d8   :  { %2147 = vmatprep.subr.bf16.mxu0 %v13644_v19 }
 0x5da   :  { %2053 = vmatpush1.bf16.msra.mxu1 %v13645_v38 }
 0x5db   :  { %2054 = vmatprep.subr.bf16.mxu1 %v13646_v44  ;;  %2148 = vmatpush1.bf16.msra.mxu0 %v13647_v11 }
 0x5dc   :  { %2149 = vmatprep.subr.bf16.mxu0 %v13648_v51 }
 0x5de   :  { %2055 = vmatpush1.bf16.msra.mxu1 %v13649_v32 }
 0x5df   :  { %2056 = vmatprep.subr.bf16.mxu1 %v13650_v55  ;;  %2150 = vmatpush1.bf16.msra.mxu0 %v13651_v49 }
 0x5e0   :  { %2151 = vmatprep.subr.bf16.mxu0 %v13652_v47 }
 0x5e2   :  { %2057 = vmatpush1.bf16.msra.mxu1 %v13653_v50 }
 0x5e3   :  { %2162 = vmatprep.subr.bf16.mxu1 %v13654_v58  ;;  %2152 = vmatpush1.bf16.msra.mxu0 %v13655_v56 }
 0x5e4   :  { %2203 = vmatprep.subr.bf16.mxu0 %v13656_v60 }
 0x5e5   :  { %2059 = vmatmul.mubr.bf16.vlgmr.msra.gmra.mrb[44].mxu1 %v10620_v63 }
 0x5e6   :  { %2163 = vmatpush1.bf16.msra.mxu1 %v13657_v30 }
 0x5e7   :  { %2164 = vmatprep.subr.bf16.mxu1 %v13658_v7 }
 0x5ea   :  { %2165 = vmatpush1.bf16.msra.mxu1 %v13659_v1 }
 0x5eb   :  { %2166 = vmatprep.subr.bf16.mxu1 %v13660_v15 }
 0x5ee   :  { %2167 = vmatpush1.bf16.msra.mxu1 %v13661_v9 }
 0x5ef   :  { %2168 = vmatprep.subr.bf16.mxu1 %v13662_v54 }
 0x5f2   :  { %2169 = vmatpush1.bf16.msra.mxu1 %v13663_v21 }
 0x5f3   :  { %2170 = vmatprep.subr.bf16.mxu1 %v13664_v61 }
 0x5f6   :  { %2171 = vmatpush1.bf16.msra.mxu1 %v13665_v12 }
 0x5f7   :  { %2172 = vmatprep.subr.bf16.mxu1 %v13666_v34 }
 0x5fa   :  { %2173 = vmatpush1.bf16.msra.mxu1 %v13667_v62 }
 0x5fb   :  { %2174 = vmatprep.subr.bf16.mxu1 %v13668_v14 }
 0x5fe   :  { %2175 = vmatpush1.bf16.msra.mxu1 %v13669_v8  ;;  %v13693_v8 = vld [vmem:[#allocation56_spill] sm:$0xff] }
 0x5ff   :  { %2176 = vmatprep.subr.bf16.mxu1 %v13670_v13 }
 0x602   :  { %2177 = vmatpush1.bf16.msra.mxu1 %v13671_v2 }
 0x603   :  { %2178 = vmatprep.subr.bf16.mxu1 %v13672_v25  ;;  %v13694_v25 = vld [vmem:[#allocation57_spill] sm:$0xff] }
 0x606   :  { %2179 = vmatpush1.bf16.msra.mxu1 %v13673_v18 }
 0x607   :  { %2180 = vmatprep.subr.bf16.mxu1 %v13674_v26 }
 0x60a   :  { %2181 = vmatpush1.bf16.msra.mxu1 %v13675_v29 }
 0x60b   :  { %2182 = vmatprep.subr.bf16.mxu1 %v13676_v0 }
 0x60e   :  { %2183 = vmatpush1.bf16.msra.mxu1 %v13677_v45 }
 0x60f   :  { %2184 = vmatprep.subr.bf16.mxu1 %v13678_v53 }
 0x612   :  { %2185 = vmatpush1.bf16.msra.mxu1 %v13679_v40 }
 0x613   :  { %2186 = vmatprep.subr.bf16.mxu1 %v13680_v16 }
 0x616   :  { %2187 = vmatpush1.bf16.msra.mxu1 %v13681_v5 }
 0x617   :  { %2188 = vmatprep.subr.bf16.mxu1 %v13682_v10 }
 0x61a   :  { %2189 = vmatpush1.bf16.msra.mxu1 %v13683_v3 }
 0x61b   :  { %2190 = vmatprep.subr.bf16.mxu1 %v13684_v43 }
 0x61e   :  { %2191 = vmatpush1.bf16.msra.mxu1 %v13685_v42 }
 0x61f   :  { %2192 = vmatprep.subr.bf16.mxu1 %v13686_v6  ;;  %v10743_v6 = vld [vmem:[#allocation7 + $0x10] ss:$24 sps:$4 sm:$0xff]  }
 0x622   :  { %2193 = vmatpush1.bf16.msra.mxu1 %v13687_v28  ;;  %v10746_v28 = vld [vmem:[#allocation7 + $0x44] ss:$24 sps:$4 sm:$0xff]  }
 0x623   :  { %2298 = vmatprep.subr.bf16.mxu1 %v13688_v35 }
 0x678   :  { %v1978_v63 = vpop.f32.mrb[40].mxu1  ;;  %v2019_v48 = vpop.f32.mrb[56].mxu0 }
 0x679   :  { %v2067_v22 = vadd.f32 %v1978_v63, %v13689_v52  ;;  %v2069_v17 = vadd.f32 %v2019_v48, %v13690_v33  ;;  %v1980_v36 = vpop.f32.mrb[41].mxu1  ;;  %v2021_v39 = vpop.f32.mrb[57].mxu0  ;;  %v10749_v63 = vld [vmem:[#allocation7] ss:$24 sps:$4 sm:$0xff]   ;;  %v10752_v48 = vld [vmem:[#allocation7 + $0x34] ss:$24 sps:$4 sm:$0xff]  }
 0x67a   :  { %v2068_v23 = vadd.f32 %v1980_v36, %v13691_v20  ;;  %v2070_v46 = vadd.f32 %v2021_v39, %v13692_v41  ;;  %v1982_v37 = vpop.f32.mrb[42].mxu1  ;;  %v2023_v19 = vpop.f32.mrb[58].mxu0  ;;  %v10755_v52 = vld [vmem:[#allocation7 + $0x40] ss:$24 sps:$4 sm:$0xff]   ;;  %v10761_v33 = vld [vmem:[#allocation7 + $0x30] ss:$24 sps:$4 sm:$0xff]  }
 0x67b   :  { %v1983_v38 = vpop.f32.mrb[43].mxu1  ;;  %v2024_v44 = vpop.f32.mrb[59].mxu0  ;;  %v7083_v11 = vmul.f32 -1.442695, %v2067_v22  ;;  %v7085_v49 = vmul.f32 -1.442695, %v2069_v17 }
 0x67c   :  { %v7084_v51 = vmul.f32 -1.442695, %v2068_v23  ;;  %v7086_v47 = vmul.f32 -1.442695, %v2070_v46  ;;  %v10758_v22 = vld [vmem:[#allocation7 + $0x74] ss:$24 sps:$4 sm:$0xff]  }
 0x67d   :  { %8387 = vpow2.f32 %v7083_v11  ;;  %v10764_v17 = vld [vmem:[#allocation7 + $0x64] ss:$24 sps:$4 sm:$0xff]   ;;  %v10767_v36 = vld [vmem:[#allocation7 + $0x70] ss:$24 sps:$4 sm:$0xff]   ;;  %v10773_v20 = vld [vmem:[#allocation7 + $0x60] ss:$24 sps:$4 sm:$0xff]  }
 0x67e   :  { %8389 = vpow2.f32 %v7084_v51  ;;  %v10770_v39 = vld [vmem:[#allocation7 + $0xa4] ss:$24 sps:$4 sm:$0xff]   ;;  %v10776_v23 = vld [vmem:[#allocation7 + $0x94] ss:$24 sps:$4 sm:$0xff]   ;;  %v10779_v41 = vld [vmem:[#allocation7 + $0xa0] ss:$24 sps:$4 sm:$0xff]  }
 0x67f   :  { %8391 = vpow2.f32 %v7085_v49  ;;  %v10782_v46 = vld [vmem:[#allocation7 + $0xd4] ss:$24 sps:$4 sm:$0xff]   ;;  %v10785_v37 = vld [vmem:[#allocation7 + $0x90] ss:$24 sps:$4 sm:$0xff]   ;;  %v10788_v19 = vld [vmem:[#allocation7 + $0xc4] ss:$24 sps:$4 sm:$0xff]  }
 0x680   :  { %8393 = vpow2.f32 %v7086_v47  ;;  %v10791_v38 = vld [vmem:[#allocation7 + $0xd0] ss:$24 sps:$4 sm:$0xff]   ;;  %v10794_v44 = vld [vmem:[#allocation7 + $0x104] ss:$24 sps:$4 sm:$0xff]   ;;  %v10797_v11 = vld [vmem:[#allocation7 + $0xc0] ss:$24 sps:$4 sm:$0xff]  }
 0x681   :  { %v10800_v51 = vld [vmem:[#allocation7 + $0xf4] ss:$24 sps:$4 sm:$0xff]   ;;  %v10809_v49 = vld [vmem:[#allocation7 + $0xf0] ss:$24 sps:$4 sm:$0xff]   ;;  %v10812_v47 = vld [vmem:[#allocation7 + $0x124] ss:$24 sps:$4 sm:$0xff]  }
 0x687   :  { %v8388_v32 = vpop.eup %8387 }
 0x688   :  { %v8390_v55 = vpop.eup %8389  ;;  %v2083_v58 = vadd.f32 1.0, %v8388_v32  ;;  %v10803_v32 = vld [vmem:[#allocation7 + $0x100] ss:$24 sps:$4 sm:$0xff]  }
 0x689   :  { %v2084_v56 = vadd.f32 1.0, %v8390_v55  ;;  %v8392_v60 = vpop.eup %8391  ;;  %v10806_v55 = vld [vmem:[#allocation7 + $0x134] ss:$24 sps:$4 sm:$0xff]  }
 0x68a   :  { %8395 = vrcp.f32 %v2083_v58  ;;  %v8394_v7 = vpop.eup %8393  ;;  %v2085_v14 = vadd.f32 1.0, %v8392_v60  ;;  %v10815_v58 = vld [vmem:[#allocation7 + $0x130] ss:$24 sps:$4 sm:$0xff]   ;;  %v10821_v60 = vld [vmem:[#allocation7 + $0x120] ss:$24 sps:$4 sm:$0xff]  }
 0x68b   :  { %8397 = vrcp.f32 %v2084_v56  ;;  %v2086_v2 = vadd.f32 1.0, %v8394_v7  ;;  %v10818_v56 = vld [vmem:[#allocation7 + $0x164] ss:$24 sps:$4 sm:$0xff]   ;;  %v10827_v7 = vld [vmem:[#allocation7 + $0x160] ss:$24 sps:$4 sm:$0xff]  }
 0x694   :  { %v8396_v9 = vpop.eup %8395 }
 0x695   :  { %v8398_v61 = vpop.eup %8397 }
 0x6b8   :  { %v2060_v30 = vpop.f32.mrb[44].mxu1 }
 0x6b9   :  { %v2095_v1 = vadd.f32 %v2060_v30, %v10052_v57  ;;  %v2062_v15 = vpop.f32.mrb[45].mxu1  ;;  %v10824_v30 = vld [vmem:[#allocation7 + $0x154] ss:$24 sps:$4 sm:$0xff]  }
 0x6ba   :  { %v2096_v54 = vadd.f32 %v2062_v15, %v10055_v59  ;;  %v2064_v21 = vpop.f32.mrb[46].mxu1  ;;  %v10833_v15 = vld [vmem:[#allocation7 + $0x150] ss:$24 sps:$4 sm:$0xff]  }
 0x6bb   :  { %v2097_v12 = vmul.f32 %v8396_v9, %v2095_v1  ;;  %v2065_v34 = vpop.f32.mrb[47].mxu1  ;;  %v10830_v1 = vld [vmem:[#allocation7 + $0x194] ss:$24 sps:$4 sm:$0xff]   ;;  %v10836_v9 = vld [vmem:[#allocation7 + $0x184] ss:$24 sps:$4 sm:$0xff]  }
 0x6bc   :  { %v2098_v62 = vmul.f32 %v8398_v61, %v2096_v54  ;;  %v10839_v54 = vld [vmem:[#allocation7 + $0x190] ss:$24 sps:$4 sm:$0xff]   ;;  %v10842_v21 = vld [vmem:[#allocation7 + $0x1c4] ss:$24 sps:$4 sm:$0xff]   ;;  %v10845_v61 = vld [vmem:[#allocation7 + $0x180] ss:$24 sps:$4 sm:$0xff]  }
 0x6bd   :  { %v2099_v13 = vadd.f32 %v2097_v12, %v13693_v8  ;;  %v10848_v12 = vld [vmem:[#allocation7 + $0x1b4] ss:$24 sps:$4 sm:$0xff]   ;;  %v10851_v34 = vld [vmem:[#allocation7 + $0x1c0] ss:$24 sps:$4 sm:$0xff]   ;;  %v10860_v8 = vld [vmem:[#allocation7 + $0x1e4] ss:$24 sps:$4 sm:$0xff]  }
 0x6be   :  { %v2100_v18 = vadd.f32 %v2098_v62, %v13694_v25  ;;  %v10854_v62 = vld [vmem:[#allocation7 + $0x1f4] ss:$24 sps:$4 sm:$0xff]   ;;  %13695 = vst [vmem:[#allocation32_spill] sm:$0xff] %v10860_v8  ;;  %v10869_v25 = vld [vmem:[#allocation7 + $0x1e0] ss:$24 sps:$4 sm:$0xff]  }
 0x6bf   :  { %8399 = vtanh.f32 %v2099_v13  ;;  %v10863_v13 = vld [vmem:[#allocation7 + $0x1f0] ss:$24 sps:$4 sm:$0xff]   ;;  %13698 = vst [vmem:[#allocation31_spill] sm:$0xff] %v10869_v25 }
 0x6c0   :  { %8401 = vtanh.f32 %v2100_v18  ;;  %13696 = vst [vmem:[#allocation52_spill] sm:$0xff] %v10863_v13  ;;  %v10872_v18 = vld [vmem:[#allocation7 + $0x214] ss:$24 sps:$4 sm:$0xff]  }
 0x6c1   :  { %8403 = vrcp.f32 %v2085_v14  ;;  %v10857_v14 = vld [vmem:[#allocation7 + $0x1b0] ss:$24 sps:$4 sm:$0xff]   ;;  %13699 = vst [vmem:[#allocation34_spill] sm:$0xff] %v10872_v18 }
 0x6c2   :  { %8405 = vrcp.f32 %v2086_v2  ;;  %v10866_v2 = vld [vmem:[#allocation7 + $0x224] ss:$24 sps:$4 sm:$0xff]  }
 0x6c3   :  { %13697 = vst [vmem:[#allocation53_spill] sm:$0xff] %v10866_v2 }
 0x6c9   :  { %v8400_v26 = vpop.eup %8399 }
 0x6ca   :  { %v8402_v29 = vpop.eup %8401  ;;  %v2103_v0 = vsub.f32 %v10612_v31, %v8400_v26  ;;  %v10908_v31 = vld [vmem:[#allocation7 + $0x2a4] ss:$24 sps:$4 sm:$0xff]  }
 0x6cb   :  { %v8404_v45 = vpop.eup %8403  ;;  %v2104_v53 = vsub.f32 %v10614_v4, %v8402_v29  ;;  %v10905_v4 = vld [vmem:[#allocation7 + $0x270] ss:$24 sps:$4 sm:$0xff]   ;;  %13711 = vst [vmem:[#allocation75_spill] sm:$0xff] %v10908_v31 }
 0x6cc   :  { %v8406_v40 = vpop.eup %8405  ;;  %v2105_v16 = vmul.f32 %v8404_v45, %v2103_v0  ;;  %v10881_v0 = vld [vmem:[#allocation7 + $0x210] ss:$24 sps:$4 sm:$0xff]   ;;  %v10884_v45 = vld [vmem:[#allocation7 + $0x244] ss:$24 sps:$4 sm:$0xff]   ;;  %13710 = vst [vmem:[#allocation74_spill] sm:$0xff] %v10905_v4 }
 0x6cd   :  { %v2106_v5 = vmul.f32 %v8406_v40, %v2104_v53  ;;  %13702 = vst [vmem:[#allocation54_spill] sm:$0xff] %v10881_v0  ;;  %13703 = vst [vmem:[#allocation55_spill] sm:$0xff] %v10884_v45  ;;  %v10887_v53 = vld [vmem:[#allocation7 + $0x250] ss:$24 sps:$4 sm:$0xff]   ;;  %v10890_v40 = vld [vmem:[#allocation7 + $0x284] ss:$24 sps:$4 sm:$0xff]  }
 0x6ce   :  { %v10731_v10 = vadd.f32 %v8400_v26, %v2105_v16  ;;  %v10875_v26 = vld [vmem:[#allocation7 + $0x220] ss:$24 sps:$4 sm:$0xff]   ;;  %13704 = vst [vmem:[#allocation68_spill] sm:$0xff] %v10887_v53  ;;  %13705 = vst [vmem:[#allocation69_spill] sm:$0xff] %v10890_v40 }
 0x6cf   :  { %v10733_v3 = vadd.f32 %v8402_v29, %v2106_v5  ;;  %13700 = vst [vmem:[#allocation33_spill] sm:$0xff] %v10875_v26  ;;  %v10878_v29 = vld [vmem:[#allocation7 + $0x254] ss:$24 sps:$4 sm:$0xff]   ;;  %v10893_v16 = vld [vmem:[#allocation7 + $0x240] ss:$24 sps:$4 sm:$0xff]  }
 0x6d0   :  { %v10739_v42 = vpack.c.bf16 %v10731_v10, %v10731_v10  ;;  %13701 = vst [vmem:[#allocation36_spill] sm:$0xff] %v10878_v29  ;;  %13706 = vst [vmem:[#allocation70_spill] sm:$0xff] %v10893_v16  ;;  %v10896_v5 = vld [vmem:[#allocation7 + $0x274] ss:$24 sps:$4 sm:$0xff]  }
 0x6d1   :  { %v2120_v43 = vpack.c.bf16 %v10733_v3, %v10733_v3  ;;  %13707 = vst [vmem:[#allocation71_spill] sm:$0xff] %v10896_v5 }
 0x6d3   :  { %2153 = vmatprep.mubr.bf16.mxu0 %v2120_v43  ;;  %2194 = vmatprep.mubr.bf16.mxu1 %v2120_v43 }
 0x6d4   :  { %2154 = vmatmul.mubr.bf16.vlgmr.msra.gmra.mrb[60].mxu0 %v10739_v42  ;;  %2195 = vmatmul.mubr.bf16.vlgmr.msra.gmra.mrb[48].mxu1 %v10739_v42 }
 0x6d5   :  { %2204 = vmatpush1.bf16.msra.mxu0 %v10743_v6  ;;  %2235 = vmatprep.mubr.bf16.mxu0 %v2120_v43  ;;  %v10899_v43 = vld [vmem:[#allocation7 + $0x280] ss:$24 sps:$4 sm:$0xff]  }
 0x6d6   :  { %2205 = vmatprep.subr.bf16.mxu0 %v10746_v28  ;;  %2299 = vmatpush1.bf16.msra.mxu1 %v10749_v63  ;;  %13708 = vst [vmem:[#allocation72_spill] sm:$0xff] %v10899_v43 }
 0x6d7   :  { %2300 = vmatprep.subr.bf16.mxu1 %v10752_v48 }
 0x6d9   :  { %2206 = vmatpush1.bf16.msra.mxu0 %v10755_v52 }
 0x6da   :  { %2207 = vmatprep.subr.bf16.mxu0 %v10758_v22  ;;  %2301 = vmatpush1.bf16.msra.mxu1 %v10761_v33 }
 0x6db   :  { %2302 = vmatprep.subr.bf16.mxu1 %v10764_v17 }
 0x6dd   :  { %2208 = vmatpush1.bf16.msra.mxu0 %v10767_v36 }
 0x6de   :  { %2209 = vmatprep.subr.bf16.mxu0 %v10770_v39  ;;  %2303 = vmatpush1.bf16.msra.mxu1 %v10773_v20 }
 0x6df   :  { %2304 = vmatprep.subr.bf16.mxu1 %v10776_v23 }
 0x6e1   :  { %2210 = vmatpush1.bf16.msra.mxu0 %v10779_v41 }
 0x6e2   :  { %2211 = vmatprep.subr.bf16.mxu0 %v10782_v46  ;;  %2305 = vmatpush1.bf16.msra.mxu1 %v10785_v37 }
 0x6e3   :  { %2306 = vmatprep.subr.bf16.mxu1 %v10788_v19 }
 0x6e5   :  { %2212 = vmatpush1.bf16.msra.mxu0 %v10791_v38 }
 0x6e6   :  { %2213 = vmatprep.subr.bf16.mxu0 %v10794_v44  ;;  %2307 = vmatpush1.bf16.msra.mxu1 %v10797_v11 }
 0x6e7   :  { %2308 = vmatprep.subr.bf16.mxu1 %v10800_v51 }
 0x6e9   :  { %2214 = vmatpush1.bf16.msra.mxu0 %v10803_v32 }
 0x6ea   :  { %2215 = vmatprep.subr.bf16.mxu0 %v10806_v55  ;;  %2309 = vmatpush1.bf16.msra.mxu1 %v10809_v49 }
 0x6eb   :  { %2310 = vmatprep.subr.bf16.mxu1 %v10812_v47 }
 0x6ed   :  { %2216 = vmatpush1.bf16.msra.mxu0 %v10815_v58 }
 0x6ee   :  { %2217 = vmatprep.subr.bf16.mxu0 %v10818_v56  ;;  %2311 = vmatpush1.bf16.msra.mxu1 %v10821_v60 }
 0x6ef   :  { %2312 = vmatprep.subr.bf16.mxu1 %v10824_v30 }
 0x6f1   :  { %2218 = vmatpush1.bf16.msra.mxu0 %v10827_v7 }
 0x6f2   :  { %2219 = vmatprep.subr.bf16.mxu0 %v10830_v1  ;;  %2313 = vmatpush1.bf16.msra.mxu1 %v10833_v15 }
 0x6f3   :  { %2314 = vmatprep.subr.bf16.mxu1 %v10836_v9 }
 0x6f5   :  { %2220 = vmatpush1.bf16.msra.mxu0 %v10839_v54 }
 0x6f6   :  { %2221 = vmatprep.subr.bf16.mxu0 %v10842_v21  ;;  %2315 = vmatpush1.bf16.msra.mxu1 %v10845_v61 }
 0x6f7   :  { %2316 = vmatprep.subr.bf16.mxu1 %v10848_v12 }
 0x6f9   :  { %2222 = vmatpush1.bf16.msra.mxu0 %v10851_v34 }
 0x6fa   :  { %2223 = vmatprep.subr.bf16.mxu0 %v10854_v62  ;;  %2317 = vmatpush1.bf16.msra.mxu1 %v10857_v14 }
 0x6fb   :  { %2318 = vmatprep.subr.bf16.mxu1 %v10860_v8 }
 0x6fd   :  { %2224 = vmatpush1.bf16.msra.mxu0 %v10863_v13 }
 0x6fe   :  { %2225 = vmatprep.subr.bf16.mxu0 %v10866_v2  ;;  %2319 = vmatpush1.bf16.msra.mxu1 %v10869_v25 }
 0x6ff   :  { %2320 = vmatprep.subr.bf16.mxu1 %v10872_v18 }
 0x701   :  { %2226 = vmatpush1.bf16.msra.mxu0 %v10875_v26 }
 0x702   :  { %2227 = vmatprep.subr.bf16.mxu0 %v10878_v29  ;;  %2321 = vmatpush1.bf16.msra.mxu1 %v10881_v0  ;;  %v13753_v0 = vld [vmem:[#allocation44_spill] sm:$0xff] }
 0x703   :  { %2322 = vmatprep.subr.bf16.mxu1 %v10884_v45  ;;  %v13752_v45 = vld [vmem:[#allocation41_spill] sm:$0xff] }
 0x705   :  { %2228 = vmatpush1.bf16.msra.mxu0 %v10887_v53 }
 0x706   :  { %2229 = vmatprep.subr.bf16.mxu0 %v10890_v40  ;;  %2323 = vmatpush1.bf16.msra.mxu1 %v10893_v16  ;;  %v13751_v16 = vld [vmem:[#allocation42_spill] sm:$0xff] }
 0x707   :  { %2324 = vmatprep.subr.bf16.mxu1 %v10896_v5  ;;  %v10914_v5 = vld [vmem:[#allocation7 + $0x2e4] ss:$24 sps:$4 sm:$0xff]  }
 0x708   :  { %13713 = vst [vmem:[#allocation77_spill] sm:$0xff] %v10914_v5 }
 0x709   :  { %2230 = vmatpush1.bf16.msra.mxu0 %v10899_v43  ;;  %v10917_v43 = vld [vmem:[#allocation7 + $0x2a0] ss:$24 sps:$4 sm:$0xff]  }
 0x70a   :  { %2231 = vmatprep.subr.bf16.mxu0 %v10902_v24  ;;  %2325 = vmatpush1.bf16.msra.mxu1 %v10905_v4  ;;  %13714 = vst [vmem:[#allocation78_spill] sm:$0xff] %v10917_v43  ;;  %v10920_v24 = vld [vmem:[#allocation7 + $0x2d4] ss:$24 sps:$4 sm:$0xff]  }
 0x70b   :  { %2326 = vmatprep.subr.bf16.mxu1 %v10908_v31  ;;  %13715 = vst [vmem:[#allocation79_spill] sm:$0xff] %v10920_v24  ;;  %v10924_v4 = vld [vmem:[#allocation7 + $0xc] ss:$24 sps:$4 sm:$0xff]   ;;  %v10927_v31 = vld [vmem:[#allocation7 + $0x2d0] ss:$24 sps:$4 sm:$0xff]  }
 0x70c   :  { %13716 = vst [vmem:[#allocation80_spill] sm:$0xff] %v10924_v4  ;;  %13717 = vst [vmem:[#allocation81_spill] sm:$0xff] %v10927_v31 }
 0x70d   :  { %2232 = vmatpush1.bf16.msra.mxu0 %v10911_v27  ;;  %v10930_v27 = vld [vmem:[#allocation7 + $0x14] ss:$24 sps:$4 sm:$0xff]  }
 0x70e   :  { %2233 = vmatprep.subr.bf16.mxu0 %v10914_v5  ;;  %2327 = vmatpush1.bf16.msra.mxu1 %v10917_v43  ;;  %13718 = vst [vmem:[#allocation82_spill] sm:$0xff] %v10930_v27  ;;  %v10934_v43 = vld [vmem:[#allocation7 + $0x8] ss:$24 sps:$4 sm:$0xff]  }
 0x70f   :  { %2328 = vmatprep.subr.bf16.mxu1 %v10920_v24  ;;  %13719 = vst [vmem:[#allocation83_spill] sm:$0xff] %v10934_v43  ;;  %v10937_v24 = vld [vmem:[#allocation7 + $0x3c] ss:$24 sps:$4 sm:$0xff]  }
 0x710   :  { %13720 = vst [vmem:[#allocation84_spill] sm:$0xff] %v10937_v24 }
 0x711   :  { %2234 = vmatpush1.bf16.msra.mxu0 %v13653_v50  ;;  %v10940_v50 = vld [vmem:[#allocation7 + $0x38] ss:$24 sps:$4 sm:$0xff]  }
 0x712   :  { %2339 = vmatprep.subr.bf16.mxu0 %v10924_v4  ;;  %2329 = vmatpush1.bf16.msra.mxu1 %v10927_v31  ;;  %13721 = vst [vmem:[#allocation85_spill] sm:$0xff] %v10940_v50  ;;  %v10943_v4 = vld [vmem:[#allocation7 + $0x6c] ss:$24 sps:$4 sm:$0xff]   ;;  %v10946_v31 = vld [vmem:[#allocation7 + $0x68] ss:$24 sps:$4 sm:$0xff]  }
 0x713   :  { %2380 = vmatprep.subr.bf16.mxu1 %v10930_v27  ;;  %13722 = vst [vmem:[#allocation86_spill] sm:$0xff] %v10943_v4  ;;  %13723 = vst [vmem:[#allocation87_spill] sm:$0xff] %v10946_v31  ;;  %v13750_v27 = vld [vmem:[#allocation39_spill] sm:$0xff] }
 0x714   :  { %2236 = vmatmul.mubr.bf16.vlgmr.msra.gmra.mrb[64].mxu0 %v10739_v42  ;;  %v10949_v42 = vld [vmem:[#allocation7 + $0x9c] ss:$24 sps:$4 sm:$0xff]  }
 0x715   :  { %2340 = vmatpush1.bf16.msra.mxu0 %v10934_v43  ;;  %13724 = vst [vmem:[#allocation88_spill] sm:$0xff] %v10949_v42  ;;  %v10952_v43 = vld [vmem:[#allocation7 + $0x98] ss:$24 sps:$4 sm:$0xff]  }
 0x716   :  { %2341 = vmatprep.subr.bf16.mxu0 %v10937_v24  ;;  %13725 = vst [vmem:[#allocation66_spill] sm:$0xff] %v10952_v43  ;;  %v10955_v24 = vld [vmem:[#allocation7 + $0xcc] ss:$24 sps:$4 sm:$0xff]  }
 0x717   :  { %13726 = vst [vmem:[#allocation89_spill] sm:$0xff] %v10955_v24 }
 0x719   :  { %2342 = vmatpush1.bf16.msra.mxu0 %v10940_v50  ;;  %v10958_v50 = vld [vmem:[#allocation7 + $0xc8] ss:$24 sps:$4 sm:$0xff]  }
 0x71a   :  { %2343 = vmatprep.subr.bf16.mxu0 %v10943_v4  ;;  %13727 = vst [vmem:[#allocation90_spill] sm:$0xff] %v10958_v50  ;;  %v10961_v4 = vld [vmem:[#allocation7 + $0xfc] ss:$24 sps:$4 sm:$0xff]  }
 0x71b   :  { %13728 = vst [vmem:[#allocation91_spill] sm:$0xff] %v10961_v4 }
 0x71d   :  { %2344 = vmatpush1.bf16.msra.mxu0 %v10946_v31  ;;  %v10964_v31 = vld [vmem:[#allocation7 + $0xf8] ss:$24 sps:$4 sm:$0xff]  }
 0x71e   :  { %2345 = vmatprep.subr.bf16.mxu0 %v10949_v42  ;;  %13729 = vst [vmem:[#allocation92_spill] sm:$0xff] %v10964_v31  ;;  %v10967_v42 = vld [vmem:[#allocation7 + $0x12c] ss:$24 sps:$4 sm:$0xff]  }
 0x71f   :  { %13730 = vst [vmem:[#allocation93_spill] sm:$0xff] %v10967_v42 }
 0x721   :  { %2346 = vmatpush1.bf16.msra.mxu0 %v10952_v43  ;;  %v10970_v43 = vld [vmem:[#allocation7 + $0x128] ss:$24 sps:$4 sm:$0xff]  }
 0x722   :  { %2347 = vmatprep.subr.bf16.mxu0 %v10955_v24  ;;  %13731 = vst [vmem:[#allocation94_spill] sm:$0xff] %v10970_v43  ;;  %v10973_v24 = vld [vmem:[#allocation7 + $0x15c] ss:$24 sps:$4 sm:$0xff]  }
 0x723   :  { %13732 = vst [vmem:[#allocation95_spill] sm:$0xff] %v10973_v24 }
 0x725   :  { %2348 = vmatpush1.bf16.msra.mxu0 %v10958_v50  ;;  %v10976_v50 = vld [vmem:[#allocation7 + $0x158] ss:$24 sps:$4 sm:$0xff]  }
 0x726   :  { %2349 = vmatprep.subr.bf16.mxu0 %v10961_v4  ;;  %13733 = vst [vmem:[#allocation96_spill] sm:$0xff] %v10976_v50  ;;  %v10979_v4 = vld [vmem:[#allocation7 + $0x18c] ss:$24 sps:$4 sm:$0xff]  }
 0x727   :  { %13734 = vst [vmem:[#allocation97_spill] sm:$0xff] %v10979_v4 }
 0x729   :  { %2350 = vmatpush1.bf16.msra.mxu0 %v10964_v31  ;;  %v10982_v31 = vld [vmem:[#allocation7 + $0x188] ss:$24 sps:$4 sm:$0xff]  }
 0x72a   :  { %2351 = vmatprep.subr.bf16.mxu0 %v10967_v42  ;;  %13735 = vst [vmem:[#allocation98_spill] sm:$0xff] %v10982_v31  ;;  %v10985_v42 = vld [vmem:[#allocation7 + $0x1bc] ss:$24 sps:$4 sm:$0xff]  }
 0x72b   :  { %13736 = vst [vmem:[#allocation99_spill] sm:$0xff] %v10985_v42 }
 0x72d   :  { %2352 = vmatpush1.bf16.msra.mxu0 %v10970_v43  ;;  %v10988_v43 = vld [vmem:[#allocation7 + $0x1b8] ss:$24 sps:$4 sm:$0xff]  }
 0x72e   :  { %2353 = vmatprep.subr.bf16.mxu0 %v10973_v24  ;;  %13737 = vst [vmem:[#allocation100_spill] sm:$0xff] %v10988_v43  ;;  %v10991_v24 = vld [vmem:[#allocation7 + $0x1ec] ss:$24 sps:$4 sm:$0xff]  }
 0x72f   :  { %13738 = vst [vmem:[#allocation101_spill] sm:$0xff] %v10991_v24 }
 0x731   :  { %2354 = vmatpush1.bf16.msra.mxu0 %v10976_v50  ;;  %v10994_v50 = vld [vmem:[#allocation7 + $0x1e8] ss:$24 sps:$4 sm:$0xff]  }
 0x732   :  { %2355 = vmatprep.subr.bf16.mxu0 %v10979_v4  ;;  %13739 = vst [vmem:[#allocation102_spill] sm:$0xff] %v10994_v50  ;;  %v10997_v4 = vld [vmem:[#allocation7 + $0x21c] ss:$24 sps:$4 sm:$0xff]  }
 0x733   :  { %13740 = vst [vmem:[#allocation103_spill] sm:$0xff] %v10997_v4 }
 0x735   :  { %2356 = vmatpush1.bf16.msra.mxu0 %v10982_v31  ;;  %v11000_v31 = vld [vmem:[#allocation7 + $0x218] ss:$24 sps:$4 sm:$0xff]  }
 0x736   :  { %2357 = vmatprep.subr.bf16.mxu0 %v10985_v42  ;;  %13741 = vst [vmem:[#allocation104_spill] sm:$0xff] %v11000_v31  ;;  %v11003_v42 = vld [vmem:[#allocation7 + $0x24c] ss:$24 sps:$4 sm:$0xff]  }
 0x737   :  { %13742 = vst [vmem:[#allocation105_spill] sm:$0xff] %v11003_v42 }
 0x739   :  { %2358 = vmatpush1.bf16.msra.mxu0 %v10988_v43  ;;  %v11006_v43 = vld [vmem:[#allocation7 + $0x248] ss:$24 sps:$4 sm:$0xff]  }
 0x73a   :  { %2359 = vmatprep.subr.bf16.mxu0 %v10991_v24  ;;  %13743 = vst [vmem:[#allocation106_spill] sm:$0xff] %v11006_v43  ;;  %v11009_v24 = vld [vmem:[#allocation7 + $0x27c] ss:$24 sps:$4 sm:$0xff]  }
 0x73b   :  { %13744 = vst [vmem:[#allocation107_spill] sm:$0xff] %v11009_v24 }
 0x73d   :  { %2360 = vmatpush1.bf16.msra.mxu0 %v10994_v50  ;;  %v11012_v50 = vld [vmem:[#allocation7 + $0x278] ss:$24 sps:$4 sm:$0xff]  }
 0x73e   :  { %2361 = vmatprep.subr.bf16.mxu0 %v10997_v4  ;;  %13745 = vst [vmem:[#allocation108_spill] sm:$0xff] %v11012_v50  ;;  %v11015_v4 = vld [vmem:[#allocation7 + $0x2ac] ss:$24 sps:$4 sm:$0xff]  }
 0x73f   :  { %13746 = vst [vmem:[#allocation109_spill] sm:$0xff] %v11015_v4 }
 0x741   :  { %2362 = vmatpush1.bf16.msra.mxu0 %v11000_v31  ;;  %v11018_v31 = vld [vmem:[#allocation7 + $0x2a8] ss:$24 sps:$4 sm:$0xff]  }
 0x742   :  { %2363 = vmatprep.subr.bf16.mxu0 %v11003_v42  ;;  %13747 = vst [vmem:[#allocation110_spill] sm:$0xff] %v11018_v31  ;;  %v11021_v42 = vld [vmem:[#allocation7 + $0x2dc] ss:$24 sps:$4 sm:$0xff]  }
 0x743   :  { %13748 = vst [vmem:[#allocation111_spill] sm:$0xff] %v11021_v42 }
 0x745   :  { %2364 = vmatpush1.bf16.msra.mxu0 %v11006_v43  ;;  %v11024_v43 = vld [vmem:[#allocation7 + $0x2d8] ss:$24 sps:$4 sm:$0xff]  }
 0x746   :  { %2365 = vmatprep.subr.bf16.mxu0 %v11009_v24  ;;  %13749 = vst [vmem:[#allocation112_spill] sm:$0xff] %v11024_v43 }
 0x749   :  { %2366 = vmatpush1.bf16.msra.mxu0 %v11012_v50 }
 0x74a   :  { %2367 = vmatprep.subr.bf16.mxu0 %v11015_v4 }
 0x74d   :  { %2368 = vmatpush1.bf16.msra.mxu0 %v11018_v31 }
 0x74e   :  { %2369 = vmatprep.subr.bf16.mxu0 %v11021_v42 }
 0x751   :  { %2370 = vmatpush1.bf16.msra.mxu0 %v11024_v43 }
 0x752   :  { %2475 = vmatprep.subr.bf16.mxu0 %v13688_v35 }
 0x7a7   :  { %v2155_v24 = vpop.f32.mrb[60].mxu0  ;;  %v2196_v50 = vpop.f32.mrb[48].mxu1 }
 0x7a8   :  { %v2244_v5 = vadd.f32 %v2155_v24, %v13750_v27  ;;  %v2246_v4 = vadd.f32 %v2196_v50, %v13751_v16  ;;  %v2157_v40 = vpop.f32.mrb[61].mxu0  ;;  %v2198_v53 = vpop.f32.mrb[49].mxu1 }
 0x7a9   :  { %v2245_v31 = vadd.f32 %v2157_v40, %v13752_v45  ;;  %v2247_v29 = vadd.f32 %v2198_v53, %v13753_v0  ;;  %v2159_v26 = vpop.f32.mrb[62].mxu0  ;;  %v2200_v42 = vpop.f32.mrb[50].mxu1 }
 0x7aa   :  { %v2160_v18 = vpop.f32.mrb[63].mxu0  ;;  %v2201_v25 = vpop.f32.mrb[51].mxu1  ;;  %v7087_v2 = vmul.f32 -1.442695, %v2244_v5  ;;  %v7089_v8 = vmul.f32 -1.442695, %v2246_v4 }
 0x7ab   :  { %v7088_v43 = vmul.f32 -1.442695, %v2245_v31  ;;  %v7090_v27 = vmul.f32 -1.442695, %v2247_v29  ;;  %v13755_v42 = vld [vmem:[#allocation59_spill] sm:$0xff] }
 0x7ac   :  { %8407 = vpow2.f32 %v7087_v2 }
 0x7ad   :  { %8409 = vpow2.f32 %v7088_v43 }
 0x7ae   :  { %8411 = vpow2.f32 %v7089_v8 }
 0x7af   :  { %8413 = vpow2.f32 %v7090_v27 }
 0x7b6   :  { %v8408_v35 = vpop.eup %8407 }
 0x7b7   :  { %v8410_v13 = vpop.eup %8409  ;;  %v2260_v24 = vadd.f32 1.0, %v8408_v35 }
 0x7b8   :  { %v2261_v16 = vadd.f32 1.0, %v8410_v13  ;;  %v8412_v45 = vpop.eup %8411  ;;  %v13754_v13 = vld [vmem:[#allocation58_spill] sm:$0xff] }
 0x7b9   :  { %8415 = vrcp.f32 %v2260_v24  ;;  %v8414_v26 = vpop.eup %8413  ;;  %v2262_v43 = vadd.f32 1.0, %v8412_v45 }
 0x7ba   :  { %8417 = vrcp.f32 %v2261_v16  ;;  %v2263_v50 = vadd.f32 1.0, %v8414_v26 }
 0x7c3   :  { %v8416_v53 = vpop.eup %8415 }
 0x7c4   :  { %v8418_v40 = vpop.eup %8417 }
 0x7e7   :  { %v2237_v0 = vpop.f32.mrb[64].mxu0 }
 0x7e8   :  { %v2272_v18 = vadd.f32 %v2237_v0, %v10052_v57  ;;  %v2239_v25 = vpop.f32.mrb[65].mxu0 }
 0x7e9   :  { %v2273_v31 = vadd.f32 %v2239_v25, %v10055_v59  ;;  %v2241_v2 = vpop.f32.mrb[66].mxu0 }
 0x7ea   :  { %v2274_v5 = vmul.f32 %v8416_v53, %v2272_v18  ;;  %v2242_v4 = vpop.f32.mrb[67].mxu0 }
 0x7eb   :  { %v2275_v29 = vmul.f32 %v8418_v40, %v2273_v31  ;;  %v13776_v4 = vld [vmem:[#allocation79_spill] sm:$0xff] }
 0x7ec   :  { %v2276_v8 = vadd.f32 %v2274_v5, %v13754_v13  ;;  %v13775_v5 = vld [vmem:[#allocation78_spill] sm:$0xff]  ;;  %v13778_v13 = vld [vmem:[#allocation81_spill] sm:$0xff] }
 0x7ed   :  { %v2277_v35 = vadd.f32 %v2275_v29, %v13755_v42  ;;  %v11110_v29 = vld [vmem:[#allocation7 + $0x2e0] ss:$24 sps:$4 sm:$0xff]   ;;  %v13781_v42 = vld [vmem:[#allocation84_spill] sm:$0xff] }
 0x7ee   :  { %8419 = vtanh.f32 %v2276_v8  ;;  %v13779_v8 = vld [vmem:[#allocation82_spill] sm:$0xff] }
 0x7ef   :  { %8421 = vtanh.f32 %v2277_v35  ;;  %v13782_v35 = vld [vmem:[#allocation85_spill] sm:$0xff] }
 0x7f0   :  { %8423 = vrcp.f32 %v2262_v43  ;;  %v13777_v43 = vld [vmem:[#allocation80_spill] sm:$0xff] }
 0x7f1   :  { %8425 = vrcp.f32 %v2263_v50  ;;  %v13780_v50 = vld [vmem:[#allocation83_spill] sm:$0xff] }
 0x7f8   :  { %v8420_v27 = vpop.eup %8419 }
 0x7f9   :  { %v8422_v24 = vpop.eup %8421  ;;  %v2280_v16 = vsub.f32 %v10731_v10, %v8420_v27 }
 0x7fa   :  { %v8424_v0 = vpop.eup %8423  ;;  %v2281_v25 = vsub.f32 %v10733_v3, %v8422_v24 }
 0x7fb   :  { %v8426_v18 = vpop.eup %8425  ;;  %v2282_v53 = vmul.f32 %v8424_v0, %v2280_v16  ;;  %v13785_v16 = vld [vmem:[#allocation88_spill] sm:$0xff]  ;;  %v13786_v0 = vld [vmem:[#allocation66_spill] sm:$0xff] }
 0x7fc   :  { %v2283_v31 = vmul.f32 %v8426_v18, %v2281_v25  ;;  %v13787_v25 = vld [vmem:[#allocation89_spill] sm:$0xff]  ;;  %v13788_v18 = vld [vmem:[#allocation90_spill] sm:$0xff] }
 0x7fd   :  { %v11038_v45 = vadd.f32 %v8420_v27, %v2282_v53  ;;  %v13783_v27 = vld [vmem:[#allocation86_spill] sm:$0xff]  ;;  %v13789_v53 = vld [vmem:[#allocation91_spill] sm:$0xff] }
 0x7fe   :  { %v11040_v2 = vadd.f32 %v8422_v24, %v2283_v31  ;;  %v13784_v24 = vld [vmem:[#allocation87_spill] sm:$0xff]  ;;  %v13790_v31 = vld [vmem:[#allocation92_spill] sm:$0xff] }
 0x7ff   :  { %v11046_v40 = vpack.c.bf16 %v11038_v45, %v11038_v45 }
 0x800   :  { %v2297_v26 = vpack.c.bf16 %v11040_v2, %v11040_v2 }
 0x802   :  { %2330 = vmatprep.mubr.bf16.mxu1 %v2297_v26  ;;  %2371 = vmatprep.mubr.bf16.mxu0 %v2297_v26 }
 0x803   :  { %2331 = vmatmul.mubr.bf16.vlgmr.msra.gmra.mrb[52].mxu1 %v11046_v40  ;;  %2372 = vmatmul.mubr.bf16.vlgmr.msra.gmra.mrb[68].mxu0 %v11046_v40 }
 0x804   :  { %2381 = vmatpush1.bf16.msra.mxu1 %v10743_v6  ;;  %2412 = vmatprep.mubr.bf16.mxu1 %v2297_v26  ;;  %v13791_v26 = vld [vmem:[#allocation93_spill] sm:$0xff] }
 0x805   :  { %2382 = vmatprep.subr.bf16.mxu1 %v10746_v28  ;;  %2476 = vmatpush1.bf16.msra.mxu0 %v10749_v63  ;;  %v13756_v63 = vld [vmem:[#allocation32_spill] sm:$0xff] }
 0x806   :  { %2477 = vmatprep.subr.bf16.mxu0 %v10752_v48  ;;  %v13757_v48 = vld [vmem:[#allocation52_spill] sm:$0xff] }
 0x808   :  { %2383 = vmatpush1.bf16.msra.mxu1 %v10755_v52 }
 0x809   :  { %2384 = vmatprep.subr.bf16.mxu1 %v10758_v22  ;;  %2478 = vmatpush1.bf16.msra.mxu0 %v10761_v33  ;;  %v13758_v33 = vld [vmem:[#allocation53_spill] sm:$0xff] }
 0x80a   :  { %2479 = vmatprep.subr.bf16.mxu0 %v10764_v17  ;;  %v13759_v17 = vld [vmem:[#allocation31_spill] sm:$0xff] }
 0x80c   :  { %2385 = vmatpush1.bf16.msra.mxu1 %v10767_v36 }
 0x80d   :  { %2386 = vmatprep.subr.bf16.mxu1 %v10770_v39  ;;  %2480 = vmatpush1.bf16.msra.mxu0 %v10773_v20  ;;  %v13760_v20 = vld [vmem:[#allocation34_spill] sm:$0xff] }
 0x80e   :  { %2481 = vmatprep.subr.bf16.mxu0 %v10776_v23  ;;  %v13761_v23 = vld [vmem:[#allocation33_spill] sm:$0xff] }
 0x810   :  { %2387 = vmatpush1.bf16.msra.mxu1 %v10779_v41 }
 0x811   :  { %2388 = vmatprep.subr.bf16.mxu1 %v10782_v46  ;;  %2482 = vmatpush1.bf16.msra.mxu0 %v10785_v37  ;;  %v13762_v37 = vld [vmem:[#allocation36_spill] sm:$0xff] }
 0x812   :  { %2483 = vmatprep.subr.bf16.mxu0 %v10788_v19  ;;  %v13763_v19 = vld [vmem:[#allocation54_spill] sm:$0xff] }
 0x814   :  { %2389 = vmatpush1.bf16.msra.mxu1 %v10791_v38 }
 0x815   :  { %2390 = vmatprep.subr.bf16.mxu1 %v10794_v44  ;;  %2484 = vmatpush1.bf16.msra.mxu0 %v10797_v11  ;;  %v13764_v11 = vld [vmem:[#allocation55_spill] sm:$0xff] }
 0x816   :  { %2485 = vmatprep.subr.bf16.mxu0 %v10800_v51  ;;  %v13765_v51 = vld [vmem:[#allocation68_spill] sm:$0xff] }
 0x818   :  { %2391 = vmatpush1.bf16.msra.mxu1 %v10803_v32 }
 0x819   :  { %2392 = vmatprep.subr.bf16.mxu1 %v10806_v55  ;;  %2486 = vmatpush1.bf16.msra.mxu0 %v10809_v49  ;;  %v13766_v49 = vld [vmem:[#allocation69_spill] sm:$0xff] }
 0x81a   :  { %2487 = vmatprep.subr.bf16.mxu0 %v10812_v47  ;;  %v13767_v47 = vld [vmem:[#allocation70_spill] sm:$0xff] }
 0x81c   :  { %2393 = vmatpush1.bf16.msra.mxu1 %v10815_v58 }
 0x81d   :  { %2394 = vmatprep.subr.bf16.mxu1 %v10818_v56  ;;  %2488 = vmatpush1.bf16.msra.mxu0 %v10821_v60  ;;  %v13768_v60 = vld [vmem:[#allocation71_spill] sm:$0xff] }
 0x81e   :  { %2489 = vmatprep.subr.bf16.mxu0 %v10824_v30  ;;  %v13769_v30 = vld [vmem:[#allocation72_spill] sm:$0xff] }
 0x820   :  { %2395 = vmatpush1.bf16.msra.mxu1 %v10827_v7 }
 0x821   :  { %2396 = vmatprep.subr.bf16.mxu1 %v10830_v1  ;;  %2490 = vmatpush1.bf16.msra.mxu0 %v10833_v15  ;;  %v13770_v15 = vld [vmem:[#allocation73_spill] sm:$0xff] }
 0x822   :  { %2491 = vmatprep.subr.bf16.mxu0 %v10836_v9  ;;  %v13771_v9 = vld [vmem:[#allocation74_spill] sm:$0xff] }
 0x824   :  { %2397 = vmatpush1.bf16.msra.mxu1 %v10839_v54 }
 0x825   :  { %2398 = vmatprep.subr.bf16.mxu1 %v10842_v21  ;;  %2492 = vmatpush1.bf16.msra.mxu0 %v10845_v61  ;;  %v13772_v61 = vld [vmem:[#allocation75_spill] sm:$0xff] }
 0x826   :  { %2493 = vmatprep.subr.bf16.mxu0 %v10848_v12  ;;  %v13773_v12 = vld [vmem:[#allocation76_spill] sm:$0xff] }
 0x828   :  { %2399 = vmatpush1.bf16.msra.mxu1 %v10851_v34 }
 0x829   :  { %2400 = vmatprep.subr.bf16.mxu1 %v10854_v62  ;;  %2494 = vmatpush1.bf16.msra.mxu0 %v10857_v14  ;;  %v13774_v14 = vld [vmem:[#allocation77_spill] sm:$0xff] }
 0x82a   :  { %2495 = vmatprep.subr.bf16.mxu0 %v13756_v63  ;;  %v13793_v63 = vld [vmem:[#allocation95_spill] sm:$0xff] }
 0x82c   :  { %2401 = vmatpush1.bf16.msra.mxu1 %v13757_v48 }
 0x82d   :  { %2402 = vmatprep.subr.bf16.mxu1 %v13758_v33  ;;  %2496 = vmatpush1.bf16.msra.mxu0 %v13759_v17  ;;  %v13794_v17 = vld [vmem:[#allocation96_spill] sm:$0xff] }
 0x82e   :  { %2497 = vmatprep.subr.bf16.mxu0 %v13760_v20  ;;  %v13795_v20 = vld [vmem:[#allocation97_spill] sm:$0xff] }
 0x830   :  { %2403 = vmatpush1.bf16.msra.mxu1 %v13761_v23 }
 0x831   :  { %2404 = vmatprep.subr.bf16.mxu1 %v13762_v37  ;;  %2498 = vmatpush1.bf16.msra.mxu0 %v13763_v19  ;;  %v13796_v19 = vld [vmem:[#allocation98_spill] sm:$0xff] }
 0x832   :  { %2499 = vmatprep.subr.bf16.mxu0 %v13764_v11  ;;  %v13797_v11 = vld [vmem:[#allocation99_spill] sm:$0xff] }
 0x834   :  { %2405 = vmatpush1.bf16.msra.mxu1 %v13765_v51 }
 0x835   :  { %2406 = vmatprep.subr.bf16.mxu1 %v13766_v49  ;;  %2500 = vmatpush1.bf16.msra.mxu0 %v13767_v47  ;;  %v13798_v47 = vld [vmem:[#allocation100_spill] sm:$0xff] }
 0x836   :  { %2501 = vmatprep.subr.bf16.mxu0 %v13768_v60  ;;  %v13799_v60 = vld [vmem:[#allocation101_spill] sm:$0xff] }
 0x838   :  { %2407 = vmatpush1.bf16.msra.mxu1 %v13769_v30 }
 0x839   :  { %2408 = vmatprep.subr.bf16.mxu1 %v13770_v15  ;;  %2502 = vmatpush1.bf16.msra.mxu0 %v13771_v9  ;;  %v13800_v9 = vld [vmem:[#allocation102_spill] sm:$0xff] }
 0x83a   :  { %2503 = vmatprep.subr.bf16.mxu0 %v13772_v61  ;;  %v13801_v61 = vld [vmem:[#allocation103_spill] sm:$0xff] }
 0x83c   :  { %2409 = vmatpush1.bf16.msra.mxu1 %v13773_v12 }
 0x83d   :  { %2410 = vmatprep.subr.bf16.mxu1 %v13774_v14  ;;  %2504 = vmatpush1.bf16.msra.mxu0 %v13775_v5  ;;  %v13802_v5 = vld [vmem:[#allocation104_spill] sm:$0xff] }
 0x83e   :  { %2505 = vmatprep.subr.bf16.mxu0 %v13776_v4  ;;  %v13803_v4 = vld [vmem:[#allocation105_spill] sm:$0xff] }
 0x840   :  { %2411 = vmatpush1.bf16.msra.mxu1 %v11110_v29 }
 0x841   :  { %2516 = vmatprep.subr.bf16.mxu1 %v13777_v43  ;;  %2506 = vmatpush1.bf16.msra.mxu0 %v13778_v13  ;;  %v13804_v43 = vld [vmem:[#allocation106_spill] sm:$0xff]  ;;  %v13805_v13 = vld [vmem:[#allocation107_spill] sm:$0xff] }
 0x842   :  { %2557 = vmatprep.subr.bf16.mxu0 %v13779_v8  ;;  %v13806_v8 = vld [vmem:[#allocation108_spill] sm:$0xff] }
 0x843   :  { %2413 = vmatmul.mubr.bf16.vlgmr.msra.gmra.mrb[56].mxu1 %v11046_v40  ;;  %v13792_v40 = vld [vmem:[#allocation94_spill] sm:$0xff] }
 0x844   :  { %2517 = vmatpush1.bf16.msra.mxu1 %v13780_v50  ;;  %v13807_v50 = vld [vmem:[#allocation109_spill] sm:$0xff] }
 0x845   :  { %2518 = vmatprep.subr.bf16.mxu1 %v13781_v42  ;;  %v13808_v42 = vld [vmem:[#allocation110_spill] sm:$0xff] }
 0x848   :  { %2519 = vmatpush1.bf16.msra.mxu1 %v13782_v35  ;;  %v13809_v35 = vld [vmem:[#allocation111_spill] sm:$0xff] }
 0x849   :  { %2520 = vmatprep.subr.bf16.mxu1 %v13783_v27  ;;  %v13810_v27 = vld [vmem:[#allocation112_spill] sm:$0xff] }
 0x84c   :  { %2521 = vmatpush1.bf16.msra.mxu1 %v13784_v24 }
 0x84d   :  { %2522 = vmatprep.subr.bf16.mxu1 %v13785_v16 }
 0x850   :  { %2523 = vmatpush1.bf16.msra.mxu1 %v13786_v0  ;;  %v13811_v0 = vld [vmem:[#allocation43_spill] sm:$0xff] }
 0x851   :  { %2524 = vmatprep.subr.bf16.mxu1 %v13787_v25 }
 0x854   :  { %2525 = vmatpush1.bf16.msra.mxu1 %v13788_v18  ;;  %v13812_v18 = vld [vmem:[#allocation46_spill] sm:$0xff] }
 0x855   :  { %2526 = vmatprep.subr.bf16.mxu1 %v13789_v53 }
 0x858   :  { %2527 = vmatpush1.bf16.msra.mxu1 %v13790_v31 }
 0x859   :  { %2528 = vmatprep.subr.bf16.mxu1 %v13791_v26 }
 0x85c   :  { %2529 = vmatpush1.bf16.msra.mxu1 %v13792_v40  ;;  %v13813_v40 = vld [vmem:[#allocation45_spill] sm:$0xff] }
 0x85d   :  { %2530 = vmatprep.subr.bf16.mxu1 %v13793_v63 }
 0x860   :  { %2531 = vmatpush1.bf16.msra.mxu1 %v13794_v17  ;;  %v13814_v17 = vld [vmem:[#allocation48_spill] sm:$0xff] }
 0x861   :  { %2532 = vmatprep.subr.bf16.mxu1 %v13795_v20 }
 0x864   :  { %2533 = vmatpush1.bf16.msra.mxu1 %v13796_v19 }
 0x865   :  { %2534 = vmatprep.subr.bf16.mxu1 %v13797_v11 }
 0x868   :  { %2535 = vmatpush1.bf16.msra.mxu1 %v13798_v47 }
 0x869   :  { %2536 = vmatprep.subr.bf16.mxu1 %v13799_v60 }
 0x86c   :  { %2537 = vmatpush1.bf16.msra.mxu1 %v13800_v9 }
 0x86d   :  { %2538 = vmatprep.subr.bf16.mxu1 %v13801_v61 }
 0x870   :  { %2539 = vmatpush1.bf16.msra.mxu1 %v13802_v5 }
 0x871   :  { %2540 = vmatprep.subr.bf16.mxu1 %v13803_v4 }
 0x874   :  { %2541 = vmatpush1.bf16.msra.mxu1 %v13804_v43 }
 0x875   :  { %2542 = vmatprep.subr.bf16.mxu1 %v13805_v13 }
 0x878   :  { %2543 = vmatpush1.bf16.msra.mxu1 %v13806_v8 }
 0x879   :  { %2544 = vmatprep.subr.bf16.mxu1 %v13807_v50 }
 0x87c   :  { %2545 = vmatpush1.bf16.msra.mxu1 %v13808_v42 }
 0x87d   :  { %2546 = vmatprep.subr.bf16.mxu1 %v13809_v35 }
 0x880   :  { %2547 = vmatpush1.bf16.msra.mxu1 %v13810_v27 }
 0x8d6   :  { %v2332_v24 = vpop.f32.mrb[52].mxu1  ;;  %v2373_v16 = vpop.f32.mrb[68].mxu0 }
 0x8d7   :  { %v2421_v25 = vadd.f32 %v2332_v24, %v13811_v0  ;;  %v2423_v53 = vadd.f32 %v2373_v16, %v13812_v18  ;;  %v2334_v31 = vpop.f32.mrb[53].mxu1  ;;  %v2375_v26 = vpop.f32.mrb[69].mxu0 }
 0x8d8   :  { %v2422_v63 = vadd.f32 %v2334_v31, %v13813_v40  ;;  %v2424_v20 = vadd.f32 %v2375_v26, %v13814_v17  ;;  %v2336_v19 = vpop.f32.mrb[54].mxu1  ;;  %v2377_v11 = vpop.f32.mrb[70].mxu0  ;;  %v13815_v17 = vld [vmem:[#allocation60_spill] sm:$0xff] }
 0x8d9   :  { %v2337_v47 = vpop.f32.mrb[55].mxu1  ;;  %v2378_v60 = vpop.f32.mrb[71].mxu0  ;;  %v7091_v9 = vmul.f32 -1.442695, %v2421_v25  ;;  %v7093_v43 = vmul.f32 -1.442695, %v2423_v53 }
 0x8da   :  { %v7092_v61 = vmul.f32 -1.442695, %v2422_v63  ;;  %v7094_v13 = vmul.f32 -1.442695, %v2424_v20  ;;  %v13816_v11 = vld [vmem:[#allocation61_spill] sm:$0xff] }
 0x8db   :  { %8427 = vpow2.f32 %v7091_v9 }
 0x8dc   :  { %8429 = vpow2.f32 %v7092_v61 }
 0x8dd   :  { %8431 = vpow2.f32 %v7093_v43 }
 0x8de   :  { %8433 = vpow2.f32 %v7094_v13 }
 0x8e5   :  { %v8428_v5 = vpop.eup %8427 }
 0x8e6   :  { %v8430_v4 = vpop.eup %8429  ;;  %v2437_v8 = vadd.f32 1.0, %v8428_v5 }
 0x8e7   :  { %v2438_v50 = vadd.f32 1.0, %v8430_v4  ;;  %v8432_v42 = vpop.eup %8431 }
 0x8e8   :  { %8435 = vrcp.f32 %v2437_v8  ;;  %v8434_v27 = vpop.eup %8433  ;;  %v2439_v63 = vadd.f32 1.0, %v8432_v42 }
 0x8e9   :  { %8437 = vrcp.f32 %v2438_v50  ;;  %v2440_v19 = vadd.f32 1.0, %v8434_v27 }
 0x8f2   :  { %v8436_v0 = vpop.eup %8435 }
 0x8f3   :  { %v8438_v31 = vpop.eup %8437 }
 0x916   :  { %v2414_v35 = vpop.f32.mrb[56].mxu1 }
 0x917   :  { %v2449_v24 = vadd.f32 %v2414_v35, %v10052_v57  ;;  %v2416_v16 = vpop.f32.mrb[57].mxu1 }
 0x918   :  { %v2450_v25 = vadd.f32 %v2416_v16, %v10055_v59  ;;  %v2418_v18 = vpop.f32.mrb[58].mxu1  ;;  %v7877_v16 = vld [vmem:[#allocation10 + $0x184] ss:$24 sps:$4 sm:$0xff]  }
 0x919   :  { %v2451_v26 = vmul.f32 %v8436_v0, %v2449_v24  ;;  %v2419_v53 = vpop.f32.mrb[59].mxu1  ;;  %v7872_v24 = vld [vmem:[#allocation10 + $0x158] ss:$24 sps:$4 sm:$0xff]   ;;  %v7880_v0 = vld [vmem:[#allocation10 + $0x18c] ss:$24 sps:$4 sm:$0xff]  }
 0x91a   :  { %v2452_v40 = vmul.f32 %v8438_v31, %v2450_v25  ;;  %v7875_v25 = vld [vmem:[#allocation10 + $0x180] ss:$24 sps:$4 sm:$0xff]   ;;  %v7883_v31 = vld [vmem:[#allocation10 + $0x1b4] ss:$24 sps:$4 sm:$0xff]   ;;  %v7881_v53 = vld [vmem:[#allocation10 + $0x1b0] ss:$24 sps:$4 sm:$0xff]  }
 0x91b   :  { %v2453_v20 = vadd.f32 %v2451_v26, %v13815_v17  ;;  %v7878_v18 = vld [vmem:[#allocation10 + $0x188] ss:$24 sps:$4 sm:$0xff]   ;;  %v7886_v26 = vld [vmem:[#allocation10 + $0x1bc] ss:$24 sps:$4 sm:$0xff]   ;;  %v7892_v17 = vld [vmem:[#allocation10 + $0x1ec] ss:$24 sps:$4 sm:$0xff]  }
 0x91c   :  { %v2454_v47 = vadd.f32 %v2452_v40, %v13816_v11  ;;  %v7884_v40 = vld [vmem:[#allocation10 + $0x1b8] ss:$24 sps:$4 sm:$0xff]   ;;  %v7895_v11 = vld [vmem:[#allocation10 + $0x214] ss:$24 sps:$4 sm:$0xff]  }
 0x91d   :  { %8439 = vtanh.f32 %v2453_v20  ;;  %v7887_v20 = vld [vmem:[#allocation10 + $0x1e0] ss:$24 sps:$4 sm:$0xff]  }
 0x91e   :  { %8441 = vtanh.f32 %v2454_v47  ;;  %v7898_v47 = vld [vmem:[#allocation10 + $0x21c] ss:$24 sps:$4 sm:$0xff]  }
 0x91f   :  { %8443 = vrcp.f32 %v2439_v63  ;;  %v7889_v63 = vld [vmem:[#allocation10 + $0x1e4] ss:$24 sps:$4 sm:$0xff]  }
 0x920   :  { %8445 = vrcp.f32 %v2440_v19  ;;  %v7890_v19 = vld [vmem:[#allocation10 + $0x1e8] ss:$24 sps:$4 sm:$0xff]  }
 0x927   :  { %v8440_v60 = vpop.eup %8439 }
 0x928   :  { %v8442_v9 = vpop.eup %8441  ;;  %v2457_v61 = vsub.f32 %v11038_v45, %v8440_v60 }
 0x929   :  { %v8444_v5 = vpop.eup %8443  ;;  %v2458_v4 = vsub.f32 %v11040_v2, %v8442_v9 }
 0x92a   :  { %v8446_v43 = vpop.eup %8445  ;;  %v2459_v13 = vmul.f32 %v8444_v5, %v2457_v61  ;;  %v7901_v61 = vld [vmem:[#allocation10 + $0x244] ss:$24 sps:$4 sm:$0xff]   ;;  %v7899_v5 = vld [vmem:[#allocation10 + $0x240] ss:$24 sps:$4 sm:$0xff]  }
 0x92b   :  { %v2460_v8 = vmul.f32 %v8446_v43, %v2458_v4  ;;  %v7902_v4 = vld [vmem:[#allocation10 + $0x248] ss:$24 sps:$4 sm:$0xff]   ;;  %v7904_v43 = vld [vmem:[#allocation10 + $0x24c] ss:$24 sps:$4 sm:$0xff]  }
 0x92c   :  { %v11158_v50 = vadd.f32 %v8440_v60, %v2459_v13  ;;  %v7893_v60 = vld [vmem:[#allocation10 + $0x210] ss:$24 sps:$4 sm:$0xff]   ;;  %v7907_v13 = vld [vmem:[#allocation10 + $0x274] ss:$24 sps:$4 sm:$0xff]  }
 0x92d   :  { %v11160_v42 = vadd.f32 %v8442_v9, %v2460_v8  ;;  %v7896_v9 = vld [vmem:[#allocation10 + $0x218] ss:$24 sps:$4 sm:$0xff]   ;;  %v7910_v8 = vld [vmem:[#allocation10 + $0x27c] ss:$24 sps:$4 sm:$0xff]  }
 0x92e   :  { %v2473_v27 = vpack.c.bf16 %v11158_v50, %v11158_v50 }
 0x92f   :  { %v2474_v35 = vpack.c.bf16 %v11160_v42, %v11160_v42 }
 0x931   :  { %2507 = vmatprep.mubr.bf16.mxu0 %v2474_v35  ;;  %2548 = vmatprep.mubr.bf16.mxu1 %v2474_v35 }
 0x932   :  { %2508 = vmatmul.mubr.bf16.vlgmr.msra.gmra.mrb[72].mxu0 %v2473_v27  ;;  %2549 = vmatmul.mubr.bf16.vlgmr.msra.gmra.mrb[60].mxu1 %v2473_v27 }
 0x933   :  { %2558 = vmatpush1.bf16.msra.mxu0 %v10743_v6  ;;  %2589 = vmatprep.mubr.bf16.mxu0 %v2474_v35  ;;  %v7827_v6 = vld [vmem:[#allocation10] ss:$24 sps:$4 sm:$0xff]   ;;  %v7905_v35 = vld [vmem:[#allocation10 + $0x270] ss:$24 sps:$4 sm:$0xff]  }
 0x934   :  { %2559 = vmatprep.subr.bf16.mxu0 %v10746_v28  ;;  %v7829_v28 = vld [vmem:[#allocation10 + $0x4] ss:$24 sps:$4 sm:$0xff]  }
 0x935   :  { %3876 = vmatprep.subr.bf16.mxu1 %v7829_v28  ;;  %v7916_v28 = vld [vmem:[#allocation10 + $0x2ac] ss:$24 sps:$4 sm:$0xff]  }
 0x936   :  { %3877 = vmatpush1.bf16.msra.mxu1 %v7827_v6  ;;  %v7913_v6 = vld [vmem:[#allocation10 + $0x2a4] ss:$24 sps:$4 sm:$0xff]  }
 0x937   :  { %2560 = vmatpush1.bf16.msra.mxu0 %v10755_v52  ;;  %v7830_v52 = vld [vmem:[#allocation10 + $0x8] ss:$24 sps:$4 sm:$0xff]  }
 0x938   :  { %2561 = vmatprep.subr.bf16.mxu0 %v10758_v22  ;;  %v7832_v22 = vld [vmem:[#allocation10 + $0xc] ss:$24 sps:$4 sm:$0xff]  }
 0x93b   :  { %2562 = vmatpush1.bf16.msra.mxu0 %v10767_v36  ;;  %v7835_v36 = vld [vmem:[#allocation10 + $0x34] ss:$24 sps:$4 sm:$0xff]  }
 0x93c   :  { %2563 = vmatprep.subr.bf16.mxu0 %v10770_v39  ;;  %v7838_v39 = vld [vmem:[#allocation10 + $0x3c] ss:$24 sps:$4 sm:$0xff]   ;;  %3878 = vmatprep.subr.bf16.mxu1 %v7835_v36 }
 0x93d   :  { %v7919_v36 = vld [vmem:[#allocation10 + $0x2d4] ss:$24 sps:$4 sm:$0xff]  }
 0x93f   :  { %2564 = vmatpush1.bf16.msra.mxu0 %v10779_v41  ;;  %v7833_v41 = vld [vmem:[#allocation10 + $0x30] ss:$24 sps:$4 sm:$0xff]  }
 0x940   :  { %2565 = vmatprep.subr.bf16.mxu0 %v10782_v46  ;;  %v7836_v46 = vld [vmem:[#allocation10 + $0x38] ss:$24 sps:$4 sm:$0xff]   ;;  %3879 = vmatpush1.bf16.msra.mxu1 %v7833_v41 }
 0x941   :  { %v7917_v41 = vld [vmem:[#allocation10 + $0x2d0] ss:$24 sps:$4 sm:$0xff]  }
 0x943   :  { %2566 = vmatpush1.bf16.msra.mxu0 %v10791_v38  ;;  %v7841_v38 = vld [vmem:[#allocation10 + $0x64] ss:$24 sps:$4 sm:$0xff]  }
 0x944   :  { %2567 = vmatprep.subr.bf16.mxu0 %v10794_v44  ;;  %v7844_v44 = vld [vmem:[#allocation10 + $0x6c] ss:$24 sps:$4 sm:$0xff]   ;;  %3880 = vmatprep.subr.bf16.mxu1 %v7841_v38 }
 0x945   :  { %v7925_v38 = vld [vmem:[#allocation10 + $0x304] ss:$24 sps:$4 sm:$0xff]  }
 0x947   :  { %2568 = vmatpush1.bf16.msra.mxu0 %v10803_v32  ;;  %v7839_v32 = vld [vmem:[#allocation10 + $0x60] ss:$24 sps:$4 sm:$0xff]  }
 0x948   :  { %2569 = vmatprep.subr.bf16.mxu0 %v10806_v55  ;;  %v7842_v55 = vld [vmem:[#allocation10 + $0x68] ss:$24 sps:$4 sm:$0xff]   ;;  %3881 = vmatpush1.bf16.msra.mxu1 %v7839_v32 }
 0x94b   :  { %2570 = vmatpush1.bf16.msra.mxu0 %v10815_v58  ;;  %v7847_v58 = vld [vmem:[#allocation10 + $0x94] ss:$24 sps:$4 sm:$0xff]  }
 0x94c   :  { %2571 = vmatprep.subr.bf16.mxu0 %v10818_v56  ;;  %v7850_v56 = vld [vmem:[#allocation10 + $0x9c] ss:$24 sps:$4 sm:$0xff]   ;;  %3882 = vmatprep.subr.bf16.mxu1 %v7847_v58  ;;  %v13817_v58 = vld [vmem:[#allocation47_spill] sm:$0xff] }
 0x94f   :  { %2572 = vmatpush1.bf16.msra.mxu0 %v10827_v7  ;;  %v7845_v7 = vld [vmem:[#allocation10 + $0x90] ss:$24 sps:$4 sm:$0xff]  }
 0x950   :  { %2573 = vmatprep.subr.bf16.mxu0 %v10830_v1  ;;  %v7848_v1 = vld [vmem:[#allocation10 + $0x98] ss:$24 sps:$4 sm:$0xff]   ;;  %3883 = vmatpush1.bf16.msra.mxu1 %v7845_v7 }
 0x951   :  { %v13818_v7 = vld [vmem:[#allocation50_spill] sm:$0xff] }
 0x953   :  { %2574 = vmatpush1.bf16.msra.mxu0 %v10839_v54  ;;  %v7853_v54 = vld [vmem:[#allocation10 + $0xc4] ss:$24 sps:$4 sm:$0xff]  }
 0x954   :  { %2575 = vmatprep.subr.bf16.mxu0 %v10842_v21  ;;  %v7856_v21 = vld [vmem:[#allocation10 + $0xcc] ss:$24 sps:$4 sm:$0xff]   ;;  %3884 = vmatprep.subr.bf16.mxu1 %v7853_v54 }
 0x957   :  { %2576 = vmatpush1.bf16.msra.mxu0 %v10851_v34  ;;  %v7851_v34 = vld [vmem:[#allocation10 + $0xc0] ss:$24 sps:$4 sm:$0xff]  }
 0x958   :  { %2577 = vmatprep.subr.bf16.mxu0 %v10854_v62  ;;  %v7854_v62 = vld [vmem:[#allocation10 + $0xc8] ss:$24 sps:$4 sm:$0xff]   ;;  %3885 = vmatpush1.bf16.msra.mxu1 %v7851_v34  ;;  %v13819_v34 = vld [vmem:[#allocation49_spill] sm:$0xff] }
 0x95b   :  { %2578 = vmatpush1.bf16.msra.mxu0 %v13757_v48  ;;  %v7859_v48 = vld [vmem:[#allocation10 + $0xf4] ss:$24 sps:$4 sm:$0xff]  }
 0x95c   :  { %2579 = vmatprep.subr.bf16.mxu0 %v13758_v33  ;;  %v7862_v33 = vld [vmem:[#allocation10 + $0xfc] ss:$24 sps:$4 sm:$0xff]   ;;  %3886 = vmatprep.subr.bf16.mxu1 %v7859_v48  ;;  %v13820_v48 = vld [vmem:[#allocation51_spill] sm:$0xff] }
 0x95f   :  { %2580 = vmatpush1.bf16.msra.mxu0 %v13761_v23  ;;  %v7857_v23 = vld [vmem:[#allocation10 + $0xf0] ss:$24 sps:$4 sm:$0xff]  }
 0x960   :  { %2581 = vmatprep.subr.bf16.mxu0 %v13762_v37  ;;  %v7860_v37 = vld [vmem:[#allocation10 + $0xf8] ss:$24 sps:$4 sm:$0xff]   ;;  %3887 = vmatpush1.bf16.msra.mxu1 %v7857_v23 }
 0x963   :  { %2582 = vmatpush1.bf16.msra.mxu0 %v13765_v51  ;;  %v7865_v51 = vld [vmem:[#allocation10 + $0x124] ss:$24 sps:$4 sm:$0xff]  }
 0x964   :  { %2583 = vmatprep.subr.bf16.mxu0 %v13766_v49  ;;  %v7868_v49 = vld [vmem:[#allocation10 + $0x12c] ss:$24 sps:$4 sm:$0xff]   ;;  %3888 = vmatprep.subr.bf16.mxu1 %v7865_v51 }
 0x967   :  { %2584 = vmatpush1.bf16.msra.mxu0 %v13769_v30  ;;  %v7863_v30 = vld [vmem:[#allocation10 + $0x120] ss:$24 sps:$4 sm:$0xff]  }
 0x968   :  { %2585 = vmatprep.subr.bf16.mxu0 %v13770_v15  ;;  %v7866_v15 = vld [vmem:[#allocation10 + $0x128] ss:$24 sps:$4 sm:$0xff]   ;;  %3889 = vmatpush1.bf16.msra.mxu1 %v7863_v30 }
 0x96b   :  { %2586 = vmatpush1.bf16.msra.mxu0 %v13773_v12  ;;  %v7871_v12 = vld [vmem:[#allocation10 + $0x154] ss:$24 sps:$4 sm:$0xff]  }
 0x96c   :  { %2587 = vmatprep.subr.bf16.mxu0 %v13774_v14  ;;  %v7874_v14 = vld [vmem:[#allocation10 + $0x15c] ss:$24 sps:$4 sm:$0xff]   ;;  %3890 = vmatprep.subr.bf16.mxu1 %v7871_v12 }
 0x96f   :  { %2588 = vmatpush1.bf16.msra.mxu0 %v11110_v29  ;;  %v7869_v29 = vld [vmem:[#allocation10 + $0x150] ss:$24 sps:$4 sm:$0xff]  }
 0x970   :  { %4022 = vmatprep.subr.bf16.mxu0 %v7832_v22  ;;  %3891 = vmatpush1.bf16.msra.mxu1 %v7869_v29  ;;  %v7914_v22 = vld [vmem:[#allocation10 + $0x2a8] ss:$24 sps:$4 sm:$0xff]  }
 0x971   :  { %3892 = vmatprep.subr.bf16.mxu1 %v7877_v16 }
 0x972   :  { %2590 = vmatmul.mubr.bf16.vlgmr.msra.gmra.mrb[76].mxu0 %v2473_v27  ;;  %v7908_v27 = vld [vmem:[#allocation10 + $0x278] ss:$24 sps:$4 sm:$0xff]  }
 0x973   :  { %4023 = vmatpush1.bf16.msra.mxu0 %v7830_v52  ;;  %v7911_v52 = vld [vmem:[#allocation10 + $0x2a0] ss:$24 sps:$4 sm:$0xff]  }
 0x974   :  { %4024 = vmatprep.subr.bf16.mxu0 %v7838_v39  ;;  %3893 = vmatpush1.bf16.msra.mxu1 %v7875_v25  ;;  %v7922_v39 = vld [vmem:[#allocation10 + $0x2dc] ss:$24 sps:$4 sm:$0xff]  }
 0x975   :  { %3894 = vmatprep.subr.bf16.mxu1 %v7883_v31 }
 0x977   :  { %4025 = vmatpush1.bf16.msra.mxu0 %v7836_v46  ;;  %v7920_v46 = vld [vmem:[#allocation10 + $0x2d8] ss:$24 sps:$4 sm:$0xff]  }
 0x978   :  { %4026 = vmatprep.subr.bf16.mxu0 %v7844_v44  ;;  %3895 = vmatpush1.bf16.msra.mxu1 %v7881_v53  ;;  %v7928_v44 = vld [vmem:[#allocation10 + $0x30c] ss:$24 sps:$4 sm:$0xff]  }
 0x979   :  { %3896 = vmatprep.subr.bf16.mxu1 %v7889_v63 }
 0x97b   :  { %4027 = vmatpush1.bf16.msra.mxu0 %v7842_v55 }
 0x97c   :  { %4028 = vmatprep.subr.bf16.mxu0 %v7850_v56  ;;  %3897 = vmatpush1.bf16.msra.mxu1 %v7887_v20 }
 0x97d   :  { %3898 = vmatprep.subr.bf16.mxu1 %v7895_v11 }
 0x97f   :  { %4029 = vmatpush1.bf16.msra.mxu0 %v7848_v1 }
 0x980   :  { %4030 = vmatprep.subr.bf16.mxu0 %v7856_v21  ;;  %3899 = vmatpush1.bf16.msra.mxu1 %v7893_v60 }
 0x981   :  { %3900 = vmatprep.subr.bf16.mxu1 %v7901_v61 }
 0x983   :  { %4031 = vmatpush1.bf16.msra.mxu0 %v7854_v62 }
 0x984   :  { %4032 = vmatprep.subr.bf16.mxu0 %v7862_v33  ;;  %3901 = vmatpush1.bf16.msra.mxu1 %v7899_v5 }
 0x985   :  { %3902 = vmatprep.subr.bf16.mxu1 %v7907_v13 }
 0x987   :  { %4033 = vmatpush1.bf16.msra.mxu0 %v7860_v37 }
 0x988   :  { %4034 = vmatprep.subr.bf16.mxu0 %v7868_v49  ;;  %3903 = vmatpush1.bf16.msra.mxu1 %v7905_v35 }
 0x989   :  { %3904 = vmatprep.subr.bf16.mxu1 %v7913_v6 }
 0x98b   :  { %4035 = vmatpush1.bf16.msra.mxu0 %v7866_v15 }
 0x98c   :  { %4036 = vmatprep.subr.bf16.mxu0 %v7874_v14  ;;  %3905 = vmatpush1.bf16.msra.mxu1 %v7911_v52 }
 0x98d   :  { %3906 = vmatprep.subr.bf16.mxu1 %v7919_v36 }
 0x98f   :  { %4037 = vmatpush1.bf16.msra.mxu0 %v7872_v24 }
 0x990   :  { %4038 = vmatprep.subr.bf16.mxu0 %v7880_v0  ;;  %3907 = vmatpush1.bf16.msra.mxu1 %v7917_v41  ;;  %v7926_v41 = vld [vmem:[#allocation10 + $0x308] ss:$24 sps:$4 sm:$0xff]  }
 0x991   :  { %3949 = vmatprep.subr.bf16.mxu1 %v7925_v38  ;;  %v13826_v38 = vld [vmem:[#allocation123_spill] sm:$0xff] }
 0x993   :  { %4039 = vmatpush1.bf16.msra.mxu0 %v7878_v18 }
 0x994   :  { %4040 = vmatprep.subr.bf16.mxu0 %v7886_v26 }
 0x997   :  { %4041 = vmatpush1.bf16.msra.mxu0 %v7884_v40 }
 0x998   :  { %4042 = vmatprep.subr.bf16.mxu0 %v7892_v17 }
 0x99b   :  { %4043 = vmatpush1.bf16.msra.mxu0 %v7890_v19 }
 0x99c   :  { %4044 = vmatprep.subr.bf16.mxu0 %v7898_v47 }
 0x99f   :  { %4045 = vmatpush1.bf16.msra.mxu0 %v7896_v9  ;;  %v13821_v9 = vld [vmem:[#allocation62_spill] sm:$0xff] }
 0x9a0   :  { %4046 = vmatprep.subr.bf16.mxu0 %v7904_v43 }
 0x9a3   :  { %4047 = vmatpush1.bf16.msra.mxu0 %v7902_v4  ;;  %v13822_v4 = vld [vmem:[#allocation63_spill] sm:$0xff] }
 0x9a4   :  { %4048 = vmatprep.subr.bf16.mxu0 %v7910_v8 }
 0x9a7   :  { %4049 = vmatpush1.bf16.msra.mxu0 %v7908_v27 }
 0x9a8   :  { %4050 = vmatprep.subr.bf16.mxu0 %v7916_v28 }
 0x9ab   :  { %4051 = vmatpush1.bf16.msra.mxu0 %v7914_v22 }
 0x9ac   :  { %4052 = vmatprep.subr.bf16.mxu0 %v7922_v39  ;;  %v7923_v39 = vld [vmem:[#allocation10 + $0x300] ss:$24 sps:$4 sm:$0xff]  }
 0x9af   :  { %4053 = vmatpush1.bf16.msra.mxu0 %v7920_v46  ;;  %v13825_v46 = vld [vmem:[#allocation64_spill] sm:$0xff] }
 0x9b0   :  { %4095 = vmatprep.subr.bf16.mxu0 %v7928_v44  ;;  %v11217_v44 = vpack.c.bf16 %v13826_v38, %v13825_v46 }
 0xa05   :  { %v2509_v32 = vpop.f32.mrb[72].mxu0  ;;  %v2550_v55 = vpop.f32.mrb[60].mxu1 }
 0xa06   :  { %v2598_v56 = vadd.f32 %v2509_v32, %v13817_v58  ;;  %v2600_v1 = vadd.f32 %v2550_v55, %v13818_v7  ;;  %v2511_v54 = vpop.f32.mrb[73].mxu0  ;;  %v2552_v21 = vpop.f32.mrb[61].mxu1  ;;  %v7931_v32 = vld [vmem:[#allocation10 + $0x334] ss:$24 sps:$4 sm:$0xff]   ;;  %v11225_v58 = vpack.c.bf16 %v10733_v3, %v11040_v2  ;;  %v7932_v7 = vld [vmem:[#allocation10 + $0x338] ss:$24 sps:$4 sm:$0xff]  }
 0xa07   :  { %v2599_v62 = vadd.f32 %v2511_v54, %v13819_v34  ;;  %v2601_v33 = vadd.f32 %v2552_v21, %v13820_v48  ;;  %v2513_v23 = vpop.f32.mrb[74].mxu0  ;;  %v2554_v37 = vpop.f32.mrb[62].mxu1  ;;  %v7934_v55 = vld [vmem:[#allocation10 + $0x33c] ss:$24 sps:$4 sm:$0xff]   ;;  %v7940_v54 = vld [vmem:[#allocation10 + $0x36c] ss:$24 sps:$4 sm:$0xff]  }
 0xa08   :  { %v2514_v51 = vpop.f32.mrb[75].mxu0  ;;  %v2555_v49 = vpop.f32.mrb[63].mxu1  ;;  %v7095_v30 = vmul.f32 -1.442695, %v2598_v56  ;;  %v7097_v29 = vmul.f32 -1.442695, %v2600_v1 }
 0xa09   :  { %v7096_v15 = vmul.f32 -1.442695, %v2599_v62  ;;  %v7098_v24 = vmul.f32 -1.442695, %v2601_v33  ;;  %v7929_v56 = vld [vmem:[#allocation10 + $0x330] ss:$24 sps:$4 sm:$0xff]  }
 0xa0a   :  { %8447 = vpow2.f32 %v7095_v30  ;;  %v7937_v1 = vld [vmem:[#allocation10 + $0x364] ss:$24 sps:$4 sm:$0xff]   ;;  %v7935_v21 = vld [vmem:[#allocation10 + $0x360] ss:$24 sps:$4 sm:$0xff]   ;;  %v7943_v23 = vld [vmem:[#allocation10 + $0x394] ss:$24 sps:$4 sm:$0xff]  }
 0xa0b   :  { %8449 = vpow2.f32 %v7096_v15  ;;  %v7938_v34 = vld [vmem:[#allocation10 + $0x368] ss:$24 sps:$4 sm:$0xff]   ;;  %v7946_v37 = vld [vmem:[#allocation10 + $0x39c] ss:$24 sps:$4 sm:$0xff]  }
 0xa0c   :  { %8451 = vpow2.f32 %v7097_v29  ;;  %v13827_v62 = vld [vmem:[#allocation67_spill] sm:$0xff]  ;;  %v13828_v48 = vld [vmem:[#allocation30_spill] sm:$0xff]  ;;  %v13829_v51 = vld [vmem:[#allocation29_spill] sm:$0xff] }
 0xa0d   :  { %8453 = vpow2.f32 %v7098_v24  ;;  %v11231_v33 = vpack.c.bf16 %v13828_v48, %v13827_v62  ;;  %v13830_v49 = vld [vmem:[#allocation24_spill] sm:$0xff]  ;;  %v7947_v24 = vld [vmem:[#allocation10 + $0x3c0] ss:$24 sps:$4 sm:$0xff]  }
 0xa0e   :  { %v11237_v30 = vpack.c.bf16 %v13830_v49, %v13829_v51  ;;  %v7941_v15 = vld [vmem:[#allocation10 + $0x390] ss:$24 sps:$4 sm:$0xff]   ;;  %v7952_v29 = vld [vmem:[#allocation10 + $0x3cc] ss:$24 sps:$4 sm:$0xff]  }
 0xa14   :  { %v8448_v12 = vpop.eup %8447 }
 0xa15   :  { %v8450_v14 = vpop.eup %8449  ;;  %v2614_v16 = vadd.f32 1.0, %v8448_v12  ;;  %v7944_v12 = vld [vmem:[#allocation10 + $0x398] ss:$24 sps:$4 sm:$0xff]  }
 0xa16   :  { %v2615_v0 = vadd.f32 1.0, %v8450_v14  ;;  %v8452_v25 = vpop.eup %8451  ;;  %v7949_v14 = vld [vmem:[#allocation10 + $0x3c4] ss:$24 sps:$4 sm:$0xff]  }
 0xa17   :  { %8455 = vrcp.f32 %v2614_v16  ;;  %v8454_v31 = vpop.eup %8453  ;;  %v2616_v60 = vadd.f32 1.0, %v8452_v25  ;;  %v7950_v16 = vld [vmem:[#allocation10 + $0x3c8] ss:$24 sps:$4 sm:$0xff]   ;;  %v7955_v25 = vld [vmem:[#allocation10 + $0x3f4] ss:$24 sps:$4 sm:$0xff]  }
 0xa18   :  { %8457 = vrcp.f32 %v2615_v0  ;;  %v2617_v5 = vadd.f32 1.0, %v8454_v31  ;;  %v11243_v0 = vpack.c.bf16 %v11038_v45, %v10731_v10  ;;  %v13831_v31 = vld [vmem:[#allocation124_spill] sm:$0xff] }
 0xa21   :  { %v8456_v40 = vpop.eup %8455 }
 0xa22   :  { %v8458_v20 = vpop.eup %8457 }
 0xa45   :  { %v2591_v18 = vpop.f32.mrb[76].mxu0 }
 0xa46   :  { %v2626_v26 = vadd.f32 %v2591_v18, %v10052_v57  ;;  %v2593_v53 = vpop.f32.mrb[77].mxu0  ;;  %v7958_v18 = vld [vmem:[#allocation10 + $0x3fc] ss:$24 sps:$4 sm:$0xff]  }
 0xa47   :  { %v2627_v63 = vadd.f32 %v2593_v53, %v10055_v59  ;;  %v2595_v17 = vpop.f32.mrb[78].mxu0 }
 0xa48   :  { %v2628_v19 = vmul.f32 %v8456_v40, %v2626_v26  ;;  %v2596_v11 = vpop.f32.mrb[79].mxu0  ;;  %v13832_v26 = vld [vmem:[#allocation65_spill] sm:$0xff]  ;;  %v7961_v17 = vld [vmem:[#allocation10 + $0x424] ss:$24 sps:$4 sm:$0xff]  }
 0xa49   :  { %v2629_v47 = vmul.f32 %v8458_v20, %v2627_v63  ;;  %v11249_v53 = vpack.c.bf16 %v13832_v26, %v13831_v31  ;;  %v7953_v40 = vld [vmem:[#allocation10 + $0x3f0] ss:$24 sps:$4 sm:$0xff]   ;;  %v7964_v20 = vld [vmem:[#allocation10 + $0x42c] ss:$24 sps:$4 sm:$0xff]  }
 0xa4a   :  { %v2630_v61 = vadd.f32 %v2628_v19, %v13821_v9  ;;  %v7956_v63 = vld [vmem:[#allocation10 + $0x3f8] ss:$24 sps:$4 sm:$0xff]   ;;  %v7962_v11 = vld [vmem:[#allocation10 + $0x428] ss:$24 sps:$4 sm:$0xff]   ;;  %v7970_v9 = vld [vmem:[#allocation10 + $0x45c] ss:$24 sps:$4 sm:$0xff]  }
 0xa4b   :  { %v2631_v43 = vadd.f32 %v2629_v47, %v13822_v4  ;;  %v7959_v19 = vld [vmem:[#allocation10 + $0x420] ss:$24 sps:$4 sm:$0xff]  }
 0xa4c   :  { %8459 = vtanh.f32 %v2630_v61  ;;  %v11261_v61 = vpack.c.bf16 %v13831_v31, %v13832_v26  ;;  %v7968_v4 = vld [vmem:[#allocation10 + $0x458] ss:$24 sps:$4 sm:$0xff]   ;;  %v8018_v31 = vld [vmem:[#allocation10 + $0x5dc] ss:$24 sps:$4 sm:$0xff]  }
 0xa4d   :  { %8461 = vtanh.f32 %v2631_v43  ;;  %v7973_v43 = vld [vmem:[#allocation10 + $0x484] ss:$24 sps:$4 sm:$0xff]   ;;  %v8013_v26 = vld [vmem:[#allocation10 + $0x5d0] ss:$24 sps:$4 sm:$0xff]  }
 0xa4e   :  { %8463 = vrcp.f32 %v2616_v60  ;;  %v7967_v60 = vld [vmem:[#allocation10 + $0x454] ss:$24 sps:$4 sm:$0xff]  }
 0xa4f   :  { %8465 = vrcp.f32 %v2617_v5  ;;  %v7965_v5 = vld [vmem:[#allocation10 + $0x450] ss:$24 sps:$4 sm:$0xff]  }
 0xa56   :  { %v8460_v57 = vpop.eup %8459 }
 0xa57   :  { %v8462_v13 = vpop.eup %8461  ;;  %v2634_v8 = vsub.f32 %v11158_v50, %v8460_v57 }
 0xa58   :  { %v8464_v59 = vpop.eup %8463  ;;  %v2635_v35 = vsub.f32 %v11160_v42, %v8462_v13 }
 0xa59   :  { %v8466_v27 = vpop.eup %8465  ;;  %v2636_v6 = vmul.f32 %v8464_v59, %v2634_v8  ;;  %v7974_v8 = vld [vmem:[#allocation10 + $0x488] ss:$24 sps:$4 sm:$0xff]   ;;  %v7979_v59 = vld [vmem:[#allocation10 + $0x4b4] ss:$24 sps:$4 sm:$0xff]  }
 0xa5a   :  { %v2637_v28 = vmul.f32 %v8466_v27, %v2635_v35  ;;  %v7982_v35 = vld [vmem:[#allocation10 + $0x4bc] ss:$24 sps:$4 sm:$0xff]   ;;  %v7977_v27 = vld [vmem:[#allocation10 + $0x4b0] ss:$24 sps:$4 sm:$0xff]  }
 0xa5b   :  { %v11207_v52 = vadd.f32 %v8460_v57, %v2636_v6  ;;  %v7976_v57 = vld [vmem:[#allocation10 + $0x48c] ss:$24 sps:$4 sm:$0xff]   ;;  %v7980_v6 = vld [vmem:[#allocation10 + $0x4b8] ss:$24 sps:$4 sm:$0xff]  }
 0xa5c   :  { %v11209_v22 = vadd.f32 %v8462_v13, %v2637_v28  ;;  %v7971_v13 = vld [vmem:[#allocation10 + $0x480] ss:$24 sps:$4 sm:$0xff]   ;;  %v7985_v28 = vld [vmem:[#allocation10 + $0x4e4] ss:$24 sps:$4 sm:$0xff]  }
 0xa5d   :  { %13823 = vst [vmem:[#allocation113_spill] sm:$0xff] %v11207_v52  ;;  %v11255_v47 = vpack.c.bf16 %v11207_v52, %v11158_v50 }
 0xa5e   :  { %13824 = vst [vmem:[#allocation114_spill] sm:$0xff] %v11209_v22  ;;  %v11213_v36 = vpack.c.bf16 %v11160_v42, %v11209_v22 }
 0xa60   :  { %3908 = vmatprep.mubr.bf16.mxu1 %v11213_v36  ;;  %4054 = vmatprep.mubr.bf16.mxu0 %v11213_v36 }
 0xa61   :  { %3909 = vmatmul.mubr.bf16.vlgmr.msra.gmra.mrb[64].mxu1 %v11217_v44  ;;  %4055 = vmatmul.mubr.bf16.vlgmr.msra.gmra.mrb[80].mxu0 %v11217_v44 }
 0xa62   :  { %3950 = vmatpush1.bf16.msra.mxu1 %v7923_v39  ;;  %4096 = vmatpush1.bf16.msra.mxu0 %v7926_v41  ;;  %v7988_v39 = vld [vmem:[#allocation10 + $0x4ec] ss:$24 sps:$4 sm:$0xff]   ;;  %v7983_v41 = vld [vmem:[#allocation10 + $0x4e0] ss:$24 sps:$4 sm:$0xff]  }
 0xa63   :  { %3918 = vmatprep.mubr.bf16.mxu1 %v11225_v58  ;;  %4064 = vmatprep.mubr.bf16.mxu0 %v11225_v58 }
 0xa64   :  { %3951 = vmatprep.subr.bf16.mxu1 %v7931_v32  ;;  %4097 = vmatprep.subr.bf16.mxu0 %v7934_v55  ;;  %v7986_v32 = vld [vmem:[#allocation10 + $0x4e8] ss:$24 sps:$4 sm:$0xff]   ;;  %v7991_v55 = vld [vmem:[#allocation10 + $0x514] ss:$24 sps:$4 sm:$0xff]  }
 0xa66   :  { %3952 = vmatpush1.bf16.msra.mxu1 %v7929_v56  ;;  %4098 = vmatpush1.bf16.msra.mxu0 %v7932_v7  ;;  %v7994_v56 = vld [vmem:[#allocation10 + $0x51c] ss:$24 sps:$4 sm:$0xff]   ;;  %v7989_v7 = vld [vmem:[#allocation10 + $0x510] ss:$24 sps:$4 sm:$0xff]  }
 0xa67   :  { %3953 = vmatprep.subr.bf16.mxu1 %v7937_v1  ;;  %4099 = vmatprep.subr.bf16.mxu0 %v7940_v54  ;;  %v7992_v1 = vld [vmem:[#allocation10 + $0x518] ss:$24 sps:$4 sm:$0xff]   ;;  %v7997_v54 = vld [vmem:[#allocation10 + $0x544] ss:$24 sps:$4 sm:$0xff]  }
 0xa69   :  { %3919 = vmatmul.mubr.bf16.gmra.mrb[68].mxu1 %v11231_v33  ;;  %4065 = vmatmul.mubr.bf16.gmra.mrb[84].mxu0 %v11231_v33 }
 0xa6a   :  { %3954 = vmatpush1.bf16.msra.mxu1 %v7935_v21  ;;  %4100 = vmatpush1.bf16.msra.mxu0 %v7938_v34  ;;  %v8000_v21 = vld [vmem:[#allocation10 + $0x54c] ss:$24 sps:$4 sm:$0xff]   ;;  %v7995_v34 = vld [vmem:[#allocation10 + $0x540] ss:$24 sps:$4 sm:$0xff]  }
 0xa6b   :  { %3928 = vmatprep.mubr.bf16.mxu1 %v11237_v30  ;;  %4074 = vmatprep.mubr.bf16.mxu0 %v11237_v30 }
 0xa6c   :  { %3955 = vmatprep.subr.bf16.mxu1 %v7943_v23  ;;  %4101 = vmatprep.subr.bf16.mxu0 %v7946_v37  ;;  %v7998_v23 = vld [vmem:[#allocation10 + $0x548] ss:$24 sps:$4 sm:$0xff]   ;;  %v8003_v37 = vld [vmem:[#allocation10 + $0x574] ss:$24 sps:$4 sm:$0xff]  }
 0xa6e   :  { %3956 = vmatpush1.bf16.msra.mxu1 %v7941_v15  ;;  %4102 = vmatpush1.bf16.msra.mxu0 %v7944_v12  ;;  %v8006_v15 = vld [vmem:[#allocation10 + $0x57c] ss:$24 sps:$4 sm:$0xff]   ;;  %v8001_v12 = vld [vmem:[#allocation10 + $0x570] ss:$24 sps:$4 sm:$0xff]  }
 0xa6f   :  { %3957 = vmatprep.subr.bf16.mxu1 %v7949_v14  ;;  %4103 = vmatprep.subr.bf16.mxu0 %v7952_v29  ;;  %v8004_v14 = vld [vmem:[#allocation10 + $0x578] ss:$24 sps:$4 sm:$0xff]   ;;  %v8009_v29 = vld [vmem:[#allocation10 + $0x5a4] ss:$24 sps:$4 sm:$0xff]  }
 0xa71   :  { %3929 = vmatmul.mubr.bf16.gmra.mrb[72].mxu1 %v11243_v0  ;;  %4075 = vmatmul.mubr.bf16.gmra.mrb[88].mxu0 %v11243_v0 }
 0xa72   :  { %3958 = vmatpush1.bf16.msra.mxu1 %v7947_v24  ;;  %4104 = vmatpush1.bf16.msra.mxu0 %v7950_v16  ;;  %v8012_v24 = vld [vmem:[#allocation10 + $0x5ac] ss:$24 sps:$4 sm:$0xff]   ;;  %v8007_v16 = vld [vmem:[#allocation10 + $0x5a0] ss:$24 sps:$4 sm:$0xff]  }
 0xa73   :  { %3938 = vmatprep.mubr.bf16.mxu1 %v11249_v53  ;;  %4084 = vmatprep.mubr.bf16.mxu0 %v11249_v53 }
 0xa74   :  { %3959 = vmatprep.subr.bf16.mxu1 %v7955_v25  ;;  %4105 = vmatprep.subr.bf16.mxu0 %v7958_v18  ;;  %v8010_v25 = vld [vmem:[#allocation10 + $0x5a8] ss:$24 sps:$4 sm:$0xff]   ;;  %v8015_v18 = vld [vmem:[#allocation10 + $0x5d4] ss:$24 sps:$4 sm:$0xff]  }
 0xa76   :  { %3960 = vmatpush1.bf16.msra.mxu1 %v7953_v40  ;;  %4106 = vmatpush1.bf16.msra.mxu0 %v7956_v63  ;;  %v8016_v40 = vld [vmem:[#allocation10 + $0x5d8] ss:$24 sps:$4 sm:$0xff]   ;;  %v8021_v63 = vld [vmem:[#allocation10 + $0x14] ss:$24 sps:$4 sm:$0xff]  }
 0xa77   :  { %3961 = vmatprep.subr.bf16.mxu1 %v7961_v17  ;;  %4107 = vmatprep.subr.bf16.mxu0 %v7964_v20  ;;  %v11265_v17 = vld [vmem:[#allocation13 + $0x4] ss:$24 sps:$4 sm:$0xff]   ;;  %v11269_v20 = vpack.c.bf16 %v11158_v50, %v11207_v52 }
 0xa78   :  { %v8025_v50 = vld [vmem:[#allocation10 + $0x40] ss:$24 sps:$4 sm:$0xff]   ;;  %v8165_v52 = vld [vmem:[#allocation10 + $0x494] ss:$24 sps:$4 sm:$0xff]  }
 0xa79   :  { %3939 = vmatmul.mubr.bf16.gmra.mrb[76].mxu1 %v11255_v47  ;;  %4085 = vmatmul.mubr.bf16.gmra.mrb[92].mxu0 %v11255_v47 }
 0xa7a   :  { %3962 = vmatpush1.bf16.msra.mxu1 %v7959_v19  ;;  %4108 = vmatpush1.bf16.msra.mxu0 %v7962_v11  ;;  %v8019_v19 = vld [vmem:[#allocation10 + $0x10] ss:$24 sps:$4 sm:$0xff]  }
 0xa7b   :  { %3981 = vmatprep.mubr.bf16.mxu1 %v11261_v61  ;;  %4127 = vmatprep.mubr.bf16.mxu0 %v11261_v61  ;;  %v11272_v11 = vld [vmem:[#allocation13] ss:$24 sps:$4 sm:$0xff]  }
 0xa7c   :  { %3963 = vmatprep.subr.bf16.mxu1 %v7967_v60  ;;  %4109 = vmatprep.subr.bf16.mxu0 %v7970_v9  ;;  %v11276_v60 = vpack.c.bf16 %v13829_v51, %v13830_v49  ;;  %v8027_v9 = vld [vmem:[#allocation10 + $0x44] ss:$24 sps:$4 sm:$0xff]   ;;  %v8033_v51 = vld [vmem:[#allocation10 + $0x74] ss:$24 sps:$4 sm:$0xff]  }
 0xa7d   :  { %v11288_v49 = vld [vmem:[#allocation13 + $0x64] ss:$24 sps:$4 sm:$0xff]  }
 0xa7e   :  { %3964 = vmatpush1.bf16.msra.mxu1 %v7965_v5  ;;  %4110 = vmatpush1.bf16.msra.mxu0 %v7968_v4  ;;  %v11278_v5 = vld [vmem:[#allocation13 + $0x34] ss:$24 sps:$4 sm:$0xff]   ;;  %v11285_v4 = vld [vmem:[#allocation13 + $0x30] ss:$24 sps:$4 sm:$0xff]  }
 0xa7f   :  { %3965 = vmatprep.subr.bf16.mxu1 %v7973_v43  ;;  %4111 = vmatprep.subr.bf16.mxu0 %v7976_v57  ;;  %v11293_v43 = vpack.c.bf16 %v10731_v10, %v11038_v45  ;;  %v8031_v57 = vld [vmem:[#allocation10 + $0x70] ss:$24 sps:$4 sm:$0xff]   ;;  %v8037_v10 = vld [vmem:[#allocation10 + $0xa0] ss:$24 sps:$4 sm:$0xff]  }
 0xa80   :  { %v11309_v45 = vld [vmem:[#allocation13 + $0x90] ss:$24 sps:$4 sm:$0xff]  }
 0xa82   :  { %3966 = vmatpush1.bf16.msra.mxu1 %v7971_v13  ;;  %4112 = vmatpush1.bf16.msra.mxu0 %v7974_v8  ;;  %v11295_v13 = vld [vmem:[#allocation13 + $0x60] ss:$24 sps:$4 sm:$0xff]   ;;  %v11300_v8 = vpack.c.bf16 %v11040_v2, %v10733_v3  ;;  %v8045_v3 = vld [vmem:[#allocation10 + $0xd4] ss:$24 sps:$4 sm:$0xff]  }
 0xa83   :  { %3967 = vmatprep.subr.bf16.mxu1 %v7979_v59  ;;  %4113 = vmatprep.subr.bf16.mxu0 %v7982_v35  ;;  %v8039_v59 = vld [vmem:[#allocation10 + $0xa4] ss:$24 sps:$4 sm:$0xff]  }
 0xa84   :  { %v11302_v35 = vld [vmem:[#allocation13 + $0x94] ss:$24 sps:$4 sm:$0xff]   ;;  %v11312_v2 = vld [vmem:[#allocation13 + $0xc4] ss:$24 sps:$4 sm:$0xff]  }
 0xa86   :  { %3968 = vmatpush1.bf16.msra.mxu1 %v7977_v27  ;;  %4114 = vmatpush1.bf16.msra.mxu0 %v7980_v6  ;;  %v11317_v27 = vpack.c.bf16 %v13827_v62, %v13828_v48  ;;  %v8043_v6 = vld [vmem:[#allocation10 + $0xd0] ss:$24 sps:$4 sm:$0xff]   ;;  %v8049_v62 = vld [vmem:[#allocation10 + $0x100] ss:$24 sps:$4 sm:$0xff]  }
 0xa87   :  { %3969 = vmatprep.subr.bf16.mxu1 %v7985_v28  ;;  %4115 = vmatprep.subr.bf16.mxu0 %v7988_v39  ;;  %v11319_v28 = vld [vmem:[#allocation13 + $0xc0] ss:$24 sps:$4 sm:$0xff]   ;;  %v11324_v39 = vpack.c.bf16 %v11209_v22, %v11160_v42  ;;  %v11333_v48 = vld [vmem:[#allocation13 + $0xf0] ss:$24 sps:$4 sm:$0xff]  }
 0xa88   :  { %v8057_v42 = vld [vmem:[#allocation10 + $0x134] ss:$24 sps:$4 sm:$0xff]   ;;  %v8163_v22 = vld [vmem:[#allocation10 + $0x490] ss:$24 sps:$4 sm:$0xff]  }
 0xa8a   :  { %3970 = vmatpush1.bf16.msra.mxu1 %v7983_v41  ;;  %4116 = vmatpush1.bf16.msra.mxu0 %v7986_v32  ;;  %v8051_v41 = vld [vmem:[#allocation10 + $0x104] ss:$24 sps:$4 sm:$0xff]  }
 0xa8b   :  { %3971 = vmatprep.subr.bf16.mxu1 %v7991_v55  ;;  %4117 = vmatprep.subr.bf16.mxu0 %v7994_v56  ;;  %v11326_v32 = vld [vmem:[#allocation13 + $0xf4] ss:$24 sps:$4 sm:$0xff]   ;;  %v11336_v55 = vld [vmem:[#allocation13 + $0x124] ss:$24 sps:$4 sm:$0xff]   ;;  %v11341_v56 = vpack.c.bf16 %v13825_v46, %v13826_v38  ;;  %v11353_v38 = vld [vmem:[#allocation13 + $0x150] ss:$24 sps:$4 sm:$0xff]  }
 0xa8c   :  { %v8061_v46 = vld [vmem:[#allocation10 + $0x160] ss:$24 sps:$4 sm:$0xff]  }
 0xa8e   :  { %3972 = vmatpush1.bf16.msra.mxu1 %v7989_v7  ;;  %4118 = vmatpush1.bf16.msra.mxu0 %v7992_v1  ;;  %v8055_v7 = vld [vmem:[#allocation10 + $0x130] ss:$24 sps:$4 sm:$0xff]  }
 0xa8f   :  { %3973 = vmatprep.subr.bf16.mxu1 %v7997_v54  ;;  %4119 = vmatprep.subr.bf16.mxu0 %v8000_v21  ;;  %v11343_v1 = vld [vmem:[#allocation13 + $0x120] ss:$24 sps:$4 sm:$0xff]   ;;  %v11346_v21 = vld [vmem:[#allocation13 + $0x154] ss:$24 sps:$4 sm:$0xff]  }
 0xa90   :  { %v8063_v54 = vld [vmem:[#allocation10 + $0x164] ss:$24 sps:$4 sm:$0xff]  }
 0xa92   :  { %3974 = vmatpush1.bf16.msra.mxu1 %v7995_v34  ;;  %4120 = vmatpush1.bf16.msra.mxu0 %v7998_v23  ;;  %v13833_v34 = vmov 0   ;;  %v8069_v23 = vld [vmem:[#allocation10 + $0x194] ss:$24 sps:$4 sm:$0xff]  }
 0xa93   :  { %3975 = vmatprep.subr.bf16.mxu1 %v8003_v37  ;;  %4121 = vmatprep.subr.bf16.mxu0 %v8006_v15  ;;  %v11356_v37 = vld [vmem:[#allocation13 + $0x184] ss:$24 sps:$4 sm:$0xff]  }
 0xa94   :  { %v8067_v15 = vld [vmem:[#allocation10 + $0x190] ss:$24 sps:$4 sm:$0xff]  }
 0xa96   :  { %3976 = vmatpush1.bf16.msra.mxu1 %v8001_v12  ;;  %4122 = vmatpush1.bf16.msra.mxu0 %v8004_v14  ;;  %v11359_v12 = vld [vmem:[#allocation13 + $0x180] ss:$24 sps:$4 sm:$0xff]   ;;  %v11362_v14 = vld [vmem:[#allocation13 + $0x1b4] ss:$24 sps:$4 sm:$0xff]  }
 0xa97   :  { %3977 = vmatprep.subr.bf16.mxu1 %v8009_v29  ;;  %4123 = vmatprep.subr.bf16.mxu0 %v8012_v24  ;;  %v8073_v29 = vld [vmem:[#allocation10 + $0x1c0] ss:$24 sps:$4 sm:$0xff]  }
 0xa98   :  { %v11365_v24 = vld [vmem:[#allocation13 + $0x1b0] ss:$24 sps:$4 sm:$0xff]  }
 0xa9a   :  { %3978 = vmatpush1.bf16.msra.mxu1 %v8007_v16  ;;  %4124 = vmatpush1.bf16.msra.mxu0 %v8010_v25  ;;  %v8081_v16 = vld [vmem:[#allocation10 + $0x1f4] ss:$24 sps:$4 sm:$0xff]  }
 0xa9b   :  { %3979 = vmatprep.subr.bf16.mxu1 %v8015_v18  ;;  %4125 = vmatprep.subr.bf16.mxu0 %v8018_v31  ;;  %v11368_v25 = vld [vmem:[#allocation13 + $0x1e4] ss:$24 sps:$4 sm:$0xff]   ;;  %v11371_v31 = vld [vmem:[#allocation13 + $0x1e0] ss:$24 sps:$4 sm:$0xff]  }
 0xa9c   :  { %v8079_v18 = vld [vmem:[#allocation10 + $0x1f0] ss:$24 sps:$4 sm:$0xff]  }
 0xa9e   :  { %3980 = vmatpush1.bf16.msra.mxu1 %v8013_v26  ;;  %4126 = vmatpush1.bf16.msra.mxu0 %v8016_v40  ;;  %v8087_v26 = vld [vmem:[#allocation10 + $0x224] ss:$24 sps:$4 sm:$0xff]  }
 0xa9f   :  { %4168 = vmatprep.subr.bf16.mxu1 %v8021_v63  ;;  %4956 = vmatprep.subr.bf16.mxu0 %v11265_v17  ;;  %v11374_v40 = vld [vmem:[#allocation13 + $0x214] ss:$24 sps:$4 sm:$0xff]  }
 0xaa0   :  { %v8085_v63 = vld [vmem:[#allocation10 + $0x220] ss:$24 sps:$4 sm:$0xff]  }
 0xaa1   :  { %3982 = vmatmul.mubr.bf16.vlgmr.msra.gmra.mrb[64].mxu1 %v11269_v20  ;;  %4128 = vmatmul.mubr.bf16.vlgmr.msra.gmra.mrb[80].mxu0 %v11269_v20 }
 0xaa2   :  { %3991 = vmatprep.mubr.bf16.mxu1 %v11276_v60  ;;  %4137 = vmatprep.mubr.bf16.mxu0 %v11276_v60 }
 0xaa3   :  { %4169 = vmatpush1.bf16.msra.mxu1 %v8019_v19  ;;  %4957 = vmatpush1.bf16.msra.mxu0 %v11272_v11  ;;  %v11377_v19 = vld [vmem:[#allocation13 + $0x210] ss:$24 sps:$4 sm:$0xff]  }
 0xaa4   :  { %4170 = vmatprep.subr.bf16.mxu1 %v8027_v9  ;;  %4958 = vmatprep.subr.bf16.mxu0 %v11278_v5  ;;  %v8093_v9 = vld [vmem:[#allocation10 + $0x254] ss:$24 sps:$4 sm:$0xff]  }
 0xaa7   :  { %4171 = vmatpush1.bf16.msra.mxu1 %v8025_v50  ;;  %4959 = vmatpush1.bf16.msra.mxu0 %v11285_v4  ;;  %v11380_v50 = vld [vmem:[#allocation13 + $0x244] ss:$24 sps:$4 sm:$0xff]  }
 0xaa8   :  { %4172 = vmatprep.subr.bf16.mxu1 %v8033_v51  ;;  %4960 = vmatprep.subr.bf16.mxu0 %v11288_v49  ;;  %v8091_v51 = vld [vmem:[#allocation10 + $0x250] ss:$24 sps:$4 sm:$0xff]  }
 0xaa9   :  { %3992 = vmatmul.mubr.bf16.gmra.mrb[68].mxu1 %v11293_v43  ;;  %4138 = vmatmul.mubr.bf16.gmra.mrb[84].mxu0 %v11293_v43 }
 0xaaa   :  { %4001 = vmatprep.mubr.bf16.mxu1 %v11300_v8  ;;  %4147 = vmatprep.mubr.bf16.mxu0 %v11300_v8 }
 0xaab   :  { %4173 = vmatpush1.bf16.msra.mxu1 %v8031_v57  ;;  %4961 = vmatpush1.bf16.msra.mxu0 %v11295_v13  ;;  %v11383_v57 = vld [vmem:[#allocation13 + $0x240] ss:$24 sps:$4 sm:$0xff]  }
 0xaac   :  { %4174 = vmatprep.subr.bf16.mxu1 %v8039_v59  ;;  %4962 = vmatprep.subr.bf16.mxu0 %v11302_v35  ;;  %v8099_v59 = vld [vmem:[#allocation10 + $0x284] ss:$24 sps:$4 sm:$0xff]  }
 0xaaf   :  { %4175 = vmatpush1.bf16.msra.mxu1 %v8037_v10  ;;  %4963 = vmatpush1.bf16.msra.mxu0 %v11309_v45  ;;  %v11386_v10 = vld [vmem:[#allocation13 + $0x274] ss:$24 sps:$4 sm:$0xff]  }
 0xab0   :  { %4176 = vmatprep.subr.bf16.mxu1 %v8045_v3  ;;  %4964 = vmatprep.subr.bf16.mxu0 %v11312_v2  ;;  %v8097_v3 = vld [vmem:[#allocation10 + $0x280] ss:$24 sps:$4 sm:$0xff]  }
 0xab1   :  { %4002 = vmatmul.mubr.bf16.gmra.mrb[72].mxu1 %v11317_v27  ;;  %4148 = vmatmul.mubr.bf16.gmra.mrb[88].mxu0 %v11317_v27 }
 0xab2   :  { %4011 = vmatprep.mubr.bf16.mxu1 %v11324_v39  ;;  %4157 = vmatprep.mubr.bf16.mxu0 %v11324_v39 }
 0xab3   :  { %4177 = vmatpush1.bf16.msra.mxu1 %v8043_v6  ;;  %4965 = vmatpush1.bf16.msra.mxu0 %v11319_v28  ;;  %v11389_v6 = vld [vmem:[#allocation13 + $0x270] ss:$24 sps:$4 sm:$0xff]  }
 0xab4   :  { %4178 = vmatprep.subr.bf16.mxu1 %v8051_v41  ;;  %4966 = vmatprep.subr.bf16.mxu0 %v11326_v32  ;;  %v8105_v41 = vld [vmem:[#allocation10 + $0x2b4] ss:$24 sps:$4 sm:$0xff]  }
 0xab7   :  { %4179 = vmatpush1.bf16.msra.mxu1 %v8049_v62  ;;  %4967 = vmatpush1.bf16.msra.mxu0 %v11333_v48  ;;  %v11392_v62 = vld [vmem:[#allocation13 + $0x2a4] ss:$24 sps:$4 sm:$0xff]  }
 0xab8   :  { %4180 = vmatprep.subr.bf16.mxu1 %v8057_v42  ;;  %4968 = vmatprep.subr.bf16.mxu0 %v11336_v55  ;;  %v8103_v42 = vld [vmem:[#allocation10 + $0x2b0] ss:$24 sps:$4 sm:$0xff]  }
 0xab9   :  { %4012 = vmatmul.mubr.bf16.gmra.mrb[76].mxu1 %v11341_v56  ;;  %4158 = vmatmul.mubr.bf16.gmra.mrb[92].mxu0 %v11341_v56 }
 0xaba   :  { %4200 = vmatprep.mubr.bf16.mxu1 %v11213_v36  ;;  %4988 = vmatprep.mubr.bf16.mxu0 %v13833_v34  ;;  %v8075_v36 = vld [vmem:[#allocation10 + $0x1c4] ss:$24 sps:$4 sm:$0xff]  }
 0xabb   :  { %4181 = vmatpush1.bf16.msra.mxu1 %v8055_v7  ;;  %4969 = vmatpush1.bf16.msra.mxu0 %v11343_v1  ;;  %v11395_v7 = vld [vmem:[#allocation13 + $0x2a0] ss:$24 sps:$4 sm:$0xff]  }
 0xabc   :  { %4182 = vmatprep.subr.bf16.mxu1 %v8063_v54  ;;  %4970 = vmatprep.subr.bf16.mxu0 %v11346_v21  ;;  %v8111_v54 = vld [vmem:[#allocation10 + $0x2e4] ss:$24 sps:$4 sm:$0xff]  }
 0xabf   :  { %4183 = vmatpush1.bf16.msra.mxu1 %v8061_v46  ;;  %4971 = vmatpush1.bf16.msra.mxu0 %v11353_v38  ;;  %v11398_v46 = vld [vmem:[#allocation13 + $0x2d4] ss:$24 sps:$4 sm:$0xff]  }
 0xac0   :  { %4184 = vmatprep.subr.bf16.mxu1 %v8069_v23  ;;  %4972 = vmatprep.subr.bf16.mxu0 %v11356_v37  ;;  %v8109_v23 = vld [vmem:[#allocation10 + $0x2e0] ss:$24 sps:$4 sm:$0xff]  }
 0xac3   :  { %4185 = vmatpush1.bf16.msra.mxu1 %v8067_v15  ;;  %4973 = vmatpush1.bf16.msra.mxu0 %v11359_v12  ;;  %v11401_v15 = vld [vmem:[#allocation13 + $0x2d0] ss:$24 sps:$4 sm:$0xff]  }
 0xac4   :  { %4186 = vmatprep.subr.bf16.mxu1 %v8075_v36  ;;  %4974 = vmatprep.subr.bf16.mxu0 %v11362_v14  ;;  %v8117_v36 = vld [vmem:[#allocation10 + $0x314] ss:$24 sps:$4 sm:$0xff]  }
 0xac7   :  { %4187 = vmatpush1.bf16.msra.mxu1 %v8073_v29  ;;  %4975 = vmatpush1.bf16.msra.mxu0 %v11365_v24  ;;  %v11404_v29 = vld [vmem:[#allocation13 + $0xc] ss:$24 sps:$4 sm:$0xff]  }
 0xac8   :  { %4188 = vmatprep.subr.bf16.mxu1 %v8081_v16  ;;  %4976 = vmatprep.subr.bf16.mxu0 %v11368_v25  ;;  %v8115_v16 = vld [vmem:[#allocation10 + $0x310] ss:$24 sps:$4 sm:$0xff]  }
 0xacb   :  { %4189 = vmatpush1.bf16.msra.mxu1 %v8079_v18  ;;  %4977 = vmatpush1.bf16.msra.mxu0 %v11371_v31  ;;  %v11408_v18 = vld [vmem:[#allocation13 + $0x8] ss:$24 sps:$4 sm:$0xff]  }
 0xacc   :  { %4190 = vmatprep.subr.bf16.mxu1 %v8087_v26  ;;  %4978 = vmatprep.subr.bf16.mxu0 %v11374_v40  ;;  %13834 = vst [vmem:[#allocation115_spill] sm:$0xff] %v11408_v18  ;;  %v8123_v26 = vld [vmem:[#allocation10 + $0x344] ss:$24 sps:$4 sm:$0xff]  }
 0xacf   :  { %4191 = vmatpush1.bf16.msra.mxu1 %v8085_v63  ;;  %4979 = vmatpush1.bf16.msra.mxu0 %v11377_v19  ;;  %v11410_v63 = vld [vmem:[#allocation13 + $0x3c] ss:$24 sps:$4 sm:$0xff]  }
 0xad0   :  { %4192 = vmatprep.subr.bf16.mxu1 %v8093_v9  ;;  %4980 = vmatprep.subr.bf16.mxu0 %v11380_v50  ;;  %13835 = vst [vmem:[#allocation116_spill] sm:$0xff] %v11410_v63  ;;  %v8121_v9 = vld [vmem:[#allocation10 + $0x340] ss:$24 sps:$4 sm:$0xff]  }
 0xad3   :  { %4193 = vmatpush1.bf16.msra.mxu1 %v8091_v51  ;;  %4981 = vmatpush1.bf16.msra.mxu0 %v11383_v57  ;;  %v11416_v51 = vld [vmem:[#allocation13 + $0x38] ss:$24 sps:$4 sm:$0xff]  }
 0xad4   :  { %4194 = vmatprep.subr.bf16.mxu1 %v8099_v59  ;;  %4982 = vmatprep.subr.bf16.mxu0 %v11386_v10  ;;  %13836 = vst [vmem:[#allocation117_spill] sm:$0xff] %v11416_v51  ;;  %v8129_v59 = vld [vmem:[#allocation10 + $0x374] ss:$24 sps:$4 sm:$0xff]  }
 0xad7   :  { %4195 = vmatpush1.bf16.msra.mxu1 %v8097_v3  ;;  %4983 = vmatpush1.bf16.msra.mxu0 %v11389_v6  ;;  %v11419_v3 = vld [vmem:[#allocation13 + $0x6c] ss:$24 sps:$4 sm:$0xff]  }
 0xad8   :  { %4196 = vmatprep.subr.bf16.mxu1 %v8105_v41  ;;  %4984 = vmatprep.subr.bf16.mxu0 %v11392_v62  ;;  %13837 = vst [vmem:[#allocation118_spill] sm:$0xff] %v11419_v3  ;;  %v8135_v41 = vld [vmem:[#allocation10 + $0x3a4] ss:$24 sps:$4 sm:$0xff]  }
 0xadb   :  { %4197 = vmatpush1.bf16.msra.mxu1 %v8103_v42  ;;  %4985 = vmatpush1.bf16.msra.mxu0 %v11395_v7  ;;  %v11426_v42 = vld [vmem:[#allocation13 + $0x9c] ss:$24 sps:$4 sm:$0xff]  }
 0xadc   :  { %4198 = vmatprep.subr.bf16.mxu1 %v8111_v54  ;;  %4986 = vmatprep.subr.bf16.mxu0 %v11398_v46  ;;  %13839 = vst [vmem:[#allocation120_spill] sm:$0xff] %v11426_v42  ;;  %v8133_v54 = vld [vmem:[#allocation10 + $0x3a0] ss:$24 sps:$4 sm:$0xff]  }
 0xadf   :  { %4199 = vmatpush1.bf16.msra.mxu1 %v8109_v23  ;;  %4987 = vmatpush1.bf16.msra.mxu0 %v11401_v15  ;;  %v11431_v23 = vld [vmem:[#allocation13 + $0x98] ss:$24 sps:$4 sm:$0xff]  }
 0xae0   :  { %4241 = vmatprep.subr.bf16.mxu1 %v8117_v36  ;;  %4997 = vmatprep.subr.bf16.mxu0 %v11404_v29  ;;  %13840 = vst [vmem:[#allocation121_spill] sm:$0xff] %v11431_v23  ;;  %v8141_v36 = vld [vmem:[#allocation10 + $0x3d4] ss:$24 sps:$4 sm:$0xff]  }
 0xae2   :  { %4201 = vmatmul.mubr.bf16.vlgmr.msra.gmra.mrb[80].mxu1 %v11217_v44  ;;  %4989 = vmatmul.mubr.bf16.vlgmr.msra.gmra.mrb[96].mxu0 %v13833_v34  ;;  %v8127_v44 = vld [vmem:[#allocation10 + $0x370] ss:$24 sps:$4 sm:$0xff]  }
 0xae3   :  { %4210 = vmatprep.mubr.bf16.mxu1 %v11225_v58  ;;  %4242 = vmatpush1.bf16.msra.mxu1 %v8115_v16  ;;  %v11423_v58 = vld [vmem:[#allocation13 + $0x68] ss:$24 sps:$4 sm:$0xff]   ;;  %v11434_v16 = vld [vmem:[#allocation13 + $0xcc] ss:$24 sps:$4 sm:$0xff]  }
 0xae4   :  { %4998 = vmatpush1.bf16.msra.mxu0 %v11408_v18  ;;  %4243 = vmatprep.subr.bf16.mxu1 %v8123_v26  ;;  %13838 = vst [vmem:[#allocation119_spill] sm:$0xff] %v11423_v58  ;;  %13841 = vst [vmem:[#allocation122_spill] sm:$0xff] %v11434_v16  ;;  %v8139_v26 = vld [vmem:[#allocation10 + $0x3d0] ss:$24 sps:$4 sm:$0xff]  }
 0xae5   :  { %4999 = vmatprep.subr.bf16.mxu0 %v11410_v63  ;;  %5029 = vmatprep.mubr.bf16.mxu0 %v13833_v34 }
 0xae7   :  { %4244 = vmatpush1.bf16.msra.mxu1 %v8121_v9  ;;  %v11440_v9 = vld [vmem:[#allocation13 + $0xfc] ss:$24 sps:$4 sm:$0xff]  }
 0xae8   :  { %5000 = vmatpush1.bf16.msra.mxu0 %v11416_v51  ;;  %4245 = vmatprep.subr.bf16.mxu1 %v8129_v59  ;;  %13843 = vst [vmem:[#allocation35_spill] sm:$0xff] %v11440_v9  ;;  %v8145_v59 = vld [vmem:[#allocation10 + $0x400] ss:$24 sps:$4 sm:$0xff]  }
 0xae9   :  { %5001 = vmatprep.subr.bf16.mxu0 %v11419_v3 }
 0xaea   :  { %4211 = vmatmul.mubr.bf16.gmra.mrb[84].mxu1 %v11231_v33  ;;  %v11437_v33 = vld [vmem:[#allocation13 + $0xc8] ss:$24 sps:$4 sm:$0xff]  }
 0xaeb   :  { %4220 = vmatprep.mubr.bf16.mxu1 %v11237_v30  ;;  %4246 = vmatpush1.bf16.msra.mxu1 %v8127_v44  ;;  %13842 = vst [vmem:[#allocation28_spill] sm:$0xff] %v11437_v33  ;;  %v8147_v30 = vld [vmem:[#allocation10 + $0x404] ss:$24 sps:$4 sm:$0xff]  }
 0xaec   :  { %5002 = vmatpush1.bf16.msra.mxu0 %v11423_v58  ;;  %4247 = vmatprep.subr.bf16.mxu1 %v8135_v41  ;;  %v11445_v44 = vld [vmem:[#allocation13 + $0xf8] ss:$24 sps:$4 sm:$0xff]  }
 0xaed   :  { %5003 = vmatprep.subr.bf16.mxu0 %v11426_v42  ;;  %13844 = vst [vmem:[#allocation38_spill] sm:$0xff] %v11445_v44  ;;  %v8153_v41 = vld [vmem:[#allocation10 + $0x434] ss:$24 sps:$4 sm:$0xff]  }
 0xaef   :  { %4248 = vmatpush1.bf16.msra.mxu1 %v8133_v54  ;;  %v11448_v54 = vld [vmem:[#allocation13 + $0x12c] ss:$24 sps:$4 sm:$0xff]  }
 0xaf0   :  { %5004 = vmatpush1.bf16.msra.mxu0 %v11431_v23  ;;  %4249 = vmatprep.subr.bf16.mxu1 %v8141_v36  ;;  %13845 = vst [vmem:[#allocation37_spill] sm:$0xff] %v11448_v54  ;;  %v8151_v36 = vld [vmem:[#allocation10 + $0x430] ss:$24 sps:$4 sm:$0xff]  }
 0xaf1   :  { %5005 = vmatprep.subr.bf16.mxu0 %v11434_v16 }
 0xaf2   :  { %4221 = vmatmul.mubr.bf16.gmra.mrb[88].mxu1 %v11243_v0  ;;  %v11451_v0 = vld [vmem:[#allocation13 + $0x128] ss:$24 sps:$4 sm:$0xff]  }
 0xaf3   :  { %4230 = vmatprep.mubr.bf16.mxu1 %v11249_v53  ;;  %4250 = vmatpush1.bf16.msra.mxu1 %v8139_v26  ;;  %13846 = vst [vmem:[#allocation40_spill] sm:$0xff] %v11451_v0  ;;  %v8159_v53 = vld [vmem:[#allocation10 + $0x464] ss:$24 sps:$4 sm:$0xff]  }
 0xaf4   :  { %5006 = vmatpush1.bf16.msra.mxu0 %v11437_v33  ;;  %4251 = vmatprep.subr.bf16.mxu1 %v8147_v30  ;;  %v11454_v26 = vld [vmem:[#allocation13 + $0x15c] ss:$24 sps:$4 sm:$0xff]  }
 0xaf5   :  { %5007 = vmatprep.subr.bf16.mxu0 %v11440_v9  ;;  %13847 = vst [vmem:[#allocation56_spill] sm:$0xff] %v11454_v26  ;;  %v8157_v30 = vld [vmem:[#allocation10 + $0x460] ss:$24 sps:$4 sm:$0xff]  }
 0xaf7   :  { %4252 = vmatpush1.bf16.msra.mxu1 %v8145_v59  ;;  %v11459_v59 = vld [vmem:[#allocation13 + $0x158] ss:$24 sps:$4 sm:$0xff]  }
 0xaf8   :  { %5008 = vmatpush1.bf16.msra.mxu0 %v11445_v44  ;;  %4253 = vmatprep.subr.bf16.mxu1 %v8153_v41  ;;  %13848 = vst [vmem:[#allocation57_spill] sm:$0xff] %v11459_v59  ;;  %v11462_v41 = vld [vmem:[#allocation13 + $0x18c] ss:$24 sps:$4 sm:$0xff]  }
 0xaf9   :  { %5009 = vmatprep.subr.bf16.mxu0 %v11448_v54  ;;  %13849 = vst [vmem:[#allocation39_spill] sm:$0xff] %v11462_v41 }
 0xafa   :  { %4231 = vmatmul.mubr.bf16.gmra.mrb[92].mxu1 %v11255_v47  ;;  %v11465_v47 = vld [vmem:[#allocation13 + $0x188] ss:$24 sps:$4 sm:$0xff]  }
 0xafb   :  { %4254 = vmatpush1.bf16.msra.mxu1 %v8151_v36  ;;  %4273 = vmatprep.mubr.bf16.mxu1 %v11261_v61  ;;  %13850 = vst [vmem:[#allocation42_spill] sm:$0xff] %v11465_v47  ;;  %v8171_v36 = vld [vmem:[#allocation10 + $0x4c4] ss:$24 sps:$4 sm:$0xff]  }
 0xafc   :  { %5010 = vmatpush1.bf16.msra.mxu0 %v11451_v0  ;;  %4255 = vmatprep.subr.bf16.mxu1 %v8159_v53  ;;  %v11468_v61 = vld [vmem:[#allocation13 + $0x1bc] ss:$24 sps:$4 sm:$0xff]   ;;  %v8177_v0 = vld [vmem:[#allocation10 + $0x4f4] ss:$24 sps:$4 sm:$0xff]  }
 0xafd   :  { %5011 = vmatprep.subr.bf16.mxu0 %v11454_v26  ;;  %13851 = vst [vmem:[#allocation41_spill] sm:$0xff] %v11468_v61  ;;  %v8169_v53 = vld [vmem:[#allocation10 + $0x4c0] ss:$24 sps:$4 sm:$0xff]  }
 0xafe   :  { %v11471_v26 = vld [vmem:[#allocation13 + $0x1b8] ss:$24 sps:$4 sm:$0xff]  }
 0xaff   :  { %4256 = vmatpush1.bf16.msra.mxu1 %v8157_v30  ;;  %13852 = vst [vmem:[#allocation44_spill] sm:$0xff] %v11471_v26  ;;  %v11474_v30 = vld [vmem:[#allocation13 + $0x1ec] ss:$24 sps:$4 sm:$0xff]  }
 0xb00   :  { %5012 = vmatpush1.bf16.msra.mxu0 %v11459_v59  ;;  %4257 = vmatprep.subr.bf16.mxu1 %v8165_v52  ;;  %13853 = vst [vmem:[#allocation58_spill] sm:$0xff] %v11474_v30  ;;  %v8175_v52 = vld [vmem:[#allocation10 + $0x4f0] ss:$24 sps:$4 sm:$0xff]   ;;  %v8183_v59 = vld [vmem:[#allocation10 + $0x524] ss:$24 sps:$4 sm:$0xff]  }
 0xb01   :  { %5013 = vmatprep.subr.bf16.mxu0 %v11462_v41  ;;  %v11477_v41 = vld [vmem:[#allocation13 + $0x1e8] ss:$24 sps:$4 sm:$0xff]  }
 0xb02   :  { %13854 = vst [vmem:[#allocation59_spill] sm:$0xff] %v11477_v41 }
 0xb03   :  { %4258 = vmatpush1.bf16.msra.mxu1 %v8163_v22  ;;  %v11480_v22 = vld [vmem:[#allocation13 + $0x21c] ss:$24 sps:$4 sm:$0xff]  }
 0xb04   :  { %5014 = vmatpush1.bf16.msra.mxu0 %v11465_v47  ;;  %4259 = vmatprep.subr.bf16.mxu1 %v8171_v36  ;;  %13855 = vst [vmem:[#allocation32_spill] sm:$0xff] %v11480_v22  ;;  %v8181_v36 = vld [vmem:[#allocation10 + $0x520] ss:$24 sps:$4 sm:$0xff]   ;;  %v8189_v47 = vld [vmem:[#allocation10 + $0x554] ss:$24 sps:$4 sm:$0xff]  }
 0xb05   :  { %5015 = vmatprep.subr.bf16.mxu0 %v11468_v61  ;;  %v11483_v61 = vld [vmem:[#allocation13 + $0x218] ss:$24 sps:$4 sm:$0xff]  }
 0xb06   :  { %13856 = vst [vmem:[#allocation52_spill] sm:$0xff] %v11483_v61 }
 0xb07   :  { %4260 = vmatpush1.bf16.msra.mxu1 %v8169_v53  ;;  %v11486_v53 = vld [vmem:[#allocation13 + $0x24c] ss:$24 sps:$4 sm:$0xff]  }
 0xb08   :  { %5016 = vmatpush1.bf16.msra.mxu0 %v11471_v26  ;;  %4261 = vmatprep.subr.bf16.mxu1 %v8177_v0  ;;  %13857 = vst [vmem:[#allocation53_spill] sm:$0xff] %v11486_v53  ;;  %v8187_v0 = vld [vmem:[#allocation10 + $0x550] ss:$24 sps:$4 sm:$0xff]   ;;  %v8195_v26 = vld [vmem:[#allocation10 + $0x584] ss:$24 sps:$4 sm:$0xff]  }
 0xb09   :  { %5017 = vmatprep.subr.bf16.mxu0 %v11474_v30  ;;  %v11489_v30 = vld [vmem:[#allocation13 + $0x248] ss:$24 sps:$4 sm:$0xff]  }
 0xb0a   :  { %13858 = vst [vmem:[#allocation31_spill] sm:$0xff] %v11489_v30 }
 0xb0b   :  { %4262 = vmatpush1.bf16.msra.mxu1 %v8175_v52  ;;  %v11492_v52 = vld [vmem:[#allocation13 + $0x27c] ss:$24 sps:$4 sm:$0xff]  }
 0xb0c   :  { %5018 = vmatpush1.bf16.msra.mxu0 %v11477_v41  ;;  %4263 = vmatprep.subr.bf16.mxu1 %v8183_v59  ;;  %13859 = vst [vmem:[#allocation34_spill] sm:$0xff] %v11492_v52  ;;  %v8193_v59 = vld [vmem:[#allocation10 + $0x580] ss:$24 sps:$4 sm:$0xff]   ;;  %v8201_v41 = vld [vmem:[#allocation10 + $0x5b4] ss:$24 sps:$4 sm:$0xff]  }
 0xb0d   :  { %5019 = vmatprep.subr.bf16.mxu0 %v11480_v22  ;;  %v11495_v22 = vld [vmem:[#allocation13 + $0x278] ss:$24 sps:$4 sm:$0xff]  }
 0xb0f   :  { %4264 = vmatpush1.bf16.msra.mxu1 %v8181_v36  ;;  %v11498_v36 = vld [vmem:[#allocation13 + $0x2ac] ss:$24 sps:$4 sm:$0xff]  }
 0xb10   :  { %5020 = vmatpush1.bf16.msra.mxu0 %v11483_v61  ;;  %4265 = vmatprep.subr.bf16.mxu1 %v8189_v47  ;;  %13860 = vst [vmem:[#allocation33_spill] sm:$0xff] %v11498_v36  ;;  %v8199_v47 = vld [vmem:[#allocation10 + $0x5b0] ss:$24 sps:$4 sm:$0xff]   ;;  %v8207_v61 = vld [vmem:[#allocation10 + $0x5e4] ss:$24 sps:$4 sm:$0xff]  }
 0xb11   :  { %5021 = vmatprep.subr.bf16.mxu0 %v11486_v53  ;;  %v11501_v53 = vld [vmem:[#allocation13 + $0x2a8] ss:$24 sps:$4 sm:$0xff]  }
 0xb12   :  { %13861 = vst [vmem:[#allocation36_spill] sm:$0xff] %v11501_v53 }
 0xb13   :  { %4266 = vmatpush1.bf16.msra.mxu1 %v8187_v0  ;;  %v11504_v0 = vld [vmem:[#allocation13 + $0x2dc] ss:$24 sps:$4 sm:$0xff]  }
 0xb14   :  { %5022 = vmatpush1.bf16.msra.mxu0 %v11489_v30  ;;  %4267 = vmatprep.subr.bf16.mxu1 %v8195_v26  ;;  %13862 = vst [vmem:[#allocation54_spill] sm:$0xff] %v11504_v0  ;;  %v8205_v26 = vld [vmem:[#allocation10 + $0x5e0] ss:$24 sps:$4 sm:$0xff]  }
 0xb15   :  { %5023 = vmatprep.subr.bf16.mxu0 %v11492_v52  ;;  %v11507_v52 = vld [vmem:[#allocation13 + $0x2d8] ss:$24 sps:$4 sm:$0xff]   ;;  %v11509_v30 = vld [vmem:[#allocation13 + $0x14] ss:$24 sps:$4 sm:$0xff]  }
 0xb16   :  { %13863 = vst [vmem:[#allocation55_spill] sm:$0xff] %v11507_v52 }
 0xb17   :  { %4268 = vmatpush1.bf16.msra.mxu1 %v8193_v59  ;;  %v11516_v59 = vld [vmem:[#allocation13 + $0x44] ss:$24 sps:$4 sm:$0xff]  }
 0xb18   :  { %5024 = vmatpush1.bf16.msra.mxu0 %v11495_v22  ;;  %4269 = vmatprep.subr.bf16.mxu1 %v8201_v41  ;;  %v11514_v41 = vld [vmem:[#allocation13 + $0x10] ss:$24 sps:$4 sm:$0xff]  }
 0xb19   :  { %5025 = vmatprep.subr.bf16.mxu0 %v11498_v36 }
 0xb1b   :  { %4270 = vmatpush1.bf16.msra.mxu1 %v8199_v47  ;;  %v11527_v47 = vld [vmem:[#allocation13 + $0x74] ss:$24 sps:$4 sm:$0xff]  }
 0xb1c   :  { %5026 = vmatpush1.bf16.msra.mxu0 %v11501_v53  ;;  %4271 = vmatprep.subr.bf16.mxu1 %v8207_v61  ;;  %v11523_v61 = vld [vmem:[#allocation13 + $0x40] ss:$24 sps:$4 sm:$0xff]  }
 0xb1d   :  { %5027 = vmatprep.subr.bf16.mxu0 %v11504_v0 }
 0xb1f   :  { %4272 = vmatpush1.bf16.msra.mxu1 %v8205_v26  ;;  %v11531_v26 = vld [vmem:[#allocation13 + $0x70] ss:$24 sps:$4 sm:$0xff]  }
 0xb20   :  { %5028 = vmatpush1.bf16.msra.mxu0 %v11507_v52  ;;  %5038 = vmatprep.subr.bf16.mxu1 %v11509_v30 }
 0xb21   :  { %5131 = vmatprep.subr.bf16.mxu0 %v11265_v17 }
 0xb22   :  { %4274 = vmatmul.mubr.bf16.vlgmr.msra.gmra.mrb[80].mxu1 %v11269_v20  ;;  %v11535_v20 = vld [vmem:[#allocation13 + $0xa4] ss:$24 sps:$4 sm:$0xff]  }
 0xb23   :  { %5030 = vmatmul.mubr.bf16.vlgmr.msra.gmra.mrb[100].mxu0 %v13833_v34  ;;  %4283 = vmatprep.mubr.bf16.mxu1 %v11276_v60  ;;  %v11545_v60 = vld [vmem:[#allocation13 + $0xd4] ss:$24 sps:$4 sm:$0xff]  }
 0xb24   :  { %5039 = vmatpush1.bf16.msra.mxu1 %v11514_v41  ;;  %5132 = vmatpush1.bf16.msra.mxu0 %v11272_v11  ;;  %v11541_v11 = vld [vmem:[#allocation13 + $0xa0] ss:$24 sps:$4 sm:$0xff]  }
 0xb25   :  { %5040 = vmatprep.subr.bf16.mxu1 %v11516_v59  ;;  %5133 = vmatprep.subr.bf16.mxu0 %v11278_v5  ;;  %v11549_v5 = vld [vmem:[#allocation13 + $0xd0] ss:$24 sps:$4 sm:$0xff]  }
 0xb28   :  { %5041 = vmatpush1.bf16.msra.mxu1 %v11523_v61  ;;  %5134 = vmatpush1.bf16.msra.mxu0 %v11285_v4  ;;  %v11553_v4 = vld [vmem:[#allocation13 + $0x104] ss:$24 sps:$4 sm:$0xff]  }
 0xb29   :  { %5042 = vmatprep.subr.bf16.mxu1 %v11527_v47  ;;  %5135 = vmatprep.subr.bf16.mxu0 %v11288_v49  ;;  %v11559_v49 = vld [vmem:[#allocation13 + $0x100] ss:$24 sps:$4 sm:$0xff]  }
 0xb2a   :  { %4284 = vmatmul.mubr.bf16.gmra.mrb[84].mxu1 %v11293_v43  ;;  %v11563_v43 = vld [vmem:[#allocation13 + $0x134] ss:$24 sps:$4 sm:$0xff]  }
 0xb2b   :  { %4293 = vmatprep.mubr.bf16.mxu1 %v11300_v8  ;;  %v11571_v8 = vld [vmem:[#allocation13 + $0x164] ss:$24 sps:$4 sm:$0xff]  }
 0xb2c   :  { %5043 = vmatpush1.bf16.msra.mxu1 %v11531_v26  ;;  %5136 = vmatpush1.bf16.msra.mxu0 %v11295_v13  ;;  %v11567_v13 = vld [vmem:[#allocation13 + $0x130] ss:$24 sps:$4 sm:$0xff]  }
 0xb2d   :  { %5044 = vmatprep.subr.bf16.mxu1 %v11535_v20  ;;  %5137 = vmatprep.subr.bf16.mxu0 %v11302_v35  ;;  %v11577_v35 = vld [vmem:[#allocation13 + $0x160] ss:$24 sps:$4 sm:$0xff]  }
 0xb30   :  { %5045 = vmatpush1.bf16.msra.mxu1 %v11541_v11  ;;  %5138 = vmatpush1.bf16.msra.mxu0 %v11309_v45  ;;  %v11581_v45 = vld [vmem:[#allocation13 + $0x194] ss:$24 sps:$4 sm:$0xff]  }
 0xb31   :  { %5046 = vmatprep.subr.bf16.mxu1 %v11545_v60  ;;  %5139 = vmatprep.subr.bf16.mxu0 %v11312_v2  ;;  %v11585_v2 = vld [vmem:[#allocation13 + $0x190] ss:$24 sps:$4 sm:$0xff]  }
 0xb32   :  { %4294 = vmatmul.mubr.bf16.gmra.mrb[88].mxu1 %v11317_v27  ;;  %v11589_v27 = vld [vmem:[#allocation13 + $0x1c4] ss:$24 sps:$4 sm:$0xff]  }
 0xb33   :  { %4303 = vmatprep.mubr.bf16.mxu1 %v11324_v39  ;;  %v11597_v39 = vld [vmem:[#allocation13 + $0x1f4] ss:$24 sps:$4 sm:$0xff]  }
 0xb34   :  { %5047 = vmatpush1.bf16.msra.mxu1 %v11549_v5  ;;  %5140 = vmatpush1.bf16.msra.mxu0 %v11319_v28  ;;  %v11593_v28 = vld [vmem:[#allocation13 + $0x1c0] ss:$24 sps:$4 sm:$0xff]  }
 0xb35   :  { %5048 = vmatprep.subr.bf16.mxu1 %v11553_v4  ;;  %5141 = vmatprep.subr.bf16.mxu0 %v11326_v32  ;;  %v11601_v32 = vld [vmem:[#allocation13 + $0x1f0] ss:$24 sps:$4 sm:$0xff]  }
 0xb38   :  { %5049 = vmatpush1.bf16.msra.mxu1 %v11559_v49  ;;  %5142 = vmatpush1.bf16.msra.mxu0 %v11333_v48  ;;  %v11605_v48 = vld [vmem:[#allocation13 + $0x224] ss:$24 sps:$4 sm:$0xff]  }
 0xb39   :  { %5050 = vmatprep.subr.bf16.mxu1 %v11563_v43  ;;  %5143 = vmatprep.subr.bf16.mxu0 %v11336_v55  ;;  %v11609_v55 = vld [vmem:[#allocation13 + $0x220] ss:$24 sps:$4 sm:$0xff]  }
 0xb3a   :  { %4304 = vmatmul.mubr.bf16.gmra.mrb[92].mxu1 %v11341_v56  ;;  %v11613_v56 = vld [vmem:[#allocation13 + $0x254] ss:$24 sps:$4 sm:$0xff]  }
 0xb3b   :  { %5070 = vmatprep.mubr.bf16.mxu1 %v13833_v34  ;;  %13864 = vst [vmem:[#allocation68_spill] sm:$0xff] %v11613_v56 }
 0xb3c   :  { %5051 = vmatpush1.bf16.msra.mxu1 %v11567_v13  ;;  %5144 = vmatpush1.bf16.msra.mxu0 %v11343_v1  ;;  %v11617_v1 = vld [vmem:[#allocation13 + $0x250] ss:$24 sps:$4 sm:$0xff]  }
 0xb3d   :  { %5052 = vmatprep.subr.bf16.mxu1 %v11571_v8  ;;  %5145 = vmatprep.subr.bf16.mxu0 %v11346_v21  ;;  %13865 = vst [vmem:[#allocation69_spill] sm:$0xff] %v11617_v1  ;;  %v11621_v21 = vld [vmem:[#allocation13 + $0x284] ss:$24 sps:$4 sm:$0xff]  }
 0xb3e   :  { %13866 = vst [vmem:[#allocation70_spill] sm:$0xff] %v11621_v21 }
 0xb40   :  { %5053 = vmatpush1.bf16.msra.mxu1 %v11577_v35  ;;  %5146 = vmatpush1.bf16.msra.mxu0 %v11353_v38  ;;  %v11625_v38 = vld [vmem:[#allocation13 + $0x280] ss:$24 sps:$4 sm:$0xff]  }
 0xb41   :  { %5054 = vmatprep.subr.bf16.mxu1 %v11581_v45  ;;  %5147 = vmatprep.subr.bf16.mxu0 %v11356_v37  ;;  %13867 = vst [vmem:[#allocation71_spill] sm:$0xff] %v11625_v38  ;;  %v11629_v37 = vld [vmem:[#allocation13 + $0x2b4] ss:$24 sps:$4 sm:$0xff]  }
 0xb42   :  { %13868 = vst [vmem:[#allocation72_spill] sm:$0xff] %v11629_v37 }
 0xb44   :  { %5055 = vmatpush1.bf16.msra.mxu1 %v11585_v2  ;;  %5148 = vmatpush1.bf16.msra.mxu0 %v11359_v12  ;;  %v11633_v12 = vld [vmem:[#allocation13 + $0x2b0] ss:$24 sps:$4 sm:$0xff]  }
 0xb45   :  { %5056 = vmatprep.subr.bf16.mxu1 %v11589_v27  ;;  %5149 = vmatprep.subr.bf16.mxu0 %v11362_v14  ;;  %13869 = vst [vmem:[#allocation73_spill] sm:$0xff] %v11633_v12  ;;  %v11637_v14 = vld [vmem:[#allocation13 + $0x2e4] ss:$24 sps:$4 sm:$0xff]  }
 0xb46   :  { %13870 = vst [vmem:[#allocation74_spill] sm:$0xff] %v11637_v14 }
 0xb48   :  { %5057 = vmatpush1.bf16.msra.mxu1 %v11593_v28  ;;  %5150 = vmatpush1.bf16.msra.mxu0 %v11365_v24  ;;  %v11641_v24 = vld [vmem:[#allocation13 + $0x2e0] ss:$24 sps:$4 sm:$0xff]  }
 0xb49   :  { %5058 = vmatprep.subr.bf16.mxu1 %v11597_v39  ;;  %5151 = vmatprep.subr.bf16.mxu0 %v11368_v25  ;;  %13871 = vst [vmem:[#allocation75_spill] sm:$0xff] %v11641_v24  ;;  %v11659_v25 = vld [vmem:[#allocation12] sm:$0x3f] }
 0xb4c   :  { %5059 = vmatpush1.bf16.msra.mxu1 %v11601_v32  ;;  %5152 = vmatpush1.bf16.msra.mxu0 %v11371_v31 }
 0xb4d   :  { %5060 = vmatprep.subr.bf16.mxu1 %v11605_v48  ;;  %5153 = vmatprep.subr.bf16.mxu0 %v11374_v40  ;;  %v13872_v40 = vld [vmem:[#allocation26_spill] sm:$0xff] }
 0xb50   :  { %5061 = vmatpush1.bf16.msra.mxu1 %v11609_v55  ;;  %5154 = vmatpush1.bf16.msra.mxu0 %v11377_v19  ;;  %v11668_v19 = vrot.slane %v11659_v25, %v13872_v40 }
 0xb51   :  { %5062 = vmatprep.subr.bf16.mxu1 %v11613_v56  ;;  %5155 = vmatprep.subr.bf16.mxu0 %v11380_v50  ;;  %v13873_v50 = vld [vmem:[#allocation25_spill] sm:$0xff] }
 0xb54   :  { %5063 = vmatpush1.bf16.msra.mxu1 %v11617_v1  ;;  %5156 = vmatpush1.bf16.msra.mxu0 %v11383_v57  ;;  %v13874_v57 = vsub.s32 2, %v13873_v50 }
 0xb55   :  { %5064 = vmatprep.subr.bf16.mxu1 %v11621_v21  ;;  %5157 = vmatprep.subr.bf16.mxu0 %v11386_v10 }
 0xb56   :  { %v11673_v10 = vrot.slane %v11659_v25, %v13874_v57 }
 0xb58   :  { %5065 = vmatpush1.bf16.msra.mxu1 %v11625_v38  ;;  %5158 = vmatpush1.bf16.msra.mxu0 %v11389_v6 }
 0xb59   :  { %5066 = vmatprep.subr.bf16.mxu1 %v11629_v37  ;;  %5159 = vmatprep.subr.bf16.mxu0 %v11392_v62 }
 0xb5c   :  { %5067 = vmatpush1.bf16.msra.mxu1 %v11633_v12  ;;  %5160 = vmatpush1.bf16.msra.mxu0 %v11395_v7  ;;  %v13875_v7 = vld [vmem:[#allocation27_spill] sm:$0xff] }
 0xb5d   :  { %5068 = vmatprep.subr.bf16.mxu1 %v11637_v14  ;;  %5161 = vmatprep.subr.bf16.mxu0 %v11398_v46  ;;  %v11682_v46 = vrot.slane %v11659_v25, %v13875_v7 }
 0xb60   :  { %5069 = vmatpush1.bf16.msra.mxu1 %v11641_v24  ;;  %5162 = vmatpush1.bf16.msra.mxu0 %v11401_v15  ;;  %v13876_v15 = vsub.s32 3, %v13873_v50 }
 0xb61   :  { %5172 = vmatprep.subr.bf16.mxu1 %v11404_v29  ;;  %5213 = vmatprep.subr.bf16.mxu0 %v11509_v30 }
 0xb63   :  { %5071 = vmatmul.mubr.bf16.vlgmr.msra.gmra.mrb[96].mxu1 %v13833_v34 }
 0xb64   :  { %5173 = vmatpush1.bf16.msra.mxu1 %v11408_v18  ;;  %v13881_v18 = vld [vmem:[#allocation40_spill] sm:$0xff] }
 0xb65   :  { %5174 = vmatprep.subr.bf16.mxu1 %v11410_v63 }
 0xb68   :  { %5175 = vmatpush1.bf16.msra.mxu1 %v11416_v51 }
 0xb69   :  { %5176 = vmatprep.subr.bf16.mxu1 %v11419_v3 }
 0xb6c   :  { %5177 = vmatpush1.bf16.msra.mxu1 %v11423_v58 }
 0xb6d   :  { %5178 = vmatprep.subr.bf16.mxu1 %v11426_v42 }
 0xb70   :  { %5179 = vmatpush1.bf16.msra.mxu1 %v11431_v23 }
 0xb71   :  { %5180 = vmatprep.subr.bf16.mxu1 %v11434_v16 }
 0xb74   :  { %v11661_v31 = vpop.f32.mrb[64].mxu1  ;;  %v11663_v34 = vpop.f32.mrb[80].mxu0  ;;  %5181 = vmatpush1.bf16.msra.mxu1 %v11437_v33  ;;  %v11687_v33 = vrot.slane %v11659_v25, %v13876_v15 }
 0xb75   :  { %v11675_v6 = vpop.f32.mrb[65].mxu1  ;;  %v11677_v62 = vpop.f32.mrb[81].mxu0  ;;  %5182 = vmatprep.subr.bf16.mxu1 %v11440_v9 }
 0xb76   :  { %v3987_v16 = vpop.f32.mrb[66].mxu1  ;;  %v4133_v23 = vpop.f32.mrb[82].mxu0 }
 0xb77   :  { %v11690_v57 = vadd.f32 %v3987_v16, %v11668_v19  ;;  %v11693_v42 = vadd.f32 %v4133_v23, %v11673_v10  ;;  %v3989_v58 = vpop.f32.mrb[67].mxu1  ;;  %v4135_v3 = vpop.f32.mrb[83].mxu0 }
 0xb78   :  { %v11696_v9 = vadd.f32 %v3989_v58, %v11682_v46  ;;  %v11699_v51 = vadd.f32 %v4135_v3, %v11687_v33  ;;  %5183 = vmatpush1.bf16.msra.mxu1 %v11445_v44  ;;  %v13893_v44 = vld [vmem:[#allocation42_spill] sm:$0xff] }
 0xb79   :  { %13877 = vst [vmem:[#allocation76_spill] sm:$0xff] %v11690_v57  ;;  %13878 = vst [vmem:[#allocation77_spill] sm:$0xff] %v11693_v42  ;;  %5184 = vmatprep.subr.bf16.mxu1 %v11448_v54 }
 0xb7a   :  { %13879 = vst [vmem:[#allocation78_spill] sm:$0xff] %v11696_v9  ;;  %13880 = vst [vmem:[#allocation79_spill] sm:$0xff] %v11699_v51  ;;  %v13884_v9 = vld [vmem:[#allocation56_spill] sm:$0xff] }
 0xb7c   :  { %v3993_v15 = vpop.f32.mrb[68].mxu1  ;;  %v4139_v63 = vpop.f32.mrb[84].mxu0  ;;  %5185 = vmatpush1.bf16.msra.mxu1 %v13881_v18 }
 0xb7d   :  { %v11705_v16 = vadd.f32 %v3993_v15, %v11668_v19  ;;  %v11708_v23 = vadd.f32 %v4139_v63, %v11673_v10  ;;  %v3995_v42 = vpop.f32.mrb[69].mxu1  ;;  %v4141_v58 = vpop.f32.mrb[85].mxu0  ;;  %5186 = vmatprep.subr.bf16.mxu1 %v13884_v9 }
 0xb7e   :  { %v11712_v3 = vadd.f32 %v3995_v42, %v11682_v46  ;;  %v11715_v51 = vadd.f32 %v4141_v58, %v11687_v33  ;;  %v3997_v57 = vpop.f32.mrb[70].mxu1  ;;  %v4143_v54 = vpop.f32.mrb[86].mxu0  ;;  %v13891_v42 = vld [vmem:[#allocation57_spill] sm:$0xff]  ;;  %v13892_v58 = vld [vmem:[#allocation39_spill] sm:$0xff] }
 0xb7f   :  { %13882 = vst [vmem:[#allocation80_spill] sm:$0xff] %v11705_v16  ;;  %13883 = vst [vmem:[#allocation81_spill] sm:$0xff] %v11708_v23  ;;  %v11718_v18 = vadd.f32 %v3997_v57, %v11668_v19  ;;  %v11721_v15 = vadd.f32 %v4143_v54, %v11673_v10  ;;  %v3999_v63 = vpop.f32.mrb[71].mxu1  ;;  %v4145_v23 = vpop.f32.mrb[87].mxu0 }
 0xb80   :  { %13885 = vst [vmem:[#allocation82_spill] sm:$0xff] %v11712_v3  ;;  %13886 = vst [vmem:[#allocation83_spill] sm:$0xff] %v11715_v51  ;;  %v11724_v16 = vadd.f32 %v3999_v63, %v11682_v46  ;;  %v11727_v9 = vadd.f32 %v4145_v23, %v11687_v33  ;;  %5187 = vmatpush1.bf16.msra.mxu1 %v13891_v42  ;;  %v13905_v42 = vld [vmem:[#allocation59_spill] sm:$0xff] }
 0xb81   :  { %13887 = vst [vmem:[#allocation84_spill] sm:$0xff] %v11718_v18  ;;  %13888 = vst [vmem:[#allocation85_spill] sm:$0xff] %v11721_v15  ;;  %5188 = vmatprep.subr.bf16.mxu1 %v13892_v58 }
 0xb82   :  { %13889 = vst [vmem:[#allocation86_spill] sm:$0xff] %v11724_v16  ;;  %13890 = vst [vmem:[#allocation87_spill] sm:$0xff] %v11727_v9  ;;  %v13896_v16 = vld [vmem:[#allocation41_spill] sm:$0xff] }
 0xb84   :  { %v4003_v51 = vpop.f32.mrb[72].mxu1  ;;  %v4149_v3 = vpop.f32.mrb[88].mxu0  ;;  %5189 = vmatpush1.bf16.msra.mxu1 %v13893_v44 }
 0xb85   :  { %v11733_v57 = vadd.f32 %v4003_v51, %v11668_v19  ;;  %v11736_v54 = vadd.f32 %v4149_v3, %v11673_v10  ;;  %v4005_v15 = vpop.f32.mrb[73].mxu1  ;;  %v4151_v63 = vpop.f32.mrb[89].mxu0  ;;  %5190 = vmatprep.subr.bf16.mxu1 %v13896_v16 }
 0xb86   :  { %v11740_v23 = vadd.f32 %v4005_v15, %v11682_v46  ;;  %v11743_v9 = vadd.f32 %v4151_v63, %v11687_v33  ;;  %v4007_v18 = vpop.f32.mrb[74].mxu1  ;;  %v4153_v58 = vpop.f32.mrb[90].mxu0  ;;  %v13903_v15 = vld [vmem:[#allocation44_spill] sm:$0xff]  ;;  %v13904_v63 = vld [vmem:[#allocation58_spill] sm:$0xff] }
 0xb87   :  { %13894 = vst [vmem:[#allocation88_spill] sm:$0xff] %v11733_v57  ;;  %13895 = vst [vmem:[#allocation66_spill] sm:$0xff] %v11736_v54  ;;  %v11746_v44 = vadd.f32 %v4007_v18, %v11668_v19  ;;  %v11749_v51 = vadd.f32 %v4153_v58, %v11673_v10  ;;  %v4009_v3 = vpop.f32.mrb[75].mxu1  ;;  %v4155_v54 = vpop.f32.mrb[91].mxu0 }
 0xb88   :  { %13897 = vst [vmem:[#allocation89_spill] sm:$0xff] %v11740_v23  ;;  %13898 = vst [vmem:[#allocation90_spill] sm:$0xff] %v11743_v9  ;;  %v11752_v57 = vadd.f32 %v4009_v3, %v11682_v46  ;;  %v11755_v16 = vadd.f32 %v4155_v54, %v11687_v33  ;;  %5191 = vmatpush1.bf16.msra.mxu1 %v13903_v15 }
 0xb89   :  { %13899 = vst [vmem:[#allocation91_spill] sm:$0xff] %v11746_v44  ;;  %13900 = vst [vmem:[#allocation92_spill] sm:$0xff] %v11749_v51  ;;  %5192 = vmatprep.subr.bf16.mxu1 %v13904_v63 }
 0xb8a   :  { %13901 = vst [vmem:[#allocation93_spill] sm:$0xff] %v11752_v57  ;;  %13902 = vst [vmem:[#allocation94_spill] sm:$0xff] %v11755_v16  ;;  %v13908_v57 = vld [vmem:[#allocation32_spill] sm:$0xff] }
 0xb8c   :  { %v4013_v9 = vpop.f32.mrb[76].mxu1  ;;  %v4159_v23 = vpop.f32.mrb[92].mxu0  ;;  %5193 = vmatpush1.bf16.msra.mxu1 %v13905_v42 }
 0xb8d   :  { %v11761_v18 = vadd.f32 %v4013_v9, %v11668_v19  ;;  %v11764_v58 = vadd.f32 %v4159_v23, %v11673_v10  ;;  %v4015_v51 = vpop.f32.mrb[77].mxu1  ;;  %v4161_v3 = vpop.f32.mrb[93].mxu0  ;;  %5194 = vmatprep.subr.bf16.mxu1 %v13908_v57 }
 0xb8e   :  { %v11768_v54 = vadd.f32 %v4015_v51, %v11682_v46  ;;  %v11771_v16 = vadd.f32 %v4161_v3, %v11687_v33  ;;  %v4017_v44 = vpop.f32.mrb[78].mxu1  ;;  %v4163_v63 = vpop.f32.mrb[94].mxu0  ;;  %v13915_v51 = vld [vmem:[#allocation52_spill] sm:$0xff]  ;;  %v13916_v3 = vld [vmem:[#allocation53_spill] sm:$0xff] }
 0xb8f   :  { %13906 = vst [vmem:[#allocation95_spill] sm:$0xff] %v11761_v18  ;;  %13907 = vst [vmem:[#allocation96_spill] sm:$0xff] %v11764_v58  ;;  %v11774_v42 = vadd.f32 %v4017_v44, %v11668_v19  ;;  %v11777_v9 = vadd.f32 %v4163_v63, %v11673_v10  ;;  %v4019_v23 = vpop.f32.mrb[79].mxu1  ;;  %v4165_v58 = vpop.f32.mrb[95].mxu0  ;;  %v7571_v44 = vadd.f32 %v11661_v31, %v11668_v19 }
 0xb90   :  { %13909 = vst [vmem:[#allocation97_spill] sm:$0xff] %v11768_v54  ;;  %13910 = vst [vmem:[#allocation98_spill] sm:$0xff] %v11771_v16  ;;  %v11780_v18 = vadd.f32 %v4019_v23, %v11682_v46  ;;  %v11783_v57 = vadd.f32 %v4165_v58, %v11687_v33  ;;  %5195 = vmatpush1.bf16.msra.mxu1 %v13915_v51  ;;  %v13917_v16 = vld [vmem:[#allocation31_spill] sm:$0xff]  ;;  %v13918_v54 = vld [vmem:[#allocation34_spill] sm:$0xff]  ;;  %v7572_v63 = vadd.f32 %v11675_v6, %v11682_v46 }
 0xb91   :  { %13911 = vst [vmem:[#allocation99_spill] sm:$0xff] %v11774_v42  ;;  %13912 = vst [vmem:[#allocation100_spill] sm:$0xff] %v11777_v9  ;;  %5196 = vmatprep.subr.bf16.mxu1 %v13916_v3 }
 0xb92   :  { %13913 = vst [vmem:[#allocation101_spill] sm:$0xff] %v11780_v18  ;;  %13914 = vst [vmem:[#allocation102_spill] sm:$0xff] %v11783_v57 }
 0xb94   :  { %5197 = vmatpush1.bf16.msra.mxu1 %v13917_v16 }
 0xb95   :  { %5198 = vmatprep.subr.bf16.mxu1 %v13918_v54 }
 0xb98   :  { %5199 = vmatpush1.bf16.msra.mxu1 %v11495_v22 }
 0xb99   :  { %5200 = vmatprep.subr.bf16.mxu1 %v11498_v36 }
 0xb9c   :  { %5201 = vmatpush1.bf16.msra.mxu1 %v11501_v53  ;;  %v7587_v53 = vadd.f32 %v11663_v34, %v11673_v10 }
 0xb9d   :  { %5202 = vmatprep.subr.bf16.mxu1 %v11504_v0 }
 0xba0   :  { %5203 = vmatpush1.bf16.msra.mxu1 %v11507_v52  ;;  %v13919_v52 = vsub.s32 4, %v13873_v50 }
 0xba1   :  { %5306 = vmatprep.subr.bf16.mxu1 %v11265_v17  ;;  %v7588_v17 = vadd.f32 %v11677_v62, %v11687_v33 }
 0xba2   :  { %v11808_v31 = vrot.slane %v11659_v25, %v13919_v52 }
 0xbb5   :  { %v4990_v58 = vpop.f32.mrb[96].mxu0 }
 0xbb6   :  { %v5079_v23 = vadd.f32 %v7571_v44, %v4990_v58  ;;  %v4992_v57 = vpop.f32.mrb[97].mxu0 }
 0xbb7   :  { %v5080_v18 = vadd.f32 %v7572_v63, %v4992_v57  ;;  %v4994_v9 = vpop.f32.mrb[98].mxu0  ;;  %v13920_v57 = vsub.s32 5, %v13873_v50 }
 0xbb8   :  { %v4995_v42 = vpop.f32.mrb[99].mxu0 }
 0xbb9   :  { %v2909_v42 = vrot.slane %v11659_v25, %v13920_v57 }
 0xbf5   :  { %v11801_v0 = vpop.f32.mrb[80].mxu1 }
 0xbf6   :  { %v5031_v19 = vpop.f32.mrb[100].mxu0  ;;  %v11810_v6 = vpop.f32.mrb[81].mxu1 }
 0xbf7   :  { %v5081_v46 = vadd.f32 %v7587_v53, %v5031_v19  ;;  %v5033_v9 = vpop.f32.mrb[101].mxu0  ;;  %v4279_v34 = vpop.f32.mrb[82].mxu1 }
 0xbf8   :  { %v5082_v10 = vadd.f32 %v7588_v17, %v5033_v9  ;;  %v11816_v44 = vadd.f32 %v4279_v34, %v11808_v31  ;;  %v4281_v33 = vpop.f32.mrb[83].mxu1  ;;  %v5035_v62 = vpop.f32.mrb[102].mxu0 }
 0xbf9   :  { %v11818_v63 = vadd.f32 %v4281_v33, %v2909_v42  ;;  %v5036_v52 = vpop.f32.mrb[103].mxu0 }
 0xbfa   :  { %13921 = vst [vmem:[#allocation103_spill] sm:$0xff] %v11816_v44 }
 0xbfb   :  { %13922 = vst [vmem:[#allocation104_spill] sm:$0xff] %v11818_v63 }
 0xbfd   :  { %v4285_v58 = vpop.f32.mrb[84].mxu1 }
 0xbfe   :  { %v11821_v36 = vadd.f32 %v4285_v58, %v11808_v31  ;;  %v4287_v53 = vpop.f32.mrb[85].mxu1 }
 0xbff   :  { %v11823_v19 = vadd.f32 %v4287_v53, %v2909_v42  ;;  %v4289_v50 = vpop.f32.mrb[86].mxu1 }
 0xc00   :  { %13923 = vst [vmem:[#allocation105_spill] sm:$0xff] %v11821_v36  ;;  %v11826_v25 = vadd.f32 %v4289_v50, %v11808_v31  ;;  %v4291_v17 = vpop.f32.mrb[87].mxu1 }
 0xc01   :  { %13924 = vst [vmem:[#allocation106_spill] sm:$0xff] %v11823_v19  ;;  %v11828_v57 = vadd.f32 %v4291_v17, %v2909_v42 }
 0xc02   :  { %13925 = vst [vmem:[#allocation107_spill] sm:$0xff] %v11826_v25 }
 0xc03   :  { %13926 = vst [vmem:[#allocation108_spill] sm:$0xff] %v11828_v57 }
 0xc05   :  { %v4295_v9 = vpop.f32.mrb[88].mxu1 }
 0xc06   :  { %v11831_v34 = vadd.f32 %v4295_v9, %v11808_v31  ;;  %v4297_v33 = vpop.f32.mrb[89].mxu1 }
 0xc07   :  { %v11833_v62 = vadd.f32 %v4297_v33, %v2909_v42  ;;  %v4299_v52 = vpop.f32.mrb[90].mxu1 }
 0xc08   :  { %13927 = vst [vmem:[#allocation109_spill] sm:$0xff] %v11831_v34  ;;  %v11836_v58 = vadd.f32 %v4299_v52, %v11808_v31  ;;  %v4301_v53 = vpop.f32.mrb[91].mxu1  ;;  %v7387_v34 = vmul.f32 -1.442695, %v5079_v23  ;;  %v7388_v52 = vmul.f32 -1.442695, %v5080_v18 }
 0xc09   :  { %13928 = vst [vmem:[#allocation110_spill] sm:$0xff] %v11833_v62  ;;  %v11838_v19 = vadd.f32 %v4301_v53, %v2909_v42 }
 0xc0a   :  { %13929 = vst [vmem:[#allocation111_spill] sm:$0xff] %v11836_v58  ;;  %8467 = vpow2.f32 %v7387_v34 }
 0xc0b   :  { %13930 = vst [vmem:[#allocation112_spill] sm:$0xff] %v11838_v19  ;;  %8469 = vpow2.f32 %v7388_v52 }
 0xc0d   :  { %v4305_v36 = vpop.f32.mrb[92].mxu1 }
 0xc0e   :  { %v11841_v50 = vadd.f32 %v4305_v36, %v11808_v31  ;;  %v4307_v17 = vpop.f32.mrb[93].mxu1  ;;  %v7389_v36 = vmul.f32 -1.442695, %v5081_v46 }
 0xc0f   :  { %v11843_v57 = vadd.f32 %v4307_v17, %v2909_v42  ;;  %v4309_v25 = vpop.f32.mrb[94].mxu1  ;;  %v4458_v17 = vld [vmem:[#allocation15] sm:$0x3] }
 0xc10   :  { %13931 = vst [vmem:[#allocation43_spill] sm:$0xff] %v11841_v50  ;;  %v11846_v9 = vadd.f32 %v4309_v25, %v11808_v31  ;;  %v4311_v33 = vpop.f32.mrb[95].mxu1  ;;  %v7390_v50 = vmul.f32 -1.442695, %v5082_v10  ;;  %v11851_v25 = vrot.slane %v4458_v17, %v13872_v40 }
 0xc11   :  { %13932 = vst [vmem:[#allocation46_spill] sm:$0xff] %v11843_v57  ;;  %v11848_v62 = vadd.f32 %v4311_v33, %v2909_v42  ;;  %v11854_v33 = vrot.slane %v4458_v17, %v13875_v7 }
 0xc12   :  { %13933 = vst [vmem:[#allocation45_spill] sm:$0xff] %v11846_v9  ;;  %13935 = vst [vmem:[#allocation60_spill] sm:$0xff] %v11851_v25 }
 0xc13   :  { %13934 = vst [vmem:[#allocation48_spill] sm:$0xff] %v11848_v62  ;;  %13936 = vst [vmem:[#allocation61_spill] sm:$0xff] %v11854_v33 }
 0xc14   :  { %v8468_v53 = vpop.eup %8467 }
 0xc15   :  { %v8470_v19 = vpop.eup %8469  ;;  %v5095_v58 = vadd.f32 1.0, %v8468_v53 }
 0xc16   :  { %v5096_v63 = vadd.f32 1.0, %v8470_v19 }
 0xc17   :  { %8471 = vrcp.f32 %v5095_v58  ;;  %v7603_v58 = vadd.f32 %v11801_v0, %v11808_v31 }
 0xc18   :  { %8473 = vrcp.f32 %v5096_v63 }
 0xc19   :  { %8475 = vpow2.f32 %v7389_v36  ;;  %v7604_v36 = vadd.f32 %v11810_v6, %v2909_v42 }
 0xc1a   :  { %8477 = vpow2.f32 %v7390_v50 }
 0xc21   :  { %v8472_v18 = vpop.eup %8471 }
 0xc22   :  { %v8474_v34 = vpop.eup %8473 }
 0xc23   :  { %v8476_v19 = vpop.eup %8475 }
 0xc24   :  { %v8478_v63 = vpop.eup %8477  ;;  %v5097_v17 = vadd.f32 1.0, %v8476_v19  ;;  %v11902_v19 = vld [vmem:[#allocation13 + $0xc4] ss:$24 sps:$4 sm:$0xff]  }
 0xc25   :  { %v5098_v9 = vadd.f32 1.0, %v8478_v63  ;;  %v11910_v63 = vld [vmem:[#allocation13 + $0xf4] ss:$24 sps:$4 sm:$0xff]  }
 0xc36   :  { %v5072_v23 = vpop.f32.mrb[96].mxu1 }
 0xc37   :  { %v5107_v52 = vadd.f32 %v5072_v23, %v11851_v25  ;;  %v5074_v53 = vpop.f32.mrb[97].mxu1 }
 0xc38   :  { %v5108_v46 = vadd.f32 %v5074_v53, %v11854_v33  ;;  %v5076_v10 = vpop.f32.mrb[98].mxu1 }
 0xc39   :  { %v5109_v50 = vmul.f32 %v8472_v18, %v5107_v52  ;;  %v5077_v40 = vpop.f32.mrb[99].mxu1  ;;  %v11899_v52 = vld [vmem:[#allocation13 + $0x90] ss:$24 sps:$4 sm:$0xff]  }
 0xc3a   :  { %v5110_v7 = vmul.f32 %v8474_v34, %v5108_v46  ;;  %v11894_v34 = vld [vmem:[#allocation13 + $0x94] ss:$24 sps:$4 sm:$0xff]   ;;  %v11907_v46 = vld [vmem:[#allocation13 + $0xc0] ss:$24 sps:$4 sm:$0xff]  }
 0xc3b   :  { %v5111_v62 = vadd.f32 %v7603_v58, %v5109_v50  ;;  %v11915_v58 = vld [vmem:[#allocation13 + $0xf0] ss:$24 sps:$4 sm:$0xff]   ;;  %v11918_v50 = vld [vmem:[#allocation13 + $0x124] ss:$24 sps:$4 sm:$0xff]   ;;  %v11923_v40 = vld [vmem:[#allocation13 + $0x120] ss:$24 sps:$4 sm:$0xff]  }
 0xc3c   :  { %v5112_v57 = vadd.f32 %v7604_v36, %v5110_v7  ;;  %v11926_v36 = vld [vmem:[#allocation13 + $0x154] ss:$24 sps:$4 sm:$0xff]   ;;  %v11931_v7 = vld [vmem:[#allocation13 + $0x150] ss:$24 sps:$4 sm:$0xff]  }
 0xc3d   :  { %8479 = vtanh.f32 %v5111_v62  ;;  %v11878_v62 = vld [vmem:[#allocation13 + $0x34] ss:$24 sps:$4 sm:$0xff]  }
 0xc3e   :  { %8481 = vtanh.f32 %v5112_v57 }
 0xc3f   :  { %8483 = vrcp.f32 %v5097_v17  ;;  %v11934_v17 = vld [vmem:[#allocation13 + $0x184] ss:$24 sps:$4 sm:$0xff]  }
 0xc40   :  { %8485 = vrcp.f32 %v5098_v9  ;;  %v11883_v9 = vld [vmem:[#allocation13 + $0x30] ss:$24 sps:$4 sm:$0xff]  }
 0xc47   :  { %v8480_v23 = vpop.eup %8479 }
 0xc48   :  { %v8482_v53 = vpop.eup %8481  ;;  %v5115_v10 = vsub.f32 0.0, %v8480_v23 }
 0xc49   :  { %v8484_v44 = vpop.eup %8483  ;;  %v5116_v33 = vsub.f32 0.0, %v8482_v53 }
 0xc4a   :  { %v8486_v25 = vpop.eup %8485  ;;  %v5117_v0 = vmul.f32 %v8484_v44, %v5115_v10  ;;  %v11875_v44 = vld [vmem:[#allocation13] ss:$24 sps:$4 sm:$0xff]   ;;  %v11947_v10 = vld [vmem:[#allocation13 + $0x1b0] ss:$24 sps:$4 sm:$0xff]  }
 0xc4b   :  { %v5118_v31 = vmul.f32 %v8486_v25, %v5116_v33  ;;  %v11886_v25 = vld [vmem:[#allocation13 + $0x64] ss:$24 sps:$4 sm:$0xff]   ;;  %v11891_v33 = vld [vmem:[#allocation13 + $0x60] ss:$24 sps:$4 sm:$0xff]   ;;  %13939 = vst [vmem:[#allocation49_spill] sm:$0xff] %v11947_v10 }
 0xc4c   :  { %v11861_v18 = vadd.f32 %v8480_v23, %v5117_v0  ;;  %v11939_v23 = vld [vmem:[#allocation13 + $0x180] ss:$24 sps:$4 sm:$0xff]   ;;  %v11950_v0 = vld [vmem:[#allocation13 + $0x1e4] ss:$24 sps:$4 sm:$0xff]  }
 0xc4d   :  { %v11863_v6 = vadd.f32 %v8482_v53, %v5118_v31  ;;  %v11942_v53 = vld [vmem:[#allocation13 + $0x1b4] ss:$24 sps:$4 sm:$0xff]   ;;  %13940 = vst [vmem:[#allocation51_spill] sm:$0xff] %v11950_v0  ;;  %v11955_v31 = vld [vmem:[#allocation13 + $0x1e0] ss:$24 sps:$4 sm:$0xff]  }
 0xc4e   :  { %13937 = vst [vmem:[#allocation47_spill] sm:$0xff] %v11861_v18  ;;  %v11869_v57 = vpack.c.bf16 %v11861_v18, %v11861_v18  ;;  %13941 = vst [vmem:[#allocation62_spill] sm:$0xff] %v11955_v31 }
 0xc4f   :  { %13938 = vst [vmem:[#allocation50_spill] sm:$0xff] %v11863_v6  ;;  %v5130_v42 = vpack.c.bf16 %v11863_v6, %v11863_v6 }
 0xc51   :  { %5163 = vmatprep.mubr.bf16.mxu0 %v5130_v42  ;;  %5204 = vmatprep.mubr.bf16.mxu1 %v5130_v42 }
 0xc52   :  { %5164 = vmatmul.mubr.bf16.vlgmr.msra.gmra.mrb[104].mxu0 %v11869_v57  ;;  %5205 = vmatmul.mubr.bf16.vlgmr.msra.gmra.mrb[100].mxu1 %v11869_v57 }
 0xc53   :  { %5214 = vmatpush1.bf16.msra.mxu0 %v11514_v41  ;;  %5245 = vmatprep.mubr.bf16.mxu0 %v5130_v42  ;;  %v11958_v42 = vld [vmem:[#allocation13 + $0x214] ss:$24 sps:$4 sm:$0xff]  }
 0xc54   :  { %5215 = vmatprep.subr.bf16.mxu0 %v11516_v59  ;;  %5307 = vmatpush1.bf16.msra.mxu1 %v11875_v44  ;;  %13942 = vst [vmem:[#allocation63_spill] sm:$0xff] %v11958_v42 }
 0xc55   :  { %5308 = vmatprep.subr.bf16.mxu1 %v11878_v62 }
 0xc57   :  { %5216 = vmatpush1.bf16.msra.mxu0 %v11523_v61 }
 0xc58   :  { %5217 = vmatprep.subr.bf16.mxu0 %v11527_v47  ;;  %5309 = vmatpush1.bf16.msra.mxu1 %v11883_v9 }
 0xc59   :  { %5310 = vmatprep.subr.bf16.mxu1 %v11886_v25 }
 0xc5b   :  { %5218 = vmatpush1.bf16.msra.mxu0 %v11531_v26 }
 0xc5c   :  { %5219 = vmatprep.subr.bf16.mxu0 %v11535_v20  ;;  %5311 = vmatpush1.bf16.msra.mxu1 %v11891_v33 }
 0xc5d   :  { %5312 = vmatprep.subr.bf16.mxu1 %v11894_v34 }
 0xc5f   :  { %5220 = vmatpush1.bf16.msra.mxu0 %v11541_v11 }
 0xc60   :  { %5221 = vmatprep.subr.bf16.mxu0 %v11545_v60  ;;  %5313 = vmatpush1.bf16.msra.mxu1 %v11899_v52 }
 0xc61   :  { %5314 = vmatprep.subr.bf16.mxu1 %v11902_v19 }
 0xc63   :  { %5222 = vmatpush1.bf16.msra.mxu0 %v11549_v5 }
 0xc64   :  { %5223 = vmatprep.subr.bf16.mxu0 %v11553_v4  ;;  %5315 = vmatpush1.bf16.msra.mxu1 %v11907_v46 }
 0xc65   :  { %5316 = vmatprep.subr.bf16.mxu1 %v11910_v63 }
 0xc67   :  { %5224 = vmatpush1.bf16.msra.mxu0 %v11559_v49 }
 0xc68   :  { %5225 = vmatprep.subr.bf16.mxu0 %v11563_v43  ;;  %5317 = vmatpush1.bf16.msra.mxu1 %v11915_v58 }
 0xc69   :  { %5318 = vmatprep.subr.bf16.mxu1 %v11918_v50 }
 0xc6b   :  { %5226 = vmatpush1.bf16.msra.mxu0 %v11567_v13 }
 0xc6c   :  { %5227 = vmatprep.subr.bf16.mxu0 %v11571_v8  ;;  %5319 = vmatpush1.bf16.msra.mxu1 %v11923_v40 }
 0xc6d   :  { %5320 = vmatprep.subr.bf16.mxu1 %v11926_v36 }
 0xc6f   :  { %5228 = vmatpush1.bf16.msra.mxu0 %v11577_v35 }
 0xc70   :  { %5229 = vmatprep.subr.bf16.mxu0 %v11581_v45  ;;  %5321 = vmatpush1.bf16.msra.mxu1 %v11931_v7 }
 0xc71   :  { %5322 = vmatprep.subr.bf16.mxu1 %v11934_v17 }
 0xc73   :  { %5230 = vmatpush1.bf16.msra.mxu0 %v11585_v2 }
 0xc74   :  { %5231 = vmatprep.subr.bf16.mxu0 %v11589_v27  ;;  %5323 = vmatpush1.bf16.msra.mxu1 %v11939_v23 }
 0xc75   :  { %5324 = vmatprep.subr.bf16.mxu1 %v11942_v53 }
 0xc77   :  { %5232 = vmatpush1.bf16.msra.mxu0 %v11593_v28 }
 0xc78   :  { %5233 = vmatprep.subr.bf16.mxu0 %v11597_v39  ;;  %5325 = vmatpush1.bf16.msra.mxu1 %v11947_v10  ;;  %v11963_v10 = vld [vmem:[#allocation13 + $0x210] ss:$24 sps:$4 sm:$0xff]  }
 0xc79   :  { %5326 = vmatprep.subr.bf16.mxu1 %v11950_v0  ;;  %13943 = vst [vmem:[#allocation64_spill] sm:$0xff] %v11963_v10  ;;  %v11966_v0 = vld [vmem:[#allocation13 + $0x244] ss:$24 sps:$4 sm:$0xff]  }
 0xc7a   :  { %13944 = vst [vmem:[#allocation123_spill] sm:$0xff] %v11966_v0 }
 0xc7b   :  { %5234 = vmatpush1.bf16.msra.mxu0 %v11601_v32 }
 0xc7c   :  { %5235 = vmatprep.subr.bf16.mxu0 %v11605_v48  ;;  %5327 = vmatpush1.bf16.msra.mxu1 %v11955_v31  ;;  %v11971_v31 = vld [vmem:[#allocation13 + $0x240] ss:$24 sps:$4 sm:$0xff]  }
 0xc7d   :  { %5328 = vmatprep.subr.bf16.mxu1 %v11958_v42  ;;  %13945 = vst [vmem:[#allocation67_spill] sm:$0xff] %v11971_v31  ;;  %v11974_v42 = vld [vmem:[#allocation13 + $0x274] ss:$24 sps:$4 sm:$0xff]  }
 0xc7e   :  { %13946 = vst [vmem:[#allocation30_spill] sm:$0xff] %v11974_v42 }
 0xc7f   :  { %5236 = vmatpush1.bf16.msra.mxu0 %v11609_v55 }
 0xc80   :  { %5237 = vmatprep.subr.bf16.mxu0 %v11613_v56  ;;  %5329 = vmatpush1.bf16.msra.mxu1 %v11963_v10  ;;  %v11979_v10 = vld [vmem:[#allocation13 + $0x270] ss:$24 sps:$4 sm:$0xff]  }
 0xc81   :  { %5330 = vmatprep.subr.bf16.mxu1 %v11966_v0  ;;  %13947 = vst [vmem:[#allocation29_spill] sm:$0xff] %v11979_v10  ;;  %v11982_v0 = vld [vmem:[#allocation13 + $0x2a4] ss:$24 sps:$4 sm:$0xff]  }
 0xc82   :  { %13948 = vst [vmem:[#allocation24_spill] sm:$0xff] %v11982_v0 }
 0xc83   :  { %5238 = vmatpush1.bf16.msra.mxu0 %v11617_v1 }
 0xc84   :  { %5239 = vmatprep.subr.bf16.mxu0 %v11621_v21  ;;  %5331 = vmatpush1.bf16.msra.mxu1 %v11971_v31  ;;  %v11987_v31 = vld [vmem:[#allocation13 + $0x2a0] ss:$24 sps:$4 sm:$0xff]  }
 0xc85   :  { %5332 = vmatprep.subr.bf16.mxu1 %v11974_v42  ;;  %13949 = vst [vmem:[#allocation124_spill] sm:$0xff] %v11987_v31  ;;  %v11990_v42 = vld [vmem:[#allocation13 + $0x2d4] ss:$24 sps:$4 sm:$0xff]  }
 0xc86   :  { %13950 = vst [vmem:[#allocation65_spill] sm:$0xff] %v11990_v42 }
 0xc87   :  { %5240 = vmatpush1.bf16.msra.mxu0 %v11625_v38 }
 0xc88   :  { %5241 = vmatprep.subr.bf16.mxu0 %v11629_v37  ;;  %5333 = vmatpush1.bf16.msra.mxu1 %v11979_v10  ;;  %v11995_v10 = vld [vmem:[#allocation13 + $0x2d0] ss:$24 sps:$4 sm:$0xff]   ;;  %v13959_v37 = vld [vmem:[#allocation122_spill] sm:$0xff] }
 0xc89   :  { %5334 = vmatprep.subr.bf16.mxu1 %v11982_v0  ;;  %13951 = vst [vmem:[#allocation26_spill] sm:$0xff] %v11995_v10  ;;  %v13955_v0 = vld [vmem:[#allocation118_spill] sm:$0xff] }
 0xc8b   :  { %5242 = vmatpush1.bf16.msra.mxu0 %v11633_v12  ;;  %v13953_v12 = vld [vmem:[#allocation116_spill] sm:$0xff] }
 0xc8c   :  { %5243 = vmatprep.subr.bf16.mxu0 %v11637_v14  ;;  %5335 = vmatpush1.bf16.msra.mxu1 %v11987_v31  ;;  %v13952_v14 = vld [vmem:[#allocation115_spill] sm:$0xff]  ;;  %v13954_v31 = vld [vmem:[#allocation117_spill] sm:$0xff] }
 0xc8d   :  { %5336 = vmatprep.subr.bf16.mxu1 %v11990_v42  ;;  %v13956_v42 = vld [vmem:[#allocation119_spill] sm:$0xff] }
 0xc8f   :  { %5244 = vmatpush1.bf16.msra.mxu0 %v11641_v24  ;;  %v13957_v24 = vld [vmem:[#allocation120_spill] sm:$0xff] }
 0xc90   :  { %5347 = vmatprep.subr.bf16.mxu0 %v11404_v29  ;;  %5337 = vmatpush1.bf16.msra.mxu1 %v11995_v10  ;;  %v13958_v29 = vld [vmem:[#allocation121_spill] sm:$0xff]  ;;  %v13960_v10 = vld [vmem:[#allocation28_spill] sm:$0xff] }
 0xc91   :  { %5388 = vmatprep.subr.bf16.mxu1 %v11509_v30  ;;  %v13961_v30 = vld [vmem:[#allocation35_spill] sm:$0xff] }
 0xc92   :  { %5246 = vmatmul.mubr.bf16.vlgmr.msra.gmra.mrb[108].mxu0 %v11869_v57  ;;  %v13962_v57 = vld [vmem:[#allocation38_spill] sm:$0xff] }
 0xc93   :  { %5348 = vmatpush1.bf16.msra.mxu0 %v13952_v14  ;;  %v13963_v14 = vld [vmem:[#allocation37_spill] sm:$0xff] }
 0xc94   :  { %5349 = vmatprep.subr.bf16.mxu0 %v13953_v12  ;;  %v13964_v12 = vld [vmem:[#allocation40_spill] sm:$0xff] }
 0xc97   :  { %5350 = vmatpush1.bf16.msra.mxu0 %v13954_v31  ;;  %v13965_v31 = vld [vmem:[#allocation56_spill] sm:$0xff] }
 0xc98   :  { %5351 = vmatprep.subr.bf16.mxu0 %v13955_v0  ;;  %v13966_v0 = vld [vmem:[#allocation57_spill] sm:$0xff] }
 0xc9b   :  { %5352 = vmatpush1.bf16.msra.mxu0 %v13956_v42  ;;  %v13967_v42 = vld [vmem:[#allocation39_spill] sm:$0xff] }
 0xc9c   :  { %5353 = vmatprep.subr.bf16.mxu0 %v13957_v24  ;;  %v13968_v24 = vld [vmem:[#allocation42_spill] sm:$0xff] }
 0xc9f   :  { %5354 = vmatpush1.bf16.msra.mxu0 %v13958_v29  ;;  %v13969_v29 = vld [vmem:[#allocation41_spill] sm:$0xff] }
 0xca0   :  { %5355 = vmatprep.subr.bf16.mxu0 %v13959_v37  ;;  %v13970_v37 = vld [vmem:[#allocation58_spill] sm:$0xff] }
 0xca3   :  { %5356 = vmatpush1.bf16.msra.mxu0 %v13960_v10  ;;  %v13971_v10 = vld [vmem:[#allocation59_spill] sm:$0xff] }
 0xca4   :  { %5357 = vmatprep.subr.bf16.mxu0 %v13961_v30  ;;  %v13972_v30 = vld [vmem:[#allocation32_spill] sm:$0xff] }
 0xca7   :  { %5358 = vmatpush1.bf16.msra.mxu0 %v13962_v57  ;;  %v13973_v57 = vld [vmem:[#allocation33_spill] sm:$0xff] }
 0xca8   :  { %5359 = vmatprep.subr.bf16.mxu0 %v13963_v14  ;;  %v13974_v14 = vld [vmem:[#allocation36_spill] sm:$0xff] }
 0xcab   :  { %5360 = vmatpush1.bf16.msra.mxu0 %v13964_v12  ;;  %v13976_v12 = vld [vmem:[#allocation55_spill] sm:$0xff] }
 0xcac   :  { %5361 = vmatprep.subr.bf16.mxu0 %v13965_v31  ;;  %v12031_v31 = vld [vmem:[#allocation13 + $0x4] ss:$24 sps:$4 sm:$0xff]  }
 0xcad   :  { %13977 = vst [vmem:[#allocation25_spill] sm:$0xff] %v12031_v31 }
 0xcaf   :  { %5362 = vmatpush1.bf16.msra.mxu0 %v13966_v0  ;;  %v13978_v0 = vld [vmem:[#allocation76_spill] sm:$0xff] }
 0xcb0   :  { %5363 = vmatprep.subr.bf16.mxu0 %v13967_v42  ;;  %v13979_v42 = vld [vmem:[#allocation77_spill] sm:$0xff] }
 0xcb3   :  { %5364 = vmatpush1.bf16.msra.mxu0 %v13968_v24 }
 0xcb4   :  { %5365 = vmatprep.subr.bf16.mxu0 %v13969_v29  ;;  %v13980_v29 = vld [vmem:[#allocation78_spill] sm:$0xff] }
 0xcb7   :  { %5366 = vmatpush1.bf16.msra.mxu0 %v13903_v15  ;;  %v13975_v15 = vld [vmem:[#allocation54_spill] sm:$0xff] }
 0xcb8   :  { %5367 = vmatprep.subr.bf16.mxu0 %v13970_v37 }
 0xcbb   :  { %5368 = vmatpush1.bf16.msra.mxu0 %v13971_v10  ;;  %v13981_v10 = vld [vmem:[#allocation79_spill] sm:$0xff] }
 0xcbc   :  { %5369 = vmatprep.subr.bf16.mxu0 %v13972_v30 }
 0xcbf   :  { %5370 = vmatpush1.bf16.msra.mxu0 %v13915_v51 }
 0xcc0   :  { %5371 = vmatprep.subr.bf16.mxu0 %v13916_v3 }
 0xcc3   :  { %5372 = vmatpush1.bf16.msra.mxu0 %v13917_v16 }
 0xcc4   :  { %5373 = vmatprep.subr.bf16.mxu0 %v13918_v54 }
 0xcc7   :  { %5374 = vmatpush1.bf16.msra.mxu0 %v11495_v22 }
 0xcc8   :  { %5375 = vmatprep.subr.bf16.mxu0 %v13973_v57 }
 0xccb   :  { %5376 = vmatpush1.bf16.msra.mxu0 %v13974_v14 }
 0xccc   :  { %5377 = vmatprep.subr.bf16.mxu0 %v13975_v15 }
 0xccf   :  { %5378 = vmatpush1.bf16.msra.mxu0 %v13976_v12 }
 0xcd0   :  { %5481 = vmatprep.subr.bf16.mxu0 %v12031_v31 }
 0xd25   :  { %v5165_v51 = vpop.f32.mrb[104].mxu0  ;;  %v5206_v3 = vpop.f32.mrb[100].mxu1 }
 0xd26   :  { %v5254_v16 = vadd.f32 %v13978_v0, %v5165_v51  ;;  %v5256_v54 = vadd.f32 %v13979_v42, %v5206_v3  ;;  %v5167_v24 = vpop.f32.mrb[105].mxu0  ;;  %v5208_v22 = vpop.f32.mrb[101].mxu1 }
 0xd27   :  { %v5255_v37 = vadd.f32 %v13980_v29, %v5167_v24  ;;  %v5257_v30 = vadd.f32 %v13981_v10, %v5208_v22  ;;  %v5169_v57 = vpop.f32.mrb[106].mxu0  ;;  %v5210_v14 = vpop.f32.mrb[102].mxu1  ;;  %v13982_v29 = vld [vmem:[#allocation60_spill] sm:$0xff] }
 0xd28   :  { %v5170_v15 = vpop.f32.mrb[107].mxu0  ;;  %v5211_v12 = vpop.f32.mrb[103].mxu1  ;;  %v7391_v38 = vmul.f32 -1.442695, %v5254_v16  ;;  %v7393_v56 = vmul.f32 -1.442695, %v5256_v54 }
 0xd29   :  { %v7392_v21 = vmul.f32 -1.442695, %v5255_v37  ;;  %v7394_v51 = vmul.f32 -1.442695, %v5257_v30  ;;  %v13983_v37 = vld [vmem:[#allocation61_spill] sm:$0xff] }
 0xd2a   :  { %8487 = vpow2.f32 %v7391_v38 }
 0xd2b   :  { %8489 = vpow2.f32 %v7392_v21 }
 0xd2c   :  { %8491 = vpow2.f32 %v7393_v56 }
 0xd2d   :  { %8493 = vpow2.f32 %v7394_v51  ;;  %v13985_v51 = vld [vmem:[#allocation104_spill] sm:$0xff] }
 0xd34   :  { %v8488_v31 = vpop.eup %8487 }
 0xd35   :  { %v8490_v1 = vpop.eup %8489  ;;  %v5270_v0 = vadd.f32 1.0, %v8488_v31 }
 0xd36   :  { %v5271_v3 = vadd.f32 1.0, %v8490_v1  ;;  %v8492_v42 = vpop.eup %8491  ;;  %v13984_v1 = vld [vmem:[#allocation103_spill] sm:$0xff] }
 0xd37   :  { %8495 = vrcp.f32 %v5270_v0  ;;  %v8494_v22 = vpop.eup %8493  ;;  %v5272_v31 = vadd.f32 1.0, %v8492_v42 }
 0xd38   :  { %8497 = vrcp.f32 %v5271_v3  ;;  %v5273_v12 = vadd.f32 1.0, %v8494_v22 }
 0xd41   :  { %v8496_v16 = vpop.eup %8495 }
 0xd42   :  { %v8498_v14 = vpop.eup %8497 }
 0xd65   :  { %v5247_v24 = vpop.f32.mrb[108].mxu0 }
 0xd66   :  { %v5282_v10 = vadd.f32 %v5247_v24, %v13982_v29  ;;  %v5249_v57 = vpop.f32.mrb[109].mxu0 }
 0xd67   :  { %v5283_v38 = vadd.f32 %v5249_v57, %v13983_v37  ;;  %v5251_v21 = vpop.f32.mrb[110].mxu0 }
 0xd68   :  { %v5284_v15 = vmul.f32 %v8496_v16, %v5282_v10  ;;  %v5252_v54 = vpop.f32.mrb[111].mxu0 }
 0xd69   :  { %v5285_v30 = vmul.f32 %v8498_v14, %v5283_v38  ;;  %v12128_v54 = vld [vmem:[#allocation13 + $0x3c] ss:$24 sps:$4 sm:$0xff]  }
 0xd6a   :  { %v5286_v56 = vadd.f32 %v13984_v1, %v5284_v15  ;;  %14012 = vst [vmem:[#allocation34_spill] sm:$0xff] %v12128_v54  ;;  %v12137_v1 = vld [vmem:[#allocation13 + $0x68] ss:$24 sps:$4 sm:$0xff]  }
 0xd6b   :  { %v5287_v0 = vadd.f32 %v13985_v51, %v5285_v30  ;;  %v12131_v30 = vld [vmem:[#allocation13 + $0x38] ss:$24 sps:$4 sm:$0xff]   ;;  %14015 = vst [vmem:[#allocation117_spill] sm:$0xff] %v12137_v1  ;;  %v12146_v51 = vld [vmem:[#allocation13 + $0xcc] ss:$24 sps:$4 sm:$0xff]  }
 0xd6c   :  { %8499 = vtanh.f32 %v5286_v56  ;;  %14013 = vst [vmem:[#allocation115_spill] sm:$0xff] %v12131_v30  ;;  %v12140_v56 = vld [vmem:[#allocation13 + $0x9c] ss:$24 sps:$4 sm:$0xff]   ;;  %14018 = vst [vmem:[#allocation120_spill] sm:$0xff] %v12146_v51 }
 0xd6d   :  { %8501 = vtanh.f32 %v5287_v0  ;;  %14016 = vst [vmem:[#allocation118_spill] sm:$0xff] %v12140_v56  ;;  %v12149_v0 = vld [vmem:[#allocation13 + $0xc8] ss:$24 sps:$4 sm:$0xff]  }
 0xd6e   :  { %8503 = vrcp.f32 %v5272_v31  ;;  %v12134_v31 = vld [vmem:[#allocation13 + $0x6c] ss:$24 sps:$4 sm:$0xff]   ;;  %14019 = vst [vmem:[#allocation121_spill] sm:$0xff] %v12149_v0 }
 0xd6f   :  { %8505 = vrcp.f32 %v5273_v12  ;;  %14014 = vst [vmem:[#allocation116_spill] sm:$0xff] %v12134_v31  ;;  %v12143_v12 = vld [vmem:[#allocation13 + $0x98] ss:$24 sps:$4 sm:$0xff]  }
 0xd70   :  { %14017 = vst [vmem:[#allocation119_spill] sm:$0xff] %v12143_v12 }
 0xd76   :  { %v8500_v3 = vpop.eup %8499 }
 0xd77   :  { %v8502_v24 = vpop.eup %8501  ;;  %v5290_v29 = vsub.f32 %v11861_v18, %v8500_v3  ;;  %v12206_v18 = vld [vmem:[#allocation13 + $0x2ac] ss:$24 sps:$4 sm:$0xff]  }
 0xd78   :  { %v8504_v57 = vpop.eup %8503  ;;  %v5291_v21 = vsub.f32 %v11863_v6, %v8502_v24  ;;  %v12203_v6 = vld [vmem:[#allocation13 + $0x278] ss:$24 sps:$4 sm:$0xff]   ;;  %14038 = vst [vmem:[#allocation76_spill] sm:$0xff] %v12206_v18 }
 0xd79   :  { %v8506_v10 = vpop.eup %8505  ;;  %v5292_v16 = vmul.f32 %v8504_v57, %v5290_v29  ;;  %v12125_v29 = vld [vmem:[#allocation13 + $0x8] ss:$24 sps:$4 sm:$0xff]   ;;  %v12158_v57 = vld [vmem:[#allocation13 + $0x12c] ss:$24 sps:$4 sm:$0xff]   ;;  %14037 = vst [vmem:[#allocation55_spill] sm:$0xff] %v12203_v6 }
 0xd7a   :  { %v5293_v38 = vmul.f32 %v8506_v10, %v5291_v21  ;;  %14011 = vst [vmem:[#allocation31_spill] sm:$0xff] %v12125_v29  ;;  %14022 = vst [vmem:[#allocation35_spill] sm:$0xff] %v12158_v57  ;;  %v12161_v21 = vld [vmem:[#allocation13 + $0x128] ss:$24 sps:$4 sm:$0xff]   ;;  %v12164_v10 = vld [vmem:[#allocation13 + $0x15c] ss:$24 sps:$4 sm:$0xff]  }
 0xd7b   :  { %v12044_v42 = vadd.f32 %v8500_v3, %v5292_v16  ;;  %v12152_v3 = vld [vmem:[#allocation13 + $0xfc] ss:$24 sps:$4 sm:$0xff]   ;;  %14023 = vst [vmem:[#allocation38_spill] sm:$0xff] %v12161_v21  ;;  %14024 = vst [vmem:[#allocation37_spill] sm:$0xff] %v12164_v10  ;;  %v12167_v16 = vld [vmem:[#allocation13 + $0x158] ss:$24 sps:$4 sm:$0xff]  }
 0xd7c   :  { %v12046_v14 = vadd.f32 %v8502_v24, %v5293_v38  ;;  %14020 = vst [vmem:[#allocation122_spill] sm:$0xff] %v12152_v3  ;;  %v12155_v24 = vld [vmem:[#allocation13 + $0xf8] ss:$24 sps:$4 sm:$0xff]   ;;  %14025 = vst [vmem:[#allocation40_spill] sm:$0xff] %v12167_v16  ;;  %v12170_v38 = vld [vmem:[#allocation13 + $0x18c] ss:$24 sps:$4 sm:$0xff]  }
 0xd7d   :  { %13986 = vst [vmem:[#allocation27_spill] sm:$0xff] %v12044_v42  ;;  %v12052_v15 = vpack.c.bf16 %v12044_v42, %v12044_v42  ;;  %14021 = vst [vmem:[#allocation28_spill] sm:$0xff] %v12155_v24 }
 0xd7e   :  { %13987 = vst [vmem:[#allocation44_spill] sm:$0xff] %v12046_v14  ;;  %v5305_v22 = vpack.c.bf16 %v12046_v14, %v12046_v14  ;;  %14026 = vst [vmem:[#allocation56_spill] sm:$0xff] %v12170_v38 }
 0xd80   :  { %5338 = vmatprep.mubr.bf16.mxu1 %v5305_v22  ;;  %5379 = vmatprep.mubr.bf16.mxu0 %v5305_v22 }
 0xd81   :  { %5339 = vmatmul.mubr.bf16.vlgmr.msra.gmra.mrb[104].mxu1 %v12052_v15  ;;  %5380 = vmatmul.mubr.bf16.vlgmr.msra.gmra.mrb[112].mxu0 %v12052_v15 }
 0xd82   :  { %5389 = vmatpush1.bf16.msra.mxu1 %v11514_v41  ;;  %5420 = vmatprep.mubr.bf16.mxu1 %v5305_v22  ;;  %v13988_v41 = vld [vmem:[#allocation49_spill] sm:$0xff]  ;;  %v12173_v22 = vld [vmem:[#allocation13 + $0x188] ss:$24 sps:$4 sm:$0xff]  }
 0xd83   :  { %5390 = vmatprep.subr.bf16.mxu1 %v11516_v59  ;;  %5482 = vmatpush1.bf16.msra.mxu0 %v11875_v44  ;;  %v13989_v59 = vld [vmem:[#allocation51_spill] sm:$0xff]  ;;  %14027 = vst [vmem:[#allocation57_spill] sm:$0xff] %v12173_v22 }
 0xd84   :  { %5483 = vmatprep.subr.bf16.mxu0 %v11878_v62 }
 0xd86   :  { %5391 = vmatpush1.bf16.msra.mxu1 %v11523_v61  ;;  %v13990_v61 = vld [vmem:[#allocation62_spill] sm:$0xff] }
 0xd87   :  { %5392 = vmatprep.subr.bf16.mxu1 %v11527_v47  ;;  %5484 = vmatpush1.bf16.msra.mxu0 %v11883_v9  ;;  %v13991_v47 = vld [vmem:[#allocation63_spill] sm:$0xff] }
 0xd88   :  { %5485 = vmatprep.subr.bf16.mxu0 %v11886_v25 }
 0xd8a   :  { %5393 = vmatpush1.bf16.msra.mxu1 %v11531_v26  ;;  %v13992_v26 = vld [vmem:[#allocation68_spill] sm:$0xff] }
 0xd8b   :  { %5394 = vmatprep.subr.bf16.mxu1 %v11535_v20  ;;  %5486 = vmatpush1.bf16.msra.mxu0 %v11891_v33  ;;  %v13993_v20 = vld [vmem:[#allocation64_spill] sm:$0xff] }
 0xd8c   :  { %5487 = vmatprep.subr.bf16.mxu0 %v11894_v34 }
 0xd8e   :  { %5395 = vmatpush1.bf16.msra.mxu1 %v11541_v11  ;;  %v13994_v11 = vld [vmem:[#allocation123_spill] sm:$0xff] }
 0xd8f   :  { %5396 = vmatprep.subr.bf16.mxu1 %v11545_v60  ;;  %5488 = vmatpush1.bf16.msra.mxu0 %v11899_v52  ;;  %v13995_v60 = vld [vmem:[#allocation69_spill] sm:$0xff] }
 0xd90   :  { %5489 = vmatprep.subr.bf16.mxu0 %v11902_v19 }
 0xd92   :  { %5397 = vmatpush1.bf16.msra.mxu1 %v11549_v5  ;;  %v13996_v5 = vld [vmem:[#allocation70_spill] sm:$0xff] }
 0xd93   :  { %5398 = vmatprep.subr.bf16.mxu1 %v11553_v4  ;;  %5490 = vmatpush1.bf16.msra.mxu0 %v11907_v46  ;;  %v13997_v4 = vld [vmem:[#allocation67_spill] sm:$0xff] }
 0xd94   :  { %5491 = vmatprep.subr.bf16.mxu0 %v11910_v63 }
 0xd96   :  { %5399 = vmatpush1.bf16.msra.mxu1 %v11559_v49  ;;  %v13998_v49 = vld [vmem:[#allocation30_spill] sm:$0xff] }
 0xd97   :  { %5400 = vmatprep.subr.bf16.mxu1 %v11563_v43  ;;  %5492 = vmatpush1.bf16.msra.mxu0 %v11915_v58  ;;  %v13999_v43 = vld [vmem:[#allocation71_spill] sm:$0xff] }
 0xd98   :  { %5493 = vmatprep.subr.bf16.mxu0 %v11918_v50 }
 0xd9a   :  { %5401 = vmatpush1.bf16.msra.mxu1 %v11567_v13  ;;  %v14000_v13 = vld [vmem:[#allocation72_spill] sm:$0xff] }
 0xd9b   :  { %5402 = vmatprep.subr.bf16.mxu1 %v11571_v8  ;;  %5494 = vmatpush1.bf16.msra.mxu0 %v11923_v40  ;;  %v14001_v8 = vld [vmem:[#allocation29_spill] sm:$0xff] }
 0xd9c   :  { %5495 = vmatprep.subr.bf16.mxu0 %v11926_v36 }
 0xd9e   :  { %5403 = vmatpush1.bf16.msra.mxu1 %v11577_v35  ;;  %v14002_v35 = vld [vmem:[#allocation24_spill] sm:$0xff] }
 0xd9f   :  { %5404 = vmatprep.subr.bf16.mxu1 %v11581_v45  ;;  %5496 = vmatpush1.bf16.msra.mxu0 %v11931_v7  ;;  %v14003_v45 = vld [vmem:[#allocation73_spill] sm:$0xff] }
 0xda0   :  { %5497 = vmatprep.subr.bf16.mxu0 %v11934_v17 }
 0xda2   :  { %5405 = vmatpush1.bf16.msra.mxu1 %v11585_v2  ;;  %v14004_v2 = vld [vmem:[#allocation74_spill] sm:$0xff] }
 0xda3   :  { %5406 = vmatprep.subr.bf16.mxu1 %v11589_v27  ;;  %5498 = vmatpush1.bf16.msra.mxu0 %v11939_v23  ;;  %v14005_v27 = vld [vmem:[#allocation124_spill] sm:$0xff] }
 0xda4   :  { %5499 = vmatprep.subr.bf16.mxu0 %v11942_v53 }
 0xda6   :  { %5407 = vmatpush1.bf16.msra.mxu1 %v11593_v28  ;;  %v14006_v28 = vld [vmem:[#allocation65_spill] sm:$0xff] }
 0xda7   :  { %5408 = vmatprep.subr.bf16.mxu1 %v11597_v39  ;;  %5500 = vmatpush1.bf16.msra.mxu0 %v13988_v41  ;;  %v14007_v39 = vld [vmem:[#allocation75_spill] sm:$0xff] }
 0xda8   :  { %5501 = vmatprep.subr.bf16.mxu0 %v13989_v59 }
 0xdaa   :  { %5409 = vmatpush1.bf16.msra.mxu1 %v11601_v32  ;;  %v12117_v32 = vld [vmem:[#allocation13 + $0xc] ss:$24 sps:$4 sm:$0xff]  }
 0xdab   :  { %5410 = vmatprep.subr.bf16.mxu1 %v11605_v48  ;;  %5502 = vmatpush1.bf16.msra.mxu0 %v13990_v61  ;;  %14008 = vst [vmem:[#allocation52_spill] sm:$0xff] %v12117_v32  ;;  %v14009_v48 = vld [vmem:[#allocation26_spill] sm:$0xff] }
 0xdac   :  { %5503 = vmatprep.subr.bf16.mxu0 %v13991_v47 }
 0xdae   :  { %5411 = vmatpush1.bf16.msra.mxu1 %v11609_v55  ;;  %v12121_v55 = vld [vmem:[#allocation13 + $0x14] ss:$24 sps:$4 sm:$0xff]  }
 0xdaf   :  { %5412 = vmatprep.subr.bf16.mxu1 %v13992_v26  ;;  %5504 = vmatpush1.bf16.msra.mxu0 %v13993_v20  ;;  %14010 = vst [vmem:[#allocation53_spill] sm:$0xff] %v12121_v55  ;;  %v12179_v26 = vld [vmem:[#allocation13 + $0x1b8] ss:$24 sps:$4 sm:$0xff]  }
 0xdb0   :  { %5505 = vmatprep.subr.bf16.mxu0 %v13994_v11  ;;  %14029 = vst [vmem:[#allocation42_spill] sm:$0xff] %v12179_v26 }
 0xdb2   :  { %5413 = vmatpush1.bf16.msra.mxu1 %v13995_v60  ;;  %v12182_v60 = vld [vmem:[#allocation13 + $0x1ec] ss:$24 sps:$4 sm:$0xff]  }
 0xdb3   :  { %5414 = vmatprep.subr.bf16.mxu1 %v13996_v5  ;;  %5506 = vmatpush1.bf16.msra.mxu0 %v13997_v4  ;;  %14030 = vst [vmem:[#allocation41_spill] sm:$0xff] %v12182_v60  ;;  %v12185_v5 = vld [vmem:[#allocation13 + $0x1e8] ss:$24 sps:$4 sm:$0xff]  }
 0xdb4   :  { %5507 = vmatprep.subr.bf16.mxu0 %v13998_v49  ;;  %14031 = vst [vmem:[#allocation58_spill] sm:$0xff] %v12185_v5 }
 0xdb6   :  { %5415 = vmatpush1.bf16.msra.mxu1 %v13999_v43  ;;  %v12188_v43 = vld [vmem:[#allocation13 + $0x21c] ss:$24 sps:$4 sm:$0xff]  }
 0xdb7   :  { %5416 = vmatprep.subr.bf16.mxu1 %v14000_v13  ;;  %5508 = vmatpush1.bf16.msra.mxu0 %v14001_v8  ;;  %14032 = vst [vmem:[#allocation59_spill] sm:$0xff] %v12188_v43  ;;  %v12191_v13 = vld [vmem:[#allocation13 + $0x218] ss:$24 sps:$4 sm:$0xff]  }
 0xdb8   :  { %5509 = vmatprep.subr.bf16.mxu0 %v14002_v35  ;;  %14033 = vst [vmem:[#allocation32_spill] sm:$0xff] %v12191_v13 }
 0xdba   :  { %5417 = vmatpush1.bf16.msra.mxu1 %v14003_v45  ;;  %v12194_v45 = vld [vmem:[#allocation13 + $0x24c] ss:$24 sps:$4 sm:$0xff]  }
 0xdbb   :  { %5418 = vmatprep.subr.bf16.mxu1 %v14004_v2  ;;  %5510 = vmatpush1.bf16.msra.mxu0 %v14005_v27  ;;  %14034 = vst [vmem:[#allocation33_spill] sm:$0xff] %v12194_v45  ;;  %v12197_v2 = vld [vmem:[#allocation13 + $0x248] ss:$24 sps:$4 sm:$0xff]  }
 0xdbc   :  { %5511 = vmatprep.subr.bf16.mxu0 %v14006_v28  ;;  %14035 = vst [vmem:[#allocation36_spill] sm:$0xff] %v12197_v2 }
 0xdbe   :  { %5419 = vmatpush1.bf16.msra.mxu1 %v14007_v39  ;;  %v12200_v39 = vld [vmem:[#allocation13 + $0x27c] ss:$24 sps:$4 sm:$0xff]  }
 0xdbf   :  { %5522 = vmatprep.subr.bf16.mxu1 %v12117_v32  ;;  %5512 = vmatpush1.bf16.msra.mxu0 %v14009_v48  ;;  %14036 = vst [vmem:[#allocation54_spill] sm:$0xff] %v12200_v39 }
 0xdc0   :  { %5563 = vmatprep.subr.bf16.mxu0 %v12121_v55 }
 0xdc1   :  { %5421 = vmatmul.mubr.bf16.vlgmr.msra.gmra.mrb[108].mxu1 %v12052_v15  ;;  %v12176_v15 = vld [vmem:[#allocation13 + $0x1bc] ss:$24 sps:$4 sm:$0xff]  }
 0xdc2   :  { %5523 = vmatpush1.bf16.msra.mxu1 %v12125_v29  ;;  %14028 = vst [vmem:[#allocation39_spill] sm:$0xff] %v12176_v15 }
 0xdc3   :  { %5524 = vmatprep.subr.bf16.mxu1 %v12128_v54 }
 0xdc6   :  { %5525 = vmatpush1.bf16.msra.mxu1 %v12131_v30 }
 0xdc7   :  { %5526 = vmatprep.subr.bf16.mxu1 %v12134_v31 }
 0xdca   :  { %5527 = vmatpush1.bf16.msra.mxu1 %v12137_v1 }
 0xdcb   :  { %5528 = vmatprep.subr.bf16.mxu1 %v12140_v56 }
 0xdce   :  { %5529 = vmatpush1.bf16.msra.mxu1 %v12143_v12 }
 0xdcf   :  { %5530 = vmatprep.subr.bf16.mxu1 %v12146_v51 }
 0xdd2   :  { %5531 = vmatpush1.bf16.msra.mxu1 %v12149_v0 }
 0xdd3   :  { %5532 = vmatprep.subr.bf16.mxu1 %v12152_v3 }
 0xdd6   :  { %5533 = vmatpush1.bf16.msra.mxu1 %v12155_v24 }
 0xdd7   :  { %5534 = vmatprep.subr.bf16.mxu1 %v12158_v57 }
 0xdda   :  { %5535 = vmatpush1.bf16.msra.mxu1 %v12161_v21 }
 0xddb   :  { %5536 = vmatprep.subr.bf16.mxu1 %v12164_v10 }
 0xdde   :  { %5537 = vmatpush1.bf16.msra.mxu1 %v12167_v16  ;;  %v14046_v16 = vld [vmem:[#allocation83_spill] sm:$0xff] }
 0xddf   :  { %5538 = vmatprep.subr.bf16.mxu1 %v12170_v38  ;;  %v14045_v38 = vld [vmem:[#allocation82_spill] sm:$0xff] }
 0xde2   :  { %5539 = vmatpush1.bf16.msra.mxu1 %v12173_v22 }
 0xde3   :  { %5540 = vmatprep.subr.bf16.mxu1 %v12176_v15 }
 0xde6   :  { %5541 = vmatpush1.bf16.msra.mxu1 %v12179_v26  ;;  %v14044_v26 = vld [vmem:[#allocation81_spill] sm:$0xff] }
 0xde7   :  { %5542 = vmatprep.subr.bf16.mxu1 %v12182_v60 }
 0xdea   :  { %5543 = vmatpush1.bf16.msra.mxu1 %v12185_v5  ;;  %v14043_v5 = vld [vmem:[#allocation80_spill] sm:$0xff] }
 0xdeb   :  { %5544 = vmatprep.subr.bf16.mxu1 %v12188_v43 }
 0xdee   :  { %5545 = vmatpush1.bf16.msra.mxu1 %v12191_v13  ;;  %v12209_v13 = vld [vmem:[#allocation13 + $0x2a8] ss:$24 sps:$4 sm:$0xff]  }
 0xdef   :  { %5546 = vmatprep.subr.bf16.mxu1 %v12194_v45  ;;  %14039 = vst [vmem:[#allocation77_spill] sm:$0xff] %v12209_v13  ;;  %v12212_v45 = vld [vmem:[#allocation13 + $0x2dc] ss:$24 sps:$4 sm:$0xff]  }
 0xdf0   :  { %14040 = vst [vmem:[#allocation78_spill] sm:$0xff] %v12212_v45 }
 0xdf2   :  { %5547 = vmatpush1.bf16.msra.mxu1 %v12197_v2  ;;  %v12215_v2 = vld [vmem:[#allocation13 + $0x2d8] ss:$24 sps:$4 sm:$0xff]  }
 0xdf3   :  { %5548 = vmatprep.subr.bf16.mxu1 %v12200_v39  ;;  %14041 = vst [vmem:[#allocation79_spill] sm:$0xff] %v12215_v2  ;;  %v14042_v39 = vld [vmem:[#allocation25_spill] sm:$0xff] }
 0xdf6   :  { %5549 = vmatpush1.bf16.msra.mxu1 %v12203_v6 }
 0xdf7   :  { %5550 = vmatprep.subr.bf16.mxu1 %v12206_v18 }
 0xdfa   :  { %5551 = vmatpush1.bf16.msra.mxu1 %v12209_v13 }
 0xdfb   :  { %5552 = vmatprep.subr.bf16.mxu1 %v12212_v45 }
 0xdfe   :  { %5553 = vmatpush1.bf16.msra.mxu1 %v12215_v2 }
 0xdff   :  { %5656 = vmatprep.subr.bf16.mxu1 %v14042_v39 }
 0xe54   :  { %v5340_v43 = vpop.f32.mrb[104].mxu1  ;;  %v5381_v6 = vpop.f32.mrb[112].mxu0 }
 0xe55   :  { %v5429_v60 = vadd.f32 %v14043_v5, %v5340_v43  ;;  %v5431_v18 = vadd.f32 %v14044_v26, %v5381_v6  ;;  %v5342_v15 = vpop.f32.mrb[105].mxu1  ;;  %v5383_v22 = vpop.f32.mrb[113].mxu0 }
 0xe56   :  { %v5430_v13 = vadd.f32 %v14045_v38, %v5342_v15  ;;  %v5432_v10 = vadd.f32 %v14046_v16, %v5383_v22  ;;  %v5344_v21 = vpop.f32.mrb[106].mxu1  ;;  %v5385_v45 = vpop.f32.mrb[114].mxu0  ;;  %v14047_v22 = vld [vmem:[#allocation60_spill] sm:$0xff] }
 0xe57   :  { %v5345_v57 = vpop.f32.mrb[107].mxu1  ;;  %v5386_v24 = vpop.f32.mrb[115].mxu0  ;;  %v7395_v3 = vmul.f32 -1.442695, %v5429_v60  ;;  %v7397_v51 = vmul.f32 -1.442695, %v5431_v18 }
 0xe58   :  { %v7396_v2 = vmul.f32 -1.442695, %v5430_v13  ;;  %v7398_v5 = vmul.f32 -1.442695, %v5432_v10 }
 0xe59   :  { %8507 = vpow2.f32 %v7395_v3 }
 0xe5a   :  { %8509 = vpow2.f32 %v7396_v2 }
 0xe5b   :  { %8511 = vpow2.f32 %v7397_v51 }
 0xe5c   :  { %8513 = vpow2.f32 %v7398_v5 }
 0xe63   :  { %v8508_v39 = vpop.eup %8507 }
 0xe64   :  { %v8510_v0 = vpop.eup %8509  ;;  %v5445_v43 = vadd.f32 1.0, %v8508_v39  ;;  %v14049_v39 = vld [vmem:[#allocation106_spill] sm:$0xff] }
 0xe65   :  { %v5446_v6 = vadd.f32 1.0, %v8510_v0  ;;  %v8512_v38 = vpop.eup %8511  ;;  %v14048_v0 = vld [vmem:[#allocation105_spill] sm:$0xff] }
 0xe66   :  { %8515 = vrcp.f32 %v5445_v43  ;;  %v8514_v21 = vpop.eup %8513  ;;  %v5447_v45 = vadd.f32 1.0, %v8512_v38 }
 0xe67   :  { %8517 = vrcp.f32 %v5446_v6  ;;  %v5448_v2 = vadd.f32 1.0, %v8514_v21 }
 0xe70   :  { %v8516_v15 = vpop.eup %8515 }
 0xe71   :  { %v8518_v60 = vpop.eup %8517 }
 0xe94   :  { %v5422_v16 = vpop.f32.mrb[108].mxu1 }
 0xe95   :  { %v5457_v57 = vadd.f32 %v5422_v16, %v14047_v22  ;;  %v5424_v24 = vpop.f32.mrb[109].mxu1 }
 0xe96   :  { %v5458_v3 = vadd.f32 %v5424_v24, %v13983_v37  ;;  %v5426_v26 = vpop.f32.mrb[110].mxu1 }
 0xe97   :  { %v5459_v13 = vmul.f32 %v8516_v15, %v5457_v57  ;;  %v5427_v18 = vpop.f32.mrb[111].mxu1 }
 0xe98   :  { %v5460_v10 = vmul.f32 %v8518_v60, %v5458_v3  ;;  %v12241_v18 = vld [vmem:[#allocation13 + $0x10] ss:$24 sps:$4 sm:$0xff]  }
 0xe99   :  { %v5461_v51 = vadd.f32 %v14048_v0, %v5459_v13  ;;  %v12252_v0 = vld [vmem:[#allocation13 + $0x74] ss:$24 sps:$4 sm:$0xff]  }
 0xe9a   :  { %v5462_v5 = vadd.f32 %v14049_v39, %v5460_v10  ;;  %v12244_v10 = vld [vmem:[#allocation13 + $0x44] ss:$24 sps:$4 sm:$0xff]   ;;  %v12265_v39 = vld [vmem:[#allocation13 + $0xa0] ss:$24 sps:$4 sm:$0xff]  }
 0xe9b   :  { %8519 = vtanh.f32 %v5461_v51  ;;  %v12257_v51 = vld [vmem:[#allocation13 + $0x70] ss:$24 sps:$4 sm:$0xff]  }
 0xe9c   :  { %8521 = vtanh.f32 %v5462_v5  ;;  %v12268_v5 = vld [vmem:[#allocation13 + $0xd4] ss:$24 sps:$4 sm:$0xff]  }
 0xe9d   :  { %8523 = vrcp.f32 %v5447_v45  ;;  %v12249_v45 = vld [vmem:[#allocation13 + $0x40] ss:$24 sps:$4 sm:$0xff]  }
 0xe9e   :  { %8525 = vrcp.f32 %v5448_v2  ;;  %v12260_v2 = vld [vmem:[#allocation13 + $0xa4] ss:$24 sps:$4 sm:$0xff]  }
 0xea5   :  { %v8520_v43 = vpop.eup %8519 }
 0xea6   :  { %v8522_v6 = vpop.eup %8521  ;;  %v5465_v16 = vsub.f32 %v12044_v42, %v8520_v43  ;;  %v12313_v42 = vld [vmem:[#allocation13 + $0x1c0] ss:$24 sps:$4 sm:$0xff]  }
 0xea7   :  { %v8524_v24 = vpop.eup %8523  ;;  %v5466_v26 = vsub.f32 %v12046_v14, %v8522_v6  ;;  %v12308_v14 = vld [vmem:[#allocation13 + $0x1c4] ss:$24 sps:$4 sm:$0xff]   ;;  %14055 = vst [vmem:[#allocation62_spill] sm:$0xff] %v12313_v42 }
 0xea8   :  { %v8526_v57 = vpop.eup %8525  ;;  %v5467_v15 = vmul.f32 %v8524_v24, %v5465_v16  ;;  %v12281_v16 = vld [vmem:[#allocation13 + $0x100] ss:$24 sps:$4 sm:$0xff]   ;;  %v12284_v24 = vld [vmem:[#allocation13 + $0x134] ss:$24 sps:$4 sm:$0xff]   ;;  %14054 = vst [vmem:[#allocation51_spill] sm:$0xff] %v12308_v14 }
 0xea9   :  { %v5468_v3 = vmul.f32 %v8526_v57, %v5466_v26  ;;  %v12289_v26 = vld [vmem:[#allocation13 + $0x130] ss:$24 sps:$4 sm:$0xff]   ;;  %v12292_v57 = vld [vmem:[#allocation13 + $0x164] ss:$24 sps:$4 sm:$0xff]  }
 0xeaa   :  { %v12229_v38 = vadd.f32 %v8520_v43, %v5467_v15  ;;  %v12273_v43 = vld [vmem:[#allocation13 + $0xd0] ss:$24 sps:$4 sm:$0xff]   ;;  %v12297_v15 = vld [vmem:[#allocation13 + $0x160] ss:$24 sps:$4 sm:$0xff]  }
 0xeab   :  { %v12231_v60 = vadd.f32 %v8522_v6, %v5468_v3  ;;  %v12276_v6 = vld [vmem:[#allocation13 + $0x104] ss:$24 sps:$4 sm:$0xff]   ;;  %v12300_v3 = vld [vmem:[#allocation13 + $0x194] ss:$24 sps:$4 sm:$0xff]  }
 0xeac   :  { %14050 = vst [vmem:[#allocation61_spill] sm:$0xff] %v12229_v38  ;;  %v12237_v13 = vpack.c.bf16 %v12229_v38, %v12229_v38  ;;  %14052 = vst [vmem:[#allocation104_spill] sm:$0xff] %v12300_v3 }
 0xead   :  { %14051 = vst [vmem:[#allocation103_spill] sm:$0xff] %v12231_v60  ;;  %v5480_v21 = vpack.c.bf16 %v12231_v60, %v12231_v60 }
 0xeaf   :  { %5513 = vmatprep.mubr.bf16.mxu0 %v5480_v21  ;;  %5554 = vmatprep.mubr.bf16.mxu1 %v5480_v21 }
 0xeb0   :  { %5514 = vmatmul.mubr.bf16.vlgmr.msra.gmra.mrb[116].mxu0 %v12237_v13  ;;  %5555 = vmatmul.mubr.bf16.vlgmr.msra.gmra.mrb[112].mxu1 %v12237_v13 }
 0xeb1   :  { %5564 = vmatpush1.bf16.msra.mxu0 %v12241_v18  ;;  %5595 = vmatprep.mubr.bf16.mxu0 %v5480_v21  ;;  %v12305_v21 = vld [vmem:[#allocation13 + $0x190] ss:$24 sps:$4 sm:$0xff]  }
 0xeb2   :  { %5565 = vmatprep.subr.bf16.mxu0 %v12244_v10  ;;  %5657 = vmatpush1.bf16.msra.mxu1 %v11875_v44  ;;  %14053 = vst [vmem:[#allocation49_spill] sm:$0xff] %v12305_v21 }
 0xeb3   :  { %5658 = vmatprep.subr.bf16.mxu1 %v11878_v62 }
 0xeb5   :  { %5566 = vmatpush1.bf16.msra.mxu0 %v12249_v45 }
 0xeb6   :  { %5567 = vmatprep.subr.bf16.mxu0 %v12252_v0  ;;  %5659 = vmatpush1.bf16.msra.mxu1 %v11883_v9 }
 0xeb7   :  { %5660 = vmatprep.subr.bf16.mxu1 %v11886_v25 }
 0xeb9   :  { %5568 = vmatpush1.bf16.msra.mxu0 %v12257_v51 }
 0xeba   :  { %5569 = vmatprep.subr.bf16.mxu0 %v12260_v2  ;;  %5661 = vmatpush1.bf16.msra.mxu1 %v11891_v33 }
 0xebb   :  { %5662 = vmatprep.subr.bf16.mxu1 %v11894_v34 }
 0xebd   :  { %5570 = vmatpush1.bf16.msra.mxu0 %v12265_v39 }
 0xebe   :  { %5571 = vmatprep.subr.bf16.mxu0 %v12268_v5  ;;  %5663 = vmatpush1.bf16.msra.mxu1 %v11899_v52 }
 0xebf   :  { %5664 = vmatprep.subr.bf16.mxu1 %v11902_v19 }
 0xec1   :  { %5572 = vmatpush1.bf16.msra.mxu0 %v12273_v43 }
 0xec2   :  { %5573 = vmatprep.subr.bf16.mxu0 %v12276_v6  ;;  %5665 = vmatpush1.bf16.msra.mxu1 %v11907_v46 }
 0xec3   :  { %5666 = vmatprep.subr.bf16.mxu1 %v11910_v63 }
 0xec5   :  { %5574 = vmatpush1.bf16.msra.mxu0 %v12281_v16 }
 0xec6   :  { %5575 = vmatprep.subr.bf16.mxu0 %v12284_v24  ;;  %5667 = vmatpush1.bf16.msra.mxu1 %v11915_v58 }
 0xec7   :  { %5668 = vmatprep.subr.bf16.mxu1 %v11918_v50 }
 0xec9   :  { %5576 = vmatpush1.bf16.msra.mxu0 %v12289_v26 }
 0xeca   :  { %5577 = vmatprep.subr.bf16.mxu0 %v12292_v57  ;;  %5669 = vmatpush1.bf16.msra.mxu1 %v11923_v40 }
 0xecb   :  { %5670 = vmatprep.subr.bf16.mxu1 %v11926_v36 }
 0xecd   :  { %5578 = vmatpush1.bf16.msra.mxu0 %v12297_v15 }
 0xece   :  { %5579 = vmatprep.subr.bf16.mxu0 %v12300_v3  ;;  %5671 = vmatpush1.bf16.msra.mxu1 %v11931_v7  ;;  %v12316_v3 = vld [vmem:[#allocation13 + $0x1f4] ss:$24 sps:$4 sm:$0xff]  }
 0xecf   :  { %5672 = vmatprep.subr.bf16.mxu1 %v11934_v17  ;;  %14056 = vst [vmem:[#allocation63_spill] sm:$0xff] %v12316_v3 }
 0xed1   :  { %5580 = vmatpush1.bf16.msra.mxu0 %v12305_v21  ;;  %v12321_v21 = vld [vmem:[#allocation13 + $0x1f0] ss:$24 sps:$4 sm:$0xff]  }
 0xed2   :  { %5581 = vmatprep.subr.bf16.mxu0 %v12308_v14  ;;  %5673 = vmatpush1.bf16.msra.mxu1 %v11939_v23  ;;  %14057 = vst [vmem:[#allocation68_spill] sm:$0xff] %v12321_v21  ;;  %v12324_v14 = vld [vmem:[#allocation13 + $0x224] ss:$24 sps:$4 sm:$0xff]  }
 0xed3   :  { %5674 = vmatprep.subr.bf16.mxu1 %v11942_v53  ;;  %14058 = vst [vmem:[#allocation64_spill] sm:$0xff] %v12324_v14 }
 0xed5   :  { %5582 = vmatpush1.bf16.msra.mxu0 %v12313_v42  ;;  %v12329_v42 = vld [vmem:[#allocation13 + $0x220] ss:$24 sps:$4 sm:$0xff]  }
 0xed6   :  { %5583 = vmatprep.subr.bf16.mxu0 %v12316_v3  ;;  %5675 = vmatpush1.bf16.msra.mxu1 %v13988_v41  ;;  %14059 = vst [vmem:[#allocation123_spill] sm:$0xff] %v12329_v42  ;;  %v12332_v3 = vld [vmem:[#allocation13 + $0x254] ss:$24 sps:$4 sm:$0xff]  }
 0xed7   :  { %5676 = vmatprep.subr.bf16.mxu1 %v13989_v59  ;;  %14060 = vst [vmem:[#allocation69_spill] sm:$0xff] %v12332_v3 }
 0xed9   :  { %5584 = vmatpush1.bf16.msra.mxu0 %v12321_v21  ;;  %v12337_v21 = vld [vmem:[#allocation13 + $0x250] ss:$24 sps:$4 sm:$0xff]  }
 0xeda   :  { %5585 = vmatprep.subr.bf16.mxu0 %v12324_v14  ;;  %5677 = vmatpush1.bf16.msra.mxu1 %v13990_v61  ;;  %14061 = vst [vmem:[#allocation70_spill] sm:$0xff] %v12337_v21  ;;  %v12340_v14 = vld [vmem:[#allocation13 + $0x284] ss:$24 sps:$4 sm:$0xff]  }
 0xedb   :  { %5678 = vmatprep.subr.bf16.mxu1 %v13991_v47  ;;  %14062 = vst [vmem:[#allocation71_spill] sm:$0xff] %v12340_v14 }
 0xedd   :  { %5586 = vmatpush1.bf16.msra.mxu0 %v12329_v42  ;;  %v12345_v42 = vld [vmem:[#allocation13 + $0x280] ss:$24 sps:$4 sm:$0xff]  }
 0xede   :  { %5587 = vmatprep.subr.bf16.mxu0 %v12332_v3  ;;  %5679 = vmatpush1.bf16.msra.mxu1 %v13993_v20  ;;  %14063 = vst [vmem:[#allocation72_spill] sm:$0xff] %v12345_v42  ;;  %v12348_v3 = vld [vmem:[#allocation13 + $0x2b4] ss:$24 sps:$4 sm:$0xff]  }
 0xedf   :  { %5680 = vmatprep.subr.bf16.mxu1 %v13994_v11  ;;  %14064 = vst [vmem:[#allocation73_spill] sm:$0xff] %v12348_v3 }
 0xee1   :  { %5588 = vmatpush1.bf16.msra.mxu0 %v12337_v21  ;;  %v12353_v21 = vld [vmem:[#allocation13 + $0x2b0] ss:$24 sps:$4 sm:$0xff]  }
 0xee2   :  { %5589 = vmatprep.subr.bf16.mxu0 %v12340_v14  ;;  %5681 = vmatpush1.bf16.msra.mxu1 %v13997_v4  ;;  %14065 = vst [vmem:[#allocation74_spill] sm:$0xff] %v12353_v21  ;;  %v12356_v14 = vld [vmem:[#allocation13 + $0x2e4] ss:$24 sps:$4 sm:$0xff]  }
 0xee3   :  { %5682 = vmatprep.subr.bf16.mxu1 %v13998_v49  ;;  %14066 = vst [vmem:[#allocation75_spill] sm:$0xff] %v12356_v14 }
 0xee5   :  { %5590 = vmatpush1.bf16.msra.mxu0 %v12345_v42  ;;  %v12361_v42 = vld [vmem:[#allocation13 + $0x2e0] ss:$24 sps:$4 sm:$0xff]  }
 0xee6   :  { %5591 = vmatprep.subr.bf16.mxu0 %v12348_v3  ;;  %5683 = vmatpush1.bf16.msra.mxu1 %v14001_v8  ;;  %14067 = vst [vmem:[#allocation80_spill] sm:$0xff] %v12361_v42 }
 0xee7   :  { %5684 = vmatprep.subr.bf16.mxu1 %v14002_v35 }
 0xee9   :  { %5592 = vmatpush1.bf16.msra.mxu0 %v12353_v21  ;;  %v14096_v21 = vld [vmem:[#allocation87_spill] sm:$0xff] }
 0xeea   :  { %5593 = vmatprep.subr.bf16.mxu0 %v12356_v14  ;;  %5685 = vmatpush1.bf16.msra.mxu1 %v14005_v27  ;;  %v14095_v14 = vld [vmem:[#allocation86_spill] sm:$0xff] }
 0xeeb   :  { %5686 = vmatprep.subr.bf16.mxu1 %v14006_v28  ;;  %v14094_v28 = vld [vmem:[#allocation85_spill] sm:$0xff] }
 0xeed   :  { %5594 = vmatpush1.bf16.msra.mxu0 %v12361_v42  ;;  %v14093_v42 = vld [vmem:[#allocation84_spill] sm:$0xff] }
 0xeee   :  { %5697 = vmatprep.subr.bf16.mxu0 %v12117_v32  ;;  %5687 = vmatpush1.bf16.msra.mxu1 %v14009_v48  ;;  %v14068_v32 = vld [vmem:[#allocation120_spill] sm:$0xff]  ;;  %v14069_v48 = vld [vmem:[#allocation121_spill] sm:$0xff] }
 0xeef   :  { %5738 = vmatprep.subr.bf16.mxu1 %v12121_v55  ;;  %v14070_v55 = vld [vmem:[#allocation122_spill] sm:$0xff] }
 0xef0   :  { %5596 = vmatmul.mubr.bf16.vlgmr.msra.gmra.mrb[120].mxu0 %v12237_v13  ;;  %v14071_v13 = vld [vmem:[#allocation28_spill] sm:$0xff] }
 0xef1   :  { %5698 = vmatpush1.bf16.msra.mxu0 %v12125_v29  ;;  %v14072_v29 = vld [vmem:[#allocation35_spill] sm:$0xff] }
 0xef2   :  { %5699 = vmatprep.subr.bf16.mxu0 %v12128_v54  ;;  %v14073_v54 = vld [vmem:[#allocation38_spill] sm:$0xff] }
 0xef5   :  { %5700 = vmatpush1.bf16.msra.mxu0 %v12131_v30  ;;  %v14074_v30 = vld [vmem:[#allocation37_spill] sm:$0xff] }
 0xef6   :  { %5701 = vmatprep.subr.bf16.mxu0 %v12134_v31  ;;  %v14075_v31 = vld [vmem:[#allocation40_spill] sm:$0xff] }
 0xef9   :  { %5702 = vmatpush1.bf16.msra.mxu0 %v12137_v1  ;;  %v14076_v1 = vld [vmem:[#allocation56_spill] sm:$0xff] }
 0xefa   :  { %5703 = vmatprep.subr.bf16.mxu0 %v12140_v56  ;;  %v14077_v56 = vld [vmem:[#allocation57_spill] sm:$0xff] }
 0xefd   :  { %5704 = vmatpush1.bf16.msra.mxu0 %v12143_v12  ;;  %v14078_v12 = vld [vmem:[#allocation39_spill] sm:$0xff] }
 0xefe   :  { %5705 = vmatprep.subr.bf16.mxu0 %v14068_v32  ;;  %v14079_v32 = vld [vmem:[#allocation42_spill] sm:$0xff] }
 0xf01   :  { %5706 = vmatpush1.bf16.msra.mxu0 %v14069_v48  ;;  %v14080_v48 = vld [vmem:[#allocation41_spill] sm:$0xff] }
 0xf02   :  { %5707 = vmatprep.subr.bf16.mxu0 %v14070_v55  ;;  %v14081_v55 = vld [vmem:[#allocation58_spill] sm:$0xff] }
 0xf05   :  { %5708 = vmatpush1.bf16.msra.mxu0 %v14071_v13  ;;  %v14082_v13 = vld [vmem:[#allocation59_spill] sm:$0xff] }
 0xf06   :  { %5709 = vmatprep.subr.bf16.mxu0 %v14072_v29  ;;  %v14083_v29 = vld [vmem:[#allocation32_spill] sm:$0xff] }
 0xf09   :  { %5710 = vmatpush1.bf16.msra.mxu0 %v14073_v54  ;;  %v14084_v54 = vld [vmem:[#allocation33_spill] sm:$0xff] }
 0xf0a   :  { %5711 = vmatprep.subr.bf16.mxu0 %v14074_v30  ;;  %v14085_v30 = vld [vmem:[#allocation36_spill] sm:$0xff] }
 0xf0d   :  { %5712 = vmatpush1.bf16.msra.mxu0 %v14075_v31  ;;  %v14086_v31 = vld [vmem:[#allocation54_spill] sm:$0xff] }
 0xf0e   :  { %5713 = vmatprep.subr.bf16.mxu0 %v14076_v1  ;;  %v14087_v1 = vld [vmem:[#allocation55_spill] sm:$0xff] }
 0xf11   :  { %5714 = vmatpush1.bf16.msra.mxu0 %v14077_v56  ;;  %v14088_v56 = vld [vmem:[#allocation76_spill] sm:$0xff] }
 0xf12   :  { %5715 = vmatprep.subr.bf16.mxu0 %v14078_v12  ;;  %v14089_v12 = vld [vmem:[#allocation77_spill] sm:$0xff] }
 0xf15   :  { %5716 = vmatpush1.bf16.msra.mxu0 %v14079_v32  ;;  %v14090_v32 = vld [vmem:[#allocation78_spill] sm:$0xff] }
 0xf16   :  { %5717 = vmatprep.subr.bf16.mxu0 %v14080_v48  ;;  %v14091_v48 = vld [vmem:[#allocation79_spill] sm:$0xff] }
 0xf19   :  { %5718 = vmatpush1.bf16.msra.mxu0 %v14081_v55  ;;  %v14092_v55 = vld [vmem:[#allocation25_spill] sm:$0xff] }
 0xf1a   :  { %5719 = vmatprep.subr.bf16.mxu0 %v14082_v13 }
 0xf1d   :  { %5720 = vmatpush1.bf16.msra.mxu0 %v14083_v29 }
 0xf1e   :  { %5721 = vmatprep.subr.bf16.mxu0 %v14084_v54 }
 0xf21   :  { %5722 = vmatpush1.bf16.msra.mxu0 %v14085_v30 }
 0xf22   :  { %5723 = vmatprep.subr.bf16.mxu0 %v14086_v31 }
 0xf25   :  { %5724 = vmatpush1.bf16.msra.mxu0 %v14087_v1 }
 0xf26   :  { %5725 = vmatprep.subr.bf16.mxu0 %v14088_v56 }
 0xf29   :  { %5726 = vmatpush1.bf16.msra.mxu0 %v14089_v12 }
 0xf2a   :  { %5727 = vmatprep.subr.bf16.mxu0 %v14090_v32 }
 0xf2d   :  { %5728 = vmatpush1.bf16.msra.mxu0 %v14091_v48 }
 0xf2e   :  { %5831 = vmatprep.subr.bf16.mxu0 %v14092_v55 }
 0xf83   :  { %v5515_v13 = vpop.f32.mrb[116].mxu0  ;;  %v5556_v29 = vpop.f32.mrb[112].mxu1 }
 0xf84   :  { %v5604_v54 = vadd.f32 %v14093_v42, %v5515_v13  ;;  %v5606_v30 = vadd.f32 %v14094_v28, %v5556_v29  ;;  %v5517_v27 = vpop.f32.mrb[117].mxu0  ;;  %v5558_v31 = vpop.f32.mrb[113].mxu1 }
 0xf85   :  { %v5605_v1 = vadd.f32 %v14095_v14, %v5517_v27  ;;  %v5607_v56 = vadd.f32 %v14096_v21, %v5558_v31  ;;  %v5519_v35 = vpop.f32.mrb[118].mxu0  ;;  %v5560_v12 = vpop.f32.mrb[114].mxu1 }
 0xf86   :  { %v5520_v8 = vpop.f32.mrb[119].mxu0  ;;  %v5561_v32 = vpop.f32.mrb[115].mxu1  ;;  %v7399_v3 = vmul.f32 -1.442695, %v5604_v54  ;;  %v7401_v4 = vmul.f32 -1.442695, %v5606_v30 }
 0xf87   :  { %v7400_v48 = vmul.f32 -1.442695, %v5605_v1  ;;  %v7402_v42 = vmul.f32 -1.442695, %v5607_v56 }
 0xf88   :  { %8527 = vpow2.f32 %v7399_v3  ;;  %v14098_v3 = vld [vmem:[#allocation108_spill] sm:$0xff] }
 0xf89   :  { %8529 = vpow2.f32 %v7400_v48 }
 0xf8a   :  { %8531 = vpow2.f32 %v7401_v4 }
 0xf8b   :  { %8533 = vpow2.f32 %v7402_v42 }
 0xf92   :  { %v8528_v55 = vpop.eup %8527 }
 0xf93   :  { %v8530_v49 = vpop.eup %8529  ;;  %v5620_v13 = vadd.f32 1.0, %v8528_v55 }
 0xf94   :  { %v5621_v28 = vadd.f32 1.0, %v8530_v49  ;;  %v8532_v14 = vpop.eup %8531  ;;  %v14097_v49 = vld [vmem:[#allocation107_spill] sm:$0xff] }
 0xf95   :  { %8535 = vrcp.f32 %v5620_v13  ;;  %v8534_v35 = vpop.eup %8533  ;;  %v5622_v55 = vadd.f32 1.0, %v8532_v14 }
 0xf96   :  { %8537 = vrcp.f32 %v5621_v28  ;;  %v5623_v12 = vadd.f32 1.0, %v8534_v35 }
 0xf9f   :  { %v8536_v29 = vpop.eup %8535 }
 0xfa0   :  { %v8538_v31 = vpop.eup %8537 }
 0xfc3   :  { %v5597_v27 = vpop.f32.mrb[120].mxu0 }
 0xfc4   :  { %v5632_v8 = vadd.f32 %v5597_v27, %v14047_v22  ;;  %v5599_v32 = vpop.f32.mrb[121].mxu0 }
 0xfc5   :  { %v5633_v54 = vadd.f32 %v5599_v32, %v13983_v37  ;;  %v5601_v48 = vpop.f32.mrb[122].mxu0 }
 0xfc6   :  { %v5634_v1 = vmul.f32 %v8536_v29, %v5632_v8  ;;  %v5602_v30 = vpop.f32.mrb[123].mxu0 }
 0xfc7   :  { %v5635_v56 = vmul.f32 %v8538_v31, %v5633_v54  ;;  %v14126_v30 = vld [vmem:[#allocation31_spill] sm:$0xff] }
 0xfc8   :  { %v5636_v4 = vadd.f32 %v14097_v49, %v5634_v1  ;;  %v14125_v1 = vld [vmem:[#allocation53_spill] sm:$0xff]  ;;  %v14129_v49 = vld [vmem:[#allocation116_spill] sm:$0xff] }
 0xfc9   :  { %v5637_v21 = vadd.f32 %v14098_v3, %v5635_v56  ;;  %v14127_v56 = vld [vmem:[#allocation34_spill] sm:$0xff]  ;;  %v14132_v3 = vld [vmem:[#allocation119_spill] sm:$0xff] }
 0xfca   :  { %8539 = vtanh.f32 %v5636_v4  ;;  %v14130_v4 = vld [vmem:[#allocation117_spill] sm:$0xff] }
 0xfcb   :  { %8541 = vtanh.f32 %v5637_v21  ;;  %v14133_v21 = vld [vmem:[#allocation120_spill] sm:$0xff] }
 0xfcc   :  { %8543 = vrcp.f32 %v5622_v55  ;;  %v14128_v55 = vld [vmem:[#allocation115_spill] sm:$0xff] }
 0xfcd   :  { %8545 = vrcp.f32 %v5623_v12  ;;  %v14131_v12 = vld [vmem:[#allocation118_spill] sm:$0xff] }
 0xfd4   :  { %v8540_v42 = vpop.eup %8539 }
 0xfd5   :  { %v8542_v13 = vpop.eup %8541  ;;  %v5640_v28 = vsub.f32 %v12229_v38, %v8540_v42  ;;  %v14152_v38 = vld [vmem:[#allocation55_spill] sm:$0xff] }
 0xfd6   :  { %v8544_v27 = vpop.eup %8543  ;;  %v5641_v32 = vsub.f32 %v12231_v60, %v8542_v13  ;;  %v14151_v60 = vld [vmem:[#allocation54_spill] sm:$0xff] }
 0xfd7   :  { %v8546_v8 = vpop.eup %8545  ;;  %v5642_v29 = vmul.f32 %v8544_v27, %v5640_v28  ;;  %v14136_v28 = vld [vmem:[#allocation28_spill] sm:$0xff]  ;;  %v14137_v27 = vld [vmem:[#allocation35_spill] sm:$0xff] }
 0xfd8   :  { %v5643_v54 = vmul.f32 %v8546_v8, %v5641_v32  ;;  %v14138_v32 = vld [vmem:[#allocation38_spill] sm:$0xff]  ;;  %v14139_v8 = vld [vmem:[#allocation37_spill] sm:$0xff] }
 0xfd9   :  { %v12410_v14 = vadd.f32 %v8540_v42, %v5642_v29  ;;  %v14134_v42 = vld [vmem:[#allocation121_spill] sm:$0xff]  ;;  %v14140_v29 = vld [vmem:[#allocation40_spill] sm:$0xff] }
 0xfda   :  { %v12412_v48 = vadd.f32 %v8542_v13, %v5643_v54  ;;  %v14135_v13 = vld [vmem:[#allocation122_spill] sm:$0xff]  ;;  %v14141_v54 = vld [vmem:[#allocation56_spill] sm:$0xff] }
 0xfdb   :  { %14099 = vst [vmem:[#allocation81_spill] sm:$0xff] %v12410_v14  ;;  %v12418_v31 = vpack.c.bf16 %v12410_v14, %v12410_v14 }
 0xfdc   :  { %14100 = vst [vmem:[#allocation82_spill] sm:$0xff] %v12412_v48  ;;  %v5655_v35 = vpack.c.bf16 %v12412_v48, %v12412_v48 }
 0xfde   :  { %5688 = vmatprep.mubr.bf16.mxu1 %v5655_v35  ;;  %5729 = vmatprep.mubr.bf16.mxu0 %v5655_v35 }
 0xfdf   :  { %5689 = vmatmul.mubr.bf16.vlgmr.msra.gmra.mrb[116].mxu1 %v12418_v31  ;;  %5730 = vmatmul.mubr.bf16.vlgmr.msra.gmra.mrb[124].mxu0 %v12418_v31 }
 0xfe0   :  { %5739 = vmatpush1.bf16.msra.mxu1 %v12241_v18  ;;  %5770 = vmatprep.mubr.bf16.mxu1 %v5655_v35  ;;  %v14142_v35 = vld [vmem:[#allocation57_spill] sm:$0xff] }
 0xfe1   :  { %5740 = vmatprep.subr.bf16.mxu1 %v12244_v10  ;;  %5832 = vmatpush1.bf16.msra.mxu0 %v11875_v44  ;;  %v14101_v44 = vld [vmem:[#allocation104_spill] sm:$0xff] }
 0xfe2   :  { %5833 = vmatprep.subr.bf16.mxu0 %v11878_v62  ;;  %v14102_v62 = vld [vmem:[#allocation49_spill] sm:$0xff] }
 0xfe4   :  { %5741 = vmatpush1.bf16.msra.mxu1 %v12249_v45 }
 0xfe5   :  { %5742 = vmatprep.subr.bf16.mxu1 %v12252_v0  ;;  %5834 = vmatpush1.bf16.msra.mxu0 %v11883_v9  ;;  %v14103_v9 = vld [vmem:[#allocation51_spill] sm:$0xff] }
 0xfe6   :  { %5835 = vmatprep.subr.bf16.mxu0 %v11886_v25  ;;  %v14104_v25 = vld [vmem:[#allocation62_spill] sm:$0xff] }
 0xfe8   :  { %5743 = vmatpush1.bf16.msra.mxu1 %v12257_v51 }
 0xfe9   :  { %5744 = vmatprep.subr.bf16.mxu1 %v12260_v2  ;;  %5836 = vmatpush1.bf16.msra.mxu0 %v11891_v33  ;;  %v14105_v33 = vld [vmem:[#allocation63_spill] sm:$0xff] }
 0xfea   :  { %5837 = vmatprep.subr.bf16.mxu0 %v11894_v34  ;;  %v14106_v34 = vld [vmem:[#allocation68_spill] sm:$0xff] }
 0xfec   :  { %5745 = vmatpush1.bf16.msra.mxu1 %v12265_v39 }
 0xfed   :  { %5746 = vmatprep.subr.bf16.mxu1 %v12268_v5  ;;  %5838 = vmatpush1.bf16.msra.mxu0 %v11899_v52  ;;  %v14107_v52 = vld [vmem:[#allocation64_spill] sm:$0xff] }
 0xfee   :  { %5839 = vmatprep.subr.bf16.mxu0 %v11902_v19  ;;  %v14108_v19 = vld [vmem:[#allocation123_spill] sm:$0xff] }
 0xff0   :  { %5747 = vmatpush1.bf16.msra.mxu1 %v12273_v43 }
 0xff1   :  { %5748 = vmatprep.subr.bf16.mxu1 %v12276_v6  ;;  %5840 = vmatpush1.bf16.msra.mxu0 %v11907_v46  ;;  %v14109_v46 = vld [vmem:[#allocation69_spill] sm:$0xff] }
 0xff2   :  { %5841 = vmatprep.subr.bf16.mxu0 %v11910_v63  ;;  %v14110_v63 = vld [vmem:[#allocation70_spill] sm:$0xff] }
 0xff4   :  { %5749 = vmatpush1.bf16.msra.mxu1 %v12281_v16 }
 0xff5   :  { %5750 = vmatprep.subr.bf16.mxu1 %v12284_v24  ;;  %5842 = vmatpush1.bf16.msra.mxu0 %v11915_v58  ;;  %v14111_v58 = vld [vmem:[#allocation71_spill] sm:$0xff] }
 0xff6   :  { %5843 = vmatprep.subr.bf16.mxu0 %v11918_v50  ;;  %v14112_v50 = vld [vmem:[#allocation67_spill] sm:$0xff] }
 0xff8   :  { %5751 = vmatpush1.bf16.msra.mxu1 %v12289_v26 }
 0xff9   :  { %5752 = vmatprep.subr.bf16.mxu1 %v12292_v57  ;;  %5844 = vmatpush1.bf16.msra.mxu0 %v11923_v40  ;;  %v14113_v40 = vld [vmem:[#allocation30_spill] sm:$0xff] }
 0xffa   :  { %5845 = vmatprep.subr.bf16.mxu0 %v11926_v36  ;;  %v14114_v36 = vld [vmem:[#allocation72_spill] sm:$0xff] }
 0xffc   :  { %5753 = vmatpush1.bf16.msra.mxu1 %v12297_v15 }
 0xffd   :  { %5754 = vmatprep.subr.bf16.mxu1 %v14101_v44  ;;  %5846 = vmatpush1.bf16.msra.mxu0 %v11931_v7  ;;  %v14115_v7 = vld [vmem:[#allocation73_spill] sm:$0xff] }
 0xffe   :  { %5847 = vmatprep.subr.bf16.mxu0 %v11934_v17  ;;  %v14116_v17 = vld [vmem:[#allocation29_spill] sm:$0xff] }
0x1000   :  { %5755 = vmatpush1.bf16.msra.mxu1 %v14102_v62 }
0x1001   :  { %5756 = vmatprep.subr.bf16.mxu1 %v14103_v9  ;;  %5848 = vmatpush1.bf16.msra.mxu0 %v11939_v23  ;;  %v14117_v23 = vld [vmem:[#allocation24_spill] sm:$0xff] }
0x1002   :  { %5849 = vmatprep.subr.bf16.mxu0 %v11942_v53  ;;  %v14118_v53 = vld [vmem:[#allocation74_spill] sm:$0xff] }
0x1004   :  { %5757 = vmatpush1.bf16.msra.mxu1 %v14104_v25 }
0x1005   :  { %5758 = vmatprep.subr.bf16.mxu1 %v14105_v33  ;;  %5850 = vmatpush1.bf16.msra.mxu0 %v13988_v41  ;;  %v14119_v41 = vld [vmem:[#allocation75_spill] sm:$0xff] }
0x1006   :  { %5851 = vmatprep.subr.bf16.mxu0 %v13989_v59  ;;  %v14120_v59 = vld [vmem:[#allocation124_spill] sm:$0xff] }
0x1008   :  { %5759 = vmatpush1.bf16.msra.mxu1 %v14106_v34 }
0x1009   :  { %5760 = vmatprep.subr.bf16.mxu1 %v14107_v52  ;;  %5852 = vmatpush1.bf16.msra.mxu0 %v13990_v61  ;;  %v14121_v61 = vld [vmem:[#allocation65_spill] sm:$0xff] }
0x100a   :  { %5853 = vmatprep.subr.bf16.mxu0 %v13991_v47  ;;  %v14122_v47 = vld [vmem:[#allocation80_spill] sm:$0xff] }
0x100c   :  { %5761 = vmatpush1.bf16.msra.mxu1 %v14108_v19 }
0x100d   :  { %5762 = vmatprep.subr.bf16.mxu1 %v14109_v46  ;;  %5854 = vmatpush1.bf16.msra.mxu0 %v13993_v20  ;;  %v14123_v20 = vld [vmem:[#allocation52_spill] sm:$0xff] }
0x100e   :  { %5855 = vmatprep.subr.bf16.mxu0 %v13994_v11  ;;  %v14124_v11 = vld [vmem:[#allocation26_spill] sm:$0xff] }
0x1010   :  { %5763 = vmatpush1.bf16.msra.mxu1 %v14110_v63 }
0x1011   :  { %5764 = vmatprep.subr.bf16.mxu1 %v14111_v58  ;;  %5856 = vmatpush1.bf16.msra.mxu0 %v14112_v50  ;;  %v14144_v50 = vld [vmem:[#allocation42_spill] sm:$0xff] }
0x1012   :  { %5857 = vmatprep.subr.bf16.mxu0 %v14113_v40  ;;  %v14145_v40 = vld [vmem:[#allocation41_spill] sm:$0xff] }
0x1014   :  { %5765 = vmatpush1.bf16.msra.mxu1 %v14114_v36 }
0x1015   :  { %5766 = vmatprep.subr.bf16.mxu1 %v14115_v7  ;;  %5858 = vmatpush1.bf16.msra.mxu0 %v14116_v17  ;;  %v14146_v17 = vld [vmem:[#allocation58_spill] sm:$0xff] }
0x1016   :  { %5859 = vmatprep.subr.bf16.mxu0 %v14117_v23  ;;  %v14147_v23 = vld [vmem:[#allocation59_spill] sm:$0xff] }
0x1018   :  { %5767 = vmatpush1.bf16.msra.mxu1 %v14118_v53 }
0x1019   :  { %5768 = vmatprep.subr.bf16.mxu1 %v14119_v41  ;;  %5860 = vmatpush1.bf16.msra.mxu0 %v14120_v59  ;;  %v14148_v59 = vld [vmem:[#allocation32_spill] sm:$0xff] }
0x101a   :  { %5861 = vmatprep.subr.bf16.mxu0 %v14121_v61  ;;  %v14149_v61 = vld [vmem:[#allocation33_spill] sm:$0xff] }
0x101c   :  { %5769 = vmatpush1.bf16.msra.mxu1 %v14122_v47 }
0x101d   :  { %5872 = vmatprep.subr.bf16.mxu1 %v14123_v20  ;;  %5862 = vmatpush1.bf16.msra.mxu0 %v14124_v11  ;;  %v14150_v11 = vld [vmem:[#allocation36_spill] sm:$0xff] }
0x101e   :  { %5913 = vmatprep.subr.bf16.mxu0 %v14125_v1 }
0x101f   :  { %5771 = vmatmul.mubr.bf16.vlgmr.msra.gmra.mrb[120].mxu1 %v12418_v31  ;;  %v14143_v31 = vld [vmem:[#allocation39_spill] sm:$0xff] }
0x1020   :  { %5873 = vmatpush1.bf16.msra.mxu1 %v14126_v30 }
0x1021   :  { %5874 = vmatprep.subr.bf16.mxu1 %v14127_v56 }
0x1024   :  { %5875 = vmatpush1.bf16.msra.mxu1 %v14128_v55 }
0x1025   :  { %5876 = vmatprep.subr.bf16.mxu1 %v14129_v49 }
0x1028   :  { %5877 = vmatpush1.bf16.msra.mxu1 %v14130_v4 }
0x1029   :  { %5878 = vmatprep.subr.bf16.mxu1 %v14131_v12 }
0x102c   :  { %5879 = vmatpush1.bf16.msra.mxu1 %v14132_v3 }
0x102d   :  { %5880 = vmatprep.subr.bf16.mxu1 %v14133_v21 }
0x1030   :  { %5881 = vmatpush1.bf16.msra.mxu1 %v14134_v42 }
0x1031   :  { %5882 = vmatprep.subr.bf16.mxu1 %v14135_v13 }
0x1034   :  { %5883 = vmatpush1.bf16.msra.mxu1 %v14136_v28 }
0x1035   :  { %5884 = vmatprep.subr.bf16.mxu1 %v14137_v27  ;;  %v14161_v27 = vld [vmem:[#allocation90_spill] sm:$0xff] }
0x1038   :  { %5885 = vmatpush1.bf16.msra.mxu1 %v14138_v32  ;;  %v14160_v32 = vld [vmem:[#allocation89_spill] sm:$0xff] }
0x1039   :  { %5886 = vmatprep.subr.bf16.mxu1 %v14139_v8 }
0x103c   :  { %5887 = vmatpush1.bf16.msra.mxu1 %v14140_v29  ;;  %v14159_v29 = vld [vmem:[#allocation66_spill] sm:$0xff] }
0x103d   :  { %5888 = vmatprep.subr.bf16.mxu1 %v14141_v54  ;;  %v14158_v54 = vld [vmem:[#allocation88_spill] sm:$0xff] }
0x1040   :  { %5889 = vmatpush1.bf16.msra.mxu1 %v14142_v35  ;;  %v14153_v35 = vld [vmem:[#allocation76_spill] sm:$0xff] }
0x1041   :  { %5890 = vmatprep.subr.bf16.mxu1 %v14143_v31  ;;  %v14154_v31 = vld [vmem:[#allocation77_spill] sm:$0xff] }
0x1044   :  { %5891 = vmatpush1.bf16.msra.mxu1 %v14144_v50  ;;  %v14155_v50 = vld [vmem:[#allocation78_spill] sm:$0xff] }
0x1045   :  { %5892 = vmatprep.subr.bf16.mxu1 %v14145_v40  ;;  %v14156_v40 = vld [vmem:[#allocation79_spill] sm:$0xff] }
0x1048   :  { %5893 = vmatpush1.bf16.msra.mxu1 %v14146_v17  ;;  %v14157_v17 = vld [vmem:[#allocation25_spill] sm:$0xff] }
0x1049   :  { %5894 = vmatprep.subr.bf16.mxu1 %v14147_v23 }
0x104c   :  { %5895 = vmatpush1.bf16.msra.mxu1 %v14148_v59 }
0x104d   :  { %5896 = vmatprep.subr.bf16.mxu1 %v14149_v61 }
0x1050   :  { %5897 = vmatpush1.bf16.msra.mxu1 %v14150_v11 }
0x1051   :  { %5898 = vmatprep.subr.bf16.mxu1 %v14151_v60 }
0x1054   :  { %5899 = vmatpush1.bf16.msra.mxu1 %v14152_v38 }
0x1055   :  { %5900 = vmatprep.subr.bf16.mxu1 %v14153_v35 }
0x1058   :  { %5901 = vmatpush1.bf16.msra.mxu1 %v14154_v31 }
0x1059   :  { %5902 = vmatprep.subr.bf16.mxu1 %v14155_v50 }
0x105c   :  { %5903 = vmatpush1.bf16.msra.mxu1 %v14156_v40 }
0x105d   :  { %6006 = vmatprep.subr.bf16.mxu1 %v14157_v17 }
0x10b2   :  { %v5690_v23 = vpop.f32.mrb[116].mxu1  ;;  %v5731_v59 = vpop.f32.mrb[124].mxu0 }
0x10b3   :  { %v5779_v61 = vadd.f32 %v14158_v54, %v5690_v23  ;;  %v5781_v11 = vadd.f32 %v14159_v29, %v5731_v59  ;;  %v5692_v8 = vpop.f32.mrb[117].mxu1  ;;  %v5733_v60 = vpop.f32.mrb[125].mxu0 }
0x10b4   :  { %v5780_v38 = vadd.f32 %v14160_v32, %v5692_v8  ;;  %v5782_v35 = vadd.f32 %v14161_v27, %v5733_v60  ;;  %v5694_v28 = vpop.f32.mrb[118].mxu1  ;;  %v5735_v31 = vpop.f32.mrb[126].mxu0 }
0x10b5   :  { %v5695_v13 = vpop.f32.mrb[119].mxu1  ;;  %v5736_v50 = vpop.f32.mrb[127].mxu0  ;;  %v7403_v42 = vmul.f32 -1.442695, %v5779_v61  ;;  %v7405_v3 = vmul.f32 -1.442695, %v5781_v11 }
0x10b6   :  { %v7404_v40 = vmul.f32 -1.442695, %v5780_v38  ;;  %v7406_v54 = vmul.f32 -1.442695, %v5782_v35  ;;  %v14163_v11 = vld [vmem:[#allocation110_spill] sm:$0xff] }
0x10b7   :  { %8547 = vpow2.f32 %v7403_v42 }
0x10b8   :  { %8549 = vpow2.f32 %v7404_v40 }
0x10b9   :  { %8551 = vpow2.f32 %v7405_v3 }
0x10ba   :  { %8553 = vpow2.f32 %v7406_v54 }
0x10c1   :  { %v8548_v17 = vpop.eup %8547 }
0x10c2   :  { %v8550_v21 = vpop.eup %8549  ;;  %v5795_v23 = vadd.f32 1.0, %v8548_v17 }
0x10c3   :  { %v5796_v29 = vadd.f32 1.0, %v8550_v21  ;;  %v8552_v32 = vpop.eup %8551  ;;  %v14162_v21 = vld [vmem:[#allocation109_spill] sm:$0xff] }
0x10c4   :  { %8555 = vrcp.f32 %v5795_v23  ;;  %v8554_v28 = vpop.eup %8553  ;;  %v5797_v59 = vadd.f32 1.0, %v8552_v32 }
0x10c5   :  { %8557 = vrcp.f32 %v5796_v29  ;;  %v5798_v61 = vadd.f32 1.0, %v8554_v28 }
0x10ce   :  { %v8556_v8 = vpop.eup %8555 }
0x10cf   :  { %v8558_v31 = vpop.eup %8557 }
0x10f2   :  { %v5772_v60 = vpop.f32.mrb[120].mxu1 }
0x10f3   :  { %v5807_v13 = vadd.f32 %v5772_v60, %v14047_v22  ;;  %v5774_v27 = vpop.f32.mrb[121].mxu1 }
0x10f4   :  { %v5808_v38 = vadd.f32 %v5774_v27, %v13983_v37  ;;  %v5776_v42 = vpop.f32.mrb[122].mxu1 }
0x10f5   :  { %v5809_v50 = vmul.f32 %v8556_v8, %v5807_v13  ;;  %v5777_v40 = vpop.f32.mrb[123].mxu1 }
0x10f6   :  { %v5810_v35 = vmul.f32 %v8558_v31, %v5808_v38  ;;  %v12546_v40 = vld [vmem:[#allocation13 + $0x34] ss:$24 sps:$4 sm:$0xff]  }
0x10f7   :  { %v5811_v3 = vadd.f32 %v14162_v21, %v5809_v50  ;;  %v12543_v50 = vld [vmem:[#allocation13] ss:$24 sps:$4 sm:$0xff]  }
0x10f8   :  { %v5812_v17 = vadd.f32 %v14163_v11, %v5810_v35  ;;  %v12551_v35 = vld [vmem:[#allocation13 + $0x30] ss:$24 sps:$4 sm:$0xff]   ;;  %v12559_v21 = vld [vmem:[#allocation13 + $0x60] ss:$24 sps:$4 sm:$0xff]   ;;  %v12570_v11 = vld [vmem:[#allocation13 + $0xc4] ss:$24 sps:$4 sm:$0xff]  }
0x10f9   :  { %8559 = vtanh.f32 %v5811_v3  ;;  %v12562_v3 = vld [vmem:[#allocation13 + $0x94] ss:$24 sps:$4 sm:$0xff]  }
0x10fa   :  { %8561 = vtanh.f32 %v5812_v17  ;;  %v12575_v17 = vld [vmem:[#allocation13 + $0xc0] ss:$24 sps:$4 sm:$0xff]  }
0x10fb   :  { %8563 = vrcp.f32 %v5797_v59  ;;  %v12554_v59 = vld [vmem:[#allocation13 + $0x64] ss:$24 sps:$4 sm:$0xff]  }
0x10fc   :  { %8565 = vrcp.f32 %v5798_v61  ;;  %v12567_v61 = vld [vmem:[#allocation13 + $0x90] ss:$24 sps:$4 sm:$0xff]  }
0x1103   :  { %v8560_v54 = vpop.eup %8559 }
0x1104   :  { %v8562_v23 = vpop.eup %8561  ;;  %v5815_v29 = vsub.f32 %v12410_v14, %v8560_v54  ;;  %v12618_v14 = vld [vmem:[#allocation13 + $0x1e4] ss:$24 sps:$4 sm:$0xff]  }
0x1105   :  { %v8564_v60 = vpop.eup %8563  ;;  %v5816_v27 = vsub.f32 %v12412_v48, %v8562_v23  ;;  %v12615_v48 = vld [vmem:[#allocation13 + $0x1b0] ss:$24 sps:$4 sm:$0xff]   ;;  %14167 = vst [vmem:[#allocation106_spill] sm:$0xff] %v12618_v14 }
0x1106   :  { %v8566_v13 = vpop.eup %8565  ;;  %v5817_v8 = vmul.f32 %v8564_v60, %v5815_v29  ;;  %v12586_v29 = vld [vmem:[#allocation13 + $0x124] ss:$24 sps:$4 sm:$0xff]   ;;  %v12591_v60 = vld [vmem:[#allocation13 + $0x120] ss:$24 sps:$4 sm:$0xff]   ;;  %14166 = vst [vmem:[#allocation105_spill] sm:$0xff] %v12615_v48 }
0x1107   :  { %v5818_v38 = vmul.f32 %v8566_v13, %v5816_v27  ;;  %v12594_v27 = vld [vmem:[#allocation13 + $0x154] ss:$24 sps:$4 sm:$0xff]   ;;  %v12599_v13 = vld [vmem:[#allocation13 + $0x150] ss:$24 sps:$4 sm:$0xff]  }
0x1108   :  { %v12529_v32 = vadd.f32 %v8560_v54, %v5817_v8  ;;  %v12578_v54 = vld [vmem:[#allocation13 + $0xf4] ss:$24 sps:$4 sm:$0xff]   ;;  %v12602_v8 = vld [vmem:[#allocation13 + $0x184] ss:$24 sps:$4 sm:$0xff]  }
0x1109   :  { %v12531_v42 = vadd.f32 %v8562_v23, %v5818_v38  ;;  %v12583_v23 = vld [vmem:[#allocation13 + $0xf0] ss:$24 sps:$4 sm:$0xff]   ;;  %v12607_v38 = vld [vmem:[#allocation13 + $0x180] ss:$24 sps:$4 sm:$0xff]  }
0x110a   :  { %v12537_v31 = vpack.c.bf16 %v12529_v32, %v12529_v32  ;;  %14164 = vst [vmem:[#allocation83_spill] sm:$0xff] %v12607_v38 }
0x110b   :  { %v5830_v28 = vpack.c.bf16 %v12531_v42, %v12531_v42 }
0x110d   :  { %5863 = vmatprep.mubr.bf16.mxu0 %v5830_v28  ;;  %5904 = vmatprep.mubr.bf16.mxu1 %v5830_v28 }
0x110e   :  { %5864 = vmatmul.mubr.bf16.vlgmr.msra.gmra.mrb[128].mxu0 %v12537_v31  ;;  %5905 = vmatmul.mubr.bf16.vlgmr.msra.gmra.mrb[124].mxu1 %v12537_v31 }
0x110f   :  { %5914 = vmatpush1.bf16.msra.mxu0 %v12241_v18  ;;  %5945 = vmatprep.mubr.bf16.mxu0 %v5830_v28  ;;  %v12610_v28 = vld [vmem:[#allocation13 + $0x1b4] ss:$24 sps:$4 sm:$0xff]  }
0x1110   :  { %5915 = vmatprep.subr.bf16.mxu0 %v12244_v10  ;;  %6007 = vmatpush1.bf16.msra.mxu1 %v12543_v50  ;;  %14165 = vst [vmem:[#allocation60_spill] sm:$0xff] %v12610_v28 }
0x1111   :  { %6008 = vmatprep.subr.bf16.mxu1 %v12546_v40 }
0x1113   :  { %5916 = vmatpush1.bf16.msra.mxu0 %v12249_v45 }
0x1114   :  { %5917 = vmatprep.subr.bf16.mxu0 %v12252_v0  ;;  %6009 = vmatpush1.bf16.msra.mxu1 %v12551_v35 }
0x1115   :  { %6010 = vmatprep.subr.bf16.mxu1 %v12554_v59 }
0x1117   :  { %5918 = vmatpush1.bf16.msra.mxu0 %v12257_v51 }
0x1118   :  { %5919 = vmatprep.subr.bf16.mxu0 %v12260_v2  ;;  %6011 = vmatpush1.bf16.msra.mxu1 %v12559_v21 }
0x1119   :  { %6012 = vmatprep.subr.bf16.mxu1 %v12562_v3 }
0x111b   :  { %5920 = vmatpush1.bf16.msra.mxu0 %v12265_v39 }
0x111c   :  { %5921 = vmatprep.subr.bf16.mxu0 %v12268_v5  ;;  %6013 = vmatpush1.bf16.msra.mxu1 %v12567_v61 }
0x111d   :  { %6014 = vmatprep.subr.bf16.mxu1 %v12570_v11 }
0x111f   :  { %5922 = vmatpush1.bf16.msra.mxu0 %v12273_v43 }
0x1120   :  { %5923 = vmatprep.subr.bf16.mxu0 %v12276_v6  ;;  %6015 = vmatpush1.bf16.msra.mxu1 %v12575_v17 }
0x1121   :  { %6016 = vmatprep.subr.bf16.mxu1 %v12578_v54 }
0x1123   :  { %5924 = vmatpush1.bf16.msra.mxu0 %v12281_v16 }
0x1124   :  { %5925 = vmatprep.subr.bf16.mxu0 %v12284_v24  ;;  %6017 = vmatpush1.bf16.msra.mxu1 %v12583_v23 }
0x1125   :  { %6018 = vmatprep.subr.bf16.mxu1 %v12586_v29 }
0x1127   :  { %5926 = vmatpush1.bf16.msra.mxu0 %v12289_v26 }
0x1128   :  { %5927 = vmatprep.subr.bf16.mxu0 %v12292_v57  ;;  %6019 = vmatpush1.bf16.msra.mxu1 %v12591_v60 }
0x1129   :  { %6020 = vmatprep.subr.bf16.mxu1 %v12594_v27 }
0x112b   :  { %5928 = vmatpush1.bf16.msra.mxu0 %v12297_v15 }
0x112c   :  { %5929 = vmatprep.subr.bf16.mxu0 %v14101_v44  ;;  %6021 = vmatpush1.bf16.msra.mxu1 %v12599_v13 }
0x112d   :  { %6022 = vmatprep.subr.bf16.mxu1 %v12602_v8 }
0x112f   :  { %5930 = vmatpush1.bf16.msra.mxu0 %v14102_v62 }
0x1130   :  { %5931 = vmatprep.subr.bf16.mxu0 %v14103_v9  ;;  %6023 = vmatpush1.bf16.msra.mxu1 %v12607_v38  ;;  %v12623_v38 = vld [vmem:[#allocation13 + $0x1e0] ss:$24 sps:$4 sm:$0xff]  }
0x1131   :  { %6024 = vmatprep.subr.bf16.mxu1 %v12610_v28  ;;  %14168 = vst [vmem:[#allocation84_spill] sm:$0xff] %v12623_v38  ;;  %v12626_v28 = vld [vmem:[#allocation13 + $0x214] ss:$24 sps:$4 sm:$0xff]  }
0x1132   :  { %14169 = vst [vmem:[#allocation85_spill] sm:$0xff] %v12626_v28 }
0x1133   :  { %5932 = vmatpush1.bf16.msra.mxu0 %v14104_v25 }
0x1134   :  { %5933 = vmatprep.subr.bf16.mxu0 %v14105_v33  ;;  %6025 = vmatpush1.bf16.msra.mxu1 %v12615_v48  ;;  %v12631_v48 = vld [vmem:[#allocation13 + $0x210] ss:$24 sps:$4 sm:$0xff]  }
0x1135   :  { %6026 = vmatprep.subr.bf16.mxu1 %v12618_v14  ;;  %14170 = vst [vmem:[#allocation86_spill] sm:$0xff] %v12631_v48  ;;  %v12634_v14 = vld [vmem:[#allocation13 + $0x244] ss:$24 sps:$4 sm:$0xff]  }
0x1136   :  { %14171 = vst [vmem:[#allocation87_spill] sm:$0xff] %v12634_v14 }
0x1137   :  { %5934 = vmatpush1.bf16.msra.mxu0 %v14106_v34 }
0x1138   :  { %5935 = vmatprep.subr.bf16.mxu0 %v14107_v52  ;;  %6027 = vmatpush1.bf16.msra.mxu1 %v12623_v38  ;;  %v12639_v38 = vld [vmem:[#allocation13 + $0x240] ss:$24 sps:$4 sm:$0xff]  }
0x1139   :  { %6028 = vmatprep.subr.bf16.mxu1 %v12626_v28  ;;  %14172 = vst [vmem:[#allocation107_spill] sm:$0xff] %v12639_v38  ;;  %v12642_v28 = vld [vmem:[#allocation13 + $0x274] ss:$24 sps:$4 sm:$0xff]  }
0x113a   :  { %14173 = vst [vmem:[#allocation108_spill] sm:$0xff] %v12642_v28 }
0x113b   :  { %5936 = vmatpush1.bf16.msra.mxu0 %v14108_v19 }
0x113c   :  { %5937 = vmatprep.subr.bf16.mxu0 %v14109_v46  ;;  %6029 = vmatpush1.bf16.msra.mxu1 %v12631_v48  ;;  %v12647_v48 = vld [vmem:[#allocation13 + $0x270] ss:$24 sps:$4 sm:$0xff]  }
0x113d   :  { %6030 = vmatprep.subr.bf16.mxu1 %v12634_v14  ;;  %14174 = vst [vmem:[#allocation104_spill] sm:$0xff] %v12647_v48  ;;  %v12650_v14 = vld [vmem:[#allocation13 + $0x2a4] ss:$24 sps:$4 sm:$0xff]  }
0x113e   :  { %14175 = vst [vmem:[#allocation49_spill] sm:$0xff] %v12650_v14 }
0x113f   :  { %5938 = vmatpush1.bf16.msra.mxu0 %v14110_v63 }
0x1140   :  { %5939 = vmatprep.subr.bf16.mxu0 %v14111_v58  ;;  %6031 = vmatpush1.bf16.msra.mxu1 %v12639_v38  ;;  %v12655_v38 = vld [vmem:[#allocation13 + $0x2a0] ss:$24 sps:$4 sm:$0xff]  }
0x1141   :  { %6032 = vmatprep.subr.bf16.mxu1 %v12642_v28  ;;  %14176 = vst [vmem:[#allocation51_spill] sm:$0xff] %v12655_v38  ;;  %v12658_v28 = vld [vmem:[#allocation13 + $0x2d4] ss:$24 sps:$4 sm:$0xff]  }
0x1142   :  { %14177 = vst [vmem:[#allocation62_spill] sm:$0xff] %v12658_v28 }
0x1143   :  { %5940 = vmatpush1.bf16.msra.mxu0 %v14114_v36 }
0x1144   :  { %5941 = vmatprep.subr.bf16.mxu0 %v14115_v7  ;;  %6033 = vmatpush1.bf16.msra.mxu1 %v12647_v48  ;;  %v12663_v48 = vld [vmem:[#allocation13 + $0x2d0] ss:$24 sps:$4 sm:$0xff]  }
0x1145   :  { %6034 = vmatprep.subr.bf16.mxu1 %v12650_v14  ;;  %14178 = vst [vmem:[#allocation63_spill] sm:$0xff] %v12663_v48  ;;  %v14207_v14 = vld [vmem:[#allocation94_spill] sm:$0xff] }
0x1147   :  { %5942 = vmatpush1.bf16.msra.mxu0 %v14118_v53  ;;  %v14206_v53 = vld [vmem:[#allocation93_spill] sm:$0xff] }
0x1148   :  { %5943 = vmatprep.subr.bf16.mxu0 %v14119_v41  ;;  %6035 = vmatpush1.bf16.msra.mxu1 %v12655_v38  ;;  %v14205_v38 = vld [vmem:[#allocation92_spill] sm:$0xff] }
0x1149   :  { %6036 = vmatprep.subr.bf16.mxu1 %v12658_v28  ;;  %v14204_v28 = vld [vmem:[#allocation91_spill] sm:$0xff] }
0x114b   :  { %5944 = vmatpush1.bf16.msra.mxu0 %v14122_v47  ;;  %v14180_v47 = vld [vmem:[#allocation120_spill] sm:$0xff] }
0x114c   :  { %6047 = vmatprep.subr.bf16.mxu0 %v14123_v20  ;;  %6037 = vmatpush1.bf16.msra.mxu1 %v12663_v48  ;;  %v14179_v20 = vld [vmem:[#allocation119_spill] sm:$0xff]  ;;  %v14181_v48 = vld [vmem:[#allocation121_spill] sm:$0xff] }
0x114d   :  { %6088 = vmatprep.subr.bf16.mxu1 %v14125_v1  ;;  %v14182_v1 = vld [vmem:[#allocation122_spill] sm:$0xff] }
0x114e   :  { %5946 = vmatmul.mubr.bf16.vlgmr.msra.gmra.mrb[132].mxu0 %v12537_v31  ;;  %v14183_v31 = vld [vmem:[#allocation28_spill] sm:$0xff] }
0x114f   :  { %6048 = vmatpush1.bf16.msra.mxu0 %v14126_v30  ;;  %v14184_v30 = vld [vmem:[#allocation35_spill] sm:$0xff] }
0x1150   :  { %6049 = vmatprep.subr.bf16.mxu0 %v14127_v56  ;;  %v14185_v56 = vld [vmem:[#allocation38_spill] sm:$0xff] }
0x1153   :  { %6050 = vmatpush1.bf16.msra.mxu0 %v14128_v55  ;;  %v14186_v55 = vld [vmem:[#allocation37_spill] sm:$0xff] }
0x1154   :  { %6051 = vmatprep.subr.bf16.mxu0 %v14129_v49  ;;  %v14187_v49 = vld [vmem:[#allocation40_spill] sm:$0xff] }
0x1157   :  { %6052 = vmatpush1.bf16.msra.mxu0 %v14130_v4  ;;  %v14188_v4 = vld [vmem:[#allocation56_spill] sm:$0xff] }
0x1158   :  { %6053 = vmatprep.subr.bf16.mxu0 %v14131_v12  ;;  %v14189_v12 = vld [vmem:[#allocation57_spill] sm:$0xff] }
0x115b   :  { %6054 = vmatpush1.bf16.msra.mxu0 %v14179_v20  ;;  %v14190_v20 = vld [vmem:[#allocation39_spill] sm:$0xff] }
0x115c   :  { %6055 = vmatprep.subr.bf16.mxu0 %v14180_v47  ;;  %v14191_v47 = vld [vmem:[#allocation42_spill] sm:$0xff] }
0x115f   :  { %6056 = vmatpush1.bf16.msra.mxu0 %v14181_v48  ;;  %v14192_v48 = vld [vmem:[#allocation41_spill] sm:$0xff] }
0x1160   :  { %6057 = vmatprep.subr.bf16.mxu0 %v14182_v1  ;;  %v14193_v1 = vld [vmem:[#allocation58_spill] sm:$0xff] }
0x1163   :  { %6058 = vmatpush1.bf16.msra.mxu0 %v14183_v31  ;;  %v14194_v31 = vld [vmem:[#allocation59_spill] sm:$0xff] }
0x1164   :  { %6059 = vmatprep.subr.bf16.mxu0 %v14184_v30  ;;  %v14195_v30 = vld [vmem:[#allocation32_spill] sm:$0xff] }
0x1167   :  { %6060 = vmatpush1.bf16.msra.mxu0 %v14185_v56  ;;  %v14196_v56 = vld [vmem:[#allocation33_spill] sm:$0xff] }
0x1168   :  { %6061 = vmatprep.subr.bf16.mxu0 %v14186_v55  ;;  %v14197_v55 = vld [vmem:[#allocation36_spill] sm:$0xff] }
0x116b   :  { %6062 = vmatpush1.bf16.msra.mxu0 %v14187_v49  ;;  %v14198_v49 = vld [vmem:[#allocation54_spill] sm:$0xff] }
0x116c   :  { %6063 = vmatprep.subr.bf16.mxu0 %v14188_v4  ;;  %v14199_v4 = vld [vmem:[#allocation55_spill] sm:$0xff] }
0x116f   :  { %6064 = vmatpush1.bf16.msra.mxu0 %v14189_v12  ;;  %v14200_v12 = vld [vmem:[#allocation76_spill] sm:$0xff] }
0x1170   :  { %6065 = vmatprep.subr.bf16.mxu0 %v14190_v20  ;;  %v14201_v20 = vld [vmem:[#allocation77_spill] sm:$0xff] }
0x1173   :  { %6066 = vmatpush1.bf16.msra.mxu0 %v14191_v47  ;;  %v14202_v47 = vld [vmem:[#allocation78_spill] sm:$0xff] }
0x1174   :  { %6067 = vmatprep.subr.bf16.mxu0 %v14192_v48  ;;  %v14203_v48 = vld [vmem:[#allocation79_spill] sm:$0xff] }
0x1177   :  { %6068 = vmatpush1.bf16.msra.mxu0 %v14193_v1  ;;  %v8946_v1 = vld [vmem:[#allocation13 + $0x4] ss:$24 sps:$4 sm:$0xff]  }
0x1178   :  { %6069 = vmatprep.subr.bf16.mxu0 %v14194_v31 }
0x117b   :  { %6070 = vmatpush1.bf16.msra.mxu0 %v14195_v30 }
0x117c   :  { %6071 = vmatprep.subr.bf16.mxu0 %v14196_v56 }
0x117f   :  { %6072 = vmatpush1.bf16.msra.mxu0 %v14197_v55 }
0x1180   :  { %6073 = vmatprep.subr.bf16.mxu0 %v14198_v49 }
0x1183   :  { %6074 = vmatpush1.bf16.msra.mxu0 %v14199_v4 }
0x1184   :  { %6075 = vmatprep.subr.bf16.mxu0 %v14200_v12 }
0x1187   :  { %6076 = vmatpush1.bf16.msra.mxu0 %v14201_v20 }
0x1188   :  { %6077 = vmatprep.subr.bf16.mxu0 %v14202_v47 }
0x118b   :  { %6078 = vmatpush1.bf16.msra.mxu0 %v14203_v48 }
0x118c   :  { %6181 = vmatprep.subr.bf16.mxu0 %v8946_v1 }
0x11e1   :  { %v5865_v31 = vpop.f32.mrb[128].mxu0  ;;  %v5906_v30 = vpop.f32.mrb[124].mxu1 }
0x11e2   :  { %v5954_v56 = vadd.f32 %v14204_v28, %v5865_v31  ;;  %v5956_v55 = vadd.f32 %v14205_v38, %v5906_v30  ;;  %v5867_v41 = vpop.f32.mrb[129].mxu0  ;;  %v5908_v49 = vpop.f32.mrb[125].mxu1 }
0x11e3   :  { %v5955_v4 = vadd.f32 %v14206_v53, %v5867_v41  ;;  %v5957_v12 = vadd.f32 %v14207_v14, %v5908_v49  ;;  %v5869_v7 = vpop.f32.mrb[130].mxu0  ;;  %v5910_v20 = vpop.f32.mrb[126].mxu1 }
0x11e4   :  { %v5870_v36 = vpop.f32.mrb[131].mxu0  ;;  %v5911_v47 = vpop.f32.mrb[127].mxu1  ;;  %v7407_v58 = vmul.f32 -1.442695, %v5954_v56  ;;  %v7409_v46 = vmul.f32 -1.442695, %v5956_v55 }
0x11e5   :  { %v7408_v48 = vmul.f32 -1.442695, %v5955_v4  ;;  %v7410_v28 = vmul.f32 -1.442695, %v5957_v12 }
0x11e6   :  { %8567 = vpow2.f32 %v7407_v58 }
0x11e7   :  { %8569 = vpow2.f32 %v7408_v48  ;;  %v14209_v48 = vld [vmem:[#allocation112_spill] sm:$0xff] }
0x11e8   :  { %8571 = vpow2.f32 %v7409_v46 }
0x11e9   :  { %8573 = vpow2.f32 %v7410_v28 }
0x11f0   :  { %v8568_v1 = vpop.eup %8567 }
0x11f1   :  { %v8570_v63 = vpop.eup %8569  ;;  %v5970_v31 = vadd.f32 1.0, %v8568_v1 }
0x11f2   :  { %v5971_v38 = vadd.f32 1.0, %v8570_v63  ;;  %v8572_v53 = vpop.eup %8571  ;;  %v14208_v63 = vld [vmem:[#allocation111_spill] sm:$0xff] }
0x11f3   :  { %8575 = vrcp.f32 %v5970_v31  ;;  %v8574_v7 = vpop.eup %8573  ;;  %v5972_v20 = vadd.f32 1.0, %v8572_v53 }
0x11f4   :  { %8577 = vrcp.f32 %v5971_v38  ;;  %v5973_v47 = vadd.f32 1.0, %v8574_v7 }
0x11fd   :  { %v8576_v30 = vpop.eup %8575 }
0x11fe   :  { %v8578_v49 = vpop.eup %8577 }
0x1221   :  { %v5947_v14 = vpop.f32.mrb[132].mxu0 }
0x1222   :  { %v5982_v36 = vadd.f32 %v5947_v14, %v14047_v22  ;;  %v5949_v41 = vpop.f32.mrb[133].mxu0 }
0x1223   :  { %v5983_v58 = vadd.f32 %v5949_v41, %v13983_v37  ;;  %v5951_v56 = vpop.f32.mrb[134].mxu0 }
0x1224   :  { %v5984_v4 = vmul.f32 %v8576_v30, %v5982_v36  ;;  %v5952_v55 = vpop.f32.mrb[135].mxu0 }
0x1225   :  { %v5985_v12 = vmul.f32 %v8578_v49, %v5983_v58  ;;  %v8964_v55 = vld [vmem:[#allocation13 + $0x18c] ss:$24 sps:$4 sm:$0xff]  }
0x1226   :  { %v5986_v46 = vadd.f32 %v14208_v63, %v5984_v4  ;;  %v8963_v4 = vld [vmem:[#allocation13 + $0x158] ss:$24 sps:$4 sm:$0xff]  }
0x1227   :  { %v5987_v1 = vadd.f32 %v14209_v48, %v5985_v12  ;;  %v8965_v12 = vld [vmem:[#allocation13 + $0x188] ss:$24 sps:$4 sm:$0xff]   ;;  %v8967_v63 = vld [vmem:[#allocation13 + $0x1b8] ss:$24 sps:$4 sm:$0xff]   ;;  %v8970_v48 = vld [vmem:[#allocation13 + $0x21c] ss:$24 sps:$4 sm:$0xff]  }
0x1228   :  { %8579 = vtanh.f32 %v5986_v46  ;;  %v8968_v46 = vld [vmem:[#allocation13 + $0x1ec] ss:$24 sps:$4 sm:$0xff]  }
0x1229   :  { %8581 = vtanh.f32 %v5987_v1  ;;  %v8971_v1 = vld [vmem:[#allocation13 + $0x218] ss:$24 sps:$4 sm:$0xff]  }
0x122a   :  { %8583 = vrcp.f32 %v5972_v20  ;;  %v8966_v20 = vld [vmem:[#allocation13 + $0x1bc] ss:$24 sps:$4 sm:$0xff]  }
0x122b   :  { %8585 = vrcp.f32 %v5973_v47  ;;  %v8969_v47 = vld [vmem:[#allocation13 + $0x1e8] ss:$24 sps:$4 sm:$0xff]  }
0x1232   :  { %v8580_v28 = vpop.eup %8579 }
0x1233   :  { %v8582_v31 = vpop.eup %8581  ;;  %v5990_v38 = vsub.f32 %v12529_v32, %v8580_v28 }
0x1234   :  { %v8584_v14 = vpop.eup %8583  ;;  %v5991_v41 = vsub.f32 %v12531_v42, %v8582_v31 }
0x1235   :  { %v8586_v36 = vpop.eup %8585  ;;  %v5992_v30 = vmul.f32 %v8584_v14, %v5990_v38  ;;  %v8974_v38 = vld [vmem:[#allocation13 + $0x27c] ss:$24 sps:$4 sm:$0xff]   ;;  %v8975_v14 = vld [vmem:[#allocation13 + $0x278] ss:$24 sps:$4 sm:$0xff]  }
0x1236   :  { %v5993_v58 = vmul.f32 %v8586_v36, %v5991_v41  ;;  %v8976_v41 = vld [vmem:[#allocation13 + $0x2ac] ss:$24 sps:$4 sm:$0xff]   ;;  %v8977_v36 = vld [vmem:[#allocation13 + $0x2a8] ss:$24 sps:$4 sm:$0xff]  }
0x1237   :  { %v12709_v53 = vadd.f32 %v8580_v28, %v5992_v30  ;;  %v8972_v28 = vld [vmem:[#allocation13 + $0x24c] ss:$24 sps:$4 sm:$0xff]   ;;  %v8978_v30 = vld [vmem:[#allocation13 + $0x2dc] ss:$24 sps:$4 sm:$0xff]  }
0x1238   :  { %v12711_v56 = vadd.f32 %v8582_v31, %v5993_v58  ;;  %v8973_v31 = vld [vmem:[#allocation13 + $0x248] ss:$24 sps:$4 sm:$0xff]   ;;  %v8979_v58 = vld [vmem:[#allocation13 + $0x2d8] ss:$24 sps:$4 sm:$0xff]  }
0x1239   :  { %v12717_v49 = vpack.c.bf16 %v12709_v53, %v12709_v53 }
0x123a   :  { %v6005_v7 = vpack.c.bf16 %v12711_v56, %v12711_v56 }
0x123c   :  { %6038 = vmatprep.mubr.bf16.mxu1 %v6005_v7  ;;  %6079 = vmatprep.mubr.bf16.mxu0 %v6005_v7 }
0x123d   :  { %6039 = vmatmul.mubr.bf16.vlgmr.msra.gmra.mrb[128].mxu1 %v12717_v49  ;;  %6080 = vmatmul.mubr.bf16.vlgmr.msra.gmra.mrb[136].mxu0 %v12717_v49 }
0x123e   :  { %6089 = vmatpush1.bf16.msra.mxu1 %v12241_v18  ;;  %6120 = vmatprep.mubr.bf16.mxu1 %v6005_v7  ;;  %v14210_v18 = vld [vmem:[#allocation83_spill] sm:$0xff] }
0x123f   :  { %6090 = vmatprep.subr.bf16.mxu1 %v12244_v10  ;;  %6182 = vmatpush1.bf16.msra.mxu0 %v12543_v50  ;;  %v14211_v10 = vld [vmem:[#allocation60_spill] sm:$0xff]  ;;  %v14232_v50 = vld [vmem:[#allocation63_spill] sm:$0xff] }
0x1240   :  { %6183 = vmatprep.subr.bf16.mxu0 %v12546_v40  ;;  %v8948_v40 = vld [vmem:[#allocation13 + $0x14] ss:$24 sps:$4 sm:$0xff]   ;;  %v8259_v7 = vld [vmem:[#allocation16 + $0x40] sm:$0xff]  }
0x1242   :  { %6091 = vmatpush1.bf16.msra.mxu1 %v12249_v45  ;;  %v14212_v45 = vld [vmem:[#allocation105_spill] sm:$0xff] }
0x1243   :  { %6092 = vmatprep.subr.bf16.mxu1 %v12252_v0  ;;  %6184 = vmatpush1.bf16.msra.mxu0 %v12551_v35  ;;  %v14213_v0 = vld [vmem:[#allocation106_spill] sm:$0xff]  ;;  %v8949_v35 = vld [vmem:[#allocation13 + $0x8] ss:$24 sps:$4 sm:$0xff]  }
0x1244   :  { %6185 = vmatprep.subr.bf16.mxu0 %v12554_v59  ;;  %v8950_v59 = vld [vmem:[#allocation13 + $0x3c] ss:$24 sps:$4 sm:$0xff]  }
0x1246   :  { %6093 = vmatpush1.bf16.msra.mxu1 %v12257_v51  ;;  %v14214_v51 = vld [vmem:[#allocation84_spill] sm:$0xff] }
0x1247   :  { %6094 = vmatprep.subr.bf16.mxu1 %v12260_v2  ;;  %6186 = vmatpush1.bf16.msra.mxu0 %v12559_v21  ;;  %v14215_v2 = vld [vmem:[#allocation85_spill] sm:$0xff] }
0x1248   :  { %6187 = vmatprep.subr.bf16.mxu0 %v12562_v3  ;;  %v8951_v21 = vld [vmem:[#allocation13 + $0x38] ss:$24 sps:$4 sm:$0xff]   ;;  %v8952_v3 = vld [vmem:[#allocation13 + $0x6c] ss:$24 sps:$4 sm:$0xff]  }
0x124a   :  { %6095 = vmatpush1.bf16.msra.mxu1 %v12265_v39  ;;  %v14216_v39 = vld [vmem:[#allocation69_spill] sm:$0xff] }
0x124b   :  { %6096 = vmatprep.subr.bf16.mxu1 %v12268_v5  ;;  %6188 = vmatpush1.bf16.msra.mxu0 %v12567_v61  ;;  %v14217_v5 = vld [vmem:[#allocation86_spill] sm:$0xff]  ;;  %v8953_v61 = vld [vmem:[#allocation13 + $0x68] ss:$24 sps:$4 sm:$0xff]  }
0x124c   :  { %6189 = vmatprep.subr.bf16.mxu0 %v12570_v11  ;;  %v8954_v11 = vld [vmem:[#allocation13 + $0x9c] ss:$24 sps:$4 sm:$0xff]  }
0x124e   :  { %6097 = vmatpush1.bf16.msra.mxu1 %v12273_v43  ;;  %v14218_v43 = vld [vmem:[#allocation87_spill] sm:$0xff] }
0x124f   :  { %6098 = vmatprep.subr.bf16.mxu1 %v12276_v6  ;;  %6190 = vmatpush1.bf16.msra.mxu0 %v12575_v17  ;;  %v14219_v6 = vld [vmem:[#allocation70_spill] sm:$0xff] }
0x1250   :  { %6191 = vmatprep.subr.bf16.mxu0 %v12578_v54  ;;  %v8955_v17 = vld [vmem:[#allocation13 + $0x98] ss:$24 sps:$4 sm:$0xff]   ;;  %v8956_v54 = vld [vmem:[#allocation13 + $0xcc] ss:$24 sps:$4 sm:$0xff]  }
0x1252   :  { %6099 = vmatpush1.bf16.msra.mxu1 %v12281_v16  ;;  %v14220_v16 = vld [vmem:[#allocation71_spill] sm:$0xff] }
0x1253   :  { %6100 = vmatprep.subr.bf16.mxu1 %v12284_v24  ;;  %6192 = vmatpush1.bf16.msra.mxu0 %v12583_v23  ;;  %v14221_v24 = vld [vmem:[#allocation107_spill] sm:$0xff] }
0x1254   :  { %6193 = vmatprep.subr.bf16.mxu0 %v12586_v29  ;;  %v8957_v23 = vld [vmem:[#allocation13 + $0xc8] ss:$24 sps:$4 sm:$0xff]   ;;  %v8958_v29 = vld [vmem:[#allocation13 + $0xfc] ss:$24 sps:$4 sm:$0xff]  }
0x1256   :  { %6101 = vmatpush1.bf16.msra.mxu1 %v12289_v26  ;;  %v14222_v26 = vld [vmem:[#allocation108_spill] sm:$0xff] }
0x1257   :  { %6102 = vmatprep.subr.bf16.mxu1 %v12292_v57  ;;  %6194 = vmatpush1.bf16.msra.mxu0 %v12591_v60  ;;  %v14223_v57 = vld [vmem:[#allocation72_spill] sm:$0xff]  ;;  %v8959_v60 = vld [vmem:[#allocation13 + $0xf8] ss:$24 sps:$4 sm:$0xff]  }
0x1258   :  { %6195 = vmatprep.subr.bf16.mxu0 %v12594_v27  ;;  %v8960_v27 = vld [vmem:[#allocation13 + $0x12c] ss:$24 sps:$4 sm:$0xff]  }
0x125a   :  { %6103 = vmatpush1.bf16.msra.mxu1 %v12297_v15  ;;  %v14224_v15 = vld [vmem:[#allocation73_spill] sm:$0xff] }
0x125b   :  { %6104 = vmatprep.subr.bf16.mxu1 %v14101_v44  ;;  %6196 = vmatpush1.bf16.msra.mxu0 %v12599_v13  ;;  %v14225_v44 = vld [vmem:[#allocation104_spill] sm:$0xff] }
0x125c   :  { %6197 = vmatprep.subr.bf16.mxu0 %v12602_v8  ;;  %v8961_v13 = vld [vmem:[#allocation13 + $0x128] ss:$24 sps:$4 sm:$0xff]   ;;  %v8962_v8 = vld [vmem:[#allocation13 + $0x15c] ss:$24 sps:$4 sm:$0xff]  }
0x125e   :  { %6105 = vmatpush1.bf16.msra.mxu1 %v14102_v62  ;;  %v14226_v62 = vld [vmem:[#allocation49_spill] sm:$0xff] }
0x125f   :  { %6106 = vmatprep.subr.bf16.mxu1 %v14103_v9  ;;  %6198 = vmatpush1.bf16.msra.mxu0 %v14210_v18  ;;  %v14227_v9 = vld [vmem:[#allocation74_spill] sm:$0xff] }
0x1260   :  { %6199 = vmatprep.subr.bf16.mxu0 %v14211_v10  ;;  %v14233_v10 = vld [vmem:[#allocation95_spill] sm:$0xff] }
0x1262   :  { %6107 = vmatpush1.bf16.msra.mxu1 %v14104_v25  ;;  %v14228_v25 = vld [vmem:[#allocation75_spill] sm:$0xff] }
0x1263   :  { %6108 = vmatprep.subr.bf16.mxu1 %v14105_v33  ;;  %6200 = vmatpush1.bf16.msra.mxu0 %v14212_v45  ;;  %v14229_v33 = vld [vmem:[#allocation51_spill] sm:$0xff] }
0x1264   :  { %6201 = vmatprep.subr.bf16.mxu0 %v14213_v0  ;;  %v14234_v0 = vld [vmem:[#allocation96_spill] sm:$0xff] }
0x1266   :  { %6109 = vmatpush1.bf16.msra.mxu1 %v14106_v34  ;;  %v14230_v34 = vld [vmem:[#allocation62_spill] sm:$0xff] }
0x1267   :  { %6110 = vmatprep.subr.bf16.mxu1 %v14107_v52  ;;  %6202 = vmatpush1.bf16.msra.mxu0 %v14214_v51  ;;  %v14231_v52 = vld [vmem:[#allocation80_spill] sm:$0xff] }
0x1268   :  { %6203 = vmatprep.subr.bf16.mxu0 %v14215_v2 }
0x126a   :  { %6111 = vmatpush1.bf16.msra.mxu1 %v14108_v19  ;;  %v8947_v19 = vld [vmem:[#allocation13 + $0xc] ss:$24 sps:$4 sm:$0xff]  }
0x126b   :  { %6112 = vmatprep.subr.bf16.mxu1 %v14216_v39  ;;  %6204 = vmatpush1.bf16.msra.mxu0 %v14217_v5  ;;  %v14235_v5 = vld [vmem:[#allocation97_spill] sm:$0xff] }
0x126c   :  { %6205 = vmatprep.subr.bf16.mxu0 %v14218_v43 }
0x126e   :  { %6113 = vmatpush1.bf16.msra.mxu1 %v14219_v6  ;;  %v14236_v6 = vld [vmem:[#allocation98_spill] sm:$0xff] }
0x126f   :  { %6114 = vmatprep.subr.bf16.mxu1 %v14220_v16  ;;  %6206 = vmatpush1.bf16.msra.mxu0 %v14221_v24 }
0x1270   :  { %6207 = vmatprep.subr.bf16.mxu0 %v14222_v26 }
0x1272   :  { %6115 = vmatpush1.bf16.msra.mxu1 %v14223_v57 }
0x1273   :  { %6116 = vmatprep.subr.bf16.mxu1 %v14224_v15  ;;  %6208 = vmatpush1.bf16.msra.mxu0 %v14225_v44 }
0x1274   :  { %6209 = vmatprep.subr.bf16.mxu0 %v14226_v62 }
0x1276   :  { %6117 = vmatpush1.bf16.msra.mxu1 %v14227_v9 }
0x1277   :  { %6118 = vmatprep.subr.bf16.mxu1 %v14228_v25  ;;  %6210 = vmatpush1.bf16.msra.mxu0 %v14229_v33 }
0x1278   :  { %6211 = vmatprep.subr.bf16.mxu0 %v14230_v34 }
0x127a   :  { %6119 = vmatpush1.bf16.msra.mxu1 %v14231_v52 }
0x127b   :  { %6222 = vmatprep.subr.bf16.mxu1 %v8947_v19  ;;  %6212 = vmatpush1.bf16.msra.mxu0 %v14232_v50 }
0x127c   :  { %6263 = vmatprep.subr.bf16.mxu0 %v8948_v40 }
0x127d   :  { %6121 = vmatmul.mubr.bf16.vlgmr.msra.gmra.mrb[132].mxu1 %v12717_v49 }
0x127e   :  { %6223 = vmatpush1.bf16.msra.mxu1 %v8949_v35 }
0x127f   :  { %6224 = vmatprep.subr.bf16.mxu1 %v8950_v59 }
0x1282   :  { %6225 = vmatpush1.bf16.msra.mxu1 %v8951_v21 }
0x1283   :  { %6226 = vmatprep.subr.bf16.mxu1 %v8952_v3 }
0x1286   :  { %6227 = vmatpush1.bf16.msra.mxu1 %v8953_v61 }
0x1287   :  { %6228 = vmatprep.subr.bf16.mxu1 %v8954_v11 }
0x128a   :  { %6229 = vmatpush1.bf16.msra.mxu1 %v8955_v17 }
0x128b   :  { %6230 = vmatprep.subr.bf16.mxu1 %v8956_v54 }
0x128e   :  { %6231 = vmatpush1.bf16.msra.mxu1 %v8957_v23 }
0x128f   :  { %6232 = vmatprep.subr.bf16.mxu1 %v8958_v29 }
0x1292   :  { %6233 = vmatpush1.bf16.msra.mxu1 %v8959_v60 }
0x1293   :  { %6234 = vmatprep.subr.bf16.mxu1 %v8960_v27  ;;  %v14237_v27 = vld [vmem:[#allocation43_spill] sm:$0xff] }
0x1296   :  { %6235 = vmatpush1.bf16.msra.mxu1 %v8961_v13 }
0x1297   :  { %6236 = vmatprep.subr.bf16.mxu1 %v8962_v8 }
0x129a   :  { %6237 = vmatpush1.bf16.msra.mxu1 %v8963_v4  ;;  %v14238_v4 = vld [vmem:[#allocation46_spill] sm:$0xff] }
0x129b   :  { %6238 = vmatprep.subr.bf16.mxu1 %v8964_v55 }
0x129e   :  { %6239 = vmatpush1.bf16.msra.mxu1 %v8965_v12 }
0x129f   :  { %6240 = vmatprep.subr.bf16.mxu1 %v8966_v20 }
0x12a2   :  { %6241 = vmatpush1.bf16.msra.mxu1 %v8967_v63 }
0x12a3   :  { %6242 = vmatprep.subr.bf16.mxu1 %v8968_v46 }
0x12a6   :  { %6243 = vmatpush1.bf16.msra.mxu1 %v8969_v47 }
0x12a7   :  { %6244 = vmatprep.subr.bf16.mxu1 %v8970_v48 }
0x12aa   :  { %6245 = vmatpush1.bf16.msra.mxu1 %v8971_v1 }
0x12ab   :  { %6246 = vmatprep.subr.bf16.mxu1 %v8972_v28 }
0x12ae   :  { %6247 = vmatpush1.bf16.msra.mxu1 %v8973_v31 }
0x12af   :  { %6248 = vmatprep.subr.bf16.mxu1 %v8974_v38 }
0x12b2   :  { %6249 = vmatpush1.bf16.msra.mxu1 %v8975_v14 }
0x12b3   :  { %6250 = vmatprep.subr.bf16.mxu1 %v8976_v41  ;;  %v8260_v41 = vld [vmem:[#allocation16] sm:$0xff]  }
0x12b6   :  { %6251 = vmatpush1.bf16.msra.mxu1 %v8977_v36 }
0x12b7   :  { %6252 = vmatprep.subr.bf16.mxu1 %v8978_v30  ;;  %v8261_v30 = vld [vmem:[#allocation16 + $0x48] sm:$0xff]  }
0x12ba   :  { %6253 = vmatpush1.bf16.msra.mxu1 %v8979_v58  ;;  %v14239_v58 = vld [vmem:[#allocation114_spill] sm:$0xff] }
0x12bb   :  { %7469 = vmatprep.subr.bf16.mxu1 %v8259_v7  ;;  %v6413_v7 = vpack.c.bf16 %v14239_v58, %v14239_v58  ;;  %v8283_v58 = vld [vmem:[#allocation16 + $0xd0] sm:$0xff]  }
0x1310   :  { %v6040_v49 = vpop.f32.mrb[128].mxu1  ;;  %v6081_v18 = vpop.f32.mrb[136].mxu0 }
0x1311   :  { %v6129_v45 = vadd.f32 %v14233_v10, %v6040_v49  ;;  %v6131_v51 = vadd.f32 %v14234_v0, %v6081_v18  ;;  %v6042_v2 = vpop.f32.mrb[129].mxu1  ;;  %v6083_v39 = vpop.f32.mrb[137].mxu0  ;;  %v8980_v49 = vld [vmem:[#allocation13 + $0x10] ss:$24 sps:$4 sm:$0xff]   ;;  %v8982_v0 = vld [vmem:[#allocation13 + $0x40] ss:$24 sps:$4 sm:$0xff]  }
0x1312   :  { %v6130_v43 = vadd.f32 %v14235_v5, %v6042_v2  ;;  %v6132_v16 = vadd.f32 %v14236_v6, %v6083_v39  ;;  %v6044_v24 = vpop.f32.mrb[130].mxu1  ;;  %v6085_v26 = vpop.f32.mrb[138].mxu0  ;;  %v8262_v18 = vld [vmem:[#allocation16 + $0x8] sm:$0xff]   ;;  %v8263_v10 = vld [vmem:[#allocation16 + $0x50] sm:$0xff]   ;;  %v8265_v39 = vld [vmem:[#allocation16 + $0x58] sm:$0xff]  }
0x1313   :  { %v6045_v57 = vpop.f32.mrb[131].mxu1  ;;  %v6086_v15 = vpop.f32.mrb[139].mxu0  ;;  %v7411_v44 = vmul.f32 -1.442695, %v6129_v45  ;;  %v7413_v33 = vmul.f32 -1.442695, %v6131_v51 }
0x1314   :  { %v7412_v62 = vmul.f32 -1.442695, %v6130_v43  ;;  %v7414_v34 = vmul.f32 -1.442695, %v6132_v16  ;;  %v8981_v45 = vld [vmem:[#allocation13 + $0x44] ss:$24 sps:$4 sm:$0xff]  }
0x1315   :  { %8587 = vpow2.f32 %v7411_v44  ;;  %v8264_v51 = vld [vmem:[#allocation16 + $0x10] sm:$0xff]   ;;  %v8266_v43 = vld [vmem:[#allocation16 + $0x18] sm:$0xff]   ;;  %v8267_v16 = vld [vmem:[#allocation16 + $0x60] sm:$0xff]  }
0x1316   :  { %8589 = vpow2.f32 %v7412_v62  ;;  %v8983_v2 = vld [vmem:[#allocation13 + $0x74] ss:$24 sps:$4 sm:$0xff]   ;;  %v8984_v5 = vld [vmem:[#allocation13 + $0x70] ss:$24 sps:$4 sm:$0xff]   ;;  %v8985_v6 = vld [vmem:[#allocation13 + $0xa4] ss:$24 sps:$4 sm:$0xff]  }
0x1317   :  { %8591 = vpow2.f32 %v7413_v33  ;;  %v8986_v24 = vld [vmem:[#allocation13 + $0xa0] ss:$24 sps:$4 sm:$0xff]   ;;  %v8987_v57 = vld [vmem:[#allocation13 + $0xd4] ss:$24 sps:$4 sm:$0xff]   ;;  %v8988_v44 = vld [vmem:[#allocation13 + $0xd0] ss:$24 sps:$4 sm:$0xff]  }
0x1318   :  { %8593 = vpow2.f32 %v7414_v34  ;;  %v8268_v26 = vld [vmem:[#allocation16 + $0x20] sm:$0xff]   ;;  %v8269_v15 = vld [vmem:[#allocation16 + $0x68] sm:$0xff]   ;;  %v8272_v34 = vld [vmem:[#allocation16 + $0x30] sm:$0xff]  }
0x1319   :  { %v8270_v62 = vld [vmem:[#allocation16 + $0x28] sm:$0xff]   ;;  %v8990_v33 = vld [vmem:[#allocation13 + $0x100] ss:$24 sps:$4 sm:$0xff]  }
0x131f   :  { %v8588_v9 = vpop.eup %8587 }
0x1320   :  { %v8590_v25 = vpop.eup %8589  ;;  %v6145_v52 = vadd.f32 1.0, %v8588_v9  ;;  %v8989_v9 = vld [vmem:[#allocation13 + $0x104] ss:$24 sps:$4 sm:$0xff]  }
0x1321   :  { %v6146_v19 = vadd.f32 1.0, %v8590_v25  ;;  %v8592_v50 = vpop.eup %8591  ;;  %v8271_v25 = vld [vmem:[#allocation16 + $0x70] sm:$0xff]  }
0x1322   :  { %8595 = vrcp.f32 %v6145_v52  ;;  %v8594_v35 = vpop.eup %8593  ;;  %v6147_v60 = vadd.f32 1.0, %v8592_v50  ;;  %v8991_v52 = vld [vmem:[#allocation13 + $0x134] ss:$24 sps:$4 sm:$0xff]   ;;  %v8992_v50 = vld [vmem:[#allocation13 + $0x130] ss:$24 sps:$4 sm:$0xff]  }
0x1323   :  { %8597 = vrcp.f32 %v6146_v19  ;;  %v6148_v8 = vadd.f32 1.0, %v8594_v35  ;;  %v8273_v19 = vld [vmem:[#allocation16 + $0x78] sm:$0xff]  }
0x1324   :  { %v8993_v35 = vld [vmem:[#allocation13 + $0x164] ss:$24 sps:$4 sm:$0xff]  }
0x132c   :  { %v8596_v3 = vpop.eup %8595 }
0x132d   :  { %v8598_v17 = vpop.eup %8597 }
0x1350   :  { %v6122_v40 = vpop.f32.mrb[132].mxu1 }
0x1351   :  { %v6157_v59 = vadd.f32 %v6122_v40, %v14047_v22  ;;  %v6124_v21 = vpop.f32.mrb[133].mxu1  ;;  %v8274_v40 = vld [vmem:[#allocation16 + $0x38] sm:$0xff]  }
0x1352   :  { %v6158_v61 = vadd.f32 %v6124_v21, %v13983_v37  ;;  %v6126_v11 = vpop.f32.mrb[134].mxu1  ;;  %v8995_v21 = vld [vmem:[#allocation13 + $0x194] ss:$24 sps:$4 sm:$0xff]  }
0x1353   :  { %v6159_v54 = vmul.f32 %v8596_v3, %v6157_v59  ;;  %v6127_v23 = vpop.f32.mrb[135].mxu1  ;;  %v8994_v59 = vld [vmem:[#allocation13 + $0x160] ss:$24 sps:$4 sm:$0xff]   ;;  %v14240_v3 = vld [vmem:[#allocation113_spill] sm:$0xff] }
0x1354   :  { %v6160_v29 = vmul.f32 %v8598_v17, %v6158_v61  ;;  %v6412_v61 = vpack.c.bf16 %v14240_v3, %v14240_v3  ;;  %v8996_v11 = vld [vmem:[#allocation13 + $0x190] ss:$24 sps:$4 sm:$0xff]   ;;  %v8997_v17 = vld [vmem:[#allocation13 + $0x1c4] ss:$24 sps:$4 sm:$0xff]   ;;  %v8999_v23 = vld [vmem:[#allocation13 + $0x1f4] ss:$24 sps:$4 sm:$0xff]  }
0x1355   :  { %v6161_v13 = vadd.f32 %v14237_v27, %v6159_v54  ;;  %v8998_v54 = vld [vmem:[#allocation13 + $0x1c0] ss:$24 sps:$4 sm:$0xff]  }
0x1356   :  { %v6162_v55 = vadd.f32 %v14238_v4, %v6160_v29  ;;  %v9000_v29 = vld [vmem:[#allocation13 + $0x1f0] ss:$24 sps:$4 sm:$0xff]   ;;  %v9002_v27 = vld [vmem:[#allocation13 + $0x220] ss:$24 sps:$4 sm:$0xff]   ;;  %v9005_v4 = vld [vmem:[#allocation13 + $0x284] ss:$24 sps:$4 sm:$0xff]  }
0x1357   :  { %8599 = vtanh.f32 %v6161_v13  ;;  %v9003_v13 = vld [vmem:[#allocation13 + $0x254] ss:$24 sps:$4 sm:$0xff]  }
0x1358   :  { %8601 = vtanh.f32 %v6162_v55  ;;  %v9006_v55 = vld [vmem:[#allocation13 + $0x280] ss:$24 sps:$4 sm:$0xff]  }
0x1359   :  { %8603 = vrcp.f32 %v6147_v60  ;;  %v9001_v60 = vld [vmem:[#allocation13 + $0x224] ss:$24 sps:$4 sm:$0xff]  }
0x135a   :  { %8605 = vrcp.f32 %v6148_v8  ;;  %v9004_v8 = vld [vmem:[#allocation13 + $0x250] ss:$24 sps:$4 sm:$0xff]  }
0x1361   :  { %v8600_v12 = vpop.eup %8599 }
0x1362   :  { %v8602_v20 = vpop.eup %8601  ;;  %v6165_v63 = vsub.f32 %v12709_v53, %v8600_v12 }
0x1363   :  { %v8604_v46 = vpop.eup %8603  ;;  %v6166_v47 = vsub.f32 %v12711_v56, %v8602_v20 }
0x1364   :  { %v8606_v48 = vpop.eup %8605  ;;  %v6167_v1 = vmul.f32 %v8604_v46, %v6165_v63  ;;  %v9009_v63 = vld [vmem:[#allocation13 + $0x2e4] ss:$24 sps:$4 sm:$0xff]   ;;  %v9010_v46 = vld [vmem:[#allocation13 + $0x2e0] ss:$24 sps:$4 sm:$0xff]  }
0x1365   :  { %v6168_v28 = vmul.f32 %v8606_v48, %v6166_v47  ;;  %v8275_v47 = vld [vmem:[#allocation16 + $0xc0] sm:$0xff]   ;;  %v8276_v48 = vld [vmem:[%s12927_s11 + $0x40] sm:$0xff]  }
0x1366   :  { %v12794_v31 = vadd.f32 %v8600_v12, %v6167_v1  ;;  %v9007_v12 = vld [vmem:[#allocation13 + $0x2b4] ss:$24 sps:$4 sm:$0xff]   ;;  %v8277_v1 = vld [vmem:[#allocation16 + $0x80] sm:$0xff]  }
0x1367   :  { %v12796_v38 = vadd.f32 %v8602_v20, %v6168_v28  ;;  %v9008_v20 = vld [vmem:[#allocation13 + $0x2b0] ss:$24 sps:$4 sm:$0xff]  }
0x1368   :  { %v12802_v36 = vpack.c.bf16 %v12794_v31, %v12794_v31  ;;  %v8278_v28 = vld [vmem:[%s12927_s11] sm:$0xff]  }
0x1369   :  { %v6180_v14 = vpack.c.bf16 %v12796_v38, %v12796_v38 }
0x136b   :  { %6213 = vmatprep.mubr.bf16.mxu0 %v6180_v14  ;;  %6254 = vmatprep.mubr.bf16.mxu1 %v6180_v14 }
0x136c   :  { %6214 = vmatmul.mubr.bf16.vlgmr.msra.gmra.mrb[140].mxu0 %v12802_v36  ;;  %6255 = vmatmul.mubr.bf16.vlgmr.msra.gmra.mrb[136].mxu1 %v12802_v36 }
0x136d   :  { %6264 = vmatpush1.bf16.msra.mxu0 %v8980_v49  ;;  %7470 = vmatpush3.bf16.msra.mxu1 %v8260_v41  ;;  %v8280_v41 = vld [vmem:[%s12927_s11 + $0x48] sm:$0xff]   ;;  %v8285_v49 = vld [vmem:[#allocation16 + $0x90] sm:$0xff]  }
0x136e   :  { %6295 = vmatprep.mubr.bf16.mxu0 %v6180_v14  ;;  %6647 = vmatprep.mubr.bf16.mxu1 %v6413_v7  ;;  %v8279_v14 = vld [vmem:[#allocation16 + $0xc8] sm:$0xff]   ;;  %v8284_v7 = vld [vmem:[%s12927_s11 + $0x50] sm:$0xff]  }
0x136f   :  { %6265 = vmatprep.subr.bf16.mxu0 %v8981_v45  ;;  %7471 = vmatprep.subr.bf16.mxu1 %v8261_v30  ;;  %v8282_v30 = vld [vmem:[%s12927_s11 + $0x8] sm:$0xff]   ;;  %v8288_v45 = vld [vmem:[%s12927_s11 + $0x58] sm:$0xff]  }
0x1371   :  { %6266 = vmatpush1.bf16.msra.mxu0 %v8982_v0  ;;  %7472 = vmatpush3.bf16.msra.mxu1 %v8262_v18  ;;  %v8286_v18 = vld [vmem:[%s12927_s11 + $0x10] sm:$0xff]   ;;  %v8289_v0 = vld [vmem:[#allocation16 + $0x98] sm:$0xff]  }
0x1372   :  { %6267 = vmatprep.subr.bf16.mxu0 %v8983_v2  ;;  %7473 = vmatprep.subr.bf16.mxu1 %v8263_v10  ;;  %v8287_v10 = vld [vmem:[#allocation16 + $0xd8] sm:$0xff]   ;;  %v8291_v2 = vld [vmem:[#allocation16 + $0xe0] sm:$0xff]  }
0x1375   :  { %6268 = vmatpush1.bf16.msra.mxu0 %v8984_v5  ;;  %7474 = vmatpush3.bf16.msra.mxu1 %v8264_v51  ;;  %v8290_v51 = vld [vmem:[%s12927_s11 + $0x18] sm:$0xff]   ;;  %v8293_v5 = vld [vmem:[#allocation16 + $0xa0] sm:$0xff]  }
0x1376   :  { %6269 = vmatprep.subr.bf16.mxu0 %v8985_v6  ;;  %7475 = vmatprep.subr.bf16.mxu1 %v8265_v39  ;;  %v8292_v39 = vld [vmem:[%s12927_s11 + $0x60] sm:$0xff]   ;;  %v8295_v6 = vld [vmem:[#allocation16 + $0xe8] sm:$0xff]  }
0x1379   :  { %6270 = vmatpush1.bf16.msra.mxu0 %v8986_v24  ;;  %7476 = vmatpush3.bf16.msra.mxu1 %v8266_v43  ;;  %v8294_v43 = vld [vmem:[%s12927_s11 + $0x20] sm:$0xff]   ;;  %v8297_v24 = vld [vmem:[#allocation16 + $0xa8] sm:$0xff]  }
0x137a   :  { %6271 = vmatprep.subr.bf16.mxu0 %v8987_v57  ;;  %7477 = vmatprep.subr.bf16.mxu1 %v8267_v16  ;;  %v8296_v16 = vld [vmem:[%s12927_s11 + $0x68] sm:$0xff]   ;;  %v8299_v57 = vld [vmem:[#allocation16 + $0xf0] sm:$0xff]  }
0x137d   :  { %6272 = vmatpush1.bf16.msra.mxu0 %v8988_v44  ;;  %7478 = vmatpush3.bf16.msra.mxu1 %v8268_v26  ;;  %v8298_v26 = vld [vmem:[%s12927_s11 + $0x28] sm:$0xff]   ;;  %v8301_v44 = vld [vmem:[#allocation16 + $0xb0] sm:$0xff]  }
0x137e   :  { %6273 = vmatprep.subr.bf16.mxu0 %v8989_v9  ;;  %7479 = vmatprep.subr.bf16.mxu1 %v8269_v15  ;;  %v8300_v15 = vld [vmem:[%s12927_s11 + $0x70] sm:$0xff]   ;;  %v8303_v9 = vld [vmem:[#allocation16 + $0xf8] sm:$0xff]  }
0x1381   :  { %6274 = vmatpush1.bf16.msra.mxu0 %v8990_v33  ;;  %7480 = vmatpush3.bf16.msra.mxu1 %v8270_v62  ;;  %v8302_v62 = vld [vmem:[%s12927_s11 + $0x30] sm:$0xff]   ;;  %v8305_v33 = vld [vmem:[#allocation16 + $0xb8] sm:$0xff]  }
0x1382   :  { %6275 = vmatprep.subr.bf16.mxu0 %v8991_v52  ;;  %7481 = vmatprep.subr.bf16.mxu1 %v8271_v25  ;;  %v8304_v25 = vld [vmem:[%s12927_s11 + $0x78] sm:$0xff]  }
0x1385   :  { %6276 = vmatpush1.bf16.msra.mxu0 %v8992_v50  ;;  %7482 = vmatpush3.bf16.msra.mxu1 %v8272_v34  ;;  %v8306_v34 = vld [vmem:[%s12927_s11 + $0x38] sm:$0xff]   ;;  %v14241_v50 = vld [vmem:[#allocation99_spill] sm:$0xff] }
0x1386   :  { %6277 = vmatprep.subr.bf16.mxu0 %v8993_v35  ;;  %7483 = vmatprep.subr.bf16.mxu1 %v8273_v19  ;;  %v14242_v35 = vld [vmem:[#allocation100_spill] sm:$0xff] }
0x1389   :  { %6278 = vmatpush1.bf16.msra.mxu0 %v8994_v59  ;;  %7484 = vmatpush3.bf16.msra.mxu1 %v8274_v40 }
0x138a   :  { %6279 = vmatprep.subr.bf16.mxu0 %v8995_v21  ;;  %7513 = vmatprep.subr.bf16.mxu1 %v8276_v48 }
0x138c   :  { %6648 = vmatmul.mubr.bf16.vlgmr.msra.gmra.mrb[140].mxu1 %v6412_v61  ;;  %v14243_v61 = vld [vmem:[#allocation101_spill] sm:$0xff] }
0x138d   :  { %6280 = vmatpush1.bf16.msra.mxu0 %v8996_v11  ;;  %7514 = vmatpush3.bf16.msra.mxu1 %v8278_v28 }
0x138e   :  { %6281 = vmatprep.subr.bf16.mxu0 %v8997_v17  ;;  %7515 = vmatprep.subr.bf16.mxu1 %v8280_v41  ;;  %v14244_v17 = vld [vmem:[#allocation102_spill] sm:$0xff] }
0x1391   :  { %6282 = vmatpush1.bf16.msra.mxu0 %v8998_v54  ;;  %7516 = vmatpush3.bf16.msra.mxu1 %v8282_v30 }
0x1392   :  { %6283 = vmatprep.subr.bf16.mxu0 %v8999_v23  ;;  %7517 = vmatprep.subr.bf16.mxu1 %v8284_v7 }
0x1395   :  { %6284 = vmatpush1.bf16.msra.mxu0 %v9000_v29  ;;  %7518 = vmatpush3.bf16.msra.mxu1 %v8286_v18 }
0x1396   :  { %6285 = vmatprep.subr.bf16.mxu0 %v9001_v60  ;;  %7519 = vmatprep.subr.bf16.mxu1 %v8288_v45 }
0x1399   :  { %6286 = vmatpush1.bf16.msra.mxu0 %v9002_v27  ;;  %7520 = vmatpush3.bf16.msra.mxu1 %v8290_v51 }
0x139a   :  { %6287 = vmatprep.subr.bf16.mxu0 %v9003_v13  ;;  %7521 = vmatprep.subr.bf16.mxu1 %v8292_v39 }
0x139d   :  { %6288 = vmatpush1.bf16.msra.mxu0 %v9004_v8  ;;  %7522 = vmatpush3.bf16.msra.mxu1 %v8294_v43 }
0x139e   :  { %6289 = vmatprep.subr.bf16.mxu0 %v9005_v4  ;;  %7523 = vmatprep.subr.bf16.mxu1 %v8296_v16  ;;  %v14246_v16 = vld [vmem:[#allocation48_spill] sm:$0xff] }
0x13a1   :  { %6290 = vmatpush1.bf16.msra.mxu0 %v9006_v55  ;;  %7524 = vmatpush3.bf16.msra.mxu1 %v8298_v26 }
0x13a2   :  { %6291 = vmatprep.subr.bf16.mxu0 %v9007_v12  ;;  %7525 = vmatprep.subr.bf16.mxu1 %v8300_v15 }
0x13a5   :  { %6292 = vmatpush1.bf16.msra.mxu0 %v9008_v20  ;;  %7526 = vmatpush3.bf16.msra.mxu1 %v8302_v62 }
0x13a6   :  { %6293 = vmatprep.subr.bf16.mxu0 %v9009_v63  ;;  %7527 = vmatprep.subr.bf16.mxu1 %v8304_v25 }
0x13a9   :  { %6294 = vmatpush1.bf16.msra.mxu0 %v9010_v46  ;;  %7528 = vmatpush3.bf16.msra.mxu1 %v8306_v34 }
0x13aa   :  { %7491 = vmatprep.subr.bf16.mxu0 %v8275_v47 }
0x13ac   :  { %6296 = vmatmul.mubr.bf16.vlgmr.msra.gmra.mrb[144].mxu0 %v12802_v36  ;;  %v8281_v36 = vld [vmem:[#allocation16 + $0x88] sm:$0xff]  }
0x13ad   :  { %7492 = vmatpush3.bf16.msra.mxu0 %v8277_v1 }
0x13ae   :  { %7493 = vmatprep.subr.bf16.mxu0 %v8279_v14 }
0x13b1   :  { %7494 = vmatpush3.bf16.msra.mxu0 %v8281_v36 }
0x13b2   :  { %7495 = vmatprep.subr.bf16.mxu0 %v8283_v58 }
0x13b5   :  { %7496 = vmatpush3.bf16.msra.mxu0 %v8285_v49 }
0x13b6   :  { %7497 = vmatprep.subr.bf16.mxu0 %v8287_v10 }
0x13b9   :  { %7498 = vmatpush3.bf16.msra.mxu0 %v8289_v0 }
0x13ba   :  { %7499 = vmatprep.subr.bf16.mxu0 %v8291_v2 }
0x13bd   :  { %7500 = vmatpush3.bf16.msra.mxu0 %v8293_v5  ;;  %v14245_v5 = vld [vmem:[#allocation45_spill] sm:$0xff] }
0x13be   :  { %7501 = vmatprep.subr.bf16.mxu0 %v8295_v6 }
0x13c1   :  { %7502 = vmatpush3.bf16.msra.mxu0 %v8297_v24 }
0x13c2   :  { %7503 = vmatprep.subr.bf16.mxu0 %v8299_v57 }
0x13c5   :  { %7504 = vmatpush3.bf16.msra.mxu0 %v8301_v44 }
0x13c6   :  { %7505 = vmatprep.subr.bf16.mxu0 %v8303_v9 }
0x13c9   :  { %7506 = vmatpush3.bf16.msra.mxu0 %v8305_v33 }
0x143f   :  { %v6215_v52 = vpop.f32.mrb[140].mxu0  ;;  %v6256_v19 = vpop.f32.mrb[136].mxu1 }
0x1440   :  { %v6304_v40 = vadd.f32 %v14241_v50, %v6215_v52  ;;  %v6306_v59 = vadd.f32 %v14242_v35, %v6256_v19  ;;  %v6217_v21 = vpop.f32.mrb[141].mxu0  ;;  %v6258_v3 = vpop.f32.mrb[137].mxu1  ;;  %v14247_v50 = vld [vmem:[#allocation47_spill] sm:$0xff] }
0x1441   :  { %v6305_v11 = vadd.f32 %v14243_v61, %v6217_v21  ;;  %v6307_v54 = vadd.f32 %v14244_v17, %v6258_v3  ;;  %v6219_v23 = vpop.f32.mrb[142].mxu0  ;;  %v6260_v29 = vpop.f32.mrb[138].mxu1  ;;  %v14249_v21 = vld [vmem:[#allocation61_spill] sm:$0xff]  ;;  %v14252_v17 = vld [vmem:[#allocation103_spill] sm:$0xff] }
0x1442   :  { %v6220_v60 = vpop.f32.mrb[143].mxu0  ;;  %v6261_v27 = vpop.f32.mrb[139].mxu1  ;;  %v7415_v12 = vmul.f32 -1.442695, %v6304_v40  ;;  %v7417_v48 = vmul.f32 -1.442695, %v6306_v59  ;;  %v6747_v59 = vpack.c.bf16 %v12531_v42, %v12711_v56 }
0x1443   :  { %v7416_v63 = vmul.f32 -1.442695, %v6305_v11  ;;  %v7418_v1 = vmul.f32 -1.442695, %v6307_v54  ;;  %v14248_v40 = vld [vmem:[#allocation27_spill] sm:$0xff]  ;;  %v14250_v3 = vld [vmem:[#allocation81_spill] sm:$0xff] }
0x1444   :  { %8607 = vpow2.f32 %v7415_v12  ;;  %v6744_v35 = vpack.c.bf16 %v14248_v40, %v14247_v50  ;;  %v6746_v61 = vpack.c.bf16 %v14250_v3, %v14249_v21  ;;  %v14251_v11 = vld [vmem:[#allocation82_spill] sm:$0xff]  ;;  %v14253_v23 = vld [vmem:[#allocation44_spill] sm:$0xff]  ;;  %v7419_v56 = vld [vmem:[%s12926_s10] ss:$0 sm:$0xff] }
0x1445   :  { %8609 = vpow2.f32 %v7416_v63  ;;  %v6749_v54 = vpack.c.bf16 %v14252_v17, %v14251_v11  ;;  %v14254_v29 = vld [vmem:[#allocation50_spill] sm:$0xff] }
0x1446   :  { %8611 = vpow2.f32 %v7417_v48  ;;  %v6751_v60 = vpack.c.bf16 %v14254_v29, %v14253_v23 }
0x1447   :  { %8613 = vpow2.f32 %v7418_v1 }
0x144e   :  { %v8608_v46 = vpop.eup %8607 }
0x144f   :  { %v8610_v47 = vpop.eup %8609  ;;  %v6320_v28 = vadd.f32 1.0, %v8608_v46 }
0x1450   :  { %v6321_v14 = vadd.f32 1.0, %v8610_v47  ;;  %v8612_v41 = vpop.eup %8611 }
0x1451   :  { %8615 = vrcp.f32 %v6320_v28  ;;  %v8614_v30 = vpop.eup %8613  ;;  %v6322_v39 = vadd.f32 1.0, %v8612_v41 }
0x1452   :  { %8617 = vrcp.f32 %v6321_v14  ;;  %v6323_v6 = vadd.f32 1.0, %v8614_v30 }
0x145b   :  { %v8616_v49 = vpop.eup %8615 }
0x145c   :  { %v8618_v45 = vpop.eup %8617 }
0x145f   :  { %v7485_v13 = vpop.f32.mrb[140].mxu1 }
0x1460   :  { %v7486_v8 = vpop.f32.mrb[141].mxu1 }
0x1461   :  { %v12863_v4 = vadd.f32 %v7486_v8, %v7485_v13  ;;  %v7488_v55 = vpop.f32.mrb[142].mxu1 }
0x1462   :  { %v7489_v20 = vpop.f32.mrb[143].mxu1  ;;  %v7452_v55 = vld [vmem:[#allocation18] ss:$0 sm:$0xff] }
0x1463   :  { %v6650_v20 = vadd.f32 %v12863_v4, %v7419_v56 }
0x147f   :  { %v6297_v36 = vpop.f32.mrb[144].mxu0 }
0x1480   :  { %v6332_v58 = vadd.f32 %v6297_v36, %v14047_v22  ;;  %v6299_v7 = vpop.f32.mrb[145].mxu0 }
0x1481   :  { %v6333_v18 = vadd.f32 %v6299_v7, %v13983_v37  ;;  %v6301_v10 = vpop.f32.mrb[146].mxu0 }
0x1482   :  { %v6334_v0 = vmul.f32 %v8616_v49, %v6332_v58  ;;  %v6302_v51 = vpop.f32.mrb[147].mxu0 }
0x1483   :  { %v6335_v2 = vmul.f32 %v8618_v45, %v6333_v18 }
0x1484   :  { %v6336_v43 = vadd.f32 %v14245_v5, %v6334_v0 }
0x1485   :  { %v6337_v24 = vadd.f32 %v14246_v16, %v6335_v2 }
0x1486   :  { %8619 = vtanh.f32 %v6336_v43 }
0x1487   :  { %8621 = vtanh.f32 %v6337_v24 }
0x1488   :  { %8623 = vrcp.f32 %v6322_v39 }
0x1489   :  { %8625 = vrcp.f32 %v6323_v6 }
0x1490   :  { %v8620_v22 = vpop.eup %8619 }
0x1491   :  { %v8622_v26 = vpop.eup %8621  ;;  %v6340_v57 = vsub.f32 %v12794_v31, %v8620_v22 }
0x1492   :  { %v8624_v37 = vpop.eup %8623  ;;  %v6341_v15 = vsub.f32 %v12796_v38, %v8622_v26 }
0x1493   :  { %v8626_v44 = vpop.eup %8625  ;;  %v6342_v62 = vmul.f32 %v8624_v37, %v6340_v57 }
0x1494   :  { %v6343_v9 = vmul.f32 %v8626_v44, %v6341_v15 }
0x1495   :  { %v6344_v25 = vadd.f32 %v8620_v22, %v6342_v62 }
0x1496   :  { %v6345_v33 = vadd.f32 %v8622_v26, %v6343_v9 }
0x1497   :  { %v6414_v19 = vpack.c.bf16 %v6344_v25, %v6344_v25  ;;  %v6750_v42 = vpack.c.bf16 %v6344_v25, %v12794_v31 }
0x1498   :  { %v6415_v34 = vpack.c.bf16 %v6345_v33, %v6345_v33  ;;  %v6745_v52 = vpack.c.bf16 %v12796_v38, %v6345_v33  ;;  %v6748_v38 = vpack.c.bf16 %v12709_v53, %v12529_v32 }
0x149a   :  { %6687 = vmatprep.mubr.bf16.mxu0 %v6415_v34  ;;  %6887 = vmatprep.mubr.bf16.mxu1 %v6745_v52 }
0x149b   :  { %6688 = vmatmul.mubr.bf16.vlgmr.msra.gmra.mrb[148].mxu0 %v6414_v19  ;;  %6888 = vmatmul.mubr.bf16.vlgmr.msra.gmra.mrb[144].mxu1 %v6744_v35 }
0x149c   :  { %6895 = vmatprep.mubr.bf16.mxu1 %v6747_v59 }
0x14a3   :  { %6896 = vmatmul.mubr.bf16.gmra.mrb[148].mxu1 %v6746_v61 }
0x14a4   :  { %6903 = vmatprep.mubr.bf16.mxu1 %v6749_v54 }
0x14ab   :  { %6904 = vmatmul.mubr.bf16.gmra.mrb[152].mxu1 %v6748_v38 }
0x14ac   :  { %6911 = vmatprep.mubr.bf16.mxu1 %v6751_v60 }
0x14b3   :  { %6912 = vmatmul.mubr.bf16.gmra.mrb[156].mxu1 %v6750_v42 }
0x156e   :  { %v7507_v27 = vpop.f32.mrb[148].mxu0  ;;  %v7529_v13 = vpop.f32.mrb[144].mxu1 }
0x156f   :  { %v7508_v8 = vpop.f32.mrb[149].mxu0  ;;  %v7530_v12 = vpop.f32.mrb[145].mxu1 }
0x1570   :  { %v7509_v32 = vadd.f32 %v7508_v8, %v7507_v27  ;;  %v7531_v53 = vadd.f32 %v7530_v12, %v7529_v13  ;;  %v7510_v63 = vpop.f32.mrb[150].mxu0  ;;  %v7532_v46 = vpop.f32.mrb[146].mxu1 }
0x1571   :  { %v7511_v47 = vpop.f32.mrb[151].mxu0  ;;  %v7533_v48 = vpop.f32.mrb[147].mxu1 }
0x1572   :  { %v6690_v1 = vadd.f32 %v7509_v32, %v6650_v20  ;;  %v6890_v31 = vadd.f32 %v7531_v53, %v7452_v55  ;;  %v7534_v28 = vadd.f32 %v7533_v48, %v7532_v46 }
0x1574   :  { %6695 = vst [vmem:[%s12930_s14] sm:$0xff] %v6690_v1  ;;  %6920 = vst [vmem:[%s12929_s13] sm:$0xff] %v6890_v31  ;;  %v6893_v14 = vadd.f32 %v7534_v28, %v7452_v55 }
0x1576   :  { %6921 = vst [vmem:[%s12929_s13 + $0x8] sm:$0xff] %v6893_v14  ;;  %v7535_v4 = vpop.f32.mrb[148].mxu1 }
0x1577   :  { %v7536_v41 = vpop.f32.mrb[149].mxu1 }
0x1578   :  { %v7537_v36 = vadd.f32 %v7536_v41, %v7535_v4  ;;  %v7538_v30 = vpop.f32.mrb[150].mxu1 }
0x1579   :  { %v7539_v58 = vpop.f32.mrb[151].mxu1 }
0x157a   :  { %v6898_v7 = vadd.f32 %v7537_v36, %v7452_v55  ;;  %v7540_v49 = vadd.f32 %v7539_v58, %v7538_v30 }
0x157c   :  { %6922 = vst [vmem:[%s12929_s13 + $0x10] sm:$0xff] %v6898_v7  ;;  %v6901_v18 = vadd.f32 %v7540_v49, %v7452_v55 }
0x157e   :  { %6923 = vst [vmem:[%s12929_s13 + $0x18] sm:$0xff] %v6901_v18  ;;  %v7541_v10 = vpop.f32.mrb[152].mxu1 }
0x157f   :  { %v7542_v45 = vpop.f32.mrb[153].mxu1 }
0x1580   :  { %v7543_v0 = vadd.f32 %v7542_v45, %v7541_v10  ;;  %v7544_v51 = vpop.f32.mrb[154].mxu1 }
0x1581   :  { %v7545_v2 = vpop.f32.mrb[155].mxu1 }
0x1582   :  { %v6906_v39 = vadd.f32 %v7543_v0, %v7452_v55  ;;  %v7546_v5 = vadd.f32 %v7545_v2, %v7544_v51 }
0x1584   :  { %6924 = vst [vmem:[%s12929_s13 + $0x20] sm:$0xff] %v6906_v39  ;;  %v6909_v43 = vadd.f32 %v7546_v5, %v7452_v55 }
0x1586   :  { %6925 = vst [vmem:[%s12929_s13 + $0x28] sm:$0xff] %v6909_v43  ;;  %v7547_v6 = vpop.f32.mrb[156].mxu1 }
0x1587   :  { %v7548_v16 = vpop.f32.mrb[157].mxu1 }
0x1588   :  { %v7549_v24 = vadd.f32 %v7548_v16, %v7547_v6  ;;  %v7550_v22 = vpop.f32.mrb[158].mxu1 }
0x1589   :  { %v7551_v26 = vpop.f32.mrb[159].mxu1 }
0x158a   :  { %v6914_v57 = vadd.f32 %v7549_v24, %v7452_v55  ;;  %v7552_v37 = vadd.f32 %v7551_v26, %v7550_v22 }
0x158c   :  { %6926 = vst [vmem:[%s12929_s13 + $0x30] sm:$0xff] %v6914_v57  ;;  %v6917_v15 = vadd.f32 %v7552_v37, %v7452_v55 }
0x158e   :  { %6927 = vst [vmem:[%s12929_s13 + $0x38] sm:$0xff] %v6917_v15 }
0x158f   :  { %6936 = vsyncpa [#allocation6], 1 }
0x1590   :  { %6937 = vsyncpa [#allocation8], 1 }
0x1591   :  { %6938 = vsyncpa [#allocation11], 1 }
0x1592   :  { %6939 = vsyncpa [#allocation14], 1 }
0x1593   :  { %6940 = vsyncpa [#allocation17], 1 }

</bundles_post_ra>
